<compile_context>
chip_gen: v6e
topology: v6e:2x2x1
jax: 0.10.0
libtpu: 0.0.40
codegen_flags: <defaults>
</compile_context>

<pallas_src>
import functools

import jax
import jax.numpy as jnp
import numpy as np
from jax.experimental import pallas as pl
from jax.experimental.pallas import tpu as pltpu

C_IN = 2
C_OUT = 32
K = 3
H = 256  # dim_embedding_key


def _round_up(x, m):
    return (x + m - 1) // m * m


def st_encoder_kernel(x_ref, wf_ref, bc_ref, wih_ref, whh_ref, bih_ref, bhh_ref,
                      out_ref, gi_ref):
    """One batch-tile program.

    x_ref:   (T, TB, K*C_IN)  time-major im2col input slab (f32)
    wf_ref:  (K*C_IN, C_OUT)  flattened conv weight (f32)
    bc_ref:  (1, C_OUT)       conv bias (f32)
    wih_ref: (C_OUT, 3H)      GRU input weights, transposed (gate order r,z,n)
    whh_ref: (H, 3H)          GRU hidden weights, transposed
    bih/bhh: (1, 3H)          GRU biases (f32)
    out_ref: (TB, H)          final hidden state for this batch tile
    gi_ref:  (T, TB, 3H)      f32 scratch: hoisted GRU input projection
    """
    T, TB, KC = x_ref.shape
    hdim = whh_ref.shape[0]
    cd = whh_ref.dtype  # MXU compute dtype (bf16 fast path / f32 check path)

    # --- Conv1d(k=3, pad=1) as a single im2col matmul + ReLU (once per tile) ---
    x2 = x_ref[...].reshape(T * TB, KC)                                  # (T*TB, 6)
    emb = jnp.maximum(
        jnp.dot(x2, wf_ref[...], preferred_element_type=jnp.float32)
        + bc_ref[...], 0.0)                                              # (T*TB, 32) f32

    # --- Hoisted GRU input projection: GI = ReLU(conv) @ W_ih^T + b_ih ---
    gi = jnp.dot(emb.astype(cd), wih_ref[...],
                 preferred_element_type=jnp.float32) + bih_ref[...]      # (T*TB, 3H) f32
    gi_ref[...] = gi.reshape(T, TB, 3 * hdim)

    whh = whh_ref[...]
    bhh = jnp.broadcast_to(bhh_ref[...], (TB, 3 * hdim))  # hoisted out of the loop

    # --- GRU recurrence: only h @ W_hh^T + gate math on the serial path ---
    def step(t, h):
        g_i = gi_ref[t]                                                  # (TB, 3H) f32
        gh = jnp.dot(h.astype(cd), whh,
                     preferred_element_type=jnp.float32) + bhh           # (TB, 3H) f32
        r = jax.nn.sigmoid(g_i[:, 0:hdim] + gh[:, 0:hdim])
        z = jax.nn.sigmoid(g_i[:, hdim:2 * hdim] + gh[:, hdim:2 * hdim])
        n = jnp.tanh(g_i[:, 2 * hdim:] + r * gh[:, 2 * hdim:])
        return (1.0 - z) * n + z * h

    h_final = jax.lax.fori_loop(0, T, step,
                                jnp.zeros((TB, hdim), jnp.float32),
                                unroll=True)
    out_ref[...] = h_final


@functools.partial(jax.jit, static_argnames=("batch_tile",))
def st_encoder_forward(X, w_flat, bc, wih_t, whh_t, bih, bhh, batch_tile=128):
    """X: (B, T, 2) f32 -> (B, 256) f32 final GRU hidden state."""
    B, T, _ = X.shape
    TB = min(batch_tile, _round_up(B, 8))   # batch rows per grid step (sublane-aligned)
    B_pad = _round_up(B, TB)

    # im2col (conv padding=1) + time-major layout + batch padding  (XLA glue)
    x_pad = jnp.pad(X, ((0, 0), (1, 1), (0, 0)))                         # (B, T+2, 2)
    x_col = jnp.concatenate([x_pad[:, k:k + T, :] for k in range(K)],
                            axis=-1)                                     # (B, T, 6)
    x_tm = jnp.transpose(x_col, (1, 0, 2))                               # (T, B, 6)
    x_tm = jnp.pad(x_tm, ((0, 0), (0, B_pad - B), (0, 0)))               # (T, B_pad, 6)

    out = pl.pallas_call(
        st_encoder_kernel,
        out_shape=jax.ShapeDtypeStruct((B_pad, H), jnp.float32),
        grid=(B_pad // TB,),
        in_specs=[
            pl.BlockSpec((T, TB, K * C_IN), lambda b: (0, b, 0)),
            pl.BlockSpec((K * C_IN, C_OUT), lambda b: (0, 0)),
            pl.BlockSpec((1, C_OUT), lambda b: (0, 0)),
            pl.BlockSpec((C_OUT, 3 * H), lambda b: (0, 0)),
            pl.BlockSpec((H, 3 * H), lambda b: (0, 0)),
            pl.BlockSpec((1, 3 * H), lambda b: (0, 0)),
            pl.BlockSpec((1, 3 * H), lambda b: (0, 0)),
        ],
        out_specs=pl.BlockSpec((TB, H), lambda b: (b, 0)),
        scratch_shapes=[pltpu.VMEM((T, TB, 3 * H), jnp.float32)],
        compiler_params=pltpu.CompilerParams(dimension_semantics=("parallel",)),
    )(x_tm, w_flat, bc, wih_t, whh_t, bih, bhh)
    return out[:B]  # drop padded batch rows


def init_params(key):
    """Deterministic synthetic init matching st_encoder.reset_parameters()."""
    k1, k2, k3 = jax.random.split(key, 3)
    w_conv = jax.random.normal(k1, (C_OUT, C_IN, K), jnp.float32) * np.sqrt(2.0 / (C_IN * K))
    b_conv = jnp.zeros((C_OUT,), jnp.float32)
    w_ih = jax.random.normal(k2, (3 * H, C_OUT), jnp.float32) * np.sqrt(2.0 / C_OUT)
    w_hh = jax.random.normal(k3, (3 * H, H), jnp.float32) * np.sqrt(2.0 / H)
    b_ih = jnp.zeros((3 * H,), jnp.float32)
    b_hh = jnp.zeros((3 * H,), jnp.float32)
    return w_conv, b_conv, w_ih, w_hh, b_ih, b_hh


def pack_params(w_conv, b_conv, w_ih, w_hh, b_ih, b_hh, *, dtype=jnp.bfloat16):
    """Pack weights for the kernel. `dtype` is the MXU dtype for the GRU mats."""
    # im2col-flattened conv weight: row k*C_IN + c matches x_col lane k*C_IN + c
    w_flat = jnp.transpose(w_conv, (2, 1, 0)).reshape(K * C_IN, C_OUT)   # (6, 32) f32
    bc = b_conv.reshape(1, C_OUT)
    wih_t = w_ih.T.astype(dtype)                                         # (32, 3H)
    whh_t = w_hh.T.astype(dtype)                                         # (H, 3H)
    bih = b_ih.reshape(1, 3 * H)
    bhh = b_hh.reshape(1, 3 * H)
    return w_flat, bc, wih_t, whh_t, bih, bhh


def reference_forward(X, w_conv, b_conv, w_ih, w_hh, b_ih, b_hh):
    """Pure-JAX f32 reference mirroring the PyTorch module."""
    Xt = jnp.transpose(X, (0, 2, 1))  # (B, C_IN, T)
    y = jax.lax.conv_general_dilated(
        Xt, w_conv, window_strides=(1,), padding=[(1, 1)],
        dimension_numbers=('NCH', 'OIH', 'NCH'))
    y = jax.nn.relu(y + b_conv[None, :, None])
    emb = jnp.transpose(y, (0, 2, 1))  # (B, T, C_OUT)

    def cell(h, x_t):
        gi = x_t @ w_ih.T + b_ih
        gh = h @ w_hh.T + b_hh
        r = jax.nn.sigmoid(gi[:, :H] + gh[:, :H])
        z = jax.nn.sigmoid(gi[:, H:2 * H] + gh[:, H:2 * H])
        n = jnp.tanh(gi[:, 2 * H:] + r * gh[:, 2 * H:])
        return (1.0 - z) * n + z * h, None

    h0 = jnp.zeros((X.shape[0], H), jnp.float32)
    h_final, _ = jax.lax.scan(cell, h0, jnp.transpose(emb, (1, 0, 2)))
    return h_final


if __name__ == "__main__":
    key = jax.random.PRNGKey(0)
    kx, kp = jax.random.split(key)

    B, T = 2, 8
    X = jax.random.normal(kx, (B, T, C_IN), jnp.float32)

    raw = init_params(kp)
    ref = jax.block_until_ready(reference_forward(X, *raw))

    # 1) f32-weight path: tight semantics check against the pure-JAX reference.
    out_f32 = jax.block_until_ready(
        st_encoder_forward(X, *pack_params(*raw, dtype=jnp.float32)))
    assert out_f32.shape == (B, H), out_f32.shape
    np.testing.assert_allclose(np.asarray(out_f32), np.asarray(ref),
                               rtol=2e-3, atol=2e-3)

    # 2) bf16 GRU weights (fast MXU path, f32 accumulation, h carried in f32):
    #    looser tolerance since bf16 rounding compounds over the T GRU steps.
    out_bf16 = jax.block_until_ready(
        st_encoder_forward(X, *pack_params(*raw, dtype=jnp.bfloat16)))
    np.testing.assert_allclose(np.asarray(out_bf16), np.asarray(ref),
                               rtol=5e-2, atol=5e-2)

    print("KERNEL_OK")
</pallas_src>

<mosaic_0001>
module attributes {stable_mosaic.version = 11 : i64} {
  func.func @st_encoder_kernel(%arg0: i32, %arg1: memref<8x8x6xf32, #tpu.memory_space<vmem>>, %arg2: memref<6x32xf32, #tpu.memory_space<vmem>>, %arg3: memref<1x32xf32, #tpu.memory_space<vmem>>, %arg4: memref<32x768xf32, #tpu.memory_space<vmem>>, %arg5: memref<256x768xf32, #tpu.memory_space<vmem>>, %arg6: memref<1x768xf32, #tpu.memory_space<vmem>>, %arg7: memref<1x768xf32, #tpu.memory_space<vmem>>, %arg8: memref<8x256xf32, #tpu.memory_space<vmem>>, %arg9: memref<8x8x768xf32, #tpu.memory_space<vmem>>) attributes {dimension_semantics = [#tpu.dimension_semantics<parallel>], iteration_bounds = array<i64: 1>, scalar_prefetch = 0 : i64, scratch_operands = 1 : i64, tpu.core_type = #tpu.core_type<tc>, window_params = [{transform_indices = @transform_0, window_bounds = array<i64: 8, 8, 6>}, {pipeline_mode = #tpu.pipeline_mode<synchronous>, transform_indices = @transform_1, window_bounds = array<i64: 6, 32>}, {pipeline_mode = #tpu.pipeline_mode<synchronous>, transform_indices = @transform_2, window_bounds = array<i64: 1, 32>}, {pipeline_mode = #tpu.pipeline_mode<synchronous>, transform_indices = @transform_3, window_bounds = array<i64: 32, 768>}, {pipeline_mode = #tpu.pipeline_mode<synchronous>, transform_indices = @transform_4, window_bounds = array<i64: 256, 768>}, {pipeline_mode = #tpu.pipeline_mode<synchronous>, transform_indices = @transform_5, window_bounds = array<i64: 1, 768>}, {pipeline_mode = #tpu.pipeline_mode<synchronous>, transform_indices = @transform_6, window_bounds = array<i64: 1, 768>}, {transform_indices = @transform_7, window_bounds = array<i64: 8, 256>}]} {
    %c0 = arith.constant 0 : index
    %c0_0 = arith.constant 0 : index
    %c0_1 = arith.constant 0 : index
    %0 = vector.load %arg1[%c0, %c0_0, %c0_1] : memref<8x8x6xf32, #tpu.memory_space<vmem>>, vector<8x8x6xf32>
    %1 = vector.shape_cast %0 : vector<8x8x6xf32> to vector<64x6xf32>
    %c0_2 = arith.constant 0 : index
    %c0_3 = arith.constant 0 : index
    %2 = vector.load %arg2[%c0_2, %c0_3] : memref<6x32xf32, #tpu.memory_space<vmem>>, vector<6x32xf32>
    %cst = arith.constant dense<0.000000e+00> : vector<64x32xf32>
    %3 = tpu.matmul %1, %2, %cst {dimension_numbers = #tpu.dot_dimension_numbers<[1], [0], [0], [1], [0, 0, 1, 1], [], []>} : vector<64x6xf32>, vector<6x32xf32>, vector<64x32xf32> -> vector<64x32xf32>
    %c0_4 = arith.constant 0 : index
    %c0_5 = arith.constant 0 : index
    %4 = vector.load %arg3[%c0_4, %c0_5] : memref<1x32xf32, #tpu.memory_space<vmem>>, vector<1x32xf32>
    %5 = vector.broadcast %4 : vector<1x32xf32> to vector<64x32xf32>
    %6 = arith.addf %3, %5 : vector<64x32xf32>
    %cst_6 = arith.constant 0.000000e+00 : f32
    %7 = vector.broadcast %cst_6 : f32 to vector<64x32xf32>
    %8 = arith.maximumf %6, %7 : vector<64x32xf32>
    %c0_7 = arith.constant 0 : index
    %c0_8 = arith.constant 0 : index
    %9 = vector.load %arg4[%c0_7, %c0_8] : memref<32x768xf32, #tpu.memory_space<vmem>>, vector<32x768xf32>
    %cst_9 = arith.constant dense<0.000000e+00> : vector<64x768xf32>
    %10 = tpu.matmul %8, %9, %cst_9 {dimension_numbers = #tpu.dot_dimension_numbers<[1], [0], [0], [1], [0, 0, 1, 1], [], []>} : vector<64x32xf32>, vector<32x768xf32>, vector<64x768xf32> -> vector<64x768xf32>
    %c0_10 = arith.constant 0 : index
    %c0_11 = arith.constant 0 : index
    %11 = vector.load %arg6[%c0_10, %c0_11] : memref<1x768xf32, #tpu.memory_space<vmem>>, vector<1x768xf32>
    %12 = vector.broadcast %11 : vector<1x768xf32> to vector<64x768xf32>
    %13 = arith.addf %10, %12 : vector<64x768xf32>
    %14 = vector.shape_cast %13 : vector<64x768xf32> to vector<8x8x768xf32>
    %c0_12 = arith.constant 0 : index
    %c0_13 = arith.constant 0 : index
    %c0_14 = arith.constant 0 : index
    %15 = vector.load %arg9[%c0_12, %c0_13, %c0_14] : memref<8x8x768xf32, #tpu.memory_space<vmem>>, vector<8x8x768xf32>
    tpu.vector_store %arg9[%c0_12, %c0_13, %c0_14], %14 {strides = array<i32>} : memref<8x8x768xf32, #tpu.memory_space<vmem>>, vector<8x8x768xf32>,
    %c0_15 = arith.constant 0 : index
    %c0_16 = arith.constant 0 : index
    %16 = vector.load %arg5[%c0_15, %c0_16] : memref<256x768xf32, #tpu.memory_space<vmem>>, vector<256x768xf32>
    %c0_17 = arith.constant 0 : index
    %c0_18 = arith.constant 0 : index
    %17 = vector.load %arg7[%c0_17, %c0_18] : memref<1x768xf32, #tpu.memory_space<vmem>>, vector<1x768xf32>
    %18 = vector.shape_cast %17 : vector<1x768xf32> to vector<1x768xf32>
    %19 = vector.broadcast %18 : vector<1x768xf32> to vector<8x768xf32>
    %cst_19 = arith.constant 0.000000e+00 : f32
    %20 = vector.broadcast %cst_19 : f32 to vector<8x256xf32>
    %c0_i32 = arith.constant 0 : i32
    %21 = arith.index_cast %c0_i32 : i32 to index
    %c0_20 = arith.constant 0 : index
    %c0_21 = arith.constant 0 : index
    %22 = vector.load %arg9[%21, %c0_20, %c0_21] : memref<8x8x768xf32, #tpu.memory_space<vmem>>, vector<1x8x768xf32>
    %23 = vector.shape_cast %22 : vector<1x8x768xf32> to vector<8x768xf32>
    %cst_22 = arith.constant dense<0.000000e+00> : vector<8x768xf32>
    %24 = tpu.matmul %20, %16, %cst_22 {dimension_numbers = #tpu.dot_dimension_numbers<[1], [0], [0], [1], [0, 0, 1, 1], [], []>} : vector<8x256xf32>, vector<256x768xf32>, vector<8x768xf32> -> vector<8x768xf32>
    %25 = arith.addf %24, %19 : vector<8x768xf32>
    %26 = vector.extract_strided_slice %23 {offsets = [0, 0], sizes = [8, 256], strides = [1, 1]} : vector<8x768xf32> to vector<8x256xf32>
    %27 = vector.extract_strided_slice %25 {offsets = [0, 0], sizes = [8, 256], strides = [1, 1]} : vector<8x768xf32> to vector<8x256xf32>
    %28 = arith.addf %26, %27 : vector<8x256xf32>
    %29 = arith.negf %28 : vector<8x256xf32>
    %30 = math.exp %29 : vector<8x256xf32>
    %cst_23 = arith.constant 1.000000e+00 : f32
    %31 = vector.broadcast %cst_23 : f32 to vector<8x256xf32>
    %32 = arith.addf %31, %30 : vector<8x256xf32>
    %33 = arith.divf %31, %32 : vector<8x256xf32>
    %34 = vector.extract_strided_slice %23 {offsets = [0, 256], sizes = [8, 256], strides = [1, 1]} : vector<8x768xf32> to vector<8x256xf32>
    %35 = vector.extract_strided_slice %25 {offsets = [0, 256], sizes = [8, 256], strides = [1, 1]} : vector<8x768xf32> to vector<8x256xf32>
    %36 = arith.addf %34, %35 : vector<8x256xf32>
    %37 = arith.negf %36 : vector<8x256xf32>
    %38 = math.exp %37 : vector<8x256xf32>
    %cst_24 = arith.constant 1.000000e+00 : f32
    %39 = vector.broadcast %cst_24 : f32 to vector<8x256xf32>
    %40 = arith.addf %39, %38 : vector<8x256xf32>
    %41 = arith.divf %39, %40 : vector<8x256xf32>
    %42 = vector.extract_strided_slice %23 {offsets = [0, 512], sizes = [8, 256], strides = [1, 1]} : vector<8x768xf32> to vector<8x256xf32>
    %43 = vector.extract_strided_slice %25 {offsets = [0, 512], sizes = [8, 256], strides = [1, 1]} : vector<8x768xf32> to vector<8x256xf32>
    %44 = arith.mulf %33, %43 : vector<8x256xf32>
    %45 = arith.addf %42, %44 : vector<8x256xf32>
    %46 = math.tanh %45 : vector<8x256xf32>
    %cst_25 = arith.constant 1.000000e+00 : f32
    %47 = vector.broadcast %cst_25 : f32 to vector<8x256xf32>
    %48 = arith.subf %47, %41 : vector<8x256xf32>
    %49 = arith.mulf %48, %46 : vector<8x256xf32>
    %50 = arith.mulf %41, %20 : vector<8x256xf32>
    %51 = arith.addf %49, %50 : vector<8x256xf32>
    %c1_i32 = arith.constant 1 : i32
    %52 = arith.index_cast %c1_i32 : i32 to index
    %c0_26 = arith.constant 0 : index
    %c0_27 = arith.constant 0 : index
    %53 = vector.load %arg9[%52, %c0_26, %c0_27] : memref<8x8x768xf32, #tpu.memory_space<vmem>>, vector<1x8x768xf32>
    %54 = vector.shape_cast %53 : vector<1x8x768xf32> to vector<8x768xf32>
    %cst_28 = arith.constant dense<0.000000e+00> : vector<8x768xf32>
    %55 = tpu.matmul %51, %16, %cst_28 {dimension_numbers = #tpu.dot_dimension_numbers<[1], [0], [0], [1], [0, 0, 1, 1], [], []>} : vector<8x256xf32>, vector<256x768xf32>, vector<8x768xf32> -> vector<8x768xf32>
    %56 = arith.addf %55, %19 : vector<8x768xf32>
    %57 = vector.extract_strided_slice %54 {offsets = [0, 0], sizes = [8, 256], strides = [1, 1]} : vector<8x768xf32> to vector<8x256xf32>
    %58 = vector.extract_strided_slice %56 {offsets = [0, 0], sizes = [8, 256], strides = [1, 1]} : vector<8x768xf32> to vector<8x256xf32>
    %59 = arith.addf %57, %58 : vector<8x256xf32>
    %60 = arith.negf %59 : vector<8x256xf32>
    %61 = math.exp %60 : vector<8x256xf32>
    %cst_29 = arith.constant 1.000000e+00 : f32
    %62 = vector.broadcast %cst_29 : f32 to vector<8x256xf32>
    %63 = arith.addf %62, %61 : vector<8x256xf32>
    %64 = arith.divf %62, %63 : vector<8x256xf32>
    %65 = vector.extract_strided_slice %54 {offsets = [0, 256], sizes = [8, 256], strides = [1, 1]} : vector<8x768xf32> to vector<8x256xf32>
    %66 = vector.extract_strided_slice %56 {offsets = [0, 256], sizes = [8, 256], strides = [1, 1]} : vector<8x768xf32> to vector<8x256xf32>
    %67 = arith.addf %65, %66 : vector<8x256xf32>
    %68 = arith.negf %67 : vector<8x256xf32>
    %69 = math.exp %68 : vector<8x256xf32>
    %cst_30 = arith.constant 1.000000e+00 : f32
    %70 = vector.broadcast %cst_30 : f32 to vector<8x256xf32>
    %71 = arith.addf %70, %69 : vector<8x256xf32>
    %72 = arith.divf %70, %71 : vector<8x256xf32>
    %73 = vector.extract_strided_slice %54 {offsets = [0, 512], sizes = [8, 256], strides = [1, 1]} : vector<8x768xf32> to vector<8x256xf32>
    %74 = vector.extract_strided_slice %56 {offsets = [0, 512], sizes = [8, 256], strides = [1, 1]} : vector<8x768xf32> to vector<8x256xf32>
    %75 = arith.mulf %64, %74 : vector<8x256xf32>
    %76 = arith.addf %73, %75 : vector<8x256xf32>
    %77 = math.tanh %76 : vector<8x256xf32>
    %cst_31 = arith.constant 1.000000e+00 : f32
    %78 = vector.broadcast %cst_31 : f32 to vector<8x256xf32>
    %79 = arith.subf %78, %72 : vector<8x256xf32>
    %80 = arith.mulf %79, %77 : vector<8x256xf32>
    %81 = arith.mulf %72, %51 : vector<8x256xf32>
    %82 = arith.addf %80, %81 : vector<8x256xf32>
    %c2_i32 = arith.constant 2 : i32
    %83 = arith.index_cast %c2_i32 : i32 to index
    %c0_32 = arith.constant 0 : index
    %c0_33 = arith.constant 0 : index
    %84 = vector.load %arg9[%83, %c0_32, %c0_33] : memref<8x8x768xf32, #tpu.memory_space<vmem>>, vector<1x8x768xf32>
    %85 = vector.shape_cast %84 : vector<1x8x768xf32> to vector<8x768xf32>
    %cst_34 = arith.constant dense<0.000000e+00> : vector<8x768xf32>
    %86 = tpu.matmul %82, %16, %cst_34 {dimension_numbers = #tpu.dot_dimension_numbers<[1], [0], [0], [1], [0, 0, 1, 1], [], []>} : vector<8x256xf32>, vector<256x768xf32>, vector<8x768xf32> -> vector<8x768xf32>
    %87 = arith.addf %86, %19 : vector<8x768xf32>
    %88 = vector.extract_strided_slice %85 {offsets = [0, 0], sizes = [8, 256], strides = [1, 1]} : vector<8x768xf32> to vector<8x256xf32>
    %89 = vector.extract_strided_slice %87 {offsets = [0, 0], sizes = [8, 256], strides = [1, 1]} : vector<8x768xf32> to vector<8x256xf32>
    %90 = arith.addf %88, %89 : vector<8x256xf32>
    %91 = arith.negf %90 : vector<8x256xf32>
    %92 = math.exp %91 : vector<8x256xf32>
    %cst_35 = arith.constant 1.000000e+00 : f32
    %93 = vector.broadcast %cst_35 : f32 to vector<8x256xf32>
    %94 = arith.addf %93, %92 : vector<8x256xf32>
    %95 = arith.divf %93, %94 : vector<8x256xf32>
    %96 = vector.extract_strided_slice %85 {offsets = [0, 256], sizes = [8, 256], strides = [1, 1]} : vector<8x768xf32> to vector<8x256xf32>
    %97 = vector.extract_strided_slice %87 {offsets = [0, 256], sizes = [8, 256], strides = [1, 1]} : vector<8x768xf32> to vector<8x256xf32>
    %98 = arith.addf %96, %97 : vector<8x256xf32>
    %99 = arith.negf %98 : vector<8x256xf32>
    %100 = math.exp %99 : vector<8x256xf32>
    %cst_36 = arith.constant 1.000000e+00 : f32
    %101 = vector.broadcast %cst_36 : f32 to vector<8x256xf32>
    %102 = arith.addf %101, %100 : vector<8x256xf32>
    %103 = arith.divf %101, %102 : vector<8x256xf32>
    %104 = vector.extract_strided_slice %85 {offsets = [0, 512], sizes = [8, 256], strides = [1, 1]} : vector<8x768xf32> to vector<8x256xf32>
    %105 = vector.extract_strided_slice %87 {offsets = [0, 512], sizes = [8, 256], strides = [1, 1]} : vector<8x768xf32> to vector<8x256xf32>
    %106 = arith.mulf %95, %105 : vector<8x256xf32>
    %107 = arith.addf %104, %106 : vector<8x256xf32>
    %108 = math.tanh %107 : vector<8x256xf32>
    %cst_37 = arith.constant 1.000000e+00 : f32
    %109 = vector.broadcast %cst_37 : f32 to vector<8x256xf32>
    %110 = arith.subf %109, %103 : vector<8x256xf32>
    %111 = arith.mulf %110, %108 : vector<8x256xf32>
    %112 = arith.mulf %103, %82 : vector<8x256xf32>
    %113 = arith.addf %111, %112 : vector<8x256xf32>
    %c3_i32 = arith.constant 3 : i32
    %114 = arith.index_cast %c3_i32 : i32 to index
    %c0_38 = arith.constant 0 : index
    %c0_39 = arith.constant 0 : index
    %115 = vector.load %arg9[%114, %c0_38, %c0_39] : memref<8x8x768xf32, #tpu.memory_space<vmem>>, vector<1x8x768xf32>
    %116 = vector.shape_cast %115 : vector<1x8x768xf32> to vector<8x768xf32>
    %cst_40 = arith.constant dense<0.000000e+00> : vector<8x768xf32>
    %117 = tpu.matmul %113, %16, %cst_40 {dimension_numbers = #tpu.dot_dimension_numbers<[1], [0], [0], [1], [0, 0, 1, 1], [], []>} : vector<8x256xf32>, vector<256x768xf32>, vector<8x768xf32> -> vector<8x768xf32>
    %118 = arith.addf %117, %19 : vector<8x768xf32>
    %119 = vector.extract_strided_slice %116 {offsets = [0, 0], sizes = [8, 256], strides = [1, 1]} : vector<8x768xf32> to vector<8x256xf32>
    %120 = vector.extract_strided_slice %118 {offsets = [0, 0], sizes = [8, 256], strides = [1, 1]} : vector<8x768xf32> to vector<8x256xf32>
    %121 = arith.addf %119, %120 : vector<8x256xf32>
    %122 = arith.negf %121 : vector<8x256xf32>
    %123 = math.exp %122 : vector<8x256xf32>
    %cst_41 = arith.constant 1.000000e+00 : f32
    %124 = vector.broadcast %cst_41 : f32 to vector<8x256xf32>
    %125 = arith.addf %124, %123 : vector<8x256xf32>
    %126 = arith.divf %124, %125 : vector<8x256xf32>
    %127 = vector.extract_strided_slice %116 {offsets = [0, 256], sizes = [8, 256], strides = [1, 1]} : vector<8x768xf32> to vector<8x256xf32>
    %128 = vector.extract_strided_slice %118 {offsets = [0, 256], sizes = [8, 256], strides = [1, 1]} : vector<8x768xf32> to vector<8x256xf32>
    %129 = arith.addf %127, %128 : vector<8x256xf32>
    %130 = arith.negf %129 : vector<8x256xf32>
    %131 = math.exp %130 : vector<8x256xf32>
    %cst_42 = arith.constant 1.000000e+00 : f32
    %132 = vector.broadcast %cst_42 : f32 to vector<8x256xf32>
    %133 = arith.addf %132, %131 : vector<8x256xf32>
    %134 = arith.divf %132, %133 : vector<8x256xf32>
    %135 = vector.extract_strided_slice %116 {offsets = [0, 512], sizes = [8, 256], strides = [1, 1]} : vector<8x768xf32> to vector<8x256xf32>
    %136 = vector.extract_strided_slice %118 {offsets = [0, 512], sizes = [8, 256], strides = [1, 1]} : vector<8x768xf32> to vector<8x256xf32>
    %137 = arith.mulf %126, %136 : vector<8x256xf32>
    %138 = arith.addf %135, %137 : vector<8x256xf32>
    %139 = math.tanh %138 : vector<8x256xf32>
    %cst_43 = arith.constant 1.000000e+00 : f32
    %140 = vector.broadcast %cst_43 : f32 to vector<8x256xf32>
    %141 = arith.subf %140, %134 : vector<8x256xf32>
    %142 = arith.mulf %141, %139 : vector<8x256xf32>
    %143 = arith.mulf %134, %113 : vector<8x256xf32>
    %144 = arith.addf %142, %143 : vector<8x256xf32>
    %c4_i32 = arith.constant 4 : i32
    %145 = arith.index_cast %c4_i32 : i32 to index
    %c0_44 = arith.constant 0 : index
    %c0_45 = arith.constant 0 : index
    %146 = vector.load %arg9[%145, %c0_44, %c0_45] : memref<8x8x768xf32, #tpu.memory_space<vmem>>, vector<1x8x768xf32>
    %147 = vector.shape_cast %146 : vector<1x8x768xf32> to vector<8x768xf32>
    %cst_46 = arith.constant dense<0.000000e+00> : vector<8x768xf32>
    %148 = tpu.matmul %144, %16, %cst_46 {dimension_numbers = #tpu.dot_dimension_numbers<[1], [0], [0], [1], [0, 0, 1, 1], [], []>} : vector<8x256xf32>, vector<256x768xf32>, vector<8x768xf32> -> vector<8x768xf32>
    %149 = arith.addf %148, %19 : vector<8x768xf32>
    %150 = vector.extract_strided_slice %147 {offsets = [0, 0], sizes = [8, 256], strides = [1, 1]} : vector<8x768xf32> to vector<8x256xf32>
    %151 = vector.extract_strided_slice %149 {offsets = [0, 0], sizes = [8, 256], strides = [1, 1]} : vector<8x768xf32> to vector<8x256xf32>
    %152 = arith.addf %150, %151 : vector<8x256xf32>
    %153 = arith.negf %152 : vector<8x256xf32>
    %154 = math.exp %153 : vector<8x256xf32>
    %cst_47 = arith.constant 1.000000e+00 : f32
    %155 = vector.broadcast %cst_47 : f32 to vector<8x256xf32>
    %156 = arith.addf %155, %154 : vector<8x256xf32>
    %157 = arith.divf %155, %156 : vector<8x256xf32>
    %158 = vector.extract_strided_slice %147 {offsets = [0, 256], sizes = [8, 256], strides = [1, 1]} : vector<8x768xf32> to vector<8x256xf32>
    %159 = vector.extract_strided_slice %149 {offsets = [0, 256], sizes = [8, 256], strides = [1, 1]} : vector<8x768xf32> to vector<8x256xf32>
    %160 = arith.addf %158, %159 : vector<8x256xf32>
    %161 = arith.negf %160 : vector<8x256xf32>
    %162 = math.exp %161 : vector<8x256xf32>
    %cst_48 = arith.constant 1.000000e+00 : f32
    %163 = vector.broadcast %cst_48 : f32 to vector<8x256xf32>
    %164 = arith.addf %163, %162 : vector<8x256xf32>
    %165 = arith.divf %163, %164 : vector<8x256xf32>
    %166 = vector.extract_strided_slice %147 {offsets = [0, 512], sizes = [8, 256], strides = [1, 1]} : vector<8x768xf32> to vector<8x256xf32>
    %167 = vector.extract_strided_slice %149 {offsets = [0, 512], sizes = [8, 256], strides = [1, 1]} : vector<8x768xf32> to vector<8x256xf32>
    %168 = arith.mulf %157, %167 : vector<8x256xf32>
    %169 = arith.addf %166, %168 : vector<8x256xf32>
    %170 = math.tanh %169 : vector<8x256xf32>
    %cst_49 = arith.constant 1.000000e+00 : f32
    %171 = vector.broadcast %cst_49 : f32 to vector<8x256xf32>
    %172 = arith.subf %171, %165 : vector<8x256xf32>
    %173 = arith.mulf %172, %170 : vector<8x256xf32>
    %174 = arith.mulf %165, %144 : vector<8x256xf32>
    %175 = arith.addf %173, %174 : vector<8x256xf32>
    %c5_i32 = arith.constant 5 : i32
    %176 = arith.index_cast %c5_i32 : i32 to index
    %c0_50 = arith.constant 0 : index
    %c0_51 = arith.constant 0 : index
    %177 = vector.load %arg9[%176, %c0_50, %c0_51] : memref<8x8x768xf32, #tpu.memory_space<vmem>>, vector<1x8x768xf32>
    %178 = vector.shape_cast %177 : vector<1x8x768xf32> to vector<8x768xf32>
    %cst_52 = arith.constant dense<0.000000e+00> : vector<8x768xf32>
    %179 = tpu.matmul %175, %16, %cst_52 {dimension_numbers = #tpu.dot_dimension_numbers<[1], [0], [0], [1], [0, 0, 1, 1], [], []>} : vector<8x256xf32>, vector<256x768xf32>, vector<8x768xf32> -> vector<8x768xf32>
    %180 = arith.addf %179, %19 : vector<8x768xf32>
    %181 = vector.extract_strided_slice %178 {offsets = [0, 0], sizes = [8, 256], strides = [1, 1]} : vector<8x768xf32> to vector<8x256xf32>
    %182 = vector.extract_strided_slice %180 {offsets = [0, 0], sizes = [8, 256], strides = [1, 1]} : vector<8x768xf32> to vector<8x256xf32>
    %183 = arith.addf %181, %182 : vector<8x256xf32>
    %184 = arith.negf %183 : vector<8x256xf32>
    %185 = math.exp %184 : vector<8x256xf32>
    %cst_53 = arith.constant 1.000000e+00 : f32
    %186 = vector.broadcast %cst_53 : f32 to vector<8x256xf32>
    %187 = arith.addf %186, %185 : vector<8x256xf32>
    %188 = arith.divf %186, %187 : vector<8x256xf32>
    %189 = vector.extract_strided_slice %178 {offsets = [0, 256], sizes = [8, 256], strides = [1, 1]} : vector<8x768xf32> to vector<8x256xf32>
    %190 = vector.extract_strided_slice %180 {offsets = [0, 256], sizes = [8, 256], strides = [1, 1]} : vector<8x768xf32> to vector<8x256xf32>
    %191 = arith.addf %189, %190 : vector<8x256xf32>
    %192 = arith.negf %191 : vector<8x256xf32>
    %193 = math.exp %192 : vector<8x256xf32>
    %cst_54 = arith.constant 1.000000e+00 : f32
    %194 = vector.broadcast %cst_54 : f32 to vector<8x256xf32>
    %195 = arith.addf %194, %193 : vector<8x256xf32>
    %196 = arith.divf %194, %195 : vector<8x256xf32>
    %197 = vector.extract_strided_slice %178 {offsets = [0, 512], sizes = [8, 256], strides = [1, 1]} : vector<8x768xf32> to vector<8x256xf32>
    %198 = vector.extract_strided_slice %180 {offsets = [0, 512], sizes = [8, 256], strides = [1, 1]} : vector<8x768xf32> to vector<8x256xf32>
    %199 = arith.mulf %188, %198 : vector<8x256xf32>
    %200 = arith.addf %197, %199 : vector<8x256xf32>
    %201 = math.tanh %200 : vector<8x256xf32>
    %cst_55 = arith.constant 1.000000e+00 : f32
    %202 = vector.broadcast %cst_55 : f32 to vector<8x256xf32>
    %203 = arith.subf %202, %196 : vector<8x256xf32>
    %204 = arith.mulf %203, %201 : vector<8x256xf32>
    %205 = arith.mulf %196, %175 : vector<8x256xf32>
    %206 = arith.addf %204, %205 : vector<8x256xf32>
    %c6_i32 = arith.constant 6 : i32
    %207 = arith.index_cast %c6_i32 : i32 to index
    %c0_56 = arith.constant 0 : index
    %c0_57 = arith.constant 0 : index
    %208 = vector.load %arg9[%207, %c0_56, %c0_57] : memref<8x8x768xf32, #tpu.memory_space<vmem>>, vector<1x8x768xf32>
    %209 = vector.shape_cast %208 : vector<1x8x768xf32> to vector<8x768xf32>
    %cst_58 = arith.constant dense<0.000000e+00> : vector<8x768xf32>
    %210 = tpu.matmul %206, %16, %cst_58 {dimension_numbers = #tpu.dot_dimension_numbers<[1], [0], [0], [1], [0, 0, 1, 1], [], []>} : vector<8x256xf32>, vector<256x768xf32>, vector<8x768xf32> -> vector<8x768xf32>
    %211 = arith.addf %210, %19 : vector<8x768xf32>
    %212 = vector.extract_strided_slice %209 {offsets = [0, 0], sizes = [8, 256], strides = [1, 1]} : vector<8x768xf32> to vector<8x256xf32>
    %213 = vector.extract_strided_slice %211 {offsets = [0, 0], sizes = [8, 256], strides = [1, 1]} : vector<8x768xf32> to vector<8x256xf32>
    %214 = arith.addf %212, %213 : vector<8x256xf32>
    %215 = arith.negf %214 : vector<8x256xf32>
    %216 = math.exp %215 : vector<8x256xf32>
    %cst_59 = arith.constant 1.000000e+00 : f32
    %217 = vector.broadcast %cst_59 : f32 to vector<8x256xf32>
    %218 = arith.addf %217, %216 : vector<8x256xf32>
    %219 = arith.divf %217, %218 : vector<8x256xf32>
    %220 = vector.extract_strided_slice %209 {offsets = [0, 256], sizes = [8, 256], strides = [1, 1]} : vector<8x768xf32> to vector<8x256xf32>
    %221 = vector.extract_strided_slice %211 {offsets = [0, 256], sizes = [8, 256], strides = [1, 1]} : vector<8x768xf32> to vector<8x256xf32>
    %222 = arith.addf %220, %221 : vector<8x256xf32>
    %223 = arith.negf %222 : vector<8x256xf32>
    %224 = math.exp %223 : vector<8x256xf32>
    %cst_60 = arith.constant 1.000000e+00 : f32
    %225 = vector.broadcast %cst_60 : f32 to vector<8x256xf32>
    %226 = arith.addf %225, %224 : vector<8x256xf32>
    %227 = arith.divf %225, %226 : vector<8x256xf32>
    %228 = vector.extract_strided_slice %209 {offsets = [0, 512], sizes = [8, 256], strides = [1, 1]} : vector<8x768xf32> to vector<8x256xf32>
    %229 = vector.extract_strided_slice %211 {offsets = [0, 512], sizes = [8, 256], strides = [1, 1]} : vector<8x768xf32> to vector<8x256xf32>
    %230 = arith.mulf %219, %229 : vector<8x256xf32>
    %231 = arith.addf %228, %230 : vector<8x256xf32>
    %232 = math.tanh %231 : vector<8x256xf32>
    %cst_61 = arith.constant 1.000000e+00 : f32
    %233 = vector.broadcast %cst_61 : f32 to vector<8x256xf32>
    %234 = arith.subf %233, %227 : vector<8x256xf32>
    %235 = arith.mulf %234, %232 : vector<8x256xf32>
    %236 = arith.mulf %227, %206 : vector<8x256xf32>
    %237 = arith.addf %235, %236 : vector<8x256xf32>
    %c7_i32 = arith.constant 7 : i32
    %238 = arith.index_cast %c7_i32 : i32 to index
    %c0_62 = arith.constant 0 : index
    %c0_63 = arith.constant 0 : index
    %239 = vector.load %arg9[%238, %c0_62, %c0_63] : memref<8x8x768xf32, #tpu.memory_space<vmem>>, vector<1x8x768xf32>
    %240 = vector.shape_cast %239 : vector<1x8x768xf32> to vector<8x768xf32>
    %cst_64 = arith.constant dense<0.000000e+00> : vector<8x768xf32>
    %241 = tpu.matmul %237, %16, %cst_64 {dimension_numbers = #tpu.dot_dimension_numbers<[1], [0], [0], [1], [0, 0, 1, 1], [], []>} : vector<8x256xf32>, vector<256x768xf32>, vector<8x768xf32> -> vector<8x768xf32>
    %242 = arith.addf %241, %19 : vector<8x768xf32>
    %243 = vector.extract_strided_slice %240 {offsets = [0, 0], sizes = [8, 256], strides = [1, 1]} : vector<8x768xf32> to vector<8x256xf32>
    %244 = vector.extract_strided_slice %242 {offsets = [0, 0], sizes = [8, 256], strides = [1, 1]} : vector<8x768xf32> to vector<8x256xf32>
    %245 = arith.addf %243, %244 : vector<8x256xf32>
    %246 = arith.negf %245 : vector<8x256xf32>
    %247 = math.exp %246 : vector<8x256xf32>
    %cst_65 = arith.constant 1.000000e+00 : f32
    %248 = vector.broadcast %cst_65 : f32 to vector<8x256xf32>
    %249 = arith.addf %248, %247 : vector<8x256xf32>
    %250 = arith.divf %248, %249 : vector<8x256xf32>
    %251 = vector.extract_strided_slice %240 {offsets = [0, 256], sizes = [8, 256], strides = [1, 1]} : vector<8x768xf32> to vector<8x256xf32>
    %252 = vector.extract_strided_slice %242 {offsets = [0, 256], sizes = [8, 256], strides = [1, 1]} : vector<8x768xf32> to vector<8x256xf32>
    %253 = arith.addf %251, %252 : vector<8x256xf32>
    %254 = arith.negf %253 : vector<8x256xf32>
    %255 = math.exp %254 : vector<8x256xf32>
    %cst_66 = arith.constant 1.000000e+00 : f32
    %256 = vector.broadcast %cst_66 : f32 to vector<8x256xf32>
    %257 = arith.addf %256, %255 : vector<8x256xf32>
    %258 = arith.divf %256, %257 : vector<8x256xf32>
    %259 = vector.extract_strided_slice %240 {offsets = [0, 512], sizes = [8, 256], strides = [1, 1]} : vector<8x768xf32> to vector<8x256xf32>
    %260 = vector.extract_strided_slice %242 {offsets = [0, 512], sizes = [8, 256], strides = [1, 1]} : vector<8x768xf32> to vector<8x256xf32>
    %261 = arith.mulf %250, %260 : vector<8x256xf32>
    %262 = arith.addf %259, %261 : vector<8x256xf32>
    %263 = math.tanh %262 : vector<8x256xf32>
    %cst_67 = arith.constant 1.000000e+00 : f32
    %264 = vector.broadcast %cst_67 : f32 to vector<8x256xf32>
    %265 = arith.subf %264, %258 : vector<8x256xf32>
    %266 = arith.mulf %265, %263 : vector<8x256xf32>
    %267 = arith.mulf %258, %237 : vector<8x256xf32>
    %268 = arith.addf %266, %267 : vector<8x256xf32>
    %c8_i32 = arith.constant 8 : i32
    %c0_68 = arith.constant 0 : index
    %c0_69 = arith.constant 0 : index
    %269 = vector.load %arg8[%c0_68, %c0_69] : memref<8x256xf32, #tpu.memory_space<vmem>>, vector<8x256xf32>
    tpu.vector_store %arg8[%c0_68, %c0_69], %268 {strides = array<i32>} : memref<8x256xf32, #tpu.memory_space<vmem>>, vector<8x256xf32>,
    return
  }
  func.func @transform_0(%arg0: i32) -> (i32, i32, i32) {
    %c0_i32 = arith.constant 0 : i32
    %c0_i32_0 = arith.constant 0 : i32
    %c0_i32_1 = arith.constant 0 : i32
    return %c0_i32, %arg0, %c0_i32_0 : i32, i32, i32
  }
  func.func @transform_1(%arg0: i32) -> (i32, i32) {
    %c0_i32 = arith.constant 0 : i32
    %c0_i32_0 = arith.constant 0 : i32
    %c0_i32_1 = arith.constant 0 : i32
    return %c0_i32, %c0_i32_0 : i32, i32
  }
  func.func @transform_2(%arg0: i32) -> (i32, i32) {
    %c0_i32 = arith.constant 0 : i32
    %c0_i32_0 = arith.constant 0 : i32
    %c0_i32_1 = arith.constant 0 : i32
    return %c0_i32, %c0_i32_0 : i32, i32
  }
  func.func @transform_3(%arg0: i32) -> (i32, i32) {
    %c0_i32 = arith.constant 0 : i32
    %c0_i32_0 = arith.constant 0 : i32
    %c0_i32_1 = arith.constant 0 : i32
    return %c0_i32, %c0_i32_0 : i32, i32
  }
  func.func @transform_4(%arg0: i32) -> (i32, i32) {
    %c0_i32 = arith.constant 0 : i32
    %c0_i32_0 = arith.constant 0 : i32
    %c0_i32_1 = arith.constant 0 : i32
    return %c0_i32, %c0_i32_0 : i32, i32
  }
  func.func @transform_5(%arg0: i32) -> (i32, i32) {
    %c0_i32 = arith.constant 0 : i32
    %c0_i32_0 = arith.constant 0 : i32
    %c0_i32_1 = arith.constant 0 : i32
    return %c0_i32, %c0_i32_0 : i32, i32
  }
  func.func @transform_6(%arg0: i32) -> (i32, i32) {
    %c0_i32 = arith.constant 0 : i32
    %c0_i32_0 = arith.constant 0 : i32
    %c0_i32_1 = arith.constant 0 : i32
    return %c0_i32, %c0_i32_0 : i32, i32
  }
  func.func @transform_7(%arg0: i32) -> (i32, i32) {
    %c0_i32 = arith.constant 0 : i32
    %c0_i32_0 = arith.constant 0 : i32
    return %arg0, %c0_i32 : i32, i32
  }
}

</mosaic_0001>

<bundles_post_ra>
// kernel: st_encoder_forward.1
= control target key start
LH: loop header
LB: loop body
LE: loop exit
PB: predicated region body
PF: predicated region fallthrough
CT: control target
= control target key end

     0   :  { %12 = vsyncpa [#allocation4], 0  ;;  %s3660_s24 = smov [#allocation3]   ;;  %s7008_s0 = inlined_call_operand.vmem [shape: f32[8,8,6], index: 0, kind: input, shape index: {}]   ;;  %s7009_s1 = inlined_call_operand.vmem [shape: f32[6,32], index: 1, kind: input, shape index: {}]   ;;  %s7010_s2 = inlined_call_operand.vmem [shape: f32[1,32], index: 2, kind: input, shape index: {}]   ;;  %s7011_s3 = inlined_call_operand.vmem [shape: f32[32,768], index: 3, kind: input, shape index: {}]   ;;  %s7012_s4 = inlined_call_operand.hbm [shape: f32[256,768], index: 4, kind: input, shape index: {}]   ;;  %s7013_s5 = inlined_call_operand.vmem [shape: f32[1,768], index: 5, kind: input, shape index: {}]   ;;  %s7014_s6 = inlined_call_operand.vmem [shape: f32[1,768], index: 6, kind: input, shape index: {}]   ;;  %s7015_s7 = inlined_call_operand.vmem [shape: f32[8,256], index: 7, kind: output, shape index: {}]  }
   0x1   :  { %s26_s25 = sshll.u32 %s3660_s24, 4  ;;  %s27_s25 = int_to_ptr.vmem [resolvable:$true] %s26_s25 }
   0x2   :  { %s3646_s26 = scalar_lea.vmem %s27_s25, 24576  ;;  %p3651_p1 = scmp.lt.s32.totalorder %s27_s25, %s27_s25 }
   0x3   :  { %p3647_p0 = scmp.ne.s32.totalorder %s27_s25, %s3646_s26  ;;  %p3652_p2 = scmp.lt.s32.totalorder %s3646_s26, %s3646_s26 }
   0x5   :  { %p3653_p3 = por %p3652_p2, %p3651_p1 }
   0x7   :  { %p3654_p4 = pnand %p3653_p3, %p3647_p0 }
   0x9   :  { %3657 = shalt.err (!%p3654_p4)
}
   0xa   :  { %s3661_s27 = smov 768   ;;  %s3662_s28 = smov 48  }
   0xb   :  { %32 = dma.hbm_to_vmem [thread:$0]  %s7012_s4, 24576, %s27_s25, [#allocation4], %s3661_s27, %s3661_s27, %s3662_s28  }
   0xc   :  { %3658 = dma.done.wait [#allocation4], 24576  }
   0xd   :  { %3659 = vsyncadd [#allocation4], 4294942720  ;;  %vm81_vm0 = vcmask 1045504   ;;  %vm56_vm1 = vcmask 48128   ;;  %v48_v0 = vld [vmem:[%s7009_s1] sm:$0x3f] }
   0xe   :  { %v40_v1 = vld [vmem:[%s7008_s0] sm:$0xff]  ;;  %v41_v2 = vld [vmem:[%s7008_s0 + $0x8] sm:$0xff]  ;;  %3067 = vmatprep.subr.msk.mxu0 %vm81_vm0, %v48_v0  ;;  %v42_v3 = vld [vmem:[%s7008_s0 + $0x10] sm:$0xff]  ;;  %v7017_v18 = vmov 0.0   ;;  %vm254_vm2 = vcmask 261120  }
   0xf   :  { %3069 = vmatprep.mubr.msk.f32.mxu0 %vm56_vm1, %v40_v1  ;;  %3068 = vmatpush3.msk.msra.mxu0 %vm81_vm0, %v48_v0  ;;  %v217_v4 = vld [vmem:[%s7011_s3 + $0x98] sm:$0xff]  ;;  %v216_v5 = vld [vmem:[%s7011_s3 + $0x90] sm:$0xff]  ;;  %v211_v6 = vld [vmem:[%s7011_s3 + $0x68] sm:$0xff] }
  0x10   :  { %3070 = vmatmul.mubr.msk.f32.vlgmr.msra.gmra.mxu0 %vm56_vm1, %v41_v2  ;;  %v43_v7 = vld [vmem:[%s7008_s0 + $0x18] sm:$0xff]  ;;  %303 = vmatprep.subr.mxu0 %v217_v4  ;;  %v44_v8 = vld [vmem:[%s7008_s0 + $0x20] sm:$0xff]  ;;  %v204_v11 = vld [vmem:[%s7011_s3 + $0x30] sm:$0xff] }
  0x11   :  { %3072 = vmatprep.mubr.msk.f32.mxu0 %vm56_vm1, %v42_v3  ;;  %304 = vmatpush1.msra.mxu0 %v216_v5  ;;  %v210_v9 = vld [vmem:[%s7011_s3 + $0x60] sm:$0xff]  ;;  %v205_v10 = vld [vmem:[%s7011_s3 + $0x38] sm:$0xff]  ;;  %v45_v12 = vld [vmem:[%s7008_s0 + $0x28] sm:$0xff] }
  0x12   :  { %3081 = vmatprep.subr.mxu1 %v217_v4  ;;  %305 = vmatprep.subr.mxu0 %v211_v6  ;;  %v46_v13 = vld [vmem:[%s7008_s0 + $0x30] sm:$0xff]  ;;  %v47_v14 = vld [vmem:[%s7008_s0 + $0x38] sm:$0xff]  ;;  %v199_v15 = vld [vmem:[%s7011_s3 + $0x8] sm:$0xff] }
  0x13   :  { %3085 = vmatpush1.msra.mxu1 %v216_v5  ;;  %306 = vmatpush1.msra.mxu0 %v210_v9  ;;  %v198_v16 = vld [vmem:[%s7011_s3] sm:$0xff]  ;;  %v219_v17 = vld [vmem:[%s7011_s3 + $0xa8] sm:$0xff]  ;;  %v221_v19 = vld [vmem:[%s7011_s3 + $0xb8] sm:$0xff] }
  0x14   :  { %3073 = vmatmul.mubr.msk.f32.gmra.mxu0 %vm56_vm1, %v43_v7  ;;  %3082 = vmatprep.subr.mxu1 %v211_v6  ;;  %v3777_v21 = vld [vmem:[%s7010_s2] ss:$0 sm:$0xff]  ;;  %v213_v29 = vld [vmem:[%s7011_s3 + $0x78] sm:$0xff]  ;;  %v212_v31 = vld [vmem:[%s7011_s3 + $0x70] sm:$0xff] }
  0x15   :  { %3075 = vmatprep.mubr.msk.f32.mxu0 %vm56_vm1, %v44_v8  ;;  %307 = vmatprep.subr.mxu0 %v205_v10  ;;  %v218_v27 = vld [vmem:[%s7011_s3 + $0xa0] sm:$0xff]  ;;  %v207_v33 = vld [vmem:[%s7011_s3 + $0x48] sm:$0xff]  ;;  %v201_v38 = vld [vmem:[%s7011_s3 + $0x18] sm:$0xff] }
  0x16   :  { %3086 = vmatpush1.msra.mxu1 %v210_v9  ;;  %308 = vmatpush1.msra.mxu0 %v204_v11  ;;  %v206_v37 = vld [vmem:[%s7011_s3 + $0x40] sm:$0xff]  ;;  %v200_v40 = vld [vmem:[%s7011_s3 + $0x10] sm:$0xff]  ;;  %v3820_v43 = vld [vmem:[#allocation3 + $0x2d8] sm:$0xff] }
  0x17   :  { %3083 = vmatprep.subr.mxu1 %v205_v10  ;;  %309 = vmatprep.subr.mxu0 %v199_v15  ;;  %v3823_v44 = vld [vmem:[#allocation3 + $0x2d0] sm:$0xff]  ;;  %v3826_v46 = vld [vmem:[#allocation3 + $0x2a8] sm:$0xff]  ;;  %v3831_v47 = vld [vmem:[#allocation3 + $0x2a0] sm:$0xff] }
  0x18   :  { %3076 = vmatmul.mubr.msk.f32.gmra.mxu0 %vm56_vm1, %v45_v12  ;;  %3087 = vmatpush1.msra.mxu1 %v204_v11  ;;  %v3839_v50 = vld [vmem:[#allocation3 + $0x278] sm:$0xff]  ;;  %v3843_v51 = vld [vmem:[#allocation3 + $0x270] sm:$0xff]  ;;  %v3847_v53 = vld [vmem:[#allocation3 + $0x248] sm:$0xff] }
  0x19   :  { %3078 = vmatprep.mubr.msk.f32.mxu0 %vm56_vm1, %v46_v13  ;;  %3084 = vmatprep.subr.mxu1 %v199_v15  ;;  %v3852_v54 = vld [vmem:[#allocation3 + $0x240] sm:$0xff]  ;;  %v220_v55 = vld [vmem:[%s7011_s3 + $0xb0] sm:$0xff]  ;;  %v3863_v58 = vld [vmem:[#allocation3 + $0x218] sm:$0xff] }
  0x1a   :  { %310 = vmatpush1.msra.mxu0 %v198_v16  ;;  %3088 = vmatpush1.msra.mxu1 %v198_v16  ;;  %v3867_v59 = vld [vmem:[#allocation3 + $0x210] sm:$0xff]  ;;  %v3870_v60 = vld [vmem:[#allocation3 + $0x1e8] sm:$0xff]  ;;  %v3873_v61 = vld [vmem:[#allocation3 + $0x1e0] sm:$0xff] }
  0x1b   :  { %416 = vmatprep.subr.mxu0 %v219_v17  ;;  %355 = vmatprep.mubr.f32.mxu1 %v7017_v18  ;;  %v215_v62 = vld [vmem:[%s7011_s3 + $0x88] sm:$0xff]  ;;  %v3885_v1 = vld [vmem:[#allocation3 + $0x1b8] sm:$0xff]  ;;  %v3889_v2 = vld [vmem:[#allocation3 + $0x1b0] sm:$0xff] }
  0x1c   :  { %3079 = vmatmul.mubr.msk.f32.gmra.mxu0 %vm56_vm1, %v47_v14  ;;  %529 = vmatprep.subr.mxu1 %v221_v19  ;;  %v3892_v3 = vld [vmem:[#allocation3 + $0x188] sm:$0xff]  ;;  %v214_v4 = vld [vmem:[%s7011_s3 + $0x80] sm:$0xff]  ;;  %v209_v7 = vld [vmem:[%s7011_s3 + $0x58] sm:$0xff] }
  0x1d   :  { %343 = vmatprep.mubr.f32.mxu0 %v7017_v18  ;;  %v3900_v5 = vld [vmem:[#allocation3 + $0x180] sm:$0xff]  ;;  %v3910_v8 = vld [vmem:[#allocation3 + $0x158] sm:$0xff]  ;;  %v3913_v9 = vld [vmem:[#allocation3 + $0x150] sm:$0xff] }
  0x1e   :  { %v208_v10 = vld [vmem:[%s7011_s3 + $0x50] sm:$0xff]  ;;  %v203_v11 = vld [vmem:[%s7011_s3 + $0x28] sm:$0xff]  ;;  %v202_v13 = vld [vmem:[%s7011_s3 + $0x20] sm:$0xff] }
  0x1f   :  { %v3924_v12 = vld [vmem:[#allocation3 + $0x128] sm:$0xff]  ;;  %v3933_v14 = vld [vmem:[#allocation3 + $0x120] sm:$0xff]  ;;  %v3936_v15 = vld [vmem:[#allocation3 + $0xf8] sm:$0xff] }
  0x20   :  { %v3938_v16 = vld [vmem:[#allocation3 + $0x2e8] sm:$0xff]  ;;  %v3942_v17 = vld [vmem:[#allocation3 + $0xf0] sm:$0xff]  ;;  %v3946_v19 = vld [vmem:[#allocation3 + $0x2e0] sm:$0xff] }
  0xd0   :  { %v3071_v20 = vpop.f32.mrf.mxu0 }
  0xd1   :  { %v157_v25 = vadd.f32 %v3071_v20, %v3777_v21  ;;  %v3950_v20 = vld [vmem:[#allocation3 + $0xc8] sm:$0xff] }
  0xd2   :  { %v151_v22 = vpop.f32.mrf.mxu0 }
  0xd3   :  { %v152_v23 = vadd.f32 %v3777_v21, %v151_v22  ;;  %v3800_v35 = vmax.f32 %v157_v25, 0.0  ;;  %v3957_v22 = vld [vmem:[#allocation3 + $0x2b0] sm:$0xff]  ;;  %v3967_v25 = vld [vmem:[#allocation3 + $0x288] sm:$0xff] }
  0xd4   :  { %v3074_v24 = vpop.f32.mrf.mxu0 }
  0xd5   :  { %v3781_v26 = vmax.f32 %v152_v23, 0.0  ;;  %v167_v32 = vadd.f32 %v3074_v24, %v3777_v21  ;;  %v3961_v23 = vld [vmem:[#allocation3 + $0xc0] sm:$0xff]  ;;  %v3965_v24 = vld [vmem:[#allocation3 + $0x98] sm:$0xff] }
  0xd6   :  { %v161_v28 = vpop.f32.mrf.mxu0 }
  0xd7   :  { %v162_v30 = vadd.f32 %v3777_v21, %v161_v28  ;;  %3002 = vmatmul.mubr.msk.f32.vlgmr.msra.gmra.mxu0 %vm254_vm2, %v3781_v26  ;;  %v3815_v41 = vmax.f32 %v167_v32, 0.0  ;;  %v3980_v28 = vld [vmem:[#allocation3 + $0x68] sm:$0xff]  ;;  %v3995_v32 = vld [vmem:[#allocation3 + $0x38] sm:$0xff] }
  0xd8   :  { %417 = vmatpush1.msra.mxu0 %v218_v27  ;;  %349 = vmatprep.mubr.f32.mxu0 %v7017_v18  ;;  %v3077_v34 = vpop.f32.mrf.mxu0  ;;  %v3976_v27 = vld [vmem:[#allocation3 + $0x280] sm:$0xff] }
  0xd9   :  { %v3802_v36 = vmax.f32 %v162_v30, 0.0  ;;  %418 = vmatprep.subr.mxu0 %v213_v29  ;;  %v177_v48 = vadd.f32 %v3077_v34, %v3777_v21  ;;  %v3982_v29 = vld [vmem:[#allocation3 + $0x258] sm:$0xff]  ;;  %v3987_v30 = vld [vmem:[#allocation3 + $0x250] sm:$0xff] }
  0xda   :  { %419 = vmatpush1.msra.mxu0 %v212_v31  ;;  %v171_v39 = vpop.f32.mrf.mxu0  ;;  %7712 = vst [vmem:[#allocation6_spill] sm:$0xff] %v3982_v29  ;;  %7713 = vst [vmem:[#allocation7_spill] sm:$0xff] %v3987_v30  ;;  %v3991_v31 = vld [vmem:[#allocation3 + $0x60] sm:$0xff]  ;;  %v4002_v34 = vld [vmem:[#allocation3 + $0x30] sm:$0xff] }
  0xdb   :  { %420 = vmatprep.subr.mxu0 %v207_v33  ;;  %3003 = vmatmul.mubr.msk.f32.gmra.mxu0 %vm254_vm2, %v3800_v35  ;;  %v172_v42 = vadd.f32 %v3777_v21, %v171_v39  ;;  %v3857_v56 = vmax.f32 %v177_v48, 0.0  ;;  %v3997_v33 = vld [vmem:[#allocation3 + $0x228] sm:$0xff]  ;;  %v4017_v39 = vld [vmem:[#allocation3 + $0x1f0] sm:$0xff]  ;;  %v4036_v48 = vld [vmem:[#allocation3 + $0x1c0] sm:$0xff] }
  0xdc   :  { %3004 = vmatmul.mubr.msk.f32.vlgmr.msra.gmra.mxu1 %vm254_vm2, %v3802_v36  ;;  %421 = vmatpush1.msra.mxu0 %v206_v37  ;;  %v3080_v45 = vpop.f32.mrf.mxu0  ;;  %7714 = vst [vmem:[#allocation8_spill] sm:$0xff] %v3997_v33  ;;  %v4010_v37 = vld [vmem:[#allocation3 + $0x8] sm:$0xff]  ;;  %7717 = vst [vmem:[#allocation11_spill] sm:$0xff] %v4017_v39 }
  0xdd   :  { %422 = vmatprep.subr.mxu0 %v201_v38  ;;  %361 = vmatprep.mubr.f32.mxu1 %v7017_v18  ;;  %v3834_v49 = vmax.f32 %v172_v42, 0.0  ;;  %v187_v63 = vadd.f32 %v3080_v45, %v3777_v21  ;;  %v4012_v38 = vld [vmem:[#allocation3 + $0x1f8] sm:$0xff]  ;;  %v4027_v45 = vld [vmem:[#allocation3 + $0x1c8] sm:$0xff]  ;;  %7719 = vst [vmem:[#allocation13_spill] sm:$0xff] %v4036_v48 }
  0xde   :  { %423 = vmatpush1.msra.mxu0 %v200_v40  ;;  %456 = vmatprep.mubr.f32.mxu0 %v7017_v18  ;;  %v181_v52 = vpop.f32.mrf.mxu0  ;;  %7716 = vst [vmem:[#allocation10_spill] sm:$0xff] %v4012_v38  ;;  %v4021_v40 = vld [vmem:[#allocation3] sm:$0xff]  ;;  %v4025_v42 = vld [vmem:[#allocation3 + $0x5d8] sm:$0xff]  ;;  %7718 = vst [vmem:[#allocation12_spill] sm:$0xff] %v4027_v45 }
  0xdf   :  { %896 = vmatprep.subr.mxu0 %v3820_v43  ;;  %3010 = vmatmul.mubr.msk.f32.vlgmr.msra.gmra.mxu0 %vm254_vm2, %v3781_v26  ;;  %v182_v57 = vadd.f32 %v3777_v21, %v181_v52  ;;  %v3902_v6 = vmax.f32 %v187_v63, 0.0  ;;  %v3952_v21 = vld [vmem:[#allocation3 + $0x2b8] sm:$0xff]  ;;  %v4040_v52 = vld [vmem:[#allocation3 + $0x5a8] sm:$0xff] }
  0xe0   :  { %3005 = vmatmul.mubr.msk.f32.gmra.mxu1 %vm254_vm2, %v3815_v41  ;;  %897 = vmatpush1.msra.mxu0 %v3823_v44  ;;  %v4055_v63 = vld [vmem:[#allocation3 + $0x578] sm:$0xff] }
  0xe1   :  { %898 = vmatprep.subr.mxu0 %v3826_v46  ;;  %367 = vmatprep.mubr.f32.mxu1 %v7017_v18  ;;  %v3880_v0 = vmax.f32 %v182_v57, 0.0  ;;  %v4047_v57 = vld [vmem:[#allocation3 + $0x190] sm:$0xff] }
  0xe2   :  { %899 = vmatpush1.msra.mxu0 %v3831_v47  ;;  %462 = vmatprep.mubr.f32.mxu0 %v7017_v18  ;;  %7721 = vst [vmem:[#allocation15_spill] sm:$0xff] %v4047_v57 }
  0xe3   :  { %900 = vmatprep.subr.mxu0 %v3839_v50  ;;  %3011 = vmatmul.mubr.msk.f32.gmra.mxu0 %vm254_vm2, %v3800_v35 }
  0xe4   :  { %3006 = vmatmul.mubr.msk.f32.gmra.mxu1 %vm254_vm2, %v3834_v49  ;;  %901 = vmatpush1.msra.mxu0 %v3843_v51 }
  0xe5   :  { %902 = vmatprep.subr.mxu0 %v3847_v53  ;;  %373 = vmatprep.mubr.f32.mxu1 %v7017_v18 }
  0xe6   :  { %903 = vmatpush1.msra.mxu0 %v3852_v54  ;;  %530 = vmatpush1.msra.mxu1 %v220_v55  ;;  %v4042_v55 = vld [vmem:[#allocation3 + $0x198] sm:$0xff] }
  0xe7   :  { %904 = vmatprep.subr.mxu0 %v3863_v58  ;;  %468 = vmatprep.mubr.f32.mxu0 %v7017_v18  ;;  %7720 = vst [vmem:[#allocation14_spill] sm:$0xff] %v4042_v55 }
  0xe8   :  { %3007 = vmatmul.mubr.msk.f32.gmra.mxu1 %vm254_vm2, %v3857_v56  ;;  %905 = vmatpush1.msra.mxu0 %v3867_v59 }
  0xe9   :  { %906 = vmatprep.subr.mxu0 %v3870_v60  ;;  %379 = vmatprep.mubr.f32.mxu1 %v7017_v18 }
  0xea   :  { %907 = vmatpush1.msra.mxu0 %v3873_v61  ;;  %531 = vmatprep.subr.mxu1 %v215_v62  ;;  %v4051_v62 = vld [vmem:[#allocation3 + $0x5a0] sm:$0xff] }
  0xeb   :  { %908 = vmatprep.subr.mxu0 %v3885_v1  ;;  %3012 = vmatmul.mubr.msk.f32.gmra.mxu0 %vm254_vm2, %v3802_v36 }
  0xec   :  { %3008 = vmatmul.mubr.msk.f32.gmra.mxu1 %vm254_vm2, %v3880_v0  ;;  %909 = vmatpush1.msra.mxu0 %v3889_v2 }
  0xed   :  { %910 = vmatprep.subr.mxu0 %v3892_v3  ;;  %532 = vmatpush1.msra.mxu1 %v214_v4  ;;  %v4057_v4 = vld [vmem:[#allocation3 + $0x168] sm:$0xff] }
  0xee   :  { %911 = vmatpush1.msra.mxu0 %v3900_v5  ;;  %385 = vmatprep.mubr.f32.mxu1 %v7017_v18  ;;  %7722 = vst [vmem:[#allocation16_spill] sm:$0xff] %v4057_v4 }
  0xef   :  { %533 = vmatprep.subr.mxu1 %v209_v7  ;;  %912 = vmatprep.subr.mxu0 %v3910_v8  ;;  %v4066_v7 = vld [vmem:[#allocation3 + $0x160] sm:$0xff] }
  0xf0   :  { %3009 = vmatmul.mubr.msk.f32.gmra.mxu1 %vm254_vm2, %v3902_v6  ;;  %913 = vmatpush1.msra.mxu0 %v3913_v9  ;;  %7723 = vst [vmem:[#allocation17_spill] sm:$0xff] %v4066_v7 }
  0xf1   :  { %534 = vmatpush1.msra.mxu1 %v208_v10  ;;  %474 = vmatprep.mubr.f32.mxu0 %v7017_v18  ;;  %v4068_v10 = vld [vmem:[#allocation3 + $0x548] sm:$0xff] }
  0xf2   :  { %535 = vmatprep.subr.mxu1 %v203_v11  ;;  %914 = vmatprep.subr.mxu0 %v3924_v12  ;;  %v4072_v11 = vld [vmem:[#allocation3 + $0x138] sm:$0xff] }
  0xf3   :  { %3013 = vmatmul.mubr.msk.f32.gmra.mxu0 %vm254_vm2, %v3815_v41  ;;  %536 = vmatpush1.msra.mxu1 %v202_v13  ;;  %7724 = vst [vmem:[#allocation18_spill] sm:$0xff] %v4072_v11  ;;  %v4074_v13 = vld [vmem:[#allocation3 + $0x540] sm:$0xff] }
  0xf4   :  { %915 = vmatpush1.msra.mxu0 %v3933_v14  ;;  %569 = vmatprep.mubr.f32.mxu1 %v7017_v18 }
  0xf5   :  { %916 = vmatprep.subr.mxu0 %v3936_v15  ;;  %967 = vmatprep.subr.mxu1 %v3938_v16 }
  0xf6   :  { %3018 = vmatmul.mubr.msk.f32.vlgmr.msra.gmra.mxu1 %vm254_vm2, %v3781_v26  ;;  %917 = vmatpush1.msra.mxu0 %v3942_v17  ;;  %v3972_v26 = vld [vmem:[#allocation3 + $0x90] sm:$0xff] }
  0xf7   :  { %968 = vmatpush1.msra.mxu1 %v3946_v19  ;;  %480 = vmatprep.mubr.f32.mxu0 %v7017_v18 }
  0xf8   :  { %918 = vmatprep.subr.mxu0 %v3950_v20  ;;  %969 = vmatprep.subr.mxu1 %v3952_v21 }
  0xf9   :  { %3014 = vmatmul.mubr.msk.f32.gmra.mxu0 %vm254_vm2, %v3834_v49  ;;  %970 = vmatpush1.msra.mxu1 %v3957_v22 }
  0xfa   :  { %919 = vmatpush1.msra.mxu0 %v3961_v23  ;;  %575 = vmatprep.mubr.f32.mxu1 %v7017_v18 }
  0xfb   :  { %920 = vmatprep.subr.mxu0 %v3965_v24  ;;  %971 = vmatprep.subr.mxu1 %v3967_v25 }
  0xfc   :  { %3019 = vmatmul.mubr.msk.f32.gmra.mxu1 %vm254_vm2, %v3800_v35  ;;  %921 = vmatpush1.msra.mxu0 %v3972_v26  ;;  %v4006_v35 = vld [vmem:[#allocation3 + $0x220] sm:$0xff] }
  0xfd   :  { %972 = vmatpush1.msra.mxu1 %v3976_v27  ;;  %486 = vmatprep.mubr.f32.mxu0 %v7017_v18  ;;  %7715 = vst [vmem:[#allocation9_spill] sm:$0xff] %v4006_v35 }
  0xfe   :  { %922 = vmatprep.subr.mxu0 %v3980_v28  ;;  %973 = vmatprep.subr.mxu1 %v3982_v29  ;;  %v4149_v29 = vld [vmem:[#allocation3 + $0x428] sm:$0xff] }
  0xff   :  { %3015 = vmatmul.mubr.msk.f32.gmra.mxu0 %vm254_vm2, %v3857_v56  ;;  %974 = vmatpush1.msra.mxu1 %v3987_v30  ;;  %v4139_v30 = vld [vmem:[#allocation3 + $0x48] sm:$0xff]  ;;  %7741 = vst [vmem:[#allocation34_spill] sm:$0xff] %v4149_v29 }
 0x100   :  { %923 = vmatpush1.msra.mxu0 %v3991_v31  ;;  %581 = vmatprep.mubr.f32.mxu1 %v7017_v18  ;;  %7738 = vst [vmem:[#allocation31_spill] sm:$0xff] %v4139_v30 }
 0x101   :  { %924 = vmatprep.subr.mxu0 %v3995_v32  ;;  %975 = vmatprep.subr.mxu1 %v3997_v33  ;;  %v4128_v33 = vld [vmem:[#allocation3 + $0x480] sm:$0xff] }
 0x102   :  { %3020 = vmatmul.mubr.msk.f32.gmra.mxu1 %vm254_vm2, %v3802_v36  ;;  %925 = vmatpush1.msra.mxu0 %v4002_v34  ;;  %v4032_v36 = vld [vmem:[#allocation3 + $0x5d0] sm:$0xff]  ;;  %7735 = vst [vmem:[#allocation28_spill] sm:$0xff] %v4128_v33 }
 0x103   :  { %976 = vmatpush1.msra.mxu1 %v4006_v35  ;;  %492 = vmatprep.mubr.f32.mxu0 %v7017_v18  ;;  %v4122_v35 = vld [vmem:[#allocation3 + $0x488] sm:$0xff] }
 0x104   :  { %926 = vmatprep.subr.mxu0 %v4010_v37  ;;  %977 = vmatprep.subr.mxu1 %v4012_v38  ;;  %v4112_v38 = vld [vmem:[#allocation3 + $0xa8] sm:$0xff]  ;;  %7733 = vst [vmem:[#allocation26_spill] sm:$0xff] %v4122_v35 }
 0x105   :  { %3016 = vmatmul.mubr.msk.f32.gmra.mxu0 %vm254_vm2, %v3880_v0  ;;  %978 = vmatpush1.msra.mxu1 %v4017_v39  ;;  %v4101_v39 = vld [vmem:[#allocation3 + $0x4e0] sm:$0xff]  ;;  %7731 = vst [vmem:[#allocation24_spill] sm:$0xff] %v4112_v38 }
 0x106   :  { %927 = vmatpush1.msra.mxu0 %v4021_v40  ;;  %587 = vmatprep.mubr.f32.mxu1 %v7017_v18 }
 0x107   :  { %928 = vmatprep.subr.mxu0 %v4025_v42  ;;  %979 = vmatprep.subr.mxu1 %v4027_v45  ;;  %v4095_v45 = vld [vmem:[#allocation3 + $0x4e8] sm:$0xff] }
 0x108   :  { %3021 = vmatmul.mubr.msk.f32.gmra.mxu1 %vm254_vm2, %v3815_v41  ;;  %929 = vmatpush2.msra.mxu0 %v4032_v36  ;;  %v4062_v41 = vld [vmem:[#allocation3 + $0x570] sm:$0xff] }
 0x109   :  { %980 = vmatpush1.msra.mxu1 %v4036_v48  ;;  %498 = vmatprep.mubr.f32.mxu0 %v7017_v18  ;;  %v4093_v48 = vld [vmem:[#allocation3 + $0x100] sm:$0xff] }
 0x10a   :  { %930 = vmatprep.subr.mxu0 %v4040_v52  ;;  %981 = vmatprep.subr.mxu1 %v4042_v55  ;;  %v4085_v55 = vld [vmem:[#allocation3 + $0x108] sm:$0xff]  ;;  %7728 = vst [vmem:[#allocation21_spill] sm:$0xff] %v4093_v48 }
 0x10b   :  { %3017 = vmatmul.mubr.msk.f32.gmra.mxu0 %vm254_vm2, %v3902_v6  ;;  %982 = vmatpush1.msra.mxu1 %v4047_v57  ;;  %v4079_v57 = vld [vmem:[#allocation3 + $0x130] sm:$0xff]  ;;  %7726 = vst [vmem:[#allocation20_spill] sm:$0xff] %v4085_v55 }
 0x10c   :  { %931 = vmatpush2.msra.mxu0 %v4051_v62  ;;  %593 = vmatprep.mubr.f32.mxu1 %v7017_v18  ;;  %7725 = vst [vmem:[#allocation19_spill] sm:$0xff] %v4079_v57  ;;  %v4083_v18 = vld [vmem:[#allocation3 + $0x518] sm:$0xff] }
 0x10d   :  { %932 = vmatprep.subr.mxu0 %v4055_v63  ;;  %983 = vmatprep.subr.mxu1 %v4057_v4  ;;  %v4089_v4 = vld [vmem:[#allocation3 + $0x510] sm:$0xff] }
 0x10e   :  { %3022 = vmatmul.mubr.msk.f32.gmra.mxu1 %vm254_vm2, %v3834_v49  ;;  %933 = vmatpush2.msra.mxu0 %v4062_v41  ;;  %v7727_v49 = vmov 0.0  }
 0x10f   :  { %984 = vmatpush1.msra.mxu1 %v4066_v7  ;;  %934 = vmatprep.subr.mxu0 %v4068_v10  ;;  %v4099_v7 = vld [vmem:[#allocation3 + $0xd8] sm:$0xff] }
 0x110   :  { %985 = vmatprep.subr.mxu1 %v4072_v11  ;;  %935 = vmatpush2.msra.mxu0 %v4074_v13  ;;  %7729 = vst [vmem:[#allocation22_spill] sm:$0xff] %v4099_v7  ;;  %v4110_v11 = vld [vmem:[#allocation3 + $0x4b8] sm:$0xff] }
 0x111   :  { %986 = vmatpush1.msra.mxu1 %v4079_v57  ;;  %599 = vmatprep.mubr.f32.mxu1 %v7727_v49  ;;  %v4106_v57 = vld [vmem:[#allocation3 + $0xd0] sm:$0xff] }
 0x112   :  { %936 = vmatprep.subr.mxu0 %v4083_v18  ;;  %987 = vmatprep.subr.mxu1 %v4085_v55  ;;  %7730 = vst [vmem:[#allocation23_spill] sm:$0xff] %v4106_v57  ;;  %v4116_v55 = vld [vmem:[#allocation3 + $0x4b0] sm:$0xff] }
 0x113   :  { %3023 = vmatmul.mubr.msk.f32.gmra.mxu1 %vm254_vm2, %v3857_v56  ;;  %937 = vmatpush2.msra.mxu0 %v4089_v4  ;;  %v4120_v56 = vld [vmem:[#allocation3 + $0xa0] sm:$0xff] }
 0x114   :  { %988 = vmatpush1.msra.mxu1 %v4093_v48  ;;  %938 = vmatprep.subr.mxu0 %v4095_v45  ;;  %7732 = vst [vmem:[#allocation25_spill] sm:$0xff] %v4120_v56  ;;  %v4126_v48 = vld [vmem:[#allocation3 + $0x78] sm:$0xff] }
 0x115   :  { %989 = vmatprep.subr.mxu1 %v4099_v7  ;;  %939 = vmatpush2.msra.mxu0 %v4101_v39  ;;  %7734 = vst [vmem:[#allocation27_spill] sm:$0xff] %v4126_v48  ;;  %v4137_v7 = vld [vmem:[#allocation3 + $0x458] sm:$0xff] }
 0x116   :  { %990 = vmatpush1.msra.mxu1 %v4106_v57  ;;  %605 = vmatprep.mubr.f32.mxu1 %v7727_v49  ;;  %v4133_v57 = vld [vmem:[#allocation3 + $0x70] sm:$0xff]  ;;  %7737 = vst [vmem:[#allocation30_spill] sm:$0xff] %v4137_v7 }
 0x117   :  { %940 = vmatprep.subr.mxu0 %v4110_v11  ;;  %991 = vmatprep.subr.mxu1 %v4112_v38  ;;  %7736 = vst [vmem:[#allocation29_spill] sm:$0xff] %v4133_v57  ;;  %v4143_v38 = vld [vmem:[#allocation3 + $0x450] sm:$0xff] }
 0x118   :  { %3024 = vmatmul.mubr.msk.f32.gmra.mxu1 %vm254_vm2, %v3880_v0  ;;  %941 = vmatpush2.msra.mxu0 %v4116_v55  ;;  %7739 = vst [vmem:[#allocation32_spill] sm:$0xff] %v4143_v38  ;;  %v4147_v0 = vld [vmem:[#allocation3 + $0x40] sm:$0xff] }
 0x119   :  { %992 = vmatpush1.msra.mxu1 %v4120_v56  ;;  %942 = vmatprep.subr.mxu0 %v4122_v35  ;;  %7740 = vst [vmem:[#allocation33_spill] sm:$0xff] %v4147_v0  ;;  %v4153_v56 = vld [vmem:[#allocation3 + $0x18] sm:$0xff]  ;;  %v4155_v35 = vld [vmem:[#allocation3 + $0x420] sm:$0xff] }
 0x11a   :  { %993 = vmatprep.subr.mxu1 %v4126_v48  ;;  %943 = vmatpush2.msra.mxu0 %v4128_v33  ;;  %7742 = vst [vmem:[#allocation35_spill] sm:$0xff] %v4153_v56  ;;  %7743 = vst [vmem:[#allocation36_spill] sm:$0xff] %v4155_v35  ;;  %v4162_v48 = vld [vmem:[#allocation3 + $0x3f8] sm:$0xff]  ;;  %v4172_v33 = vld [vmem:[#allocation3 + $0x5e0] sm:$0xff] }
 0x11b   :  { %994 = vmatpush1.msra.mxu1 %v4133_v57  ;;  %611 = vmatprep.mubr.f32.mxu1 %v7727_v49  ;;  %v4160_v57 = vld [vmem:[#allocation3 + $0x10] sm:$0xff]  ;;  %7745 = vst [vmem:[#allocation38_spill] sm:$0xff] %v4162_v48  ;;  %7748 = vst [vmem:[#allocation41_spill] sm:$0xff] %v4172_v33 }
 0x11c   :  { %944 = vmatprep.subr.mxu0 %v4137_v7  ;;  %995 = vmatprep.subr.mxu1 %v4139_v30  ;;  %7744 = vst [vmem:[#allocation37_spill] sm:$0xff] %v4160_v57  ;;  %v4166_v7 = vld [vmem:[#allocation3 + $0x5e8] sm:$0xff]  ;;  %v4168_v30 = vld [vmem:[#allocation3 + $0x3f0] sm:$0xff] }
 0x11d   :  { %3025 = vmatmul.mubr.msk.f32.gmra.mxu1 %vm254_vm2, %v3902_v6  ;;  %945 = vmatpush2.msra.mxu0 %v4143_v38  ;;  %7746 = vst [vmem:[#allocation39_spill] sm:$0xff] %v4166_v7  ;;  %7747 = vst [vmem:[#allocation40_spill] sm:$0xff] %v4168_v30  ;;  %v4174_v6 = vld [vmem:[#allocation3 + $0x3c8] sm:$0xff]  ;;  %v4178_v38 = vld [vmem:[#allocation3 + $0x5b8] sm:$0xff] }
 0x11e   :  { %996 = vmatpush1.msra.mxu1 %v4147_v0  ;;  %946 = vmatprep.subr.mxu0 %v4149_v29  ;;  %7749 = vst [vmem:[#allocation42_spill] sm:$0xff] %v4174_v6  ;;  %7750 = vst [vmem:[#allocation43_spill] sm:$0xff] %v4178_v38  ;;  %v4180_v0 = vld [vmem:[#allocation3 + $0x3c0] sm:$0xff]  ;;  %v4184_v29 = vld [vmem:[#allocation3 + $0x5b0] sm:$0xff] }
 0x11f   :  { %997 = vmatprep.subr.mxu1 %v4153_v56  ;;  %947 = vmatpush2.msra.mxu0 %v4155_v35  ;;  %7751 = vst [vmem:[#allocation44_spill] sm:$0xff] %v4180_v0  ;;  %7752 = vst [vmem:[#allocation45_spill] sm:$0xff] %v4184_v29  ;;  %v4186_v56 = vld [vmem:[#allocation3 + $0x398] sm:$0xff]  ;;  %v4190_v35 = vld [vmem:[#allocation3 + $0x588] sm:$0xff] }
 0x120   :  { %998 = vmatpush1.msra.mxu1 %v4160_v57  ;;  %948 = vmatprep.subr.mxu0 %v4162_v48  ;;  %7753 = vst [vmem:[#allocation46_spill] sm:$0xff] %v4186_v56  ;;  %7754 = vst [vmem:[#allocation47_spill] sm:$0xff] %v4190_v35  ;;  %v4192_v57 = vld [vmem:[#allocation3 + $0x390] sm:$0xff]  ;;  %v4196_v48 = vld [vmem:[#allocation3 + $0x580] sm:$0xff] }
 0x121   :  { %999 = vmatprep.subr.mxu1 %v4166_v7  ;;  %949 = vmatpush2.msra.mxu0 %v4168_v30  ;;  %7755 = vst [vmem:[#allocation48_spill] sm:$0xff] %v4192_v57  ;;  %7756 = vst [vmem:[#allocation49_spill] sm:$0xff] %v4196_v48  ;;  %v4198_v7 = vld [vmem:[#allocation3 + $0x368] sm:$0xff]  ;;  %v4202_v30 = vld [vmem:[#allocation3 + $0x558] sm:$0xff] }
 0x122   :  { %1000 = vmatpush2.msra.mxu1 %v4172_v33  ;;  %950 = vmatprep.subr.mxu0 %v4174_v6  ;;  %7757 = vst [vmem:[#allocation50_spill] sm:$0xff] %v4198_v7  ;;  %7758 = vst [vmem:[#allocation51_spill] sm:$0xff] %v4202_v30  ;;  %v4204_v33 = vld [vmem:[#allocation3 + $0x360] sm:$0xff]  ;;  %v4208_v6 = vld [vmem:[#allocation3 + $0x550] sm:$0xff] }
 0x123   :  { %1001 = vmatprep.subr.mxu1 %v4178_v38  ;;  %951 = vmatpush2.msra.mxu0 %v4180_v0  ;;  %7759 = vst [vmem:[#allocation52_spill] sm:$0xff] %v4204_v33  ;;  %7760 = vst [vmem:[#allocation53_spill] sm:$0xff] %v4208_v6  ;;  %v4210_v38 = vld [vmem:[#allocation3 + $0x338] sm:$0xff]  ;;  %v4214_v0 = vld [vmem:[#allocation3 + $0x528] sm:$0xff] }
 0x124   :  { %1002 = vmatpush2.msra.mxu1 %v4184_v29  ;;  %952 = vmatprep.subr.mxu0 %v4186_v56  ;;  %7761 = vst [vmem:[#allocation54_spill] sm:$0xff] %v4210_v38  ;;  %7762 = vst [vmem:[#allocation55_spill] sm:$0xff] %v4214_v0  ;;  %v4216_v29 = vld [vmem:[#allocation3 + $0x330] sm:$0xff]  ;;  %v4220_v56 = vld [vmem:[#allocation3 + $0x520] sm:$0xff] }
 0x125   :  { %1003 = vmatprep.subr.mxu1 %v4190_v35  ;;  %953 = vmatpush2.msra.mxu0 %v4192_v57  ;;  %7763 = vst [vmem:[#allocation56_spill] sm:$0xff] %v4216_v29  ;;  %7764 = vst [vmem:[#allocation57_spill] sm:$0xff] %v4220_v56  ;;  %v4222_v35 = vld [vmem:[#allocation3 + $0x308] sm:$0xff]  ;;  %v4226_v57 = vld [vmem:[#allocation3 + $0x4f8] sm:$0xff] }
 0x126   :  { %1004 = vmatpush2.msra.mxu1 %v4196_v48  ;;  %954 = vmatprep.subr.mxu0 %v4198_v7  ;;  %7765 = vst [vmem:[#allocation58_spill] sm:$0xff] %v4222_v35  ;;  %7766 = vst [vmem:[#allocation59_spill] sm:$0xff] %v4226_v57  ;;  %v4228_v48 = vld [vmem:[#allocation3 + $0x300] sm:$0xff]  ;;  %v4232_v7 = vld [vmem:[#allocation3 + $0x4f0] sm:$0xff] }
 0x127   :  { %1005 = vmatprep.subr.mxu1 %v4202_v30  ;;  %955 = vmatpush2.msra.mxu0 %v4204_v33  ;;  %7767 = vst [vmem:[#allocation60_spill] sm:$0xff] %v4228_v48  ;;  %7768 = vst [vmem:[#allocation61_spill] sm:$0xff] %v4232_v7  ;;  %v4236_v30 = vld [vmem:[#allocation3 + $0x4c8] sm:$0xff]  ;;  %v4266_v33 = vld [vmem:[#allocation3 + $0x460] sm:$0xff] }
 0x128   :  { %1006 = vmatpush2.msra.mxu1 %v4208_v6  ;;  %956 = vmatprep.subr.mxu0 %v4210_v38  ;;  %7769 = vst [vmem:[#allocation62_spill] sm:$0xff] %v4236_v30  ;;  %v4240_v6 = vld [vmem:[#allocation3 + $0x2f8] sm:$0xff]  ;;  %v4242_v38 = vld [vmem:[#allocation3 + $0x4c0] sm:$0xff]  ;;  %7779 = vst [vmem:[#allocation72_spill] sm:$0xff] %v4266_v33 }
 0x129   :  { %1007 = vmatprep.subr.mxu1 %v4214_v0  ;;  %957 = vmatpush2.msra.mxu0 %v4216_v29  ;;  %7770 = vst [vmem:[#allocation63_spill] sm:$0xff] %v4240_v6  ;;  %7771 = vst [vmem:[#allocation64_spill] sm:$0xff] %v4242_v38  ;;  %v4246_v0 = vld [vmem:[#allocation3 + $0x2f0] sm:$0xff]  ;;  %v4248_v29 = vld [vmem:[#allocation3 + $0x498] sm:$0xff] }
 0x12a   :  { %1008 = vmatpush2.msra.mxu1 %v4220_v56  ;;  %958 = vmatprep.subr.mxu0 %v4222_v35  ;;  %7772 = vst [vmem:[#allocation65_spill] sm:$0xff] %v4246_v0  ;;  %7773 = vst [vmem:[#allocation66_spill] sm:$0xff] %v4248_v29  ;;  %v4252_v56 = vld [vmem:[#allocation3 + $0x2c8] sm:$0xff] }
 0x12b   :  { %1009 = vmatprep.subr.mxu1 %v4226_v57  ;;  %959 = vmatpush2.msra.mxu0 %v4228_v48  ;;  %7774 = vst [vmem:[#allocation67_spill] sm:$0xff] %v4252_v56  ;;  %v4254_v57 = vld [vmem:[#allocation3 + $0x490] sm:$0xff]  ;;  %v4258_v48 = vld [vmem:[#allocation3 + $0x2c0] sm:$0xff]  ;;  %v4260_v35 = vld [vmem:[#allocation3 + $0x468] sm:$0xff] }
 0x12c   :  { %960 = vmatprep.mubr.f32.mxu0 %v7727_v49  ;;  %1010 = vmatpush2.msra.mxu1 %v4232_v7  ;;  %7775 = vst [vmem:[#allocation68_spill] sm:$0xff] %v4254_v57  ;;  %7776 = vst [vmem:[#allocation69_spill] sm:$0xff] %v4258_v48  ;;  %v4264_v7 = vld [vmem:[#allocation3 + $0x298] sm:$0xff] }
 0x12d   :  { %961 = vmatmul.mubr.f32.vlgmr.msra.gmra.mxu0 %v7727_v49  ;;  %1011 = vmatprep.subr.mxu1 %v4236_v30  ;;  %7777 = vst [vmem:[#allocation70_spill] sm:$0xff] %v4260_v35  ;;  %7778 = vst [vmem:[#allocation71_spill] sm:$0xff] %v4264_v7  ;;  %v4270_v30 = vld [vmem:[#allocation3 + $0x290] sm:$0xff] }
 0x12e   :  { %1038 = vmatprep.subr.mxu0 %v4240_v6  ;;  %1012 = vmatpush2.msra.mxu1 %v4242_v38  ;;  %7780 = vst [vmem:[#allocation73_spill] sm:$0xff] %v4270_v30  ;;  %v4272_v6 = vld [vmem:[#allocation3 + $0x438] sm:$0xff]  ;;  %v4276_v38 = vld [vmem:[#allocation3 + $0x268] sm:$0xff] }
 0x12f   :  { %1039 = vmatpush1.msra.mxu0 %v4246_v0  ;;  %1013 = vmatprep.subr.mxu1 %v4248_v29  ;;  %7781 = vst [vmem:[#allocation74_spill] sm:$0xff] %v4272_v6  ;;  %7782 = vst [vmem:[#allocation75_spill] sm:$0xff] %v4276_v38  ;;  %v4278_v0 = vld [vmem:[#allocation3 + $0x430] sm:$0xff]  ;;  %v4282_v29 = vld [vmem:[#allocation3 + $0x260] sm:$0xff] }
 0x130   :  { %1040 = vmatprep.subr.mxu0 %v4252_v56  ;;  %1014 = vmatpush2.msra.mxu1 %v4254_v57  ;;  %7783 = vst [vmem:[#allocation76_spill] sm:$0xff] %v4278_v0  ;;  %7784 = vst [vmem:[#allocation77_spill] sm:$0xff] %v4282_v29  ;;  %v4284_v56 = vld [vmem:[#allocation3 + $0x408] sm:$0xff]  ;;  %v4288_v57 = vld [vmem:[#allocation3 + $0x238] sm:$0xff] }
 0x131   :  { %1041 = vmatpush1.msra.mxu0 %v4258_v48  ;;  %1015 = vmatprep.subr.mxu1 %v4260_v35  ;;  %7785 = vst [vmem:[#allocation78_spill] sm:$0xff] %v4284_v56  ;;  %7786 = vst [vmem:[#allocation79_spill] sm:$0xff] %v4288_v57  ;;  %v4290_v48 = vld [vmem:[#allocation3 + $0x400] sm:$0xff]  ;;  %v4294_v35 = vld [vmem:[#allocation3 + $0x230] sm:$0xff] }
 0x132   :  { %1042 = vmatprep.subr.mxu0 %v4264_v7  ;;  %1016 = vmatpush2.msra.mxu1 %v4266_v33  ;;  %7787 = vst [vmem:[#allocation80_spill] sm:$0xff] %v4290_v48  ;;  %7788 = vst [vmem:[#allocation81_spill] sm:$0xff] %v4294_v35  ;;  %v4296_v7 = vld [vmem:[#allocation3 + $0x3d8] sm:$0xff]  ;;  %v4300_v33 = vld [vmem:[#allocation3 + $0x208] sm:$0xff] }
 0x133   :  { %1043 = vmatpush1.msra.mxu0 %v4270_v30  ;;  %1017 = vmatprep.subr.mxu1 %v4272_v6  ;;  %7789 = vst [vmem:[#allocation82_spill] sm:$0xff] %v4296_v7  ;;  %7790 = vst [vmem:[#allocation83_spill] sm:$0xff] %v4300_v33  ;;  %v4302_v30 = vld [vmem:[#allocation3 + $0x3d0] sm:$0xff]  ;;  %v4306_v6 = vld [vmem:[#allocation3 + $0x200] sm:$0xff] }
 0x134   :  { %1044 = vmatprep.subr.mxu0 %v4276_v38  ;;  %1018 = vmatpush2.msra.mxu1 %v4278_v0  ;;  %7791 = vst [vmem:[#allocation84_spill] sm:$0xff] %v4302_v30  ;;  %7792 = vst [vmem:[#allocation85_spill] sm:$0xff] %v4306_v6  ;;  %v4308_v38 = vld [vmem:[#allocation3 + $0x3a8] sm:$0xff]  ;;  %v4312_v0 = vld [vmem:[#allocation3 + $0x1d8] sm:$0xff] }
 0x135   :  { %1045 = vmatpush1.msra.mxu0 %v4282_v29  ;;  %1019 = vmatprep.subr.mxu1 %v4284_v56  ;;  %7793 = vst [vmem:[#allocation86_spill] sm:$0xff] %v4308_v38  ;;  %7794 = vst [vmem:[#allocation87_spill] sm:$0xff] %v4312_v0  ;;  %v4314_v29 = vld [vmem:[#allocation3 + $0x3a0] sm:$0xff]  ;;  %v4318_v56 = vld [vmem:[#allocation3 + $0x1d0] sm:$0xff] }
 0x136   :  { %1046 = vmatprep.subr.mxu0 %v4288_v57  ;;  %1020 = vmatpush2.msra.mxu1 %v4290_v48  ;;  %7795 = vst [vmem:[#allocation88_spill] sm:$0xff] %v4314_v29  ;;  %7796 = vst [vmem:[#allocation89_spill] sm:$0xff] %v4318_v56  ;;  %v4320_v57 = vld [vmem:[#allocation3 + $0x378] sm:$0xff]  ;;  %v4324_v48 = vld [vmem:[#allocation3 + $0x1a8] sm:$0xff] }
 0x137   :  { %1047 = vmatpush1.msra.mxu0 %v4294_v35  ;;  %1021 = vmatprep.subr.mxu1 %v4296_v7  ;;  %7797 = vst [vmem:[#allocation90_spill] sm:$0xff] %v4320_v57  ;;  %7798 = vst [vmem:[#allocation91_spill] sm:$0xff] %v4324_v48  ;;  %v4326_v35 = vld [vmem:[#allocation3 + $0x370] sm:$0xff]  ;;  %v4330_v7 = vld [vmem:[#allocation3 + $0x1a0] sm:$0xff] }
 0x138   :  { %1048 = vmatprep.subr.mxu0 %v4300_v33  ;;  %1022 = vmatpush2.msra.mxu1 %v4302_v30  ;;  %7799 = vst [vmem:[#allocation92_spill] sm:$0xff] %v4330_v7  ;;  %v4332_v33 = vld [vmem:[#allocation3 + $0x348] sm:$0xff]  ;;  %v4336_v30 = vld [vmem:[#allocation3 + $0x178] sm:$0xff] }
 0x139   :  { %1049 = vmatpush1.msra.mxu0 %v4306_v6  ;;  %1023 = vmatprep.subr.mxu1 %v4308_v38  ;;  %7800 = vst [vmem:[#allocation93_spill] sm:$0xff] %v4336_v30  ;;  %v4338_v6 = vld [vmem:[#allocation3 + $0x340] sm:$0xff]  ;;  %v4342_v38 = vld [vmem:[#allocation3 + $0x170] sm:$0xff] }
 0x13a   :  { %1050 = vmatprep.subr.mxu0 %v4312_v0  ;;  %1024 = vmatpush2.msra.mxu1 %v4314_v29  ;;  %7801 = vst [vmem:[#allocation94_spill] sm:$0xff] %v4342_v38  ;;  %v4344_v0 = vld [vmem:[#allocation3 + $0x318] sm:$0xff]  ;;  %v4348_v29 = vld [vmem:[#allocation3 + $0x148] sm:$0xff] }
 0x13b   :  { %1051 = vmatpush1.msra.mxu0 %v4318_v56  ;;  %1025 = vmatprep.subr.mxu1 %v4320_v57  ;;  %7802 = vst [vmem:[#allocation95_spill] sm:$0xff] %v4344_v0  ;;  %7803 = vst [vmem:[#allocation96_spill] sm:$0xff] %v4348_v29  ;;  %v4350_v56 = vld [vmem:[#allocation3 + $0x310] sm:$0xff]  ;;  %v4354_v57 = vld [vmem:[#allocation3 + $0x140] sm:$0xff] }
 0x13c   :  { %1052 = vmatprep.subr.mxu0 %v4324_v48  ;;  %1026 = vmatpush2.msra.mxu1 %v4326_v35  ;;  %7804 = vst [vmem:[#allocation97_spill] sm:$0xff] %v4354_v57  ;;  %v4358_v48 = vld [vmem:[#allocation3 + $0x118] sm:$0xff] }
 0x13d   :  { %1053 = vmatpush1.msra.mxu0 %v4330_v7  ;;  %1027 = vmatprep.subr.mxu1 %v4332_v33  ;;  %7805 = vst [vmem:[#allocation98_spill] sm:$0xff] %v4358_v48  ;;  %v4362_v7 = vld [vmem:[#allocation3 + $0x110] sm:$0xff] }
 0x13e   :  { %1054 = vmatprep.subr.mxu0 %v4336_v30  ;;  %1028 = vmatpush2.msra.mxu1 %v4338_v6  ;;  %7806 = vst [vmem:[#allocation99_spill] sm:$0xff] %v4362_v7  ;;  %v4366_v30 = vld [vmem:[#allocation3 + $0xe8] sm:$0xff] }
 0x13f   :  { %1055 = vmatpush1.msra.mxu0 %v4342_v38  ;;  %1029 = vmatprep.subr.mxu1 %v4344_v0  ;;  %v4370_v38 = vld [vmem:[#allocation3 + $0xe0] sm:$0xff]  ;;  %v4373_v0 = vld [vmem:[#allocation3 + $0xb8] sm:$0xff] }
 0x140   :  { %1056 = vmatprep.subr.mxu0 %v4348_v29  ;;  %1030 = vmatpush2.msra.mxu1 %v4350_v56  ;;  %v4377_v29 = vld [vmem:[#allocation3 + $0xb0] sm:$0xff] }
 0x141   :  { %1031 = vmatprep.mubr.f32.mxu1 %v7727_v49  ;;  %1057 = vmatpush1.msra.mxu0 %v4354_v57  ;;  %v4381_v57 = vld [vmem:[#allocation3 + $0x88] sm:$0xff] }
 0x142   :  { %1032 = vmatmul.mubr.f32.vlgmr.msra.gmra.mxu1 %v7727_v49  ;;  %1058 = vmatprep.subr.mxu0 %v4358_v48  ;;  %v4385_v48 = vld [vmem:[#allocation3 + $0x80] sm:$0xff] }
 0x143   :  { %1059 = vmatpush1.msra.mxu0 %v4362_v7  ;;  %1102 = vmatprep.mubr.f32.mxu0 %v7727_v49  ;;  %v4389_v7 = vld [vmem:[#allocation3 + $0x58] sm:$0xff] }
 0x144   :  { %1060 = vmatprep.subr.mxu0 %v4366_v30  ;;  %1158 = vmatprep.subr.mxu1 %v3820_v43  ;;  %v4393_v43 = vld [vmem:[#allocation3 + $0x50] sm:$0xff] }
 0x145   :  { %1061 = vmatpush1.msra.mxu0 %v4370_v38  ;;  %1159 = vmatpush1.msra.mxu1 %v3823_v44  ;;  %v4397_v44 = vld [vmem:[#allocation3 + $0x28] sm:$0xff] }
 0x146   :  { %1062 = vmatprep.subr.mxu0 %v4373_v0  ;;  %1160 = vmatprep.subr.mxu1 %v3826_v46  ;;  %v4401_v46 = vld [vmem:[#allocation3 + $0x20] sm:$0xff] }
 0x147   :  { %1063 = vmatpush1.msra.mxu0 %v4377_v29  ;;  %1161 = vmatpush1.msra.mxu1 %v3831_v47  ;;  %v4405_v47 = vld [vmem:[#allocation3 + $0x5f8] sm:$0xff] }
 0x148   :  { %1064 = vmatprep.subr.mxu0 %v4381_v57  ;;  %1162 = vmatprep.subr.mxu1 %v3839_v50  ;;  %v4409_v50 = vld [vmem:[#allocation3 + $0x5f0] sm:$0xff] }
 0x149   :  { %1065 = vmatpush1.msra.mxu0 %v4385_v48  ;;  %1163 = vmatpush1.msra.mxu1 %v3843_v51  ;;  %v4413_v51 = vld [vmem:[#allocation3 + $0x5c8] sm:$0xff] }
 0x14a   :  { %1066 = vmatprep.subr.mxu0 %v4389_v7  ;;  %1164 = vmatprep.subr.mxu1 %v3847_v53  ;;  %v4417_v53 = vld [vmem:[#allocation3 + $0x5c0] sm:$0xff] }
 0x14b   :  { %1067 = vmatpush1.msra.mxu0 %v4393_v43  ;;  %1165 = vmatpush1.msra.mxu1 %v3852_v54  ;;  %v4421_v54 = vld [vmem:[#allocation3 + $0x598] sm:$0xff] }
 0x14c   :  { %1068 = vmatprep.subr.mxu0 %v4397_v44  ;;  %1166 = vmatprep.subr.mxu1 %v3863_v58  ;;  %v4425_v58 = vld [vmem:[#allocation3 + $0x590] sm:$0xff] }
 0x14d   :  { %1069 = vmatpush1.msra.mxu0 %v4401_v46  ;;  %1167 = vmatpush1.msra.mxu1 %v3867_v59  ;;  %v4429_v59 = vld [vmem:[#allocation3 + $0x568] sm:$0xff] }
 0x14e   :  { %1070 = vmatprep.subr.mxu0 %v4405_v47  ;;  %1168 = vmatprep.subr.mxu1 %v3870_v60  ;;  %v4433_v60 = vld [vmem:[#allocation3 + $0x560] sm:$0xff] }
 0x14f   :  { %1071 = vmatpush2.msra.mxu0 %v4409_v50  ;;  %1169 = vmatpush1.msra.mxu1 %v3873_v61  ;;  %v4437_v61 = vld [vmem:[#allocation3 + $0x538] sm:$0xff] }
 0x150   :  { %1072 = vmatprep.subr.mxu0 %v4413_v51  ;;  %1170 = vmatprep.subr.mxu1 %v3885_v1  ;;  %v4441_v1 = vld [vmem:[#allocation3 + $0x530] sm:$0xff] }
 0x151   :  { %1073 = vmatpush2.msra.mxu0 %v4417_v53  ;;  %1171 = vmatpush1.msra.mxu1 %v3889_v2  ;;  %v4445_v2 = vld [vmem:[#allocation3 + $0x508] sm:$0xff] }
 0x152   :  { %1074 = vmatprep.subr.mxu0 %v4421_v54  ;;  %1172 = vmatprep.subr.mxu1 %v3892_v3  ;;  %v4449_v3 = vld [vmem:[#allocation3 + $0x500] sm:$0xff] }
 0x153   :  { %1075 = vmatpush2.msra.mxu0 %v4425_v58  ;;  %1173 = vmatpush1.msra.mxu1 %v3900_v5  ;;  %v4453_v5 = vld [vmem:[#allocation3 + $0x4d8] sm:$0xff] }
 0x154   :  { %1076 = vmatprep.subr.mxu0 %v4429_v59  ;;  %1174 = vmatprep.subr.mxu1 %v3910_v8  ;;  %v4457_v8 = vld [vmem:[#allocation3 + $0x4d0] sm:$0xff] }
 0x155   :  { %1077 = vmatpush2.msra.mxu0 %v4433_v60  ;;  %1175 = vmatpush1.msra.mxu1 %v3913_v9  ;;  %v4461_v9 = vld [vmem:[#allocation3 + $0x4a8] sm:$0xff] }
 0x156   :  { %1078 = vmatprep.subr.mxu0 %v4437_v61  ;;  %1176 = vmatprep.subr.mxu1 %v3924_v12  ;;  %v4465_v12 = vld [vmem:[#allocation3 + $0x4a0] sm:$0xff] }
 0x157   :  { %1079 = vmatpush2.msra.mxu0 %v4441_v1  ;;  %1177 = vmatpush1.msra.mxu1 %v3933_v14  ;;  %v4469_v14 = vld [vmem:[#allocation3 + $0x478] sm:$0xff] }
 0x158   :  { %1080 = vmatprep.subr.mxu0 %v4445_v2  ;;  %1178 = vmatprep.subr.mxu1 %v3936_v15  ;;  %v4473_v15 = vld [vmem:[#allocation3 + $0x470] sm:$0xff] }
 0x159   :  { %1081 = vmatpush2.msra.mxu0 %v4449_v3  ;;  %1179 = vmatpush1.msra.mxu1 %v3942_v17  ;;  %v4477_v17 = vld [vmem:[#allocation3 + $0x448] sm:$0xff] }
 0x15a   :  { %1082 = vmatprep.subr.mxu0 %v4453_v5  ;;  %1180 = vmatprep.subr.mxu1 %v3950_v20  ;;  %v4481_v20 = vld [vmem:[#allocation3 + $0x440] sm:$0xff] }
 0x15b   :  { %1083 = vmatpush2.msra.mxu0 %v4457_v8  ;;  %1181 = vmatpush1.msra.mxu1 %v3961_v23  ;;  %v4485_v23 = vld [vmem:[#allocation3 + $0x418] sm:$0xff] }
 0x15c   :  { %1084 = vmatprep.subr.mxu0 %v4461_v9  ;;  %1182 = vmatprep.subr.mxu1 %v3965_v24  ;;  %v4489_v24 = vld [vmem:[#allocation3 + $0x410] sm:$0xff] }
 0x15d   :  { %1085 = vmatpush2.msra.mxu0 %v4465_v12  ;;  %1183 = vmatpush1.msra.mxu1 %v3972_v26  ;;  %v4493_v26 = vld [vmem:[#allocation3 + $0x3e8] sm:$0xff] }
 0x15e   :  { %1086 = vmatprep.subr.mxu0 %v4469_v14  ;;  %1184 = vmatprep.subr.mxu1 %v3980_v28  ;;  %v4497_v28 = vld [vmem:[#allocation3 + $0x3e0] sm:$0xff] }
 0x15f   :  { %1087 = vmatpush2.msra.mxu0 %v4473_v15  ;;  %1185 = vmatpush1.msra.mxu1 %v3991_v31  ;;  %v4501_v31 = vld [vmem:[#allocation3 + $0x3b8] sm:$0xff] }
 0x160   :  { %1088 = vmatprep.subr.mxu0 %v4477_v17  ;;  %1186 = vmatprep.subr.mxu1 %v3995_v32  ;;  %v4505_v32 = vld [vmem:[#allocation3 + $0x3b0] sm:$0xff] }
 0x161   :  { %1089 = vmatpush2.msra.mxu0 %v4481_v20  ;;  %1187 = vmatpush1.msra.mxu1 %v4002_v34  ;;  %7807 = vst [vmem:[#allocation100_spill] sm:$0xff] %v4505_v32  ;;  %v4509_v34 = vld [vmem:[#allocation3 + $0x388] sm:$0xff] }
 0x162   :  { %1090 = vmatprep.subr.mxu0 %v4485_v23  ;;  %1188 = vmatprep.subr.mxu1 %v4010_v37  ;;  %7808 = vst [vmem:[#allocation101_spill] sm:$0xff] %v4509_v34  ;;  %v4513_v37 = vld [vmem:[#allocation3 + $0x380] sm:$0xff] }
 0x163   :  { %1091 = vmatpush2.msra.mxu0 %v4489_v24  ;;  %1189 = vmatpush1.msra.mxu1 %v4021_v40  ;;  %7809 = vst [vmem:[#allocation102_spill] sm:$0xff] %v4513_v37  ;;  %v4517_v40 = vld [vmem:[#allocation3 + $0x358] sm:$0xff] }
 0x164   :  { %1092 = vmatprep.subr.mxu0 %v4493_v26  ;;  %1190 = vmatprep.subr.mxu1 %v4025_v42  ;;  %7810 = vst [vmem:[#allocation103_spill] sm:$0xff] %v4517_v40  ;;  %v4521_v42 = vld [vmem:[#allocation3 + $0x350] sm:$0xff] }
 0x165   :  { %1093 = vmatpush2.msra.mxu0 %v4497_v28  ;;  %1191 = vmatpush2.msra.mxu1 %v4032_v36  ;;  %7811 = vst [vmem:[#allocation104_spill] sm:$0xff] %v4521_v42  ;;  %v4525_v36 = vld [vmem:[#allocation3 + $0x328] sm:$0xff] }
 0x166   :  { %1094 = vmatprep.subr.mxu0 %v4501_v31  ;;  %1192 = vmatprep.subr.mxu1 %v4040_v52  ;;  %7812 = vst [vmem:[#allocation105_spill] sm:$0xff] %v4525_v36  ;;  %v4529_v52 = vld [vmem:[#allocation3 + $0x320] sm:$0xff] }
 0x167   :  { %1095 = vmatpush2.msra.mxu0 %v4505_v32  ;;  %1193 = vmatpush2.msra.mxu1 %v4051_v62  ;;  %7813 = vst [vmem:[#allocation106_spill] sm:$0xff] %v4529_v52  ;;  %v7821_v62 = vld [vmem:[#allocation9_spill] sm:$0xff] }
 0x168   :  { %1096 = vmatprep.subr.mxu0 %v4509_v34  ;;  %1194 = vmatprep.subr.mxu1 %v4055_v63  ;;  %v7825_v63 = vld [vmem:[#allocation11_spill] sm:$0xff] }
 0x169   :  { %1097 = vmatpush2.msra.mxu0 %v4513_v37  ;;  %1195 = vmatpush2.msra.mxu1 %v4062_v41  ;;  %v7827_v41 = vld [vmem:[#allocation12_spill] sm:$0xff] }
 0x16a   :  { %1098 = vmatprep.subr.mxu0 %v4517_v40  ;;  %1196 = vmatprep.subr.mxu1 %v4068_v10  ;;  %v7828_v10 = vld [vmem:[#allocation40_spill] sm:$0xff] }
 0x16b   :  { %1099 = vmatpush2.msra.mxu0 %v4521_v42  ;;  %1197 = vmatpush2.msra.mxu1 %v4074_v13  ;;  %v7830_v13 = vld [vmem:[#allocation42_spill] sm:$0xff]  ;;  %v7896_v40 = vld [vmem:[#allocation88_spill] sm:$0xff] }
 0x16c   :  { %1100 = vmatprep.subr.mxu0 %v4525_v36  ;;  %1198 = vmatprep.subr.mxu1 %v4083_v18  ;;  %v7814_v18 = vld [vmem:[#allocation26_spill] sm:$0xff] }
 0x16d   :  { %1101 = vmatpush2.msra.mxu0 %v4529_v52  ;;  %1199 = vmatpush2.msra.mxu1 %v4089_v4  ;;  %v7826_v4 = vld [vmem:[#allocation38_spill] sm:$0xff] }
 0x16e   :  { %1103 = vmatmul.mubr.f32.vlgmr.msra.gmra.mxu0 %v7727_v49  ;;  %1229 = vmatprep.subr.mxu0 %v3938_v16  ;;  %v7815_v16 = vld [vmem:[#allocation6_spill] sm:$0xff] }
 0x16f   :  { %1230 = vmatpush1.msra.mxu0 %v3946_v19  ;;  %1200 = vmatprep.subr.mxu1 %v4095_v45  ;;  %v7816_v19 = vld [vmem:[#allocation28_spill] sm:$0xff]  ;;  %v7817_v45 = vld [vmem:[#allocation7_spill] sm:$0xff]  ;;  %v7831_v49 = vld [vmem:[#allocation14_spill] sm:$0xff] }
 0x170   :  { %1231 = vmatprep.subr.mxu0 %v3952_v21  ;;  %1201 = vmatpush2.msra.mxu1 %v4101_v39  ;;  %v7818_v21 = vld [vmem:[#allocation30_spill] sm:$0xff]  ;;  %v7819_v39 = vld [vmem:[#allocation8_spill] sm:$0xff] }
 0x171   :  { %1232 = vmatpush1.msra.mxu0 %v3957_v22  ;;  %1202 = vmatprep.subr.mxu1 %v4110_v11  ;;  %v7820_v22 = vld [vmem:[#allocation32_spill] sm:$0xff]  ;;  %v7829_v11 = vld [vmem:[#allocation13_spill] sm:$0xff]  ;;  %v7894_v42 = vld [vmem:[#allocation86_spill] sm:$0xff] }
 0x172   :  { %1233 = vmatprep.subr.mxu0 %v3967_v25  ;;  %1203 = vmatpush2.msra.mxu1 %v4116_v55  ;;  %v7822_v25 = vld [vmem:[#allocation34_spill] sm:$0xff] }
 0x173   :  { %1234 = vmatpush1.msra.mxu0 %v3976_v27  ;;  %1204 = vmatprep.subr.mxu1 %v7814_v18  ;;  %v7823_v55 = vld [vmem:[#allocation10_spill] sm:$0xff]  ;;  %v7824_v27 = vld [vmem:[#allocation36_spill] sm:$0xff] }
 0x174   :  { %1235 = vmatprep.subr.mxu0 %v7815_v16  ;;  %1205 = vmatpush2.msra.mxu1 %v7816_v19  ;;  %v7832_v18 = vld [vmem:[#allocation44_spill] sm:$0xff]  ;;  %v7833_v16 = vld [vmem:[#allocation15_spill] sm:$0xff]  ;;  %v7834_v19 = vld [vmem:[#allocation46_spill] sm:$0xff] }
 0x175   :  { %1236 = vmatpush1.msra.mxu0 %v7817_v45  ;;  %1206 = vmatprep.subr.mxu1 %v7818_v21  ;;  %v7835_v45 = vld [vmem:[#allocation16_spill] sm:$0xff] }
 0x176   :  { %1237 = vmatprep.subr.mxu0 %v7819_v39  ;;  %1207 = vmatpush2.msra.mxu1 %v7820_v22  ;;  %v7836_v21 = vld [vmem:[#allocation48_spill] sm:$0xff]  ;;  %v7837_v39 = vld [vmem:[#allocation17_spill] sm:$0xff]  ;;  %v7838_v22 = vld [vmem:[#allocation50_spill] sm:$0xff] }
 0x177   :  { %1238 = vmatpush1.msra.mxu0 %v7821_v62  ;;  %1208 = vmatprep.subr.mxu1 %v7822_v25  ;;  %v7839_v62 = vld [vmem:[#allocation18_spill] sm:$0xff]  ;;  %v7840_v25 = vld [vmem:[#allocation52_spill] sm:$0xff] }
 0x178   :  { %1239 = vmatprep.subr.mxu0 %v7823_v55  ;;  %1209 = vmatpush2.msra.mxu1 %v7824_v27  ;;  %v7841_v55 = vld [vmem:[#allocation19_spill] sm:$0xff]  ;;  %v7842_v27 = vld [vmem:[#allocation54_spill] sm:$0xff] }
 0x179   :  { %1240 = vmatpush1.msra.mxu0 %v7825_v63  ;;  %1210 = vmatprep.subr.mxu1 %v7826_v4  ;;  %v7843_v63 = vld [vmem:[#allocation20_spill] sm:$0xff] }
 0x17a   :  { %1241 = vmatprep.subr.mxu0 %v7827_v41  ;;  %1211 = vmatpush2.msra.mxu1 %v7828_v10  ;;  %v7844_v4 = vld [vmem:[#allocation56_spill] sm:$0xff]  ;;  %v7845_v41 = vld [vmem:[#allocation21_spill] sm:$0xff]  ;;  %v7846_v10 = vld [vmem:[#allocation58_spill] sm:$0xff] }
 0x17b   :  { %1242 = vmatpush1.msra.mxu0 %v7829_v11  ;;  %1212 = vmatprep.subr.mxu1 %v7830_v13  ;;  %v7847_v11 = vld [vmem:[#allocation22_spill] sm:$0xff]  ;;  %v7848_v13 = vld [vmem:[#allocation60_spill] sm:$0xff] }
 0x17c   :  { %1243 = vmatprep.subr.mxu0 %v7831_v49  ;;  %1213 = vmatpush2.msra.mxu1 %v7832_v18  ;;  %v7849_v49 = vld [vmem:[#allocation23_spill] sm:$0xff] }
 0x17d   :  { %1244 = vmatpush1.msra.mxu0 %v7833_v16  ;;  %1214 = vmatprep.subr.mxu1 %v7834_v19  ;;  %v7850_v18 = vld [vmem:[#allocation63_spill] sm:$0xff]  ;;  %v7851_v16 = vld [vmem:[#allocation24_spill] sm:$0xff]  ;;  %v7852_v19 = vld [vmem:[#allocation25_spill] sm:$0xff] }
 0x17e   :  { %1245 = vmatprep.subr.mxu0 %v7835_v45  ;;  %1215 = vmatpush2.msra.mxu1 %v7836_v21  ;;  %v7853_v45 = vld [vmem:[#allocation27_spill] sm:$0xff]  ;;  %v7854_v21 = vld [vmem:[#allocation29_spill] sm:$0xff] }
 0x17f   :  { %1246 = vmatpush1.msra.mxu0 %v7837_v39  ;;  %1216 = vmatprep.subr.mxu1 %v7838_v22  ;;  %v7855_v39 = vld [vmem:[#allocation31_spill] sm:$0xff]  ;;  %v7856_v22 = vld [vmem:[#allocation33_spill] sm:$0xff] }
 0x180   :  { %1247 = vmatprep.subr.mxu0 %v7839_v62  ;;  %1217 = vmatpush2.msra.mxu1 %v7840_v25  ;;  %v7857_v62 = vld [vmem:[#allocation35_spill] sm:$0xff]  ;;  %v7858_v25 = vld [vmem:[#allocation37_spill] sm:$0xff] }
 0x181   :  { %1248 = vmatpush1.msra.mxu0 %v7841_v55  ;;  %1218 = vmatprep.subr.mxu1 %v7842_v27  ;;  %v224_v55 = vlaneseq  ;;  %v7859_v27 = vld [vmem:[#allocation39_spill] sm:$0xff] }
 0x182   :  { %1249 = vmatprep.subr.mxu0 %v7843_v63  ;;  %1219 = vmatpush2.msra.mxu1 %v7844_v4  ;;  %v7860_v63 = vld [vmem:[#allocation41_spill] sm:$0xff]  ;;  %v7861_v4 = vld [vmem:[#allocation43_spill] sm:$0xff] }
 0x183   :  { %1250 = vmatpush1.msra.mxu0 %v7845_v41  ;;  %1220 = vmatprep.subr.mxu1 %v7846_v10  ;;  %v7862_v41 = vld [vmem:[#allocation45_spill] sm:$0xff]  ;;  %v4598_v10 = vshrl.u32 %v224_v55, 7 }
 0x184   :  { %1251 = vmatprep.subr.mxu0 %v7847_v11  ;;  %1221 = vmatpush2.msra.mxu1 %v7848_v13  ;;  %v7863_v11 = vld [vmem:[#allocation47_spill] sm:$0xff]  ;;  %v7864_v13 = vld [vmem:[#allocation49_spill] sm:$0xff] }
 0x185   :  { %1252 = vmatpush1.msra.mxu0 %v7849_v49  ;;  %1300 = vmatprep.subr.mxu1 %v7850_v18  ;;  %v7865_v49 = vld [vmem:[#allocation51_spill] sm:$0xff]  ;;  %v7866_v18 = vld [vmem:[#allocation53_spill] sm:$0xff]  ;;  %v7936_v32 = vsub.s32 2, %v4598_v10 }
 0x186   :  { %1253 = vmatprep.subr.mxu0 %v7851_v16  ;;  %v7113_v16 = vsub.s32 0, %v4598_v10  ;;  %v7870_v55 = vld [vmem:[#allocation61_spill] sm:$0xff] }
 0x187   :  { %1254 = vmatpush1.msra.mxu0 %v7852_v19  ;;  %v7867_v19 = vld [vmem:[#allocation55_spill] sm:$0xff] }
 0x188   :  { %1255 = vmatprep.subr.mxu0 %v7853_v45  ;;  %v4609_v45 = vld [vmem:[%s7013_s5] sm:$0x3f] }
 0x189   :  { %1256 = vmatpush1.msra.mxu0 %v7854_v21 }
 0x18a   :  { %1257 = vmatprep.subr.mxu0 %v7855_v39  ;;  %v7868_v39 = vld [vmem:[#allocation57_spill] sm:$0xff] }
 0x18b   :  { %1258 = vmatpush1.msra.mxu0 %v7856_v22  ;;  %v7112_v22 = vsub.s32 1, %v4598_v10 }
 0x18c   :  { %1259 = vmatprep.subr.mxu0 %v7857_v62  ;;  %v7869_v62 = vld [vmem:[#allocation59_spill] sm:$0xff] }
 0x18d   :  { %1260 = vmatpush1.msra.mxu0 %v7858_v25 }
 0x18e   :  { %1261 = vmatprep.subr.mxu0 %v7859_v27  ;;  %v4622_v27 = vrot.slane %v4609_v45, %v7113_v16 }
 0x18f   :  { %1262 = vmatpush2.msra.mxu0 %v7860_v63  ;;  %v7871_v63 = vld [vmem:[#allocation62_spill] sm:$0xff] }
 0x190   :  { %1263 = vmatprep.subr.mxu0 %v7861_v4 }
 0x191   :  { %1264 = vmatpush2.msra.mxu0 %v7862_v41  ;;  %v7872_v41 = vld [vmem:[#allocation64_spill] sm:$0xff] }
 0x192   :  { %1265 = vmatprep.subr.mxu0 %v7863_v11  ;;  %v4629_v11 = vrot.slane %v4609_v45, %v7112_v22  ;;  %v7878_v22 = vld [vmem:[#allocation70_spill] sm:$0xff] }
 0x193   :  { %1266 = vmatpush2.msra.mxu0 %v7864_v13 }
 0x194   :  { %1267 = vmatprep.subr.mxu0 %v7865_v49 }
 0x195   :  { %1268 = vmatpush2.msra.mxu0 %v7866_v18  ;;  %v7874_v18 = vld [vmem:[#allocation66_spill] sm:$0xff] }
 0x196   :  { %1269 = vmatprep.subr.mxu0 %v7867_v19 }
 0x197   :  { %v4611_v21 = vpop.f32.mrf.mxu0  ;;  %1270 = vmatpush2.msra.mxu0 %v7868_v39 }
 0x198   :  { %1271 = vmatprep.subr.mxu0 %v7869_v62  ;;  %v7876_v62 = vld [vmem:[#allocation68_spill] sm:$0xff] }
 0x199   :  { %v4616_v25 = vpop.f32.mrf.mxu0  ;;  %1272 = vmatpush2.msra.mxu0 %v7870_v55 }
 0x19a   :  { %1273 = vmatprep.subr.mxu0 %v7871_v63 }
 0x19b   :  { %v351_v4 = vpop.f32.mrf.mxu0  ;;  %1274 = vmatpush2.msra.mxu0 %v7872_v41  ;;  %v7883_v41 = vld [vmem:[#allocation76_spill] sm:$0xff] }
 0x19c   :  { %v4632_v13 = vadd.f32 %v351_v4, %v4622_v27  ;;  %v357_v49 = vpop.f32.mrf.mxu1  ;;  %1275 = vmatprep.subr.mxu0 %v7874_v18  ;;  %v7880_v18 = vld [vmem:[#allocation72_spill] sm:$0xff] }
 0x19d   :  { %v4636_v19 = vadd.f32 %v357_v49, %v4622_v27  ;;  %v353_v39 = vpop.f32.mrf.mxu0  ;;  %1276 = vmatpush2.msra.mxu0 %v7876_v62 }
 0x19e   :  { %7873 = vst [vmem:[#allocation26_spill] sm:$0xff] %v4632_v13  ;;  %v4640_v55 = vadd.f32 %v353_v39, %v4629_v11  ;;  %v359_v63 = vpop.f32.mrf.mxu1  ;;  %1277 = vmatprep.subr.mxu0 %v7878_v22  ;;  %v7881_v13 = vld [vmem:[#allocation74_spill] sm:$0xff]  ;;  %v7884_v22 = vsub.s32 2, %v4598_v10 }
 0x19f   :  { %7875 = vst [vmem:[#allocation6_spill] sm:$0xff] %v4636_v19  ;;  %v4645_v4 = vadd.f32 %v359_v63, %v4629_v11  ;;  %v4647_v16 = vpop.f32.mrf.mxu0  ;;  %1278 = vmatpush2.msra.mxu0 %v7880_v18 }
 0x1a0   :  { %7877 = vst [vmem:[#allocation28_spill] sm:$0xff] %v4640_v55  ;;  %v363_v49 = vpop.f32.mrf.mxu1  ;;  %1279 = vmatprep.subr.mxu0 %v7881_v13  ;;  %v4661_v63 = vrot.slane %v4609_v45, %v7884_v22  ;;  %v7885_v55 = vld [vmem:[#allocation78_spill] sm:$0xff]  ;;  %v7887_v13 = vld [vmem:[#allocation80_spill] sm:$0xff] }
 0x1a1   :  { %7879 = vst [vmem:[#allocation7_spill] sm:$0xff] %v4645_v4  ;;  %v4653_v39 = vadd.f32 %v363_v49, %v4622_v27  ;;  %v4655_v62 = vpop.f32.mrf.mxu0  ;;  %1280 = vmatpush2.msra.mxu0 %v7883_v41  ;;  %v7888_v49 = vsub.s32 3, %v4598_v10  ;;  %v7890_v22 = vld [vmem:[#allocation82_spill] sm:$0xff] }
 0x1a2   :  { %v365_v4 = vpop.f32.mrf.mxu1  ;;  %1281 = vmatprep.subr.mxu0 %v7885_v55 }
 0x1a3   :  { %7882 = vst [vmem:[#allocation30_spill] sm:$0xff] %v4653_v39  ;;  %v4665_v18 = vadd.f32 %v365_v4, %v4629_v11  ;;  %v464_v19 = vpop.f32.mrf.mxu0  ;;  %1282 = vmatpush2.msra.mxu0 %v7887_v13  ;;  %v4671_v39 = vrot.slane %v4609_v45, %v7888_v49  ;;  %v7892_v4 = vld [vmem:[#allocation84_spill] sm:$0xff] }
 0x1a4   :  { %v369_v41 = vpop.f32.mrf.mxu1  ;;  %v4674_v52 = vadd.f32 %v464_v19, %v4661_v63  ;;  %1283 = vmatprep.subr.mxu0 %v7890_v22 }
 0x1a5   :  { %7886 = vst [vmem:[#allocation8_spill] sm:$0xff] %v4665_v18  ;;  %v4678_v36 = vadd.f32 %v369_v41, %v4622_v27  ;;  %v466_v55 = vpop.f32.mrf.mxu0  ;;  %1284 = vmatpush2.msra.mxu0 %v7892_v4  ;;  %v7901_v4 = vld [vmem:[#allocation95_spill] sm:$0xff] }
 0x1a6   :  { %7889 = vst [vmem:[#allocation32_spill] sm:$0xff] %v4674_v52  ;;  %v371_v18 = vpop.f32.mrf.mxu1  ;;  %v4682_v13 = vadd.f32 %v466_v55, %v4671_v39  ;;  %1285 = vmatprep.subr.mxu0 %v7894_v42  ;;  %v7897_v52 = vld [vmem:[#allocation90_spill] sm:$0xff] }
 0x1a7   :  { %7891 = vst [vmem:[#allocation9_spill] sm:$0xff] %v4678_v36  ;;  %v4686_v49 = vadd.f32 %v371_v18, %v4629_v11  ;;  %1286 = vmatpush2.msra.mxu0 %v7896_v40 }
 0x1a8   :  { %7893 = vst [vmem:[#allocation34_spill] sm:$0xff] %v4682_v13  ;;  %v375_v19 = vpop.f32.mrf.mxu1  ;;  %1287 = vmatprep.subr.mxu0 %v7897_v52 }
 0x1a9   :  { %7895 = vst [vmem:[#allocation10_spill] sm:$0xff] %v4686_v49  ;;  %v4691_v41 = vadd.f32 %v375_v19, %v4622_v27  ;;  %1288 = vmatpush2.msra.mxu0 %v4326_v35 }
 0x1aa   :  { %v377_v22 = vpop.f32.mrf.mxu1  ;;  %1289 = vmatprep.subr.mxu0 %v4332_v33 }
 0x1ab   :  { %7898 = vst [vmem:[#allocation36_spill] sm:$0xff] %v4691_v41  ;;  %v4696_v55 = vadd.f32 %v377_v22, %v4629_v11  ;;  %v470_v42 = vpop.f32.mrf.mxu0  ;;  %1290 = vmatpush2.msra.mxu0 %v4338_v6  ;;  %v4710_v22 = vld [vmem:[#allocation3 + $0x2d8] sm:$0xff] }
 0x1ac   :  { %v381_v18 = vpop.f32.mrf.mxu1  ;;  %v4700_v40 = vadd.f32 %v470_v42, %v4661_v63  ;;  %1291 = vmatprep.subr.mxu0 %v7901_v4  ;;  %7904 = vst [vmem:[#allocation13_spill] sm:$0xff] %v4710_v22 }
 0x1ad   :  { %7899 = vst [vmem:[#allocation11_spill] sm:$0xff] %v4696_v55  ;;  %v4704_v52 = vadd.f32 %v381_v18, %v4622_v27  ;;  %v472_v19 = vpop.f32.mrf.mxu0  ;;  %1292 = vmatpush2.msra.mxu0 %v4350_v56 }
 0x1ae   :  { %7900 = vst [vmem:[#allocation38_spill] sm:$0xff] %v4700_v40  ;;  %v383_v35 = vpop.f32.mrf.mxu1  ;;  %v4708_v33 = vadd.f32 %v472_v19, %v4671_v39  ;;  %1420 = vmatprep.subr.mxu0 %v4710_v22 }
 0x1af   :  { %7902 = vst [vmem:[#allocation12_spill] sm:$0xff] %v4704_v52  ;;  %v4714_v6 = vadd.f32 %v383_v35, %v4629_v11  ;;  %v7118_v35 = vsub.s32 4, %v4598_v10 }
 0x1b0   :  { %7903 = vst [vmem:[#allocation40_spill] sm:$0xff] %v4708_v33  ;;  %v387_v42 = vpop.f32.mrf.mxu1 }
 0x1b1   :  { %7905 = vst [vmem:[#allocation42_spill] sm:$0xff] %v4714_v6  ;;  %v4717_v4 = vadd.f32 %v387_v42, %v4622_v27 }
 0x1b2   :  { %v389_v18 = vpop.f32.mrf.mxu1 }
 0x1b3   :  { %7906 = vst [vmem:[#allocation14_spill] sm:$0xff] %v4717_v4  ;;  %v4720_v52 = vadd.f32 %v389_v18, %v4629_v11  ;;  %v476_v56 = vpop.f32.mrf.mxu0  ;;  %v7119_v4 = vsub.s32 5, %v4598_v10 }
 0x1b4   :  { %v4723_v55 = vadd.f32 %v476_v56, %v4661_v63  ;;  %v4740_v56 = vrot.slane %v4609_v45, %v7118_v35 }
 0x1b5   :  { %7907 = vst [vmem:[#allocation44_spill] sm:$0xff] %v4720_v52  ;;  %v478_v19 = vpop.f32.mrf.mxu0 }
 0x1b6   :  { %7908 = vst [vmem:[#allocation15_spill] sm:$0xff] %v4723_v55  ;;  %v4726_v41 = vadd.f32 %v478_v19, %v4671_v39  ;;  %v4728_v49 = vpop.f32.mrf.mxu1 }
 0x1b8   :  { %7909 = vst [vmem:[#allocation46_spill] sm:$0xff] %v4726_v41  ;;  %v4731_v6 = vpop.f32.mrf.mxu1  ;;  %v4748_v41 = vrot.slane %v4609_v45, %v7119_v4 }
 0x1b9   :  { %v482_v42 = vpop.f32.mrf.mxu0 }
 0x1ba   :  { %v4735_v18 = vadd.f32 %v482_v42, %v4661_v63 }
 0x1bb   :  { %v484_v52 = vpop.f32.mrf.mxu0 }
 0x1bc   :  { %7910 = vst [vmem:[#allocation16_spill] sm:$0xff] %v4735_v18  ;;  %v4743_v19 = vadd.f32 %v484_v52, %v4671_v39  ;;  %v577_v36 = vpop.f32.mrf.mxu1 }
 0x1bd   :  { %v4751_v55 = vadd.f32 %v577_v36, %v4740_v56 }
 0x1be   :  { %7911 = vst [vmem:[#allocation48_spill] sm:$0xff] %v4743_v19  ;;  %v579_v42 = vpop.f32.mrf.mxu1 }
 0x1bf   :  { %7912 = vst [vmem:[#allocation17_spill] sm:$0xff] %v4751_v55  ;;  %v488_v18 = vpop.f32.mrf.mxu0  ;;  %v4754_v33 = vadd.f32 %v579_v42, %v4748_v41 }
 0x1c0   :  { %v4757_v35 = vadd.f32 %v488_v18, %v4661_v63 }
 0x1c1   :  { %7913 = vst [vmem:[#allocation50_spill] sm:$0xff] %v4754_v33  ;;  %v490_v40 = vpop.f32.mrf.mxu0 }
 0x1c2   :  { %7914 = vst [vmem:[#allocation18_spill] sm:$0xff] %v4757_v35  ;;  %v4760_v52 = vadd.f32 %v490_v40, %v4671_v39  ;;  %v583_v19 = vpop.f32.mrf.mxu1 }
 0x1c3   :  { %v4763_v13 = vadd.f32 %v583_v19, %v4740_v56 }
 0x1c4   :  { %7915 = vst [vmem:[#allocation52_spill] sm:$0xff] %v4760_v52  ;;  %v585_v45 = vpop.f32.mrf.mxu1 }
 0x1c5   :  { %7916 = vst [vmem:[#allocation19_spill] sm:$0xff] %v4763_v13  ;;  %v494_v4 = vpop.f32.mrf.mxu0  ;;  %v4766_v36 = vadd.f32 %v585_v45, %v4748_v41 }
 0x1c6   :  { %v4769_v55 = vadd.f32 %v494_v4, %v4661_v63 }
 0x1c7   :  { %7917 = vst [vmem:[#allocation54_spill] sm:$0xff] %v4766_v36  ;;  %v496_v42 = vpop.f32.mrf.mxu0 }
 0x1c8   :  { %7918 = vst [vmem:[#allocation20_spill] sm:$0xff] %v4769_v55  ;;  %v4772_v18 = vadd.f32 %v496_v42, %v4671_v39  ;;  %v589_v35 = vpop.f32.mrf.mxu1 }
 0x1c9   :  { %v4775_v40 = vadd.f32 %v589_v35, %v4740_v56 }
 0x1ca   :  { %7919 = vst [vmem:[#allocation56_spill] sm:$0xff] %v4772_v18  ;;  %v591_v52 = vpop.f32.mrf.mxu1 }
 0x1cb   :  { %7920 = vst [vmem:[#allocation21_spill] sm:$0xff] %v4775_v40  ;;  %v500_v33 = vpop.f32.mrf.mxu0  ;;  %v4778_v19 = vadd.f32 %v591_v52, %v4748_v41 }
 0x1cc   :  { %v4781_v13 = vadd.f32 %v500_v33, %v4661_v63 }
 0x1cd   :  { %7921 = vst [vmem:[#allocation58_spill] sm:$0xff] %v4778_v19  ;;  %v502_v45 = vpop.f32.mrf.mxu0 }
 0x1ce   :  { %7922 = vst [vmem:[#allocation22_spill] sm:$0xff] %v4781_v13  ;;  %v4784_v4 = vadd.f32 %v502_v45, %v4671_v39  ;;  %v595_v55 = vpop.f32.mrf.mxu1 }
 0x1cf   :  { %v4787_v42 = vadd.f32 %v595_v55, %v4740_v56 }
 0x1d0   :  { %7923 = vst [vmem:[#allocation60_spill] sm:$0xff] %v4784_v4  ;;  %v597_v18 = vpop.f32.mrf.mxu1 }
 0x1d1   :  { %7924 = vst [vmem:[#allocation23_spill] sm:$0xff] %v4787_v42  ;;  %v4790_v35 = vadd.f32 %v597_v18, %v4748_v41 }
 0x1d3   :  { %7925 = vst [vmem:[#allocation63_spill] sm:$0xff] %v4790_v35  ;;  %v601_v40 = vpop.f32.mrf.mxu1 }
 0x1d4   :  { %v4793_v36 = vadd.f32 %v601_v40, %v4740_v56 }
 0x1d5   :  { %v603_v52 = vpop.f32.mrf.mxu1 }
 0x1d6   :  { %7926 = vst [vmem:[#allocation24_spill] sm:$0xff] %v4793_v36  ;;  %v4796_v33 = vadd.f32 %v603_v52, %v4748_v41  ;;  %v858_v52 = vld [vmem:[%s7014_s6] sm:$0x3f] }
 0x1d8   :  { %7927 = vst [vmem:[#allocation25_spill] sm:$0xff] %v4796_v33  ;;  %v607_v13 = vpop.f32.mrf.mxu1 }
 0x1d9   :  { %v4799_v45 = vadd.f32 %v607_v13, %v4740_v56  ;;  %v7932_v13 = vsub.s32 0, %v4598_v10 }
 0x1da   :  { %v609_v4 = vpop.f32.mrf.mxu1 }
 0x1db   :  { %7928 = vst [vmem:[#allocation27_spill] sm:$0xff] %v4799_v45  ;;  %v4802_v55 = vadd.f32 %v609_v4, %v4748_v41  ;;  %v4815_v45 = vrot.slane %v858_v52, %v7932_v13  ;;  %v7934_v4 = vsub.s32 1, %v4598_v10 }
 0x1dd   :  { %7929 = vst [vmem:[#allocation29_spill] sm:$0xff] %v4802_v55  ;;  %v613_v42 = vpop.f32.mrf.mxu1  ;;  %7933 = vst [vmem:[#allocation35_spill] sm:$0xff] %v4815_v45  ;;  %v4819_v55 = vrot.slane %v858_v52, %v7934_v4  ;;  %v4829_v4 = vrot.slane %v858_v52, %v7936_v32 }
 0x1de   :  { %v4805_v18 = vadd.f32 %v613_v42, %v4740_v56 }
 0x1df   :  { %v615_v35 = vpop.f32.mrf.mxu1  ;;  %7935 = vst [vmem:[#allocation37_spill] sm:$0xff] %v4819_v55 }
 0x1e0   :  { %7930 = vst [vmem:[#allocation31_spill] sm:$0xff] %v4805_v18  ;;  %v4808_v40 = vadd.f32 %v615_v35, %v4748_v41  ;;  %v346_v35 = vadd.f32 %v4611_v21, %v4622_v27  ;;  %v348_v18 = vadd.f32 %v4616_v25, %v4629_v11  ;;  %v459_v11 = vadd.f32 %v4647_v16, %v4661_v63 }
 0x1e2   :  { %7931 = vst [vmem:[#allocation33_spill] sm:$0xff] %v4808_v40 }
 0x1ed   :  { %v962_v33 = vpop.f32.mrf.mxu0 }
 0x1ee   :  { %v963_v42 = vadd.f32 %v962_v33, %v4815_v45  ;;  %v7937_v33 = vsub.s32 3, %v4598_v10 }
 0x1ef   :  { %v964_v36 = vpop.f32.mrf.mxu0 }
 0x1f0   :  { %v965_v40 = vadd.f32 %v964_v36, %v4819_v55  ;;  %v1109_v19 = vadd.f32 %v963_v42, %v346_v35  ;;  %v4833_v45 = vrot.slane %v858_v52, %v7937_v33 }
 0x1f2   :  { %v1110_v22 = vadd.f32 %v965_v40, %v348_v18  ;;  %v3026_v37 = vmul.f32 -1.442695, %v1109_v19 }
 0x1f4   :  { %v3027_v34 = vmul.f32 -1.442695, %v1110_v22  ;;  %3093 = vpow2.f32 %v3026_v37  ;;  %v461_v22 = vadd.f32 %v4655_v62, %v4671_v39  ;;  %v7939_v39 = vsub.s32 5, %v4598_v10 }
 0x1f6   :  { %3095 = vpow2.f32 %v3027_v34  ;;  %v4847_v62 = vrot.slane %v858_v52, %v7939_v39 }
 0x201   :  { %v3094_v18 = vpop.eup %3093 }
 0x202   :  { %v1033_v13 = vpop.f32.mrf.mxu1  ;;  %v1117_v42 = vadd.f32 1.0, %v3094_v18 }
 0x203   :  { %v1034_v27 = vadd.f32 %v1033_v13, %v4829_v4  ;;  %v3096_v40 = vpop.eup %3095  ;;  %v7938_v13 = vsub.s32 4, %v4598_v10  ;;  %v574_v10 = vadd.f32 %v4731_v6, %v4748_v41  ;;  %v7940_v41 = vld [vmem:[#allocation65_spill] sm:$0xff]  ;;  %v7941_v6 = vld [vmem:[#allocation67_spill] sm:$0xff] }
 0x204   :  { %v1035_v21 = vpop.f32.mrf.mxu1  ;;  %v1118_v34 = vadd.f32 1.0, %v3096_v40 }
 0x205   :  { %v1036_v25 = vadd.f32 %v1035_v21, %v4833_v45  ;;  %v1123_v36 = vadd.f32 %v1034_v27, %v459_v11  ;;  %v4843_v33 = vrot.slane %v858_v52, %v7938_v13 }
 0x207   :  { %v1124_v32 = vadd.f32 %v1036_v25, %v461_v22  ;;  %v3028_v19 = vmul.f32 -1.442695, %v1123_v36  ;;  %v572_v36 = vadd.f32 %v4728_v49, %v4740_v56 }
 0x209   :  { %v3029_v37 = vmul.f32 -1.442695, %v1124_v32  ;;  %3097 = vpow2.f32 %v3028_v19 }
 0x20b   :  { %3099 = vpow2.f32 %v3029_v37 }
 0x20c   :  { %3101 = vrcp.f32 %v1117_v42 }
 0x20d   :  { %3103 = vrcp.f32 %v1118_v34 }
 0x216   :  { %v3098_v35 = vpop.eup %3097 }
 0x217   :  { %v1131_v63 = vadd.f32 1.0, %v3098_v35 }
 0x218   :  { %v3100_v16 = vpop.eup %3099 }
 0x219   :  { %v1132_v27 = vadd.f32 1.0, %v3100_v16  ;;  %v3102_v11 = vpop.eup %3101  ;;  %3105 = vrcp.f32 %v1131_v63 }
 0x21a   :  { %v3104_v37 = vpop.eup %3103 }
 0x21b   :  { %3107 = vrcp.f32 %v1132_v27  ;;  %v4866_v27 = vld [vmem:[#allocation3 + $0x2d0] sm:$0xff] }
 0x226   :  { %v3106_v42 = vpop.eup %3105 }
 0x227   :  { %v1143_v13 = vsub.f32 1.0, %v3106_v42 }
 0x228   :  { %v3108_v34 = vpop.eup %3107 }
 0x229   :  { %v1144_v16 = vsub.f32 1.0, %v3108_v34 }
 0x22e   :  { %v1104_v21 = vpop.f32.mrf.mxu0 }
 0x22f   :  { %v1105_v25 = vadd.f32 %v1104_v21, %v4843_v33  ;;  %v1148_v21 = vmul.f32 0.0, %v3108_v34  ;;  %v7947_v34 = vld [vmem:[#allocation79_spill] sm:$0xff] }
 0x230   :  { %v1106_v22 = vpop.f32.mrf.mxu0 }
 0x231   :  { %v1137_v32 = vmul.f32 %v3102_v11, %v1105_v25  ;;  %v1107_v19 = vadd.f32 %v1106_v22, %v4847_v62  ;;  %v1147_v25 = vmul.f32 0.0, %v3106_v42  ;;  %v7942_v22 = vld [vmem:[#allocation69_spill] sm:$0xff]  ;;  %v4886_v42 = vld [vmem:[#allocation3 + $0x248] sm:$0xff] }
 0x233   :  { %v1139_v52 = vadd.f32 %v1137_v32, %v572_v36  ;;  %v1138_v18 = vmul.f32 %v3104_v37, %v1107_v19  ;;  %v4870_v36 = vld [vmem:[#allocation3 + $0x2a8] sm:$0xff]  ;;  %v4874_v19 = vld [vmem:[#allocation3 + $0x2a0] sm:$0xff]  ;;  %v7944_v37 = vld [vmem:[#allocation73_spill] sm:$0xff] }
 0x234   :  { %v7943_v32 = vld [vmem:[#allocation71_spill] sm:$0xff] }
 0x235   :  { %3109 = vtanh.f32 %v1139_v52  ;;  %v1140_v40 = vadd.f32 %v1138_v18, %v574_v10  ;;  %v4878_v10 = vld [vmem:[#allocation3 + $0x278] sm:$0xff]  ;;  %v7945_v52 = vld [vmem:[#allocation75_spill] sm:$0xff]  ;;  %v4882_v18 = vld [vmem:[#allocation3 + $0x270] sm:$0xff] }
 0x237   :  { %3111 = vtanh.f32 %v1140_v40  ;;  %v7946_v40 = vld [vmem:[#allocation77_spill] sm:$0xff] }
 0x242   :  { %v3110_v35 = vpop.eup %3109 }
 0x243   :  { %v1145_v56 = vmul.f32 %v3110_v35, %v1143_v13  ;;  %v4890_v35 = vld [vmem:[#allocation3 + $0x240] sm:$0xff]  ;;  %v7948_v13 = vld [vmem:[#allocation81_spill] sm:$0xff] }
 0x244   :  { %v3112_v49 = vpop.eup %3111 }
 0x245   :  { %v1146_v39 = vmul.f32 %v3112_v49, %v1144_v16  ;;  %v4857_v11 = vadd.f32 %v1147_v25, %v1145_v56  ;;  %v4894_v16 = vld [vmem:[#allocation3 + $0x218] sm:$0xff]  ;;  %v7949_v49 = vld [vmem:[#allocation83_spill] sm:$0xff]  ;;  %v4898_v56 = vld [vmem:[#allocation3 + $0x210] sm:$0xff] }
 0x246   :  { %v7951_v25 = vld [vmem:[#allocation87_spill] sm:$0xff] }
 0x247   :  { %v4855_v63 = vadd.f32 %v1148_v21, %v1146_v39  ;;  %v7950_v39 = vld [vmem:[#allocation85_spill] sm:$0xff]  ;;  %v4902_v21 = vld [vmem:[#allocation3 + $0x1e8] sm:$0xff] }
 0x249   :  { %1222 = vmatprep.mubr.f32.mxu1 %v4855_v63  ;;  %1293 = vmatprep.mubr.f32.mxu0 %v4855_v63 }
 0x24a   :  { %1223 = vmatmul.mubr.f32.vlgmr.msra.gmra.mxu1 %v4857_v11  ;;  %1294 = vmatmul.mubr.f32.vlgmr.msra.gmra.mxu0 %v4857_v11 }
 0x24b   :  { %1301 = vmatpush1.msra.mxu1 %v7940_v41  ;;  %1364 = vmatprep.mubr.f32.mxu1 %v4855_v63  ;;  %v4906_v41 = vld [vmem:[#allocation3 + $0x1e0] sm:$0xff] }
 0x24c   :  { %1302 = vmatprep.subr.mxu1 %v7941_v6  ;;  %1421 = vmatpush1.msra.mxu0 %v4866_v27  ;;  %v7952_v6 = vld [vmem:[#allocation89_spill] sm:$0xff] }
 0x24d   :  { %1303 = vmatpush1.msra.mxu1 %v7942_v22  ;;  %1422 = vmatprep.subr.mxu0 %v4870_v36  ;;  %v4910_v22 = vld [vmem:[#allocation3 + $0x1b8] sm:$0xff] }
 0x24e   :  { %1304 = vmatprep.subr.mxu1 %v7943_v32  ;;  %1423 = vmatpush1.msra.mxu0 %v4874_v19  ;;  %v7953_v32 = vld [vmem:[#allocation91_spill] sm:$0xff] }
 0x24f   :  { %1305 = vmatpush1.msra.mxu1 %v7944_v37  ;;  %1424 = vmatprep.subr.mxu0 %v4878_v10  ;;  %v4914_v37 = vld [vmem:[#allocation3 + $0x1b0] sm:$0xff] }
 0x250   :  { %1306 = vmatprep.subr.mxu1 %v7945_v52  ;;  %1425 = vmatpush1.msra.mxu0 %v4882_v18  ;;  %v7954_v52 = vld [vmem:[#allocation92_spill] sm:$0xff] }
 0x251   :  { %1307 = vmatpush1.msra.mxu1 %v7946_v40  ;;  %1426 = vmatprep.subr.mxu0 %v4886_v42  ;;  %v4918_v40 = vld [vmem:[#allocation3 + $0x188] sm:$0xff] }
 0x252   :  { %1308 = vmatprep.subr.mxu1 %v7947_v34  ;;  %1427 = vmatpush1.msra.mxu0 %v4890_v35  ;;  %v7955_v34 = vld [vmem:[#allocation93_spill] sm:$0xff] }
 0x253   :  { %1309 = vmatpush1.msra.mxu1 %v7948_v13  ;;  %1428 = vmatprep.subr.mxu0 %v4894_v16  ;;  %v4922_v13 = vld [vmem:[#allocation3 + $0x180] sm:$0xff] }
 0x254   :  { %1310 = vmatprep.subr.mxu1 %v7949_v49  ;;  %1429 = vmatpush1.msra.mxu0 %v4898_v56  ;;  %7956 = vst [vmem:[#allocation39_spill] sm:$0xff] %v4922_v13  ;;  %v7957_v49 = vld [vmem:[#allocation94_spill] sm:$0xff] }
 0x255   :  { %1311 = vmatpush1.msra.mxu1 %v7950_v39  ;;  %1430 = vmatprep.subr.mxu0 %v4902_v21  ;;  %v4926_v39 = vld [vmem:[#allocation3 + $0x158] sm:$0xff] }
 0x256   :  { %1312 = vmatprep.subr.mxu1 %v7951_v25  ;;  %1431 = vmatpush1.msra.mxu0 %v4906_v41  ;;  %7958 = vst [vmem:[#allocation41_spill] sm:$0xff] %v4926_v39  ;;  %v7959_v25 = vld [vmem:[#allocation96_spill] sm:$0xff] }
 0x257   :  { %1313 = vmatpush1.msra.mxu1 %v7952_v6  ;;  %1432 = vmatprep.subr.mxu0 %v4910_v22  ;;  %v4930_v6 = vld [vmem:[#allocation3 + $0x150] sm:$0xff] }
 0x258   :  { %1314 = vmatprep.subr.mxu1 %v7953_v32  ;;  %1433 = vmatpush1.msra.mxu0 %v4914_v37  ;;  %v7960_v32 = vld [vmem:[#allocation97_spill] sm:$0xff] }
 0x259   :  { %1315 = vmatpush1.msra.mxu1 %v7954_v52  ;;  %1434 = vmatprep.subr.mxu0 %v4918_v40  ;;  %v4934_v52 = vld [vmem:[#allocation3 + $0x128] sm:$0xff] }
 0x25a   :  { %1316 = vmatprep.subr.mxu1 %v7955_v34  ;;  %1435 = vmatpush1.msra.mxu0 %v4922_v13  ;;  %v7961_v34 = vld [vmem:[#allocation98_spill] sm:$0xff] }
 0x25b   :  { %1317 = vmatpush1.msra.mxu1 %v7957_v49  ;;  %1436 = vmatprep.subr.mxu0 %v4926_v39  ;;  %v4938_v13 = vld [vmem:[#allocation3 + $0x120] sm:$0xff]  ;;  %v7962_v49 = vld [vmem:[#allocation99_spill] sm:$0xff]  ;;  %v4942_v39 = vld [vmem:[#allocation3 + $0xf8] sm:$0xff] }
 0x25c   :  { %1318 = vmatprep.subr.mxu1 %v7959_v25  ;;  %1437 = vmatpush1.msra.mxu0 %v4930_v6  ;;  %v4946_v25 = vld [vmem:[#allocation3 + $0xf0] sm:$0xff] }
 0x25d   :  { %1319 = vmatpush1.msra.mxu1 %v7960_v32  ;;  %1438 = vmatprep.subr.mxu0 %v4934_v52  ;;  %v4950_v32 = vld [vmem:[#allocation3 + $0xc8] sm:$0xff] }
 0x25e   :  { %1320 = vmatprep.subr.mxu1 %v7961_v34  ;;  %1439 = vmatpush1.msra.mxu0 %v4938_v13  ;;  %v4954_v34 = vld [vmem:[#allocation3 + $0xc0] sm:$0xff] }
 0x25f   :  { %1321 = vmatpush1.msra.mxu1 %v7962_v49  ;;  %1440 = vmatprep.subr.mxu0 %v4942_v39  ;;  %v4958_v49 = vld [vmem:[#allocation3 + $0x98] sm:$0xff] }
 0x260   :  { %1322 = vmatprep.subr.mxu1 %v4366_v30  ;;  %1441 = vmatpush1.msra.mxu0 %v4946_v25  ;;  %v4962_v30 = vld [vmem:[#allocation3 + $0x90] sm:$0xff] }
 0x261   :  { %1323 = vmatpush1.msra.mxu1 %v4370_v38  ;;  %1442 = vmatprep.subr.mxu0 %v4950_v32  ;;  %v4966_v38 = vld [vmem:[#allocation3 + $0x68] sm:$0xff] }
 0x262   :  { %1324 = vmatprep.subr.mxu1 %v4373_v0  ;;  %1443 = vmatpush1.msra.mxu0 %v4954_v34  ;;  %v4970_v0 = vld [vmem:[#allocation3 + $0x60] sm:$0xff] }
 0x263   :  { %1325 = vmatpush1.msra.mxu1 %v4377_v29  ;;  %1444 = vmatprep.subr.mxu0 %v4958_v49  ;;  %7963 = vst [vmem:[#allocation43_spill] sm:$0xff] %v4970_v0  ;;  %v4974_v29 = vld [vmem:[#allocation3 + $0x38] sm:$0xff] }
 0x264   :  { %1326 = vmatprep.subr.mxu1 %v4381_v57  ;;  %1445 = vmatpush1.msra.mxu0 %v4962_v30  ;;  %7964 = vst [vmem:[#allocation45_spill] sm:$0xff] %v4974_v29  ;;  %v4978_v57 = vld [vmem:[#allocation3 + $0x30] sm:$0xff] }
 0x265   :  { %1327 = vmatpush1.msra.mxu1 %v4385_v48  ;;  %1446 = vmatprep.subr.mxu0 %v4966_v38  ;;  %7965 = vst [vmem:[#allocation47_spill] sm:$0xff] %v4978_v57  ;;  %v4982_v48 = vld [vmem:[#allocation3 + $0x8] sm:$0xff] }
 0x266   :  { %1328 = vmatprep.subr.mxu1 %v4389_v7  ;;  %1447 = vmatpush1.msra.mxu0 %v4970_v0  ;;  %7966 = vst [vmem:[#allocation49_spill] sm:$0xff] %v4982_v48  ;;  %v4986_v7 = vld [vmem:[#allocation3] sm:$0xff] }
 0x267   :  { %1329 = vmatpush1.msra.mxu1 %v4393_v43  ;;  %1448 = vmatprep.subr.mxu0 %v4974_v29  ;;  %7967 = vst [vmem:[#allocation51_spill] sm:$0xff] %v4986_v7  ;;  %v4990_v43 = vld [vmem:[#allocation3 + $0x5d8] sm:$0xff] }
 0x268   :  { %1330 = vmatprep.subr.mxu1 %v4397_v44  ;;  %1449 = vmatpush1.msra.mxu0 %v4978_v57  ;;  %7968 = vst [vmem:[#allocation53_spill] sm:$0xff] %v4990_v43  ;;  %v4994_v44 = vld [vmem:[#allocation3 + $0x5d0] sm:$0xff] }
 0x269   :  { %1331 = vmatpush1.msra.mxu1 %v4401_v46  ;;  %1450 = vmatprep.subr.mxu0 %v4982_v48  ;;  %7969 = vst [vmem:[#allocation55_spill] sm:$0xff] %v4994_v44  ;;  %v4998_v46 = vld [vmem:[#allocation3 + $0x5a8] sm:$0xff] }
 0x26a   :  { %1332 = vmatprep.subr.mxu1 %v4405_v47  ;;  %1451 = vmatpush1.msra.mxu0 %v4986_v7  ;;  %7970 = vst [vmem:[#allocation57_spill] sm:$0xff] %v4998_v46  ;;  %v5002_v47 = vld [vmem:[#allocation3 + $0x5a0] sm:$0xff] }
 0x26b   :  { %1333 = vmatpush2.msra.mxu1 %v4409_v50  ;;  %1452 = vmatprep.subr.mxu0 %v4990_v43  ;;  %7971 = vst [vmem:[#allocation59_spill] sm:$0xff] %v5002_v47  ;;  %v5006_v50 = vld [vmem:[#allocation3 + $0x578] sm:$0xff] }
 0x26c   :  { %1334 = vmatprep.subr.mxu1 %v4413_v51  ;;  %1453 = vmatpush2.msra.mxu0 %v4994_v44  ;;  %7972 = vst [vmem:[#allocation61_spill] sm:$0xff] %v5006_v50  ;;  %v5010_v51 = vld [vmem:[#allocation3 + $0x570] sm:$0xff] }
 0x26d   :  { %1335 = vmatpush2.msra.mxu1 %v4417_v53  ;;  %1454 = vmatprep.subr.mxu0 %v4998_v46  ;;  %7973 = vst [vmem:[#allocation62_spill] sm:$0xff] %v5010_v51  ;;  %v5014_v53 = vld [vmem:[#allocation3 + $0x548] sm:$0xff] }
 0x26e   :  { %1336 = vmatprep.subr.mxu1 %v4421_v54  ;;  %1455 = vmatpush2.msra.mxu0 %v5002_v47  ;;  %7974 = vst [vmem:[#allocation64_spill] sm:$0xff] %v5014_v53  ;;  %v5018_v54 = vld [vmem:[#allocation3 + $0x540] sm:$0xff] }
 0x26f   :  { %1337 = vmatpush2.msra.mxu1 %v4425_v58  ;;  %1456 = vmatprep.subr.mxu0 %v5006_v50  ;;  %7975 = vst [vmem:[#allocation66_spill] sm:$0xff] %v5018_v54  ;;  %v5022_v58 = vld [vmem:[#allocation3 + $0x518] sm:$0xff] }
 0x270   :  { %1338 = vmatprep.subr.mxu1 %v4429_v59  ;;  %1457 = vmatpush2.msra.mxu0 %v5010_v51  ;;  %7976 = vst [vmem:[#allocation68_spill] sm:$0xff] %v5022_v58  ;;  %v5026_v59 = vld [vmem:[#allocation3 + $0x510] sm:$0xff] }
 0x271   :  { %1339 = vmatpush2.msra.mxu1 %v4433_v60  ;;  %1458 = vmatprep.subr.mxu0 %v5014_v53  ;;  %7977 = vst [vmem:[#allocation70_spill] sm:$0xff] %v5026_v59  ;;  %v5030_v60 = vld [vmem:[#allocation3 + $0x4e8] sm:$0xff] }
 0x272   :  { %1340 = vmatprep.subr.mxu1 %v4437_v61  ;;  %1459 = vmatpush2.msra.mxu0 %v5018_v54  ;;  %7978 = vst [vmem:[#allocation72_spill] sm:$0xff] %v5030_v60  ;;  %v5034_v61 = vld [vmem:[#allocation3 + $0x4e0] sm:$0xff] }
 0x273   :  { %1341 = vmatpush2.msra.mxu1 %v4441_v1  ;;  %1460 = vmatprep.subr.mxu0 %v5022_v58  ;;  %7979 = vst [vmem:[#allocation74_spill] sm:$0xff] %v5034_v61  ;;  %v5038_v1 = vld [vmem:[#allocation3 + $0x4b8] sm:$0xff] }
 0x274   :  { %1342 = vmatprep.subr.mxu1 %v4445_v2  ;;  %1461 = vmatpush2.msra.mxu0 %v5026_v59  ;;  %7980 = vst [vmem:[#allocation76_spill] sm:$0xff] %v5038_v1  ;;  %v5042_v2 = vld [vmem:[#allocation3 + $0x4b0] sm:$0xff] }
 0x275   :  { %1343 = vmatpush2.msra.mxu1 %v4449_v3  ;;  %1462 = vmatprep.subr.mxu0 %v5030_v60  ;;  %7981 = vst [vmem:[#allocation78_spill] sm:$0xff] %v5042_v2  ;;  %v5046_v3 = vld [vmem:[#allocation3 + $0x488] sm:$0xff]  ;;  %v8077_v60 = vld [vmem:[#allocation34_spill] sm:$0xff] }
 0x276   :  { %1344 = vmatprep.subr.mxu1 %v4453_v5  ;;  %1463 = vmatpush2.msra.mxu0 %v5034_v61  ;;  %7982 = vst [vmem:[#allocation80_spill] sm:$0xff] %v5046_v3  ;;  %v5050_v5 = vld [vmem:[#allocation3 + $0x480] sm:$0xff] }
 0x277   :  { %1345 = vmatpush2.msra.mxu1 %v4457_v8  ;;  %1464 = vmatprep.subr.mxu0 %v5038_v1  ;;  %7983 = vst [vmem:[#allocation82_spill] sm:$0xff] %v5050_v5  ;;  %v5054_v8 = vld [vmem:[#allocation3 + $0x458] sm:$0xff] }
 0x278   :  { %1346 = vmatprep.subr.mxu1 %v4461_v9  ;;  %1465 = vmatpush2.msra.mxu0 %v5042_v2  ;;  %7984 = vst [vmem:[#allocation84_spill] sm:$0xff] %v5054_v8  ;;  %v5058_v9 = vld [vmem:[#allocation3 + $0x450] sm:$0xff] }
 0x279   :  { %1347 = vmatpush2.msra.mxu1 %v4465_v12  ;;  %1466 = vmatprep.subr.mxu0 %v5046_v3  ;;  %7985 = vst [vmem:[#allocation86_spill] sm:$0xff] %v5058_v9  ;;  %v5062_v12 = vld [vmem:[#allocation3 + $0x428] sm:$0xff] }
 0x27a   :  { %1348 = vmatprep.subr.mxu1 %v4469_v14  ;;  %1467 = vmatpush2.msra.mxu0 %v5050_v5  ;;  %7986 = vst [vmem:[#allocation88_spill] sm:$0xff] %v5062_v12  ;;  %v5066_v14 = vld [vmem:[#allocation3 + $0x420] sm:$0xff] }
 0x27b   :  { %1349 = vmatpush2.msra.mxu1 %v4473_v15  ;;  %1468 = vmatprep.subr.mxu0 %v5054_v8  ;;  %7987 = vst [vmem:[#allocation90_spill] sm:$0xff] %v5066_v14  ;;  %v5070_v15 = vld [vmem:[#allocation3 + $0x3f8] sm:$0xff]  ;;  %v8075_v8 = vld [vmem:[#allocation28_spill] sm:$0xff] }
 0x27c   :  { %1350 = vmatprep.subr.mxu1 %v4477_v17  ;;  %1469 = vmatpush2.msra.mxu0 %v5058_v9  ;;  %7988 = vst [vmem:[#allocation95_spill] sm:$0xff] %v5070_v15  ;;  %v5074_v17 = vld [vmem:[#allocation3 + $0x3f0] sm:$0xff] }
 0x27d   :  { %1351 = vmatpush2.msra.mxu1 %v4481_v20  ;;  %1470 = vmatprep.subr.mxu0 %v5062_v12  ;;  %7989 = vst [vmem:[#allocation65_spill] sm:$0xff] %v5074_v17  ;;  %v5078_v20 = vld [vmem:[#allocation3 + $0x3c8] sm:$0xff]  ;;  %v8074_v12 = vld [vmem:[#allocation26_spill] sm:$0xff] }
 0x27e   :  { %1352 = vmatprep.subr.mxu1 %v4485_v23  ;;  %1471 = vmatpush2.msra.mxu0 %v5066_v14  ;;  %7990 = vst [vmem:[#allocation67_spill] sm:$0xff] %v5078_v20  ;;  %v5082_v23 = vld [vmem:[#allocation3 + $0x3c0] sm:$0xff] }
 0x27f   :  { %1353 = vmatpush2.msra.mxu1 %v4489_v24  ;;  %1472 = vmatprep.subr.mxu0 %v5070_v15  ;;  %7991 = vst [vmem:[#allocation69_spill] sm:$0xff] %v5082_v23  ;;  %v7992_v24 = vld [vmem:[#allocation100_spill] sm:$0xff]  ;;  %v5086_v15 = vld [vmem:[#allocation3 + $0x398] sm:$0xff] }
 0x280   :  { %1354 = vmatprep.subr.mxu1 %v4493_v26  ;;  %1473 = vmatpush2.msra.mxu0 %v5074_v17  ;;  %7993 = vst [vmem:[#allocation71_spill] sm:$0xff] %v5086_v15  ;;  %v7994_v26 = vld [vmem:[#allocation101_spill] sm:$0xff]  ;;  %v5090_v17 = vld [vmem:[#allocation3 + $0x390] sm:$0xff] }
 0x281   :  { %1355 = vmatpush2.msra.mxu1 %v4497_v28  ;;  %1474 = vmatprep.subr.mxu0 %v5078_v20  ;;  %7995 = vst [vmem:[#allocation73_spill] sm:$0xff] %v5090_v17  ;;  %v7996_v28 = vld [vmem:[#allocation102_spill] sm:$0xff]  ;;  %v5094_v20 = vld [vmem:[#allocation3 + $0x368] sm:$0xff] }
 0x282   :  { %1356 = vmatprep.subr.mxu1 %v4501_v31  ;;  %1475 = vmatpush2.msra.mxu0 %v5082_v23  ;;  %7997 = vst [vmem:[#allocation75_spill] sm:$0xff] %v5094_v20  ;;  %v7998_v31 = vld [vmem:[#allocation103_spill] sm:$0xff]  ;;  %v5098_v23 = vld [vmem:[#allocation3 + $0x360] sm:$0xff] }
 0x283   :  { %1357 = vmatpush2.msra.mxu1 %v7992_v24  ;;  %1476 = vmatprep.subr.mxu0 %v5086_v15  ;;  %7999 = vst [vmem:[#allocation77_spill] sm:$0xff] %v5098_v23  ;;  %v8000_v24 = vld [vmem:[#allocation104_spill] sm:$0xff]  ;;  %v5102_v15 = vld [vmem:[#allocation3 + $0x338] sm:$0xff] }
 0x284   :  { %1358 = vmatprep.subr.mxu1 %v7994_v26  ;;  %1477 = vmatpush2.msra.mxu0 %v5090_v17  ;;  %8001 = vst [vmem:[#allocation79_spill] sm:$0xff] %v5102_v15  ;;  %v8002_v26 = vld [vmem:[#allocation105_spill] sm:$0xff]  ;;  %v5106_v17 = vld [vmem:[#allocation3 + $0x330] sm:$0xff] }
 0x285   :  { %1359 = vmatpush2.msra.mxu1 %v7996_v28  ;;  %1478 = vmatprep.subr.mxu0 %v5094_v20  ;;  %8003 = vst [vmem:[#allocation81_spill] sm:$0xff] %v5106_v17  ;;  %v8004_v28 = vld [vmem:[#allocation106_spill] sm:$0xff]  ;;  %v5110_v20 = vld [vmem:[#allocation3 + $0x308] sm:$0xff] }
 0x286   :  { %1360 = vmatprep.subr.mxu1 %v7998_v31  ;;  %1479 = vmatpush2.msra.mxu0 %v5098_v23  ;;  %8005 = vst [vmem:[#allocation83_spill] sm:$0xff] %v5110_v20  ;;  %v5114_v31 = vld [vmem:[#allocation3 + $0x2e8] sm:$0xff] }
 0x287   :  { %1361 = vmatpush2.msra.mxu1 %v8000_v24  ;;  %1480 = vmatprep.subr.mxu0 %v5102_v15  ;;  %8006 = vst [vmem:[#allocation85_spill] sm:$0xff] %v5114_v31  ;;  %v5117_v24 = vld [vmem:[#allocation3 + $0x2e0] sm:$0xff]  ;;  %v8073_v23 = vld [vmem:[#allocation35_spill] sm:$0xff] }
 0x288   :  { %1362 = vmatprep.subr.mxu1 %v8002_v26  ;;  %1481 = vmatpush2.msra.mxu0 %v5106_v17  ;;  %8007 = vst [vmem:[#allocation87_spill] sm:$0xff] %v5117_v24  ;;  %v5120_v26 = vld [vmem:[#allocation3 + $0x300] sm:$0xff]  ;;  %v5123_v17 = vld [vmem:[#allocation3 + $0x2b8] sm:$0xff] }
 0x289   :  { %1363 = vmatpush2.msra.mxu1 %v8004_v28  ;;  %1482 = vmatprep.subr.mxu0 %v5110_v20  ;;  %8008 = vst [vmem:[#allocation89_spill] sm:$0xff] %v5120_v26  ;;  %8009 = vst [vmem:[#allocation91_spill] sm:$0xff] %v5123_v17  ;;  %v5126_v28 = vld [vmem:[#allocation3 + $0x2f8] sm:$0xff]  ;;  %v5129_v20 = vld [vmem:[#allocation3 + $0x2b0] sm:$0xff] }
 0x28a   :  { %1365 = vmatmul.mubr.f32.vlgmr.msra.gmra.mxu1 %v4857_v11  ;;  %1491 = vmatprep.subr.mxu1 %v5114_v31  ;;  %8010 = vst [vmem:[#allocation92_spill] sm:$0xff] %v5126_v28  ;;  %8011 = vst [vmem:[#allocation93_spill] sm:$0xff] %v5129_v20  ;;  %v5132_v31 = vld [vmem:[#allocation3 + $0x288] sm:$0xff] }
 0x28b   :  { %1492 = vmatpush1.msra.mxu1 %v5117_v24  ;;  %1483 = vmatpush2.msra.mxu0 %v5120_v26  ;;  %8012 = vst [vmem:[#allocation94_spill] sm:$0xff] %v5132_v31  ;;  %v5135_v24 = vld [vmem:[#allocation3 + $0x280] sm:$0xff]  ;;  %v5138_v26 = vld [vmem:[#allocation3 + $0x258] sm:$0xff] }
 0x28c   :  { %1493 = vmatprep.subr.mxu1 %v5123_v17  ;;  %1562 = vmatprep.subr.mxu0 %v5126_v28  ;;  %8013 = vst [vmem:[#allocation96_spill] sm:$0xff] %v5135_v24  ;;  %8014 = vst [vmem:[#allocation97_spill] sm:$0xff] %v5138_v26  ;;  %v5141_v17 = vld [vmem:[#allocation3 + $0x250] sm:$0xff]  ;;  %v5144_v28 = vld [vmem:[#allocation3 + $0x228] sm:$0xff] }
 0x28d   :  { %1494 = vmatpush1.msra.mxu1 %v5129_v20  ;;  %8015 = vst [vmem:[#allocation98_spill] sm:$0xff] %v5141_v17  ;;  %8016 = vst [vmem:[#allocation99_spill] sm:$0xff] %v5144_v28  ;;  %v5147_v20 = vld [vmem:[#allocation3 + $0x220] sm:$0xff] }
 0x28e   :  { %1495 = vmatprep.subr.mxu1 %v5132_v31  ;;  %8017 = vst [vmem:[#allocation100_spill] sm:$0xff] %v5147_v20  ;;  %v5150_v31 = vld [vmem:[#allocation3 + $0x1f8] sm:$0xff] }
 0x28f   :  { %1496 = vmatpush1.msra.mxu1 %v5135_v24  ;;  %8018 = vst [vmem:[#allocation101_spill] sm:$0xff] %v5150_v31  ;;  %v5153_v24 = vld [vmem:[#allocation3 + $0x1f0] sm:$0xff] }
 0x290   :  { %1497 = vmatprep.subr.mxu1 %v5138_v26  ;;  %8019 = vst [vmem:[#allocation102_spill] sm:$0xff] %v5153_v24  ;;  %v5156_v26 = vld [vmem:[#allocation3 + $0x1c8] sm:$0xff] }
 0x291   :  { %1498 = vmatpush1.msra.mxu1 %v5141_v17  ;;  %8020 = vst [vmem:[#allocation103_spill] sm:$0xff] %v5156_v26  ;;  %v5159_v17 = vld [vmem:[#allocation3 + $0x1c0] sm:$0xff] }
 0x292   :  { %1499 = vmatprep.subr.mxu1 %v5144_v28  ;;  %8021 = vst [vmem:[#allocation104_spill] sm:$0xff] %v5159_v17  ;;  %v5162_v28 = vld [vmem:[#allocation3 + $0x198] sm:$0xff] }
 0x293   :  { %1500 = vmatpush1.msra.mxu1 %v5147_v20  ;;  %8022 = vst [vmem:[#allocation105_spill] sm:$0xff] %v5162_v28  ;;  %v5165_v20 = vld [vmem:[#allocation3 + $0x190] sm:$0xff] }
 0x294   :  { %1501 = vmatprep.subr.mxu1 %v5150_v31  ;;  %8023 = vst [vmem:[#allocation106_spill] sm:$0xff] %v5165_v20  ;;  %v5168_v31 = vld [vmem:[#allocation3 + $0x168] sm:$0xff] }
 0x295   :  { %1502 = vmatpush1.msra.mxu1 %v5153_v24  ;;  %8024 = vst [vmem:[#allocation107_spill] sm:$0xff] %v5168_v31  ;;  %v5171_v24 = vld [vmem:[#allocation3 + $0x160] sm:$0xff] }
 0x296   :  { %1503 = vmatprep.subr.mxu1 %v5156_v26  ;;  %8025 = vst [vmem:[#allocation108_spill] sm:$0xff] %v5171_v24  ;;  %v5174_v26 = vld [vmem:[#allocation3 + $0x138] sm:$0xff] }
 0x297   :  { %1504 = vmatpush1.msra.mxu1 %v5159_v17  ;;  %8026 = vst [vmem:[#allocation109_spill] sm:$0xff] %v5174_v26  ;;  %v5177_v17 = vld [vmem:[#allocation3 + $0x130] sm:$0xff] }
 0x298   :  { %1505 = vmatprep.subr.mxu1 %v5162_v28  ;;  %8027 = vst [vmem:[#allocation110_spill] sm:$0xff] %v5177_v17  ;;  %v5180_v28 = vld [vmem:[#allocation3 + $0x108] sm:$0xff] }
 0x299   :  { %1506 = vmatpush1.msra.mxu1 %v5165_v20  ;;  %8028 = vst [vmem:[#allocation111_spill] sm:$0xff] %v5180_v28  ;;  %v5183_v20 = vld [vmem:[#allocation3 + $0x100] sm:$0xff] }
 0x29a   :  { %1507 = vmatprep.subr.mxu1 %v5168_v31  ;;  %8029 = vst [vmem:[#allocation112_spill] sm:$0xff] %v5183_v20  ;;  %v5186_v31 = vld [vmem:[#allocation3 + $0xd8] sm:$0xff] }
 0x29b   :  { %1508 = vmatpush1.msra.mxu1 %v5171_v24  ;;  %8030 = vst [vmem:[#allocation113_spill] sm:$0xff] %v5186_v31  ;;  %v5189_v24 = vld [vmem:[#allocation3 + $0xd0] sm:$0xff] }
 0x29c   :  { %1509 = vmatprep.subr.mxu1 %v5174_v26  ;;  %8031 = vst [vmem:[#allocation114_spill] sm:$0xff] %v5189_v24  ;;  %v5192_v26 = vld [vmem:[#allocation3 + $0xa8] sm:$0xff] }
 0x29d   :  { %1510 = vmatpush1.msra.mxu1 %v5177_v17  ;;  %8032 = vst [vmem:[#allocation115_spill] sm:$0xff] %v5192_v26  ;;  %v5195_v17 = vld [vmem:[#allocation3 + $0xa0] sm:$0xff] }
 0x29e   :  { %1511 = vmatprep.subr.mxu1 %v5180_v28  ;;  %8033 = vst [vmem:[#allocation116_spill] sm:$0xff] %v5195_v17  ;;  %v5198_v28 = vld [vmem:[#allocation3 + $0x78] sm:$0xff] }
 0x29f   :  { %1512 = vmatpush1.msra.mxu1 %v5183_v20  ;;  %8034 = vst [vmem:[#allocation117_spill] sm:$0xff] %v5198_v28  ;;  %v5201_v20 = vld [vmem:[#allocation3 + $0x70] sm:$0xff] }
 0x2a0   :  { %1513 = vmatprep.subr.mxu1 %v5186_v31  ;;  %8035 = vst [vmem:[#allocation118_spill] sm:$0xff] %v5201_v20  ;;  %v5204_v31 = vld [vmem:[#allocation3 + $0x48] sm:$0xff] }
 0x2a1   :  { %1514 = vmatpush1.msra.mxu1 %v5189_v24  ;;  %8036 = vst [vmem:[#allocation119_spill] sm:$0xff] %v5204_v31  ;;  %v5207_v24 = vld [vmem:[#allocation3 + $0x40] sm:$0xff] }
 0x2a2   :  { %1515 = vmatprep.subr.mxu1 %v5192_v26  ;;  %8037 = vst [vmem:[#allocation120_spill] sm:$0xff] %v5207_v24  ;;  %v5210_v26 = vld [vmem:[#allocation3 + $0x18] sm:$0xff] }
 0x2a3   :  { %1516 = vmatpush1.msra.mxu1 %v5195_v17  ;;  %8038 = vst [vmem:[#allocation121_spill] sm:$0xff] %v5210_v26  ;;  %v5213_v17 = vld [vmem:[#allocation3 + $0x10] sm:$0xff] }
 0x2a4   :  { %1517 = vmatprep.subr.mxu1 %v5198_v28  ;;  %8039 = vst [vmem:[#allocation122_spill] sm:$0xff] %v5213_v17  ;;  %v5216_v28 = vld [vmem:[#allocation3 + $0x5e8] sm:$0xff] }
 0x2a5   :  { %1518 = vmatpush1.msra.mxu1 %v5201_v20  ;;  %8040 = vst [vmem:[#allocation123_spill] sm:$0xff] %v5216_v28  ;;  %v5219_v20 = vld [vmem:[#allocation3 + $0x5e0] sm:$0xff] }
 0x2a6   :  { %1519 = vmatprep.subr.mxu1 %v5204_v31  ;;  %8041 = vst [vmem:[#allocation124_spill] sm:$0xff] %v5219_v20  ;;  %v5222_v31 = vld [vmem:[#allocation3 + $0x5b8] sm:$0xff] }
 0x2a7   :  { %1520 = vmatpush1.msra.mxu1 %v5207_v24  ;;  %8042 = vst [vmem:[#allocation125_spill] sm:$0xff] %v5222_v31  ;;  %v5225_v24 = vld [vmem:[#allocation3 + $0x5b0] sm:$0xff] }
 0x2a8   :  { %1521 = vmatprep.subr.mxu1 %v5210_v26  ;;  %8043 = vst [vmem:[#allocation126_spill] sm:$0xff] %v5225_v24  ;;  %v5228_v26 = vld [vmem:[#allocation3 + $0x588] sm:$0xff] }
 0x2a9   :  { %1522 = vmatpush1.msra.mxu1 %v5213_v17  ;;  %8044 = vst [vmem:[#allocation127_spill] sm:$0xff] %v5228_v26  ;;  %v5231_v17 = vld [vmem:[#allocation3 + $0x580] sm:$0xff] }
 0x2aa   :  { %1523 = vmatprep.subr.mxu1 %v5216_v28  ;;  %8045 = vst [vmem:[#allocation128_spill] sm:$0xff] %v5231_v17  ;;  %v5234_v28 = vld [vmem:[#allocation3 + $0x558] sm:$0xff] }
 0x2ab   :  { %1524 = vmatpush2.msra.mxu1 %v5219_v20  ;;  %8046 = vst [vmem:[#allocation129_spill] sm:$0xff] %v5234_v28  ;;  %v5237_v20 = vld [vmem:[#allocation3 + $0x550] sm:$0xff] }
 0x2ac   :  { %1525 = vmatprep.subr.mxu1 %v5222_v31  ;;  %8047 = vst [vmem:[#allocation130_spill] sm:$0xff] %v5237_v20  ;;  %v5240_v31 = vld [vmem:[#allocation3 + $0x528] sm:$0xff] }
 0x2ad   :  { %1526 = vmatpush2.msra.mxu1 %v5225_v24  ;;  %8048 = vst [vmem:[#allocation131_spill] sm:$0xff] %v5240_v31  ;;  %v5243_v24 = vld [vmem:[#allocation3 + $0x520] sm:$0xff] }
 0x2ae   :  { %1527 = vmatprep.subr.mxu1 %v5228_v26  ;;  %8049 = vst [vmem:[#allocation132_spill] sm:$0xff] %v5243_v24  ;;  %v5246_v26 = vld [vmem:[#allocation3 + $0x4f8] sm:$0xff] }
 0x2af   :  { %1528 = vmatpush2.msra.mxu1 %v5231_v17  ;;  %8050 = vst [vmem:[#allocation133_spill] sm:$0xff] %v5246_v26  ;;  %v5249_v17 = vld [vmem:[#allocation3 + $0x4f0] sm:$0xff] }
 0x2b0   :  { %1529 = vmatprep.subr.mxu1 %v5234_v28  ;;  %8051 = vst [vmem:[#allocation134_spill] sm:$0xff] %v5249_v17  ;;  %v5252_v28 = vld [vmem:[#allocation3 + $0x4c8] sm:$0xff] }
 0x2b1   :  { %1530 = vmatpush2.msra.mxu1 %v5237_v20  ;;  %8052 = vst [vmem:[#allocation135_spill] sm:$0xff] %v5252_v28  ;;  %v5255_v20 = vld [vmem:[#allocation3 + $0x4c0] sm:$0xff] }
 0x2b2   :  { %1531 = vmatprep.subr.mxu1 %v5240_v31  ;;  %8053 = vst [vmem:[#allocation136_spill] sm:$0xff] %v5255_v20  ;;  %v5258_v31 = vld [vmem:[#allocation3 + $0x498] sm:$0xff] }
 0x2b3   :  { %1532 = vmatpush2.msra.mxu1 %v5243_v24  ;;  %8054 = vst [vmem:[#allocation137_spill] sm:$0xff] %v5258_v31  ;;  %v5261_v24 = vld [vmem:[#allocation3 + $0x490] sm:$0xff] }
 0x2b4   :  { %1533 = vmatprep.subr.mxu1 %v5246_v26  ;;  %8055 = vst [vmem:[#allocation138_spill] sm:$0xff] %v5261_v24  ;;  %v5264_v26 = vld [vmem:[#allocation3 + $0x468] sm:$0xff] }
 0x2b5   :  { %1534 = vmatpush2.msra.mxu1 %v5249_v17  ;;  %8056 = vst [vmem:[#allocation139_spill] sm:$0xff] %v5264_v26  ;;  %v5267_v17 = vld [vmem:[#allocation3 + $0x460] sm:$0xff] }
 0x2b6   :  { %1535 = vmatprep.subr.mxu1 %v5252_v28  ;;  %8057 = vst [vmem:[#allocation140_spill] sm:$0xff] %v5267_v17  ;;  %v5270_v28 = vld [vmem:[#allocation3 + $0x438] sm:$0xff] }
 0x2b7   :  { %1536 = vmatpush2.msra.mxu1 %v5255_v20  ;;  %8058 = vst [vmem:[#allocation141_spill] sm:$0xff] %v5270_v28  ;;  %v5273_v20 = vld [vmem:[#allocation3 + $0x430] sm:$0xff] }
 0x2b8   :  { %1537 = vmatprep.subr.mxu1 %v5258_v31  ;;  %8059 = vst [vmem:[#allocation142_spill] sm:$0xff] %v5273_v20  ;;  %v5276_v31 = vld [vmem:[#allocation3 + $0x408] sm:$0xff] }
 0x2b9   :  { %1538 = vmatpush2.msra.mxu1 %v5261_v24  ;;  %8060 = vst [vmem:[#allocation143_spill] sm:$0xff] %v5276_v31  ;;  %v5279_v24 = vld [vmem:[#allocation3 + $0x400] sm:$0xff] }
 0x2ba   :  { %1539 = vmatprep.subr.mxu1 %v5264_v26  ;;  %8061 = vst [vmem:[#allocation144_spill] sm:$0xff] %v5279_v24  ;;  %v5282_v26 = vld [vmem:[#allocation3 + $0x3d8] sm:$0xff] }
 0x2bb   :  { %1540 = vmatpush2.msra.mxu1 %v5267_v17  ;;  %8062 = vst [vmem:[#allocation145_spill] sm:$0xff] %v5282_v26  ;;  %v5285_v17 = vld [vmem:[#allocation3 + $0x3d0] sm:$0xff] }
 0x2bc   :  { %1541 = vmatprep.subr.mxu1 %v5270_v28  ;;  %8063 = vst [vmem:[#allocation146_spill] sm:$0xff] %v5285_v17  ;;  %v5288_v28 = vld [vmem:[#allocation3 + $0x3a8] sm:$0xff] }
 0x2bd   :  { %1542 = vmatpush2.msra.mxu1 %v5273_v20  ;;  %8064 = vst [vmem:[#allocation147_spill] sm:$0xff] %v5288_v28  ;;  %v5291_v20 = vld [vmem:[#allocation3 + $0x3a0] sm:$0xff] }
 0x2be   :  { %1543 = vmatprep.subr.mxu1 %v5276_v31  ;;  %8065 = vst [vmem:[#allocation148_spill] sm:$0xff] %v5291_v20  ;;  %v5294_v31 = vld [vmem:[#allocation3 + $0x378] sm:$0xff] }
 0x2bf   :  { %1544 = vmatpush2.msra.mxu1 %v5279_v24  ;;  %8066 = vst [vmem:[#allocation149_spill] sm:$0xff] %v5294_v31  ;;  %v5297_v24 = vld [vmem:[#allocation3 + $0x370] sm:$0xff] }
 0x2c0   :  { %1545 = vmatprep.subr.mxu1 %v5282_v26  ;;  %8067 = vst [vmem:[#allocation150_spill] sm:$0xff] %v5297_v24  ;;  %v5300_v26 = vld [vmem:[#allocation3 + $0x348] sm:$0xff] }
 0x2c1   :  { %1546 = vmatpush2.msra.mxu1 %v5285_v17  ;;  %8068 = vst [vmem:[#allocation151_spill] sm:$0xff] %v5300_v26  ;;  %v5303_v17 = vld [vmem:[#allocation3 + $0x340] sm:$0xff] }
 0x2c2   :  { %1547 = vmatprep.subr.mxu1 %v5288_v28  ;;  %8069 = vst [vmem:[#allocation152_spill] sm:$0xff] %v5303_v17  ;;  %v5306_v28 = vld [vmem:[#allocation3 + $0x318] sm:$0xff] }
 0x2c3   :  { %1548 = vmatpush2.msra.mxu1 %v5291_v20  ;;  %8070 = vst [vmem:[#allocation153_spill] sm:$0xff] %v5306_v28  ;;  %v5309_v20 = vld [vmem:[#allocation3 + $0x310] sm:$0xff] }
 0x2c4   :  { %1549 = vmatprep.subr.mxu1 %v5294_v31  ;;  %8071 = vst [vmem:[#allocation154_spill] sm:$0xff] %v5309_v20  ;;  %v8072_v31 = vld [vmem:[#allocation13_spill] sm:$0xff] }
 0x2c5   :  { %1550 = vmatpush2.msra.mxu1 %v5297_v24 }
 0x2c6   :  { %1551 = vmatprep.subr.mxu1 %v5300_v26 }
 0x2c7   :  { %1552 = vmatpush2.msra.mxu1 %v5303_v17 }
 0x2c8   :  { %1553 = vmatprep.subr.mxu1 %v5306_v28 }
 0x2c9   :  { %1554 = vmatpush2.msra.mxu1 %v5309_v20  ;;  %v8076_v20 = vld [vmem:[#allocation32_spill] sm:$0xff] }
 0x2ca   :  { %1682 = vmatprep.subr.mxu1 %v8072_v31 }
 0x30a   :  { %v1224_v15 = vpop.f32.mrf.mxu1  ;;  %v1295_v3 = vpop.f32.mrf.mxu0 }
 0x30b   :  { %v1225_v14 = vadd.f32 %v1224_v15, %v8073_v23  ;;  %v1296_v1 = vadd.f32 %v1295_v3, %v4829_v4 }
 0x30c   :  { %v1226_v24 = vpop.f32.mrf.mxu1  ;;  %v1297_v28 = vpop.f32.mrf.mxu0 }
 0x30d   :  { %v1227_v26 = vadd.f32 %v1226_v24, %v4819_v55  ;;  %v1371_v9 = vadd.f32 %v1225_v14, %v8074_v12  ;;  %v1298_v31 = vadd.f32 %v1297_v28, %v4833_v45  ;;  %v1385_v61 = vadd.f32 %v1296_v1, %v8076_v20 }
 0x30f   :  { %v1372_v17 = vadd.f32 %v1227_v26, %v8075_v8  ;;  %v3030_v5 = vmul.f32 -1.442695, %v1371_v9  ;;  %v1386_v15 = vadd.f32 %v1298_v31, %v8077_v60  ;;  %v3032_v23 = vmul.f32 -1.442695, %v1385_v61 }
 0x311   :  { %v3031_v2 = vmul.f32 -1.442695, %v1372_v17  ;;  %3113 = vpow2.f32 %v3030_v5  ;;  %v3033_v24 = vmul.f32 -1.442695, %v1386_v15  ;;  %v8079_v15 = vld [vmem:[#allocation50_spill] sm:$0xff] }
 0x313   :  { %3115 = vpow2.f32 %v3031_v2 }
 0x314   :  { %3117 = vpow2.f32 %v3032_v23 }
 0x315   :  { %3119 = vpow2.f32 %v3033_v24 }
 0x31e   :  { %v3114_v55 = vpop.eup %3113 }
 0x31f   :  { %v1379_v8 = vadd.f32 1.0, %v3114_v55  ;;  %v8078_v55 = vld [vmem:[#allocation17_spill] sm:$0xff] }
 0x320   :  { %v3116_v12 = vpop.eup %3115 }
 0x321   :  { %v1380_v9 = vadd.f32 1.0, %v3116_v12  ;;  %3121 = vrcp.f32 %v1379_v8  ;;  %v3118_v5 = vpop.eup %3117 }
 0x322   :  { %v3120_v14 = vpop.eup %3119  ;;  %v1393_v3 = vadd.f32 1.0, %v3118_v5 }
 0x323   :  { %3123 = vrcp.f32 %v1380_v9  ;;  %v1394_v17 = vadd.f32 1.0, %v3120_v14 }
 0x324   :  { %3125 = vrcp.f32 %v1393_v3 }
 0x325   :  { %3127 = vrcp.f32 %v1394_v17 }
 0x32e   :  { %v3122_v1 = vpop.eup %3121 }
 0x330   :  { %v3124_v23 = vpop.eup %3123 }
 0x331   :  { %v3126_v12 = vpop.eup %3125 }
 0x332   :  { %v3128_v8 = vpop.eup %3127  ;;  %v1405_v9 = vsub.f32 1.0, %v3126_v12  ;;  %v1409_v3 = vmul.f32 %v3126_v12, %v4857_v11  ;;  %v5339_v11 = vld [vmem:[#allocation3 + $0x2c8] sm:$0xff] }
 0x333   :  { %v1406_v14 = vsub.f32 1.0, %v3128_v8  ;;  %v5371_v12 = vld [vmem:[#allocation3 + $0x208] sm:$0xff] }
 0x34a   :  { %v1366_v2 = vpop.f32.mrf.mxu1 }
 0x34b   :  { %v1367_v26 = vadd.f32 %v1366_v2, %v4843_v33 }
 0x34c   :  { %v1368_v20 = vpop.f32.mrf.mxu1 }
 0x34d   :  { %v1399_v60 = vmul.f32 %v3122_v1, %v1367_v26  ;;  %v1369_v61 = vadd.f32 %v1368_v20, %v4847_v62  ;;  %v1410_v20 = vmul.f32 %v3128_v8, %v4855_v63  ;;  %v5343_v63 = vld [vmem:[#allocation3 + $0x2c0] sm:$0xff] }
 0x34e   :  { %v5375_v8 = vld [vmem:[#allocation3 + $0x200] sm:$0xff] }
 0x34f   :  { %v1401_v28 = vadd.f32 %v1399_v60, %v8078_v55  ;;  %v1400_v31 = vmul.f32 %v3124_v23, %v1369_v61  ;;  %v5335_v61 = vld [vmem:[#allocation3 + $0x2f0] sm:$0xff]  ;;  %v5347_v23 = vld [vmem:[#allocation3 + $0x298] sm:$0xff] }
 0x350   :  { %v5351_v55 = vld [vmem:[#allocation3 + $0x290] sm:$0xff] }
 0x351   :  { %3129 = vtanh.f32 %v1401_v28  ;;  %v1402_v24 = vadd.f32 %v1400_v31, %v8079_v15  ;;  %v5355_v28 = vld [vmem:[#allocation3 + $0x268] sm:$0xff]  ;;  %v5359_v31 = vld [vmem:[#allocation3 + $0x260] sm:$0xff]  ;;  %v5363_v15 = vld [vmem:[#allocation3 + $0x238] sm:$0xff] }
 0x353   :  { %3131 = vtanh.f32 %v1402_v24  ;;  %v5367_v24 = vld [vmem:[#allocation3 + $0x230] sm:$0xff] }
 0x35e   :  { %v3130_v5 = vpop.eup %3129 }
 0x35f   :  { %v1407_v2 = vmul.f32 %v3130_v5, %v1405_v9  ;;  %v5379_v9 = vld [vmem:[#allocation3 + $0x1d8] sm:$0xff]  ;;  %v5383_v5 = vld [vmem:[#allocation3 + $0x1d0] sm:$0xff] }
 0x360   :  { %v3132_v26 = vpop.eup %3131 }
 0x361   :  { %v1408_v1 = vmul.f32 %v3132_v26, %v1406_v14  ;;  %v5327_v17 = vadd.f32 %v1409_v3, %v1407_v2  ;;  %v5387_v14 = vld [vmem:[#allocation3 + $0x1a8] sm:$0xff]  ;;  %v5391_v2 = vld [vmem:[#allocation3 + $0x1a0] sm:$0xff]  ;;  %v5395_v3 = vld [vmem:[#allocation3 + $0x178] sm:$0xff] }
 0x362   :  { %8080 = vst [vmem:[#allocation13_spill] sm:$0xff] %v5387_v14  ;;  %8081 = vst [vmem:[#allocation26_spill] sm:$0xff] %v5391_v2  ;;  %v8083_v26 = vld [vmem:[#allocation39_spill] sm:$0xff] }
 0x363   :  { %v5329_v60 = vadd.f32 %v1410_v20, %v1408_v1  ;;  %8082 = vst [vmem:[#allocation28_spill] sm:$0xff] %v5395_v3  ;;  %v5399_v1 = vld [vmem:[#allocation3 + $0x170] sm:$0xff]  ;;  %v8085_v20 = vld [vmem:[#allocation41_spill] sm:$0xff] }
 0x364   :  { %8084 = vst [vmem:[#allocation32_spill] sm:$0xff] %v5399_v1 }
 0x365   :  { %1484 = vmatprep.mubr.f32.mxu0 %v5329_v60  ;;  %1555 = vmatprep.mubr.f32.mxu1 %v5329_v60 }
 0x366   :  { %1485 = vmatmul.mubr.f32.vlgmr.msra.gmra.mxu0 %v5327_v17  ;;  %1556 = vmatmul.mubr.f32.vlgmr.msra.gmra.mxu1 %v5327_v17 }
 0x367   :  { %1563 = vmatpush1.msra.mxu0 %v5335_v61  ;;  %1626 = vmatprep.mubr.f32.mxu0 %v5329_v60 }
 0x368   :  { %1564 = vmatprep.subr.mxu0 %v5339_v11  ;;  %1683 = vmatpush1.msra.mxu1 %v4866_v27 }
 0x369   :  { %1565 = vmatpush1.msra.mxu0 %v5343_v63  ;;  %1684 = vmatprep.subr.mxu1 %v4870_v36 }
 0x36a   :  { %1566 = vmatprep.subr.mxu0 %v5347_v23  ;;  %1685 = vmatpush1.msra.mxu1 %v4874_v19 }
 0x36b   :  { %1567 = vmatpush1.msra.mxu0 %v5351_v55  ;;  %1686 = vmatprep.subr.mxu1 %v4878_v10 }
 0x36c   :  { %1568 = vmatprep.subr.mxu0 %v5355_v28  ;;  %1687 = vmatpush1.msra.mxu1 %v4882_v18 }
 0x36d   :  { %1569 = vmatpush1.msra.mxu0 %v5359_v31  ;;  %1688 = vmatprep.subr.mxu1 %v4886_v42 }
 0x36e   :  { %1570 = vmatprep.subr.mxu0 %v5363_v15  ;;  %1689 = vmatpush1.msra.mxu1 %v4890_v35 }
 0x36f   :  { %1571 = vmatpush1.msra.mxu0 %v5367_v24  ;;  %1690 = vmatprep.subr.mxu1 %v4894_v16 }
 0x370   :  { %1572 = vmatprep.subr.mxu0 %v5371_v12  ;;  %1691 = vmatpush1.msra.mxu1 %v4898_v56 }
 0x371   :  { %1573 = vmatpush1.msra.mxu0 %v5375_v8  ;;  %1692 = vmatprep.subr.mxu1 %v4902_v21 }
 0x372   :  { %1574 = vmatprep.subr.mxu0 %v5379_v9  ;;  %1693 = vmatpush1.msra.mxu1 %v4906_v41 }
 0x373   :  { %1575 = vmatpush1.msra.mxu0 %v5383_v5  ;;  %1694 = vmatprep.subr.mxu1 %v4910_v22 }
 0x374   :  { %1576 = vmatprep.subr.mxu0 %v5387_v14  ;;  %1695 = vmatpush1.msra.mxu1 %v4914_v37  ;;  %v5403_v14 = vld [vmem:[#allocation3 + $0x148] sm:$0xff] }
 0x375   :  { %1577 = vmatpush1.msra.mxu0 %v5391_v2  ;;  %1696 = vmatprep.subr.mxu1 %v4918_v40  ;;  %8086 = vst [vmem:[#allocation34_spill] sm:$0xff] %v5403_v14  ;;  %v5407_v2 = vld [vmem:[#allocation3 + $0x140] sm:$0xff] }
 0x376   :  { %1578 = vmatprep.subr.mxu0 %v5395_v3  ;;  %1697 = vmatpush1.msra.mxu1 %v8083_v26  ;;  %8087 = vst [vmem:[#allocation17_spill] sm:$0xff] %v5407_v2  ;;  %v5411_v3 = vld [vmem:[#allocation3 + $0x118] sm:$0xff] }
 0x377   :  { %1579 = vmatpush1.msra.mxu0 %v5399_v1  ;;  %1698 = vmatprep.subr.mxu1 %v8085_v20  ;;  %8088 = vst [vmem:[#allocation50_spill] sm:$0xff] %v5411_v3  ;;  %v5415_v1 = vld [vmem:[#allocation3 + $0x110] sm:$0xff] }
 0x378   :  { %1580 = vmatprep.subr.mxu0 %v5403_v14  ;;  %1699 = vmatpush1.msra.mxu1 %v4930_v6  ;;  %8089 = vst [vmem:[#allocation39_spill] sm:$0xff] %v5415_v1  ;;  %v5419_v14 = vld [vmem:[#allocation3 + $0xe8] sm:$0xff] }
 0x379   :  { %1581 = vmatpush1.msra.mxu0 %v5407_v2  ;;  %1700 = vmatprep.subr.mxu1 %v4934_v52  ;;  %8090 = vst [vmem:[#allocation41_spill] sm:$0xff] %v5419_v14  ;;  %v5423_v2 = vld [vmem:[#allocation3 + $0xe0] sm:$0xff] }
 0x37a   :  { %1582 = vmatprep.subr.mxu0 %v5411_v3  ;;  %1701 = vmatpush1.msra.mxu1 %v4938_v13  ;;  %8091 = vst [vmem:[#allocation155_spill] sm:$0xff] %v5423_v2  ;;  %v5427_v3 = vld [vmem:[#allocation3 + $0xb8] sm:$0xff] }
 0x37b   :  { %1583 = vmatpush1.msra.mxu0 %v5415_v1  ;;  %1702 = vmatprep.subr.mxu1 %v4942_v39  ;;  %8092 = vst [vmem:[#allocation156_spill] sm:$0xff] %v5427_v3  ;;  %v5431_v1 = vld [vmem:[#allocation3 + $0xb0] sm:$0xff] }
 0x37c   :  { %1584 = vmatprep.subr.mxu0 %v5419_v14  ;;  %1703 = vmatpush1.msra.mxu1 %v4946_v25  ;;  %8093 = vst [vmem:[#allocation157_spill] sm:$0xff] %v5431_v1  ;;  %v5435_v14 = vld [vmem:[#allocation3 + $0x88] sm:$0xff] }
 0x37d   :  { %1585 = vmatpush1.msra.mxu0 %v5423_v2  ;;  %1704 = vmatprep.subr.mxu1 %v4950_v32  ;;  %8094 = vst [vmem:[#allocation158_spill] sm:$0xff] %v5435_v14  ;;  %v5439_v2 = vld [vmem:[#allocation3 + $0x80] sm:$0xff] }
 0x37e   :  { %1586 = vmatprep.subr.mxu0 %v5427_v3  ;;  %1705 = vmatpush1.msra.mxu1 %v4954_v34  ;;  %8095 = vst [vmem:[#allocation159_spill] sm:$0xff] %v5439_v2  ;;  %v5443_v3 = vld [vmem:[#allocation3 + $0x58] sm:$0xff] }
 0x37f   :  { %1587 = vmatpush1.msra.mxu0 %v5431_v1  ;;  %1706 = vmatprep.subr.mxu1 %v4958_v49  ;;  %8096 = vst [vmem:[#allocation160_spill] sm:$0xff] %v5443_v3  ;;  %v5447_v1 = vld [vmem:[#allocation3 + $0x50] sm:$0xff] }
 0x380   :  { %1588 = vmatprep.subr.mxu0 %v5435_v14  ;;  %1707 = vmatpush1.msra.mxu1 %v4962_v30  ;;  %8097 = vst [vmem:[#allocation161_spill] sm:$0xff] %v5447_v1  ;;  %v5451_v14 = vld [vmem:[#allocation3 + $0x28] sm:$0xff] }
 0x381   :  { %1589 = vmatpush1.msra.mxu0 %v5439_v2  ;;  %1708 = vmatprep.subr.mxu1 %v4966_v38  ;;  %8098 = vst [vmem:[#allocation162_spill] sm:$0xff] %v5451_v14  ;;  %v5455_v2 = vld [vmem:[#allocation3 + $0x20] sm:$0xff] }
 0x382   :  { %1590 = vmatprep.subr.mxu0 %v5443_v3  ;;  %1709 = vmatpush1.msra.mxu1 %v4970_v0  ;;  %8099 = vst [vmem:[#allocation163_spill] sm:$0xff] %v5455_v2  ;;  %v5459_v3 = vld [vmem:[#allocation3 + $0x5f8] sm:$0xff]  ;;  %v8225_v0 = vld [vmem:[#allocation40_spill] sm:$0xff] }
 0x383   :  { %1591 = vmatpush1.msra.mxu0 %v5447_v1  ;;  %1710 = vmatprep.subr.mxu1 %v4974_v29  ;;  %8100 = vst [vmem:[#allocation164_spill] sm:$0xff] %v5459_v3  ;;  %v5463_v1 = vld [vmem:[#allocation3 + $0x5f0] sm:$0xff] }
 0x384   :  { %1592 = vmatprep.subr.mxu0 %v5451_v14  ;;  %1711 = vmatpush1.msra.mxu1 %v4978_v57  ;;  %8101 = vst [vmem:[#allocation165_spill] sm:$0xff] %v5463_v1  ;;  %v5467_v14 = vld [vmem:[#allocation3 + $0x5c8] sm:$0xff]  ;;  %v8224_v57 = vld [vmem:[#allocation38_spill] sm:$0xff] }
 0x385   :  { %1593 = vmatpush1.msra.mxu0 %v5455_v2  ;;  %1712 = vmatprep.subr.mxu1 %v4982_v48  ;;  %8102 = vst [vmem:[#allocation166_spill] sm:$0xff] %v5467_v14  ;;  %v5471_v2 = vld [vmem:[#allocation3 + $0x5c0] sm:$0xff] }
 0x386   :  { %1594 = vmatprep.subr.mxu0 %v5459_v3  ;;  %1713 = vmatpush1.msra.mxu1 %v4986_v7  ;;  %8103 = vst [vmem:[#allocation167_spill] sm:$0xff] %v5471_v2  ;;  %v5475_v3 = vld [vmem:[#allocation3 + $0x598] sm:$0xff] }
 0x387   :  { %1595 = vmatpush2.msra.mxu0 %v5463_v1  ;;  %1714 = vmatprep.subr.mxu1 %v4990_v43  ;;  %8104 = vst [vmem:[#allocation168_spill] sm:$0xff] %v5475_v3  ;;  %v5479_v1 = vld [vmem:[#allocation3 + $0x590] sm:$0xff]  ;;  %v8223_v43 = vld [vmem:[#allocation7_spill] sm:$0xff] }
 0x388   :  { %1596 = vmatprep.subr.mxu0 %v5467_v14  ;;  %1715 = vmatpush2.msra.mxu1 %v4994_v44  ;;  %8105 = vst [vmem:[#allocation169_spill] sm:$0xff] %v5479_v1  ;;  %v5483_v14 = vld [vmem:[#allocation3 + $0x568] sm:$0xff]  ;;  %v8222_v44 = vld [vmem:[#allocation6_spill] sm:$0xff] }
 0x389   :  { %1597 = vmatpush2.msra.mxu0 %v5471_v2  ;;  %1716 = vmatprep.subr.mxu1 %v4998_v46  ;;  %8106 = vst [vmem:[#allocation170_spill] sm:$0xff] %v5483_v14  ;;  %v5487_v2 = vld [vmem:[#allocation3 + $0x560] sm:$0xff]  ;;  %v8221_v46 = vld [vmem:[#allocation37_spill] sm:$0xff] }
 0x38a   :  { %1598 = vmatprep.subr.mxu0 %v5475_v3  ;;  %1717 = vmatpush2.msra.mxu1 %v5002_v47  ;;  %8107 = vst [vmem:[#allocation171_spill] sm:$0xff] %v5487_v2  ;;  %v5491_v3 = vld [vmem:[#allocation3 + $0x538] sm:$0xff]  ;;  %v8163_v47 = vld [vmem:[#allocation99_spill] sm:$0xff] }
 0x38b   :  { %1599 = vmatpush2.msra.mxu0 %v5479_v1  ;;  %1718 = vmatprep.subr.mxu1 %v5006_v50  ;;  %8108 = vst [vmem:[#allocation172_spill] sm:$0xff] %v5491_v3  ;;  %v5495_v1 = vld [vmem:[#allocation3 + $0x530] sm:$0xff] }
 0x38c   :  { %1600 = vmatprep.subr.mxu0 %v5483_v14  ;;  %1719 = vmatpush2.msra.mxu1 %v5010_v51  ;;  %8109 = vst [vmem:[#allocation173_spill] sm:$0xff] %v5495_v1  ;;  %v5499_v14 = vld [vmem:[#allocation3 + $0x508] sm:$0xff]  ;;  %v8157_v51 = vld [vmem:[#allocation92_spill] sm:$0xff] }
 0x38d   :  { %1601 = vmatpush2.msra.mxu0 %v5487_v2  ;;  %1720 = vmatprep.subr.mxu1 %v5014_v53  ;;  %8110 = vst [vmem:[#allocation174_spill] sm:$0xff] %v5499_v14  ;;  %v5503_v2 = vld [vmem:[#allocation3 + $0x500] sm:$0xff]  ;;  %v8112_v53 = vld [vmem:[#allocation72_spill] sm:$0xff] }
 0x38e   :  { %1602 = vmatprep.subr.mxu0 %v5491_v3  ;;  %1721 = vmatpush2.msra.mxu1 %v5018_v54  ;;  %8111 = vst [vmem:[#allocation175_spill] sm:$0xff] %v5503_v2  ;;  %v5507_v3 = vld [vmem:[#allocation3 + $0x4d8] sm:$0xff]  ;;  %v8114_v54 = vld [vmem:[#allocation74_spill] sm:$0xff]  ;;  %v8160_v50 = vld [vmem:[#allocation96_spill] sm:$0xff] }
 0x38f   :  { %1603 = vmatpush2.msra.mxu0 %v5495_v1  ;;  %1722 = vmatprep.subr.mxu1 %v5022_v58  ;;  %8113 = vst [vmem:[#allocation176_spill] sm:$0xff] %v5507_v3  ;;  %v5511_v1 = vld [vmem:[#allocation3 + $0x4d0] sm:$0xff] }
 0x390   :  { %1604 = vmatprep.subr.mxu0 %v5499_v14  ;;  %1723 = vmatpush2.msra.mxu1 %v5026_v59  ;;  %8115 = vst [vmem:[#allocation177_spill] sm:$0xff] %v5511_v1  ;;  %v8116_v58 = vld [vmem:[#allocation76_spill] sm:$0xff]  ;;  %v5515_v14 = vld [vmem:[#allocation3 + $0x4a8] sm:$0xff]  ;;  %v8118_v59 = vld [vmem:[#allocation78_spill] sm:$0xff] }
 0x391   :  { %1605 = vmatpush2.msra.mxu0 %v5503_v2  ;;  %1724 = vmatprep.subr.mxu1 %v8112_v53  ;;  %8117 = vst [vmem:[#allocation178_spill] sm:$0xff] %v5515_v14  ;;  %v5519_v2 = vld [vmem:[#allocation3 + $0x4a0] sm:$0xff]  ;;  %v8120_v53 = vld [vmem:[#allocation80_spill] sm:$0xff] }
 0x392   :  { %1606 = vmatprep.subr.mxu0 %v5507_v3  ;;  %1725 = vmatpush2.msra.mxu1 %v8114_v54  ;;  %8119 = vst [vmem:[#allocation179_spill] sm:$0xff] %v5519_v2  ;;  %v5523_v3 = vld [vmem:[#allocation3 + $0x478] sm:$0xff]  ;;  %v8122_v54 = vld [vmem:[#allocation82_spill] sm:$0xff] }
 0x393   :  { %1607 = vmatpush2.msra.mxu0 %v5511_v1  ;;  %1726 = vmatprep.subr.mxu1 %v8116_v58  ;;  %8121 = vst [vmem:[#allocation180_spill] sm:$0xff] %v5523_v3  ;;  %v5527_v1 = vld [vmem:[#allocation3 + $0x470] sm:$0xff] }
 0x394   :  { %1608 = vmatprep.subr.mxu0 %v5515_v14  ;;  %1727 = vmatpush2.msra.mxu1 %v8118_v59  ;;  %8123 = vst [vmem:[#allocation181_spill] sm:$0xff] %v5527_v1  ;;  %v8124_v58 = vld [vmem:[#allocation84_spill] sm:$0xff]  ;;  %v5531_v14 = vld [vmem:[#allocation3 + $0x448] sm:$0xff]  ;;  %v8126_v59 = vld [vmem:[#allocation86_spill] sm:$0xff] }
 0x395   :  { %1609 = vmatpush2.msra.mxu0 %v5519_v2  ;;  %1728 = vmatprep.subr.mxu1 %v8120_v53  ;;  %8125 = vst [vmem:[#allocation182_spill] sm:$0xff] %v5531_v14  ;;  %v5535_v2 = vld [vmem:[#allocation3 + $0x440] sm:$0xff]  ;;  %v8128_v53 = vld [vmem:[#allocation88_spill] sm:$0xff] }
 0x396   :  { %1610 = vmatprep.subr.mxu0 %v5523_v3  ;;  %1729 = vmatpush2.msra.mxu1 %v8122_v54  ;;  %8127 = vst [vmem:[#allocation183_spill] sm:$0xff] %v5535_v2  ;;  %v5539_v3 = vld [vmem:[#allocation3 + $0x418] sm:$0xff]  ;;  %v8130_v54 = vld [vmem:[#allocation90_spill] sm:$0xff] }
 0x397   :  { %1611 = vmatpush2.msra.mxu0 %v5527_v1  ;;  %1730 = vmatprep.subr.mxu1 %v8124_v58  ;;  %8129 = vst [vmem:[#allocation184_spill] sm:$0xff] %v5539_v3  ;;  %v5543_v1 = vld [vmem:[#allocation3 + $0x410] sm:$0xff]  ;;  %v8132_v58 = vld [vmem:[#allocation95_spill] sm:$0xff] }
 0x398   :  { %1612 = vmatprep.subr.mxu0 %v5531_v14  ;;  %1731 = vmatpush2.msra.mxu1 %v8126_v59  ;;  %8131 = vst [vmem:[#allocation185_spill] sm:$0xff] %v5543_v1  ;;  %v5547_v14 = vld [vmem:[#allocation3 + $0x3e8] sm:$0xff]  ;;  %v8134_v59 = vld [vmem:[#allocation65_spill] sm:$0xff] }
 0x399   :  { %1613 = vmatpush2.msra.mxu0 %v5535_v2  ;;  %1732 = vmatprep.subr.mxu1 %v8128_v53  ;;  %8133 = vst [vmem:[#allocation186_spill] sm:$0xff] %v5547_v14  ;;  %v5551_v2 = vld [vmem:[#allocation3 + $0x3e0] sm:$0xff]  ;;  %v8136_v53 = vld [vmem:[#allocation67_spill] sm:$0xff] }
 0x39a   :  { %1614 = vmatprep.subr.mxu0 %v5539_v3  ;;  %1733 = vmatpush2.msra.mxu1 %v8130_v54  ;;  %8135 = vst [vmem:[#allocation187_spill] sm:$0xff] %v5551_v2  ;;  %v5555_v3 = vld [vmem:[#allocation3 + $0x3b8] sm:$0xff] }
 0x39b   :  { %1615 = vmatpush2.msra.mxu0 %v5543_v1  ;;  %1734 = vmatprep.subr.mxu1 %v8132_v58  ;;  %8137 = vst [vmem:[#allocation188_spill] sm:$0xff] %v5555_v3  ;;  %v8138_v54 = vld [vmem:[#allocation69_spill] sm:$0xff]  ;;  %v5559_v1 = vld [vmem:[#allocation3 + $0x3b0] sm:$0xff]  ;;  %v8140_v58 = vld [vmem:[#allocation71_spill] sm:$0xff] }
 0x39c   :  { %1616 = vmatprep.subr.mxu0 %v5547_v14  ;;  %1735 = vmatpush2.msra.mxu1 %v8134_v59  ;;  %8139 = vst [vmem:[#allocation189_spill] sm:$0xff] %v5559_v1  ;;  %v5563_v14 = vld [vmem:[#allocation3 + $0x388] sm:$0xff]  ;;  %v8142_v59 = vld [vmem:[#allocation73_spill] sm:$0xff] }
 0x39d   :  { %1617 = vmatpush2.msra.mxu0 %v5551_v2  ;;  %1736 = vmatprep.subr.mxu1 %v8136_v53  ;;  %8141 = vst [vmem:[#allocation190_spill] sm:$0xff] %v5563_v14  ;;  %v5567_v2 = vld [vmem:[#allocation3 + $0x380] sm:$0xff]  ;;  %v8144_v53 = vld [vmem:[#allocation75_spill] sm:$0xff] }
 0x39e   :  { %1618 = vmatprep.subr.mxu0 %v5555_v3  ;;  %1737 = vmatpush2.msra.mxu1 %v8138_v54  ;;  %8143 = vst [vmem:[#allocation191_spill] sm:$0xff] %v5567_v2  ;;  %v5571_v3 = vld [vmem:[#allocation3 + $0x358] sm:$0xff] }
 0x39f   :  { %1619 = vmatpush2.msra.mxu0 %v5559_v1  ;;  %1738 = vmatprep.subr.mxu1 %v8140_v58  ;;  %8145 = vst [vmem:[#allocation192_spill] sm:$0xff] %v5571_v3  ;;  %v8146_v54 = vld [vmem:[#allocation77_spill] sm:$0xff]  ;;  %v5575_v1 = vld [vmem:[#allocation3 + $0x350] sm:$0xff]  ;;  %v8148_v58 = vld [vmem:[#allocation79_spill] sm:$0xff] }
 0x3a0   :  { %1620 = vmatprep.subr.mxu0 %v5563_v14  ;;  %1739 = vmatpush2.msra.mxu1 %v8142_v59  ;;  %8147 = vst [vmem:[#allocation193_spill] sm:$0xff] %v5575_v1  ;;  %v5579_v14 = vld [vmem:[#allocation3 + $0x328] sm:$0xff]  ;;  %v8150_v59 = vld [vmem:[#allocation81_spill] sm:$0xff] }
 0x3a1   :  { %1621 = vmatpush2.msra.mxu0 %v5567_v2  ;;  %1740 = vmatprep.subr.mxu1 %v8144_v53  ;;  %8149 = vst [vmem:[#allocation194_spill] sm:$0xff] %v5579_v14  ;;  %v5583_v2 = vld [vmem:[#allocation3 + $0x320] sm:$0xff]  ;;  %v8152_v53 = vld [vmem:[#allocation83_spill] sm:$0xff] }
 0x3a2   :  { %1622 = vmatprep.subr.mxu0 %v5571_v3  ;;  %1741 = vmatpush2.msra.mxu1 %v8146_v54  ;;  %8151 = vst [vmem:[#allocation195_spill] sm:$0xff] %v5583_v2  ;;  %v8153_v54 = vld [vmem:[#allocation85_spill] sm:$0xff]  ;;  %v8154_v3 = vld [vmem:[#allocation87_spill] sm:$0xff] }
 0x3a3   :  { %1623 = vmatpush2.msra.mxu0 %v5575_v1  ;;  %1742 = vmatprep.subr.mxu1 %v8148_v58  ;;  %v8155_v1 = vld [vmem:[#allocation89_spill] sm:$0xff]  ;;  %v8156_v58 = vld [vmem:[#allocation91_spill] sm:$0xff] }
 0x3a4   :  { %1624 = vmatprep.subr.mxu0 %v5579_v14  ;;  %1743 = vmatpush2.msra.mxu1 %v8150_v59  ;;  %v8158_v14 = vld [vmem:[#allocation93_spill] sm:$0xff]  ;;  %v8159_v59 = vld [vmem:[#allocation94_spill] sm:$0xff] }
 0x3a5   :  { %1625 = vmatpush2.msra.mxu0 %v5583_v2  ;;  %1744 = vmatprep.subr.mxu1 %v8152_v53  ;;  %v8161_v2 = vld [vmem:[#allocation97_spill] sm:$0xff]  ;;  %v8162_v53 = vld [vmem:[#allocation98_spill] sm:$0xff] }
 0x3a6   :  { %1627 = vmatmul.mubr.f32.vlgmr.msra.gmra.mxu0 %v5327_v17  ;;  %1753 = vmatprep.subr.mxu0 %v8153_v54  ;;  %v8164_v54 = vld [vmem:[#allocation100_spill] sm:$0xff] }
 0x3a7   :  { %1754 = vmatpush1.msra.mxu0 %v8154_v3  ;;  %1745 = vmatpush2.msra.mxu1 %v8155_v1  ;;  %v8165_v3 = vld [vmem:[#allocation101_spill] sm:$0xff]  ;;  %v8166_v1 = vld [vmem:[#allocation102_spill] sm:$0xff] }
 0x3a8   :  { %1755 = vmatprep.subr.mxu0 %v8156_v58  ;;  %1824 = vmatprep.subr.mxu1 %v8157_v51  ;;  %v8167_v58 = vld [vmem:[#allocation103_spill] sm:$0xff]  ;;  %v8168_v51 = vld [vmem:[#allocation104_spill] sm:$0xff] }
 0x3a9   :  { %1756 = vmatpush1.msra.mxu0 %v8158_v14  ;;  %v8169_v14 = vld [vmem:[#allocation105_spill] sm:$0xff] }
 0x3aa   :  { %1757 = vmatprep.subr.mxu0 %v8159_v59  ;;  %v8170_v59 = vld [vmem:[#allocation106_spill] sm:$0xff] }
 0x3ab   :  { %1758 = vmatpush1.msra.mxu0 %v8160_v50  ;;  %v8171_v50 = vld [vmem:[#allocation107_spill] sm:$0xff] }
 0x3ac   :  { %1759 = vmatprep.subr.mxu0 %v8161_v2  ;;  %v8172_v2 = vld [vmem:[#allocation108_spill] sm:$0xff] }
 0x3ad   :  { %1760 = vmatpush1.msra.mxu0 %v8162_v53  ;;  %v8173_v53 = vld [vmem:[#allocation109_spill] sm:$0xff] }
 0x3ae   :  { %1761 = vmatprep.subr.mxu0 %v8163_v47  ;;  %v8174_v47 = vld [vmem:[#allocation110_spill] sm:$0xff] }
 0x3af   :  { %1762 = vmatpush1.msra.mxu0 %v8164_v54  ;;  %v8175_v54 = vld [vmem:[#allocation111_spill] sm:$0xff] }
 0x3b0   :  { %1763 = vmatprep.subr.mxu0 %v8165_v3  ;;  %v8176_v3 = vld [vmem:[#allocation112_spill] sm:$0xff] }
 0x3b1   :  { %1764 = vmatpush1.msra.mxu0 %v8166_v1  ;;  %v8177_v1 = vld [vmem:[#allocation113_spill] sm:$0xff] }
 0x3b2   :  { %1765 = vmatprep.subr.mxu0 %v8167_v58  ;;  %v8178_v58 = vld [vmem:[#allocation114_spill] sm:$0xff] }
 0x3b3   :  { %1766 = vmatpush1.msra.mxu0 %v8168_v51  ;;  %v8179_v51 = vld [vmem:[#allocation115_spill] sm:$0xff] }
 0x3b4   :  { %1767 = vmatprep.subr.mxu0 %v8169_v14  ;;  %v8180_v14 = vld [vmem:[#allocation116_spill] sm:$0xff] }
 0x3b5   :  { %1768 = vmatpush1.msra.mxu0 %v8170_v59  ;;  %v8181_v59 = vld [vmem:[#allocation117_spill] sm:$0xff] }
 0x3b6   :  { %1769 = vmatprep.subr.mxu0 %v8171_v50  ;;  %v8182_v50 = vld [vmem:[#allocation118_spill] sm:$0xff] }
 0x3b7   :  { %1770 = vmatpush1.msra.mxu0 %v8172_v2  ;;  %v8183_v2 = vld [vmem:[#allocation119_spill] sm:$0xff] }
 0x3b8   :  { %1771 = vmatprep.subr.mxu0 %v8173_v53  ;;  %v8184_v53 = vld [vmem:[#allocation120_spill] sm:$0xff] }
 0x3b9   :  { %1772 = vmatpush1.msra.mxu0 %v8174_v47  ;;  %v8185_v47 = vld [vmem:[#allocation121_spill] sm:$0xff] }
 0x3ba   :  { %1773 = vmatprep.subr.mxu0 %v8175_v54  ;;  %v8186_v54 = vld [vmem:[#allocation122_spill] sm:$0xff] }
 0x3bb   :  { %1774 = vmatpush1.msra.mxu0 %v8176_v3  ;;  %v8187_v3 = vld [vmem:[#allocation123_spill] sm:$0xff] }
 0x3bc   :  { %1775 = vmatprep.subr.mxu0 %v8177_v1  ;;  %v8188_v1 = vld [vmem:[#allocation124_spill] sm:$0xff] }
 0x3bd   :  { %1776 = vmatpush1.msra.mxu0 %v8178_v58  ;;  %v8189_v58 = vld [vmem:[#allocation125_spill] sm:$0xff] }
 0x3be   :  { %1777 = vmatprep.subr.mxu0 %v8179_v51  ;;  %v8190_v51 = vld [vmem:[#allocation126_spill] sm:$0xff] }
 0x3bf   :  { %1778 = vmatpush1.msra.mxu0 %v8180_v14  ;;  %v8191_v14 = vld [vmem:[#allocation127_spill] sm:$0xff] }
 0x3c0   :  { %1779 = vmatprep.subr.mxu0 %v8181_v59  ;;  %v8192_v59 = vld [vmem:[#allocation128_spill] sm:$0xff] }
 0x3c1   :  { %1780 = vmatpush1.msra.mxu0 %v8182_v50  ;;  %v8193_v50 = vld [vmem:[#allocation129_spill] sm:$0xff] }
 0x3c2   :  { %1781 = vmatprep.subr.mxu0 %v8183_v2  ;;  %v8194_v2 = vld [vmem:[#allocation130_spill] sm:$0xff] }
 0x3c3   :  { %1782 = vmatpush1.msra.mxu0 %v8184_v53  ;;  %v8195_v53 = vld [vmem:[#allocation131_spill] sm:$0xff] }
 0x3c4   :  { %1783 = vmatprep.subr.mxu0 %v8185_v47  ;;  %v8196_v47 = vld [vmem:[#allocation132_spill] sm:$0xff] }
 0x3c5   :  { %1784 = vmatpush1.msra.mxu0 %v8186_v54  ;;  %v8197_v54 = vld [vmem:[#allocation133_spill] sm:$0xff] }
 0x3c6   :  { %1785 = vmatprep.subr.mxu0 %v8187_v3  ;;  %v8198_v3 = vld [vmem:[#allocation134_spill] sm:$0xff] }
 0x3c7   :  { %1786 = vmatpush2.msra.mxu0 %v8188_v1  ;;  %v8199_v1 = vld [vmem:[#allocation135_spill] sm:$0xff] }
 0x3c8   :  { %1787 = vmatprep.subr.mxu0 %v8189_v58  ;;  %v8200_v58 = vld [vmem:[#allocation136_spill] sm:$0xff] }
 0x3c9   :  { %1788 = vmatpush2.msra.mxu0 %v8190_v51  ;;  %v8201_v51 = vld [vmem:[#allocation137_spill] sm:$0xff] }
 0x3ca   :  { %1789 = vmatprep.subr.mxu0 %v8191_v14  ;;  %v8202_v14 = vld [vmem:[#allocation138_spill] sm:$0xff] }
 0x3cb   :  { %1790 = vmatpush2.msra.mxu0 %v8192_v59  ;;  %v8203_v59 = vld [vmem:[#allocation139_spill] sm:$0xff] }
 0x3cc   :  { %1791 = vmatprep.subr.mxu0 %v8193_v50  ;;  %v8204_v50 = vld [vmem:[#allocation140_spill] sm:$0xff] }
 0x3cd   :  { %1792 = vmatpush2.msra.mxu0 %v8194_v2  ;;  %v8205_v2 = vld [vmem:[#allocation141_spill] sm:$0xff] }
 0x3ce   :  { %1793 = vmatprep.subr.mxu0 %v8195_v53  ;;  %v8206_v53 = vld [vmem:[#allocation142_spill] sm:$0xff] }
 0x3cf   :  { %1794 = vmatpush2.msra.mxu0 %v8196_v47  ;;  %v8207_v47 = vld [vmem:[#allocation143_spill] sm:$0xff] }
 0x3d0   :  { %1795 = vmatprep.subr.mxu0 %v8197_v54  ;;  %v8208_v54 = vld [vmem:[#allocation144_spill] sm:$0xff] }
 0x3d1   :  { %1796 = vmatpush2.msra.mxu0 %v8198_v3  ;;  %v8209_v3 = vld [vmem:[#allocation145_spill] sm:$0xff] }
 0x3d2   :  { %1797 = vmatprep.subr.mxu0 %v8199_v1  ;;  %v8210_v1 = vld [vmem:[#allocation146_spill] sm:$0xff] }
 0x3d3   :  { %1798 = vmatpush2.msra.mxu0 %v8200_v58  ;;  %v8211_v58 = vld [vmem:[#allocation147_spill] sm:$0xff] }
 0x3d4   :  { %1799 = vmatprep.subr.mxu0 %v8201_v51  ;;  %v8212_v51 = vld [vmem:[#allocation148_spill] sm:$0xff] }
 0x3d5   :  { %1800 = vmatpush2.msra.mxu0 %v8202_v14  ;;  %v8213_v14 = vld [vmem:[#allocation149_spill] sm:$0xff] }
 0x3d6   :  { %1801 = vmatprep.subr.mxu0 %v8203_v59  ;;  %v8214_v59 = vld [vmem:[#allocation150_spill] sm:$0xff] }
 0x3d7   :  { %1802 = vmatpush2.msra.mxu0 %v8204_v50  ;;  %v8215_v50 = vld [vmem:[#allocation151_spill] sm:$0xff] }
 0x3d8   :  { %1803 = vmatprep.subr.mxu0 %v8205_v2  ;;  %v8216_v2 = vld [vmem:[#allocation152_spill] sm:$0xff] }
 0x3d9   :  { %1804 = vmatpush2.msra.mxu0 %v8206_v53  ;;  %v8217_v53 = vld [vmem:[#allocation153_spill] sm:$0xff] }
 0x3da   :  { %1805 = vmatprep.subr.mxu0 %v8207_v47  ;;  %v8218_v47 = vld [vmem:[#allocation154_spill] sm:$0xff] }
 0x3db   :  { %1806 = vmatpush2.msra.mxu0 %v8208_v54  ;;  %v5654_v54 = vld [vmem:[#allocation3 + $0x2d8] sm:$0xff] }
 0x3dc   :  { %1807 = vmatprep.subr.mxu0 %v8209_v3  ;;  %8219 = vst [vmem:[#allocation196_spill] sm:$0xff] %v5654_v54  ;;  %v8220_v3 = vld [vmem:[#allocation35_spill] sm:$0xff] }
 0x3dd   :  { %1808 = vmatpush2.msra.mxu0 %v8210_v1 }
 0x3de   :  { %1809 = vmatprep.subr.mxu0 %v8211_v58 }
 0x3df   :  { %1810 = vmatpush2.msra.mxu0 %v8212_v51 }
 0x3e0   :  { %1811 = vmatprep.subr.mxu0 %v8213_v14 }
 0x3e1   :  { %1812 = vmatpush2.msra.mxu0 %v8214_v59 }
 0x3e2   :  { %1813 = vmatprep.subr.mxu0 %v8215_v50 }
 0x3e3   :  { %1814 = vmatpush2.msra.mxu0 %v8216_v2 }
 0x3e4   :  { %1815 = vmatprep.subr.mxu0 %v8217_v53 }
 0x3e5   :  { %1816 = vmatpush2.msra.mxu0 %v8218_v47 }
 0x3e6   :  { %1944 = vmatprep.subr.mxu0 %v5654_v54 }
 0x426   :  { %v1486_v1 = vpop.f32.mrf.mxu0  ;;  %v1557_v2 = vpop.f32.mrf.mxu1 }
 0x427   :  { %v1487_v51 = vadd.f32 %v1486_v1, %v8220_v3  ;;  %v1558_v47 = vadd.f32 %v1557_v2, %v4829_v4 }
 0x428   :  { %v1488_v58 = vpop.f32.mrf.mxu0  ;;  %v1559_v53 = vpop.f32.mrf.mxu1 }
 0x429   :  { %v1489_v14 = vadd.f32 %v1488_v58, %v8221_v46  ;;  %v1633_v59 = vadd.f32 %v1487_v51, %v8222_v44  ;;  %v1560_v54 = vadd.f32 %v1559_v53, %v4833_v45  ;;  %v1647_v29 = vadd.f32 %v1558_v47, %v8224_v57 }
 0x42b   :  { %v1634_v50 = vadd.f32 %v1489_v14, %v8223_v43  ;;  %v3034_v7 = vmul.f32 -1.442695, %v1633_v59  ;;  %v1648_v1 = vadd.f32 %v1560_v54, %v8225_v0  ;;  %v3036_v3 = vmul.f32 -1.442695, %v1647_v29 }
 0x42d   :  { %v3035_v48 = vmul.f32 -1.442695, %v1634_v50  ;;  %3133 = vpow2.f32 %v3034_v7  ;;  %v3037_v58 = vmul.f32 -1.442695, %v1648_v1  ;;  %v8227_v1 = vld [vmem:[#allocation54_spill] sm:$0xff] }
 0x42f   :  { %3135 = vpow2.f32 %v3035_v48 }
 0x430   :  { %3137 = vpow2.f32 %v3036_v3 }
 0x431   :  { %3139 = vpow2.f32 %v3037_v58 }
 0x43a   :  { %v3134_v46 = vpop.eup %3133 }
 0x43b   :  { %v1641_v43 = vadd.f32 1.0, %v3134_v46  ;;  %v8226_v46 = vld [vmem:[#allocation19_spill] sm:$0xff] }
 0x43c   :  { %v3136_v44 = vpop.eup %3135 }
 0x43d   :  { %v1642_v51 = vadd.f32 1.0, %v3136_v44  ;;  %3141 = vrcp.f32 %v1641_v43  ;;  %v3138_v7 = vpop.eup %3137 }
 0x43e   :  { %v3140_v50 = vpop.eup %3139  ;;  %v1655_v59 = vadd.f32 1.0, %v3138_v7 }
 0x43f   :  { %3143 = vrcp.f32 %v1642_v51  ;;  %v1656_v14 = vadd.f32 1.0, %v3140_v50 }
 0x440   :  { %3145 = vrcp.f32 %v1655_v59 }
 0x441   :  { %3147 = vrcp.f32 %v1656_v14 }
 0x44a   :  { %v3142_v57 = vpop.eup %3141 }
 0x44c   :  { %v3144_v54 = vpop.eup %3143 }
 0x44d   :  { %v3146_v44 = vpop.eup %3145 }
 0x44e   :  { %v3148_v43 = vpop.eup %3147  ;;  %v1667_v51 = vsub.f32 1.0, %v3146_v44  ;;  %v1671_v59 = vmul.f32 %v3146_v44, %v5327_v17  ;;  %v8251_v17 = vld [vmem:[#allocation51_spill] sm:$0xff]  ;;  %v8263_v44 = vld [vmem:[#allocation62_spill] sm:$0xff] }
 0x44f   :  { %v1668_v50 = vsub.f32 1.0, %v3148_v43 }
 0x466   :  { %v1628_v48 = vpop.f32.mrf.mxu0 }
 0x467   :  { %v1629_v53 = vadd.f32 %v1628_v48, %v4843_v33 }
 0x468   :  { %v1630_v47 = vpop.f32.mrf.mxu0 }
 0x469   :  { %v1661_v0 = vmul.f32 %v3142_v57, %v1629_v53  ;;  %v1631_v29 = vadd.f32 %v1630_v47, %v4847_v62  ;;  %v1672_v47 = vmul.f32 %v3148_v43, %v5329_v60  ;;  %v8253_v60 = vld [vmem:[#allocation53_spill] sm:$0xff]  ;;  %v8264_v43 = vld [vmem:[#allocation171_spill] sm:$0xff] }
 0x46b   :  { %v1663_v2 = vadd.f32 %v1661_v0, %v8226_v46  ;;  %v1662_v3 = vmul.f32 %v3144_v54, %v1631_v29  ;;  %v8256_v29 = vld [vmem:[#allocation167_spill] sm:$0xff]  ;;  %v8257_v54 = vld [vmem:[#allocation57_spill] sm:$0xff]  ;;  %v8258_v46 = vld [vmem:[#allocation168_spill] sm:$0xff] }
 0x46d   :  { %3149 = vtanh.f32 %v1663_v2  ;;  %v1664_v58 = vadd.f32 %v1662_v3, %v8227_v1  ;;  %v8259_v2 = vld [vmem:[#allocation59_spill] sm:$0xff]  ;;  %v8260_v3 = vld [vmem:[#allocation169_spill] sm:$0xff] }
 0x46e   :  { %v8261_v1 = vld [vmem:[#allocation61_spill] sm:$0xff] }
 0x46f   :  { %3151 = vtanh.f32 %v1664_v58  ;;  %v8262_v58 = vld [vmem:[#allocation170_spill] sm:$0xff] }
 0x47a   :  { %v3150_v7 = vpop.eup %3149 }
 0x47b   :  { %v1669_v48 = vmul.f32 %v3150_v7, %v1667_v51  ;;  %v8265_v51 = vld [vmem:[#allocation64_spill] sm:$0xff] }
 0x47c   :  { %v3152_v53 = vpop.eup %3151  ;;  %v8266_v7 = vld [vmem:[#allocation172_spill] sm:$0xff] }
 0x47d   :  { %v1670_v57 = vmul.f32 %v3152_v53, %v1668_v50  ;;  %v5671_v14 = vadd.f32 %v1671_v59, %v1669_v48  ;;  %v8267_v50 = vld [vmem:[#allocation66_spill] sm:$0xff]  ;;  %v8268_v48 = vld [vmem:[#allocation173_spill] sm:$0xff]  ;;  %v8269_v59 = vld [vmem:[#allocation68_spill] sm:$0xff] }
 0x47e   :  { %v8270_v53 = vld [vmem:[#allocation174_spill] sm:$0xff] }
 0x47f   :  { %v5673_v0 = vadd.f32 %v1672_v47, %v1670_v57  ;;  %v8271_v57 = vld [vmem:[#allocation70_spill] sm:$0xff]  ;;  %v8272_v47 = vld [vmem:[#allocation175_spill] sm:$0xff] }
 0x481   :  { %1746 = vmatprep.mubr.f32.mxu1 %v5673_v0  ;;  %1817 = vmatprep.mubr.f32.mxu0 %v5673_v0 }
 0x482   :  { %1747 = vmatmul.mubr.f32.vlgmr.msra.gmra.mxu1 %v5671_v14  ;;  %1818 = vmatmul.mubr.f32.vlgmr.msra.gmra.mxu0 %v5671_v14 }
 0x483   :  { %1825 = vmatpush1.msra.mxu1 %v5335_v61  ;;  %1888 = vmatprep.mubr.f32.mxu1 %v5673_v0 }
 0x484   :  { %1826 = vmatprep.subr.mxu1 %v5339_v11  ;;  %1945 = vmatpush1.msra.mxu0 %v4866_v27  ;;  %v8228_v27 = vld [vmem:[#allocation13_spill] sm:$0xff] }
 0x485   :  { %1827 = vmatpush1.msra.mxu1 %v5343_v63  ;;  %1946 = vmatprep.subr.mxu0 %v4870_v36  ;;  %v8229_v36 = vld [vmem:[#allocation26_spill] sm:$0xff] }
 0x486   :  { %1828 = vmatprep.subr.mxu1 %v5347_v23  ;;  %1947 = vmatpush1.msra.mxu0 %v4874_v19  ;;  %v8230_v19 = vld [vmem:[#allocation28_spill] sm:$0xff] }
 0x487   :  { %1829 = vmatpush1.msra.mxu1 %v5351_v55  ;;  %1948 = vmatprep.subr.mxu0 %v4878_v10  ;;  %v8231_v10 = vld [vmem:[#allocation32_spill] sm:$0xff] }
 0x488   :  { %1830 = vmatprep.subr.mxu1 %v5355_v28  ;;  %1949 = vmatpush1.msra.mxu0 %v4882_v18  ;;  %v8232_v18 = vld [vmem:[#allocation34_spill] sm:$0xff] }
 0x489   :  { %1831 = vmatpush1.msra.mxu1 %v5359_v31  ;;  %1950 = vmatprep.subr.mxu0 %v4886_v42  ;;  %v8233_v42 = vld [vmem:[#allocation17_spill] sm:$0xff] }
 0x48a   :  { %1832 = vmatprep.subr.mxu1 %v5363_v15  ;;  %1951 = vmatpush1.msra.mxu0 %v4890_v35  ;;  %v8234_v35 = vld [vmem:[#allocation50_spill] sm:$0xff] }
 0x48b   :  { %1833 = vmatpush1.msra.mxu1 %v5367_v24  ;;  %1952 = vmatprep.subr.mxu0 %v4894_v16  ;;  %v8235_v16 = vld [vmem:[#allocation39_spill] sm:$0xff] }
 0x48c   :  { %1834 = vmatprep.subr.mxu1 %v5371_v12  ;;  %1953 = vmatpush1.msra.mxu0 %v4898_v56  ;;  %v8236_v56 = vld [vmem:[#allocation41_spill] sm:$0xff] }
 0x48d   :  { %1835 = vmatpush1.msra.mxu1 %v5375_v8  ;;  %1954 = vmatprep.subr.mxu0 %v4902_v21  ;;  %v8237_v21 = vld [vmem:[#allocation155_spill] sm:$0xff] }
 0x48e   :  { %1836 = vmatprep.subr.mxu1 %v5379_v9  ;;  %1955 = vmatpush1.msra.mxu0 %v4906_v41  ;;  %v8238_v41 = vld [vmem:[#allocation156_spill] sm:$0xff] }
 0x48f   :  { %1837 = vmatpush1.msra.mxu1 %v5383_v5  ;;  %1956 = vmatprep.subr.mxu0 %v4910_v22  ;;  %v8239_v22 = vld [vmem:[#allocation157_spill] sm:$0xff] }
 0x490   :  { %1838 = vmatprep.subr.mxu1 %v8228_v27  ;;  %1957 = vmatpush1.msra.mxu0 %v4914_v37  ;;  %v8240_v37 = vld [vmem:[#allocation158_spill] sm:$0xff] }
 0x491   :  { %1839 = vmatpush1.msra.mxu1 %v8229_v36  ;;  %1958 = vmatprep.subr.mxu0 %v4918_v40  ;;  %v8241_v40 = vld [vmem:[#allocation159_spill] sm:$0xff] }
 0x492   :  { %1840 = vmatprep.subr.mxu1 %v8230_v19  ;;  %1959 = vmatpush1.msra.mxu0 %v8083_v26  ;;  %v8254_v26 = vld [vmem:[#allocation166_spill] sm:$0xff] }
 0x493   :  { %1841 = vmatpush1.msra.mxu1 %v8231_v10  ;;  %1960 = vmatprep.subr.mxu0 %v8085_v20  ;;  %v8255_v20 = vld [vmem:[#allocation55_spill] sm:$0xff] }
 0x494   :  { %1842 = vmatprep.subr.mxu1 %v8232_v18  ;;  %1961 = vmatpush1.msra.mxu0 %v4930_v6  ;;  %v8244_v6 = vld [vmem:[#allocation161_spill] sm:$0xff] }
 0x495   :  { %1843 = vmatpush1.msra.mxu1 %v8233_v42  ;;  %1962 = vmatprep.subr.mxu0 %v4934_v52  ;;  %v8245_v52 = vld [vmem:[#allocation45_spill] sm:$0xff] }
 0x496   :  { %1844 = vmatprep.subr.mxu1 %v8234_v35  ;;  %1963 = vmatpush1.msra.mxu0 %v4938_v13  ;;  %v8242_v13 = vld [vmem:[#allocation160_spill] sm:$0xff] }
 0x497   :  { %1845 = vmatpush1.msra.mxu1 %v8235_v16  ;;  %1964 = vmatprep.subr.mxu0 %v4942_v39  ;;  %v8243_v39 = vld [vmem:[#allocation43_spill] sm:$0xff] }
 0x498   :  { %1846 = vmatprep.subr.mxu1 %v8236_v56  ;;  %1965 = vmatpush1.msra.mxu0 %v4946_v25  ;;  %v8246_v25 = vld [vmem:[#allocation162_spill] sm:$0xff] }
 0x499   :  { %1847 = vmatpush1.msra.mxu1 %v8237_v21  ;;  %1966 = vmatprep.subr.mxu0 %v4950_v32  ;;  %v8247_v32 = vld [vmem:[#allocation47_spill] sm:$0xff] }
 0x49a   :  { %1848 = vmatprep.subr.mxu1 %v8238_v41  ;;  %1967 = vmatpush1.msra.mxu0 %v4954_v34  ;;  %v8248_v34 = vld [vmem:[#allocation163_spill] sm:$0xff] }
 0x49b   :  { %1849 = vmatpush1.msra.mxu1 %v8239_v22  ;;  %1968 = vmatprep.subr.mxu0 %v4958_v49  ;;  %v8249_v49 = vld [vmem:[#allocation49_spill] sm:$0xff] }
 0x49c   :  { %1850 = vmatprep.subr.mxu1 %v8240_v37  ;;  %1969 = vmatpush1.msra.mxu0 %v4962_v30  ;;  %v8250_v30 = vld [vmem:[#allocation164_spill] sm:$0xff] }
 0x49d   :  { %1851 = vmatpush1.msra.mxu1 %v8241_v40  ;;  %1970 = vmatprep.subr.mxu0 %v4966_v38  ;;  %v8252_v38 = vld [vmem:[#allocation165_spill] sm:$0xff] }
 0x49e   :  { %1852 = vmatprep.subr.mxu1 %v8242_v13  ;;  %1971 = vmatpush1.msra.mxu0 %v8243_v39  ;;  %v8273_v39 = vld [vmem:[#allocation72_spill] sm:$0xff] }
 0x49f   :  { %1853 = vmatpush1.msra.mxu1 %v8244_v6  ;;  %1972 = vmatprep.subr.mxu0 %v8245_v52  ;;  %v8274_v52 = vld [vmem:[#allocation176_spill] sm:$0xff] }
 0x4a0   :  { %1854 = vmatprep.subr.mxu1 %v8246_v25  ;;  %1973 = vmatpush1.msra.mxu0 %v8247_v32  ;;  %v8275_v32 = vld [vmem:[#allocation74_spill] sm:$0xff] }
 0x4a1   :  { %1855 = vmatpush1.msra.mxu1 %v8248_v34  ;;  %1974 = vmatprep.subr.mxu0 %v8249_v49  ;;  %v8276_v49 = vld [vmem:[#allocation177_spill] sm:$0xff] }
 0x4a2   :  { %1856 = vmatprep.subr.mxu1 %v8250_v30  ;;  %1975 = vmatpush1.msra.mxu0 %v8251_v17  ;;  %v8277_v17 = vld [vmem:[#allocation76_spill] sm:$0xff] }
 0x4a3   :  { %1857 = vmatpush2.msra.mxu1 %v8252_v38  ;;  %1976 = vmatprep.subr.mxu0 %v8253_v60  ;;  %v8278_v60 = vld [vmem:[#allocation178_spill] sm:$0xff] }
 0x4a4   :  { %1858 = vmatprep.subr.mxu1 %v8254_v26  ;;  %1977 = vmatpush2.msra.mxu0 %v8255_v20  ;;  %v8279_v20 = vld [vmem:[#allocation78_spill] sm:$0xff] }
 0x4a5   :  { %1859 = vmatpush2.msra.mxu1 %v8256_v29  ;;  %1978 = vmatprep.subr.mxu0 %v8257_v54  ;;  %v8280_v54 = vld [vmem:[#allocation179_spill] sm:$0xff] }
 0x4a6   :  { %1860 = vmatprep.subr.mxu1 %v8258_v46  ;;  %1979 = vmatpush2.msra.mxu0 %v8259_v2  ;;  %v8281_v2 = vld [vmem:[#allocation80_spill] sm:$0xff] }
 0x4a7   :  { %1861 = vmatpush2.msra.mxu1 %v8260_v3  ;;  %1980 = vmatprep.subr.mxu0 %v8261_v1  ;;  %v8282_v1 = vld [vmem:[#allocation180_spill] sm:$0xff] }
 0x4a8   :  { %1862 = vmatprep.subr.mxu1 %v8262_v58  ;;  %1981 = vmatpush2.msra.mxu0 %v8263_v44  ;;  %v8283_v44 = vld [vmem:[#allocation82_spill] sm:$0xff] }
 0x4a9   :  { %1863 = vmatpush2.msra.mxu1 %v8264_v43  ;;  %1982 = vmatprep.subr.mxu0 %v8265_v51  ;;  %v8284_v51 = vld [vmem:[#allocation181_spill] sm:$0xff] }
 0x4aa   :  { %1864 = vmatprep.subr.mxu1 %v8266_v7  ;;  %1983 = vmatpush2.msra.mxu0 %v8267_v50  ;;  %v8285_v50 = vld [vmem:[#allocation84_spill] sm:$0xff]  ;;  %v8386_v7 = vld [vmem:[#allocation46_spill] sm:$0xff] }
 0x4ab   :  { %1865 = vmatpush2.msra.mxu1 %v8268_v48  ;;  %1984 = vmatprep.subr.mxu0 %v8269_v59  ;;  %v8286_v59 = vld [vmem:[#allocation182_spill] sm:$0xff] }
 0x4ac   :  { %1866 = vmatprep.subr.mxu1 %v8270_v53  ;;  %1985 = vmatpush2.msra.mxu0 %v8271_v57  ;;  %v8287_v57 = vld [vmem:[#allocation86_spill] sm:$0xff] }
 0x4ad   :  { %1867 = vmatpush2.msra.mxu1 %v8272_v47  ;;  %1986 = vmatprep.subr.mxu0 %v8273_v39  ;;  %v8288_v39 = vld [vmem:[#allocation183_spill] sm:$0xff] }
 0x4ae   :  { %1868 = vmatprep.subr.mxu1 %v8274_v52  ;;  %1987 = vmatpush2.msra.mxu0 %v8275_v32  ;;  %v8289_v32 = vld [vmem:[#allocation88_spill] sm:$0xff] }
 0x4af   :  { %1869 = vmatpush2.msra.mxu1 %v8276_v49  ;;  %1988 = vmatprep.subr.mxu0 %v8277_v17  ;;  %v8290_v17 = vld [vmem:[#allocation184_spill] sm:$0xff]  ;;  %v8383_v49 = vld [vmem:[#allocation30_spill] sm:$0xff] }
 0x4b0   :  { %1870 = vmatprep.subr.mxu1 %v8278_v60  ;;  %1989 = vmatpush2.msra.mxu0 %v8279_v20  ;;  %v8291_v20 = vld [vmem:[#allocation90_spill] sm:$0xff]  ;;  %v8382_v60 = vld [vmem:[#allocation37_spill] sm:$0xff]  ;;  %v8384_v52 = vld [vmem:[#allocation8_spill] sm:$0xff] }
 0x4b1   :  { %1871 = vmatpush2.msra.mxu1 %v8280_v54  ;;  %1990 = vmatprep.subr.mxu0 %v8281_v2  ;;  %v8292_v2 = vld [vmem:[#allocation185_spill] sm:$0xff]  ;;  %v8381_v54 = vld [vmem:[#allocation35_spill] sm:$0xff] }
 0x4b2   :  { %1872 = vmatprep.subr.mxu1 %v8282_v1  ;;  %1991 = vmatpush2.msra.mxu0 %v8283_v44  ;;  %v8293_v1 = vld [vmem:[#allocation95_spill] sm:$0xff]  ;;  %v8294_v44 = vld [vmem:[#allocation186_spill] sm:$0xff] }
 0x4b3   :  { %1873 = vmatpush2.msra.mxu1 %v8284_v51  ;;  %1992 = vmatprep.subr.mxu0 %v8285_v50  ;;  %v8295_v51 = vld [vmem:[#allocation65_spill] sm:$0xff]  ;;  %v8296_v50 = vld [vmem:[#allocation187_spill] sm:$0xff] }
 0x4b4   :  { %1874 = vmatprep.subr.mxu1 %v8286_v59  ;;  %1993 = vmatpush2.msra.mxu0 %v8287_v57  ;;  %v8297_v59 = vld [vmem:[#allocation67_spill] sm:$0xff]  ;;  %v8298_v57 = vld [vmem:[#allocation188_spill] sm:$0xff] }
 0x4b5   :  { %1875 = vmatpush2.msra.mxu1 %v8288_v39  ;;  %1994 = vmatprep.subr.mxu0 %v8289_v32  ;;  %v8299_v39 = vld [vmem:[#allocation69_spill] sm:$0xff] }
 0x4b6   :  { %1876 = vmatprep.subr.mxu1 %v8290_v17  ;;  %1995 = vmatpush2.msra.mxu0 %v8291_v20  ;;  %v8300_v32 = vld [vmem:[#allocation189_spill] sm:$0xff]  ;;  %v8301_v17 = vld [vmem:[#allocation71_spill] sm:$0xff]  ;;  %v8302_v20 = vld [vmem:[#allocation190_spill] sm:$0xff] }
 0x4b7   :  { %1877 = vmatpush2.msra.mxu1 %v8292_v2  ;;  %1996 = vmatprep.subr.mxu0 %v8293_v1  ;;  %v8303_v2 = vld [vmem:[#allocation73_spill] sm:$0xff]  ;;  %v8304_v1 = vld [vmem:[#allocation191_spill] sm:$0xff] }
 0x4b8   :  { %1878 = vmatprep.subr.mxu1 %v8294_v44  ;;  %1997 = vmatpush2.msra.mxu0 %v8295_v51  ;;  %v8305_v44 = vld [vmem:[#allocation75_spill] sm:$0xff]  ;;  %v8306_v51 = vld [vmem:[#allocation192_spill] sm:$0xff] }
 0x4b9   :  { %1879 = vmatpush2.msra.mxu1 %v8296_v50  ;;  %1998 = vmatprep.subr.mxu0 %v8297_v59  ;;  %v8307_v50 = vld [vmem:[#allocation77_spill] sm:$0xff] }
 0x4ba   :  { %1880 = vmatprep.subr.mxu1 %v8298_v57  ;;  %1999 = vmatpush2.msra.mxu0 %v8299_v39  ;;  %v8308_v59 = vld [vmem:[#allocation193_spill] sm:$0xff]  ;;  %v8309_v57 = vld [vmem:[#allocation79_spill] sm:$0xff]  ;;  %v8310_v39 = vld [vmem:[#allocation194_spill] sm:$0xff] }
 0x4bb   :  { %1881 = vmatpush2.msra.mxu1 %v8300_v32  ;;  %2000 = vmatprep.subr.mxu0 %v8301_v17  ;;  %v8311_v32 = vld [vmem:[#allocation81_spill] sm:$0xff]  ;;  %v8312_v17 = vld [vmem:[#allocation195_spill] sm:$0xff] }
 0x4bc   :  { %1882 = vmatprep.subr.mxu1 %v8302_v20  ;;  %2001 = vmatpush2.msra.mxu0 %v8303_v2  ;;  %v8313_v20 = vld [vmem:[#allocation83_spill] sm:$0xff]  ;;  %v8314_v2 = vld [vmem:[#allocation85_spill] sm:$0xff] }
 0x4bd   :  { %1883 = vmatpush2.msra.mxu1 %v8304_v1  ;;  %2002 = vmatprep.subr.mxu0 %v8305_v44  ;;  %v8315_v44 = vld [vmem:[#allocation87_spill] sm:$0xff] }
 0x4be   :  { %1884 = vmatprep.subr.mxu1 %v8306_v51  ;;  %2003 = vmatpush2.msra.mxu0 %v8307_v50  ;;  %v8316_v51 = vld [vmem:[#allocation89_spill] sm:$0xff]  ;;  %v8317_v50 = vld [vmem:[#allocation91_spill] sm:$0xff] }
 0x4bf   :  { %1885 = vmatpush2.msra.mxu1 %v8308_v59  ;;  %2004 = vmatprep.subr.mxu0 %v8309_v57  ;;  %v8318_v59 = vld [vmem:[#allocation92_spill] sm:$0xff]  ;;  %v8319_v57 = vld [vmem:[#allocation93_spill] sm:$0xff]  ;;  %v8324_v1 = vld [vmem:[#allocation99_spill] sm:$0xff] }
 0x4c0   :  { %1886 = vmatprep.subr.mxu1 %v8310_v39  ;;  %2005 = vmatpush2.msra.mxu0 %v8311_v32  ;;  %v8320_v39 = vld [vmem:[#allocation94_spill] sm:$0xff]  ;;  %v8321_v32 = vld [vmem:[#allocation96_spill] sm:$0xff] }
 0x4c1   :  { %1887 = vmatpush2.msra.mxu1 %v8312_v17  ;;  %2006 = vmatprep.subr.mxu0 %v8313_v20  ;;  %v8322_v17 = vld [vmem:[#allocation97_spill] sm:$0xff]  ;;  %v8323_v20 = vld [vmem:[#allocation98_spill] sm:$0xff] }
 0x4c2   :  { %1889 = vmatmul.mubr.f32.vlgmr.msra.gmra.mxu1 %v5671_v14  ;;  %2015 = vmatprep.subr.mxu1 %v8314_v2  ;;  %v8325_v2 = vld [vmem:[#allocation100_spill] sm:$0xff] }
 0x4c3   :  { %2016 = vmatpush1.msra.mxu1 %v8315_v44  ;;  %2007 = vmatpush2.msra.mxu0 %v8316_v51  ;;  %v8326_v44 = vld [vmem:[#allocation101_spill] sm:$0xff]  ;;  %v8327_v51 = vld [vmem:[#allocation102_spill] sm:$0xff] }
 0x4c4   :  { %2017 = vmatprep.subr.mxu1 %v8317_v50  ;;  %2086 = vmatprep.subr.mxu0 %v8318_v59  ;;  %v8328_v50 = vld [vmem:[#allocation103_spill] sm:$0xff]  ;;  %v8329_v59 = vld [vmem:[#allocation104_spill] sm:$0xff] }
 0x4c5   :  { %2018 = vmatpush1.msra.mxu1 %v8319_v57  ;;  %v8330_v57 = vld [vmem:[#allocation105_spill] sm:$0xff] }
 0x4c6   :  { %2019 = vmatprep.subr.mxu1 %v8320_v39  ;;  %v8331_v39 = vld [vmem:[#allocation106_spill] sm:$0xff] }
 0x4c7   :  { %2020 = vmatpush1.msra.mxu1 %v8321_v32  ;;  %v8332_v32 = vld [vmem:[#allocation107_spill] sm:$0xff] }
 0x4c8   :  { %2021 = vmatprep.subr.mxu1 %v8322_v17  ;;  %v8333_v17 = vld [vmem:[#allocation108_spill] sm:$0xff] }
 0x4c9   :  { %2022 = vmatpush1.msra.mxu1 %v8323_v20  ;;  %v8334_v20 = vld [vmem:[#allocation109_spill] sm:$0xff] }
 0x4ca   :  { %2023 = vmatprep.subr.mxu1 %v8324_v1  ;;  %v8335_v1 = vld [vmem:[#allocation110_spill] sm:$0xff] }
 0x4cb   :  { %2024 = vmatpush1.msra.mxu1 %v8325_v2  ;;  %v8336_v2 = vld [vmem:[#allocation111_spill] sm:$0xff] }
 0x4cc   :  { %2025 = vmatprep.subr.mxu1 %v8326_v44  ;;  %v8337_v44 = vld [vmem:[#allocation112_spill] sm:$0xff] }
 0x4cd   :  { %2026 = vmatpush1.msra.mxu1 %v8327_v51  ;;  %v8338_v51 = vld [vmem:[#allocation113_spill] sm:$0xff] }
 0x4ce   :  { %2027 = vmatprep.subr.mxu1 %v8328_v50  ;;  %v8339_v50 = vld [vmem:[#allocation114_spill] sm:$0xff] }
 0x4cf   :  { %2028 = vmatpush1.msra.mxu1 %v8329_v59  ;;  %v8340_v59 = vld [vmem:[#allocation115_spill] sm:$0xff] }
 0x4d0   :  { %2029 = vmatprep.subr.mxu1 %v8330_v57  ;;  %v8341_v57 = vld [vmem:[#allocation116_spill] sm:$0xff] }
 0x4d1   :  { %2030 = vmatpush1.msra.mxu1 %v8331_v39  ;;  %v8342_v39 = vld [vmem:[#allocation117_spill] sm:$0xff] }
 0x4d2   :  { %2031 = vmatprep.subr.mxu1 %v8332_v32  ;;  %v8343_v32 = vld [vmem:[#allocation118_spill] sm:$0xff] }
 0x4d3   :  { %2032 = vmatpush1.msra.mxu1 %v8333_v17  ;;  %v8344_v17 = vld [vmem:[#allocation119_spill] sm:$0xff] }
 0x4d4   :  { %2033 = vmatprep.subr.mxu1 %v8334_v20  ;;  %v8345_v20 = vld [vmem:[#allocation120_spill] sm:$0xff] }
 0x4d5   :  { %2034 = vmatpush1.msra.mxu1 %v8335_v1  ;;  %v8346_v1 = vld [vmem:[#allocation121_spill] sm:$0xff] }
 0x4d6   :  { %2035 = vmatprep.subr.mxu1 %v8336_v2  ;;  %v8347_v2 = vld [vmem:[#allocation122_spill] sm:$0xff] }
 0x4d7   :  { %2036 = vmatpush1.msra.mxu1 %v8337_v44  ;;  %v8348_v44 = vld [vmem:[#allocation123_spill] sm:$0xff] }
 0x4d8   :  { %2037 = vmatprep.subr.mxu1 %v8338_v51  ;;  %v8349_v51 = vld [vmem:[#allocation124_spill] sm:$0xff] }
 0x4d9   :  { %2038 = vmatpush1.msra.mxu1 %v8339_v50  ;;  %v8350_v50 = vld [vmem:[#allocation125_spill] sm:$0xff] }
 0x4da   :  { %2039 = vmatprep.subr.mxu1 %v8340_v59  ;;  %v8351_v59 = vld [vmem:[#allocation126_spill] sm:$0xff] }
 0x4db   :  { %2040 = vmatpush1.msra.mxu1 %v8341_v57  ;;  %v8352_v57 = vld [vmem:[#allocation127_spill] sm:$0xff] }
 0x4dc   :  { %2041 = vmatprep.subr.mxu1 %v8342_v39  ;;  %v8353_v39 = vld [vmem:[#allocation128_spill] sm:$0xff] }
 0x4dd   :  { %2042 = vmatpush1.msra.mxu1 %v8343_v32  ;;  %v8354_v32 = vld [vmem:[#allocation129_spill] sm:$0xff] }
 0x4de   :  { %2043 = vmatprep.subr.mxu1 %v8344_v17  ;;  %v8355_v17 = vld [vmem:[#allocation130_spill] sm:$0xff] }
 0x4df   :  { %2044 = vmatpush1.msra.mxu1 %v8345_v20  ;;  %v8356_v20 = vld [vmem:[#allocation131_spill] sm:$0xff] }
 0x4e0   :  { %2045 = vmatprep.subr.mxu1 %v8346_v1  ;;  %v8357_v1 = vld [vmem:[#allocation132_spill] sm:$0xff] }
 0x4e1   :  { %2046 = vmatpush1.msra.mxu1 %v8347_v2  ;;  %v8358_v2 = vld [vmem:[#allocation133_spill] sm:$0xff] }
 0x4e2   :  { %2047 = vmatprep.subr.mxu1 %v8348_v44  ;;  %v8359_v44 = vld [vmem:[#allocation134_spill] sm:$0xff] }
 0x4e3   :  { %2048 = vmatpush2.msra.mxu1 %v8349_v51  ;;  %v8360_v51 = vld [vmem:[#allocation135_spill] sm:$0xff] }
 0x4e4   :  { %2049 = vmatprep.subr.mxu1 %v8350_v50  ;;  %v8361_v50 = vld [vmem:[#allocation136_spill] sm:$0xff] }
 0x4e5   :  { %2050 = vmatpush2.msra.mxu1 %v8351_v59  ;;  %v8362_v59 = vld [vmem:[#allocation137_spill] sm:$0xff] }
 0x4e6   :  { %2051 = vmatprep.subr.mxu1 %v8352_v57  ;;  %v8363_v57 = vld [vmem:[#allocation138_spill] sm:$0xff] }
 0x4e7   :  { %2052 = vmatpush2.msra.mxu1 %v8353_v39  ;;  %v8364_v39 = vld [vmem:[#allocation139_spill] sm:$0xff] }
 0x4e8   :  { %2053 = vmatprep.subr.mxu1 %v8354_v32  ;;  %v8365_v32 = vld [vmem:[#allocation140_spill] sm:$0xff] }
 0x4e9   :  { %2054 = vmatpush2.msra.mxu1 %v8355_v17  ;;  %v8366_v17 = vld [vmem:[#allocation141_spill] sm:$0xff] }
 0x4ea   :  { %2055 = vmatprep.subr.mxu1 %v8356_v20  ;;  %v8367_v20 = vld [vmem:[#allocation142_spill] sm:$0xff] }
 0x4eb   :  { %2056 = vmatpush2.msra.mxu1 %v8357_v1  ;;  %v8368_v1 = vld [vmem:[#allocation143_spill] sm:$0xff] }
 0x4ec   :  { %2057 = vmatprep.subr.mxu1 %v8358_v2  ;;  %v8369_v2 = vld [vmem:[#allocation144_spill] sm:$0xff] }
 0x4ed   :  { %2058 = vmatpush2.msra.mxu1 %v8359_v44  ;;  %v8370_v44 = vld [vmem:[#allocation145_spill] sm:$0xff] }
 0x4ee   :  { %2059 = vmatprep.subr.mxu1 %v8360_v51  ;;  %v8371_v51 = vld [vmem:[#allocation146_spill] sm:$0xff] }
 0x4ef   :  { %2060 = vmatpush2.msra.mxu1 %v8361_v50  ;;  %v8372_v50 = vld [vmem:[#allocation147_spill] sm:$0xff] }
 0x4f0   :  { %2061 = vmatprep.subr.mxu1 %v8362_v59  ;;  %v8373_v59 = vld [vmem:[#allocation148_spill] sm:$0xff] }
 0x4f1   :  { %2062 = vmatpush2.msra.mxu1 %v8363_v57  ;;  %v8374_v57 = vld [vmem:[#allocation149_spill] sm:$0xff] }
 0x4f2   :  { %2063 = vmatprep.subr.mxu1 %v8364_v39  ;;  %v8375_v39 = vld [vmem:[#allocation150_spill] sm:$0xff] }
 0x4f3   :  { %2064 = vmatpush2.msra.mxu1 %v8365_v32  ;;  %v8376_v32 = vld [vmem:[#allocation151_spill] sm:$0xff] }
 0x4f4   :  { %2065 = vmatprep.subr.mxu1 %v8366_v17  ;;  %v8377_v17 = vld [vmem:[#allocation152_spill] sm:$0xff] }
 0x4f5   :  { %2066 = vmatpush2.msra.mxu1 %v8367_v20  ;;  %v8378_v20 = vld [vmem:[#allocation153_spill] sm:$0xff] }
 0x4f6   :  { %2067 = vmatprep.subr.mxu1 %v8368_v1  ;;  %v8379_v1 = vld [vmem:[#allocation154_spill] sm:$0xff] }
 0x4f7   :  { %2068 = vmatpush2.msra.mxu1 %v8369_v2  ;;  %v8380_v2 = vld [vmem:[#allocation196_spill] sm:$0xff] }
 0x4f8   :  { %2069 = vmatprep.subr.mxu1 %v8370_v44 }
 0x4f9   :  { %2070 = vmatpush2.msra.mxu1 %v8371_v51 }
 0x4fa   :  { %2071 = vmatprep.subr.mxu1 %v8372_v50 }
 0x4fb   :  { %2072 = vmatpush2.msra.mxu1 %v8373_v59 }
 0x4fc   :  { %2073 = vmatprep.subr.mxu1 %v8374_v57 }
 0x4fd   :  { %2074 = vmatpush2.msra.mxu1 %v8375_v39 }
 0x4fe   :  { %2075 = vmatprep.subr.mxu1 %v8376_v32 }
 0x4ff   :  { %2076 = vmatpush2.msra.mxu1 %v8377_v17 }
 0x500   :  { %2077 = vmatprep.subr.mxu1 %v8378_v20 }
 0x501   :  { %2078 = vmatpush2.msra.mxu1 %v8379_v1 }
 0x502   :  { %2206 = vmatprep.subr.mxu1 %v8380_v2  ;;  %v8385_v2 = vld [vmem:[#allocation15_spill] sm:$0xff] }
 0x542   :  { %v1748_v44 = vpop.f32.mrf.mxu1  ;;  %v1819_v32 = vpop.f32.mrf.mxu0 }
 0x543   :  { %v1749_v50 = vadd.f32 %v1748_v44, %v8381_v54  ;;  %v1820_v20 = vadd.f32 %v1819_v32, %v4829_v4 }
 0x544   :  { %v1750_v51 = vpop.f32.mrf.mxu1  ;;  %v1821_v17 = vpop.f32.mrf.mxu0 }
 0x545   :  { %v1751_v59 = vadd.f32 %v1750_v51, %v8382_v60  ;;  %v1895_v57 = vadd.f32 %v1749_v50, %v8383_v49  ;;  %v1822_v1 = vadd.f32 %v1821_v17, %v4833_v45  ;;  %v1909_v48 = vadd.f32 %v1820_v20, %v8385_v2 }
 0x547   :  { %v1896_v39 = vadd.f32 %v1751_v59, %v8384_v52  ;;  %v3038_v47 = vmul.f32 -1.442695, %v1895_v57  ;;  %v1910_v44 = vadd.f32 %v1822_v1, %v8386_v7  ;;  %v3040_v54 = vmul.f32 -1.442695, %v1909_v48 }
 0x549   :  { %v3039_v53 = vmul.f32 -1.442695, %v1896_v39  ;;  %3153 = vpow2.f32 %v3038_v47  ;;  %v3041_v51 = vmul.f32 -1.442695, %v1910_v44  ;;  %v8388_v44 = vld [vmem:[#allocation58_spill] sm:$0xff] }
 0x54b   :  { %3155 = vpow2.f32 %v3039_v53 }
 0x54c   :  { %3157 = vpow2.f32 %v3040_v54 }
 0x54d   :  { %3159 = vpow2.f32 %v3041_v51 }
 0x556   :  { %v3154_v60 = vpop.eup %3153 }
 0x557   :  { %v1903_v52 = vadd.f32 1.0, %v3154_v60  ;;  %v8387_v60 = vld [vmem:[#allocation21_spill] sm:$0xff] }
 0x558   :  { %v3156_v49 = vpop.eup %3155 }
 0x559   :  { %v1904_v50 = vadd.f32 1.0, %v3156_v49  ;;  %3161 = vrcp.f32 %v1903_v52  ;;  %v3158_v47 = vpop.eup %3157 }
 0x55a   :  { %v3160_v59 = vpop.eup %3159  ;;  %v1917_v57 = vadd.f32 1.0, %v3158_v47 }
 0x55b   :  { %3163 = vrcp.f32 %v1904_v50  ;;  %v1918_v39 = vadd.f32 1.0, %v3160_v59 }
 0x55c   :  { %3165 = vrcp.f32 %v1917_v57 }
 0x55d   :  { %3167 = vrcp.f32 %v1918_v39 }
 0x566   :  { %v3162_v2 = vpop.eup %3161 }
 0x568   :  { %v3164_v54 = vpop.eup %3163 }
 0x569   :  { %v3166_v49 = vpop.eup %3165 }
 0x56a   :  { %v3168_v52 = vpop.eup %3167  ;;  %v1929_v50 = vsub.f32 1.0, %v3166_v49  ;;  %v1933_v57 = vmul.f32 %v3166_v49, %v5671_v14  ;;  %v5898_v14 = vld [vmem:[#allocation3 + $0x2d0] sm:$0xff]  ;;  %v8413_v49 = vld [vmem:[#allocation177_spill] sm:$0xff] }
 0x56b   :  { %v1930_v59 = vsub.f32 1.0, %v3168_v52 }
 0x582   :  { %v1890_v53 = vpop.f32.mrf.mxu1 }
 0x583   :  { %v1891_v32 = vadd.f32 %v1890_v53, %v4843_v33 }
 0x584   :  { %v1892_v17 = vpop.f32.mrf.mxu1 }
 0x585   :  { %v1923_v7 = vmul.f32 %v3162_v2, %v1891_v32  ;;  %v1893_v48 = vadd.f32 %v1892_v17, %v4847_v62  ;;  %v1934_v17 = vmul.f32 %v3168_v52, %v5673_v0  ;;  %v5902_v0 = vld [vmem:[#allocation3 + $0x2a8] sm:$0xff]  ;;  %v6070_v52 = vld [vmem:[#allocation3 + $0x4b8] sm:$0xff] }
 0x586   :  { %8414 = vst [vmem:[#allocation159_spill] sm:$0xff] %v6070_v52 }
 0x587   :  { %v1925_v20 = vadd.f32 %v1923_v7, %v8387_v60  ;;  %v1924_v1 = vmul.f32 %v3164_v54, %v1893_v48  ;;  %v5906_v48 = vld [vmem:[#allocation3 + $0x2a0] sm:$0xff]  ;;  %v6054_v60 = vld [vmem:[#allocation3 + $0x518] sm:$0xff] }
 0x588   :  { %v6050_v54 = vld [vmem:[#allocation3 + $0x540] sm:$0xff]  ;;  %8406 = vst [vmem:[#allocation155_spill] sm:$0xff] %v6054_v60 }
 0x589   :  { %3169 = vtanh.f32 %v1925_v20  ;;  %v1926_v51 = vadd.f32 %v1924_v1, %v8388_v44  ;;  %8404 = vst [vmem:[#allocation41_spill] sm:$0xff] %v6050_v54  ;;  %v6058_v20 = vld [vmem:[#allocation3 + $0x510] sm:$0xff]  ;;  %v6062_v1 = vld [vmem:[#allocation3 + $0x4e8] sm:$0xff] }
 0x58a   :  { %8408 = vst [vmem:[#allocation156_spill] sm:$0xff] %v6058_v20  ;;  %8410 = vst [vmem:[#allocation157_spill] sm:$0xff] %v6062_v1  ;;  %v8411_v44 = vld [vmem:[#allocation176_spill] sm:$0xff] }
 0x58b   :  { %3171 = vtanh.f32 %v1926_v51  ;;  %v6066_v51 = vld [vmem:[#allocation3 + $0x4e0] sm:$0xff] }
 0x58c   :  { %8412 = vst [vmem:[#allocation158_spill] sm:$0xff] %v6066_v51 }
 0x596   :  { %v3170_v47 = vpop.eup %3169 }
 0x597   :  { %v1931_v53 = vmul.f32 %v3170_v47, %v1929_v50  ;;  %v8415_v50 = vld [vmem:[#allocation178_spill] sm:$0xff]  ;;  %v6074_v47 = vld [vmem:[#allocation3 + $0x4b0] sm:$0xff] }
 0x598   :  { %v3172_v32 = vpop.eup %3171  ;;  %8416 = vst [vmem:[#allocation160_spill] sm:$0xff] %v6074_v47 }
 0x599   :  { %v1932_v2 = vmul.f32 %v3172_v32, %v1930_v59  ;;  %v5887_v39 = vadd.f32 %v1933_v57, %v1931_v53  ;;  %v8417_v59 = vld [vmem:[#allocation179_spill] sm:$0xff]  ;;  %v8419_v57 = vld [vmem:[#allocation180_spill] sm:$0xff]  ;;  %v6082_v32 = vld [vmem:[#allocation3 + $0x480] sm:$0xff] }
 0x59a   :  { %v6078_v53 = vld [vmem:[#allocation3 + $0x488] sm:$0xff]  ;;  %8420 = vst [vmem:[#allocation161_spill] sm:$0xff] %v6082_v32 }
 0x59b   :  { %v5889_v7 = vadd.f32 %v1934_v17, %v1932_v2  ;;  %8418 = vst [vmem:[#allocation43_spill] sm:$0xff] %v6078_v53  ;;  %v8421_v2 = vld [vmem:[#allocation181_spill] sm:$0xff] }
 0x59c   :  { %v6086_v17 = vld [vmem:[#allocation3 + $0x458] sm:$0xff] }
 0x59d   :  { %2008 = vmatprep.mubr.f32.mxu0 %v5889_v7  ;;  %2079 = vmatprep.mubr.f32.mxu1 %v5889_v7  ;;  %8422 = vst [vmem:[#allocation45_spill] sm:$0xff] %v6086_v17 }
 0x59e   :  { %2009 = vmatmul.mubr.f32.vlgmr.msra.gmra.mxu0 %v5887_v39  ;;  %2080 = vmatmul.mubr.f32.vlgmr.msra.gmra.mxu1 %v5887_v39 }
 0x59f   :  { %2087 = vmatpush1.msra.mxu0 %v5335_v61  ;;  %2150 = vmatprep.mubr.f32.mxu0 %v5889_v7  ;;  %v5910_v61 = vld [vmem:[#allocation3 + $0x278] sm:$0xff] }
 0x5a0   :  { %2088 = vmatprep.subr.mxu0 %v5339_v11  ;;  %2207 = vmatpush1.msra.mxu1 %v5898_v14  ;;  %v5914_v11 = vld [vmem:[#allocation3 + $0x270] sm:$0xff] }
 0x5a1   :  { %2089 = vmatpush1.msra.mxu0 %v5343_v63  ;;  %2208 = vmatprep.subr.mxu1 %v5902_v0  ;;  %v5918_v63 = vld [vmem:[#allocation3 + $0x248] sm:$0xff] }
 0x5a2   :  { %2090 = vmatprep.subr.mxu0 %v5347_v23  ;;  %2209 = vmatpush1.msra.mxu1 %v5906_v48  ;;  %v5922_v23 = vld [vmem:[#allocation3 + $0x240] sm:$0xff] }
 0x5a3   :  { %2091 = vmatpush1.msra.mxu0 %v5351_v55  ;;  %2210 = vmatprep.subr.mxu1 %v5910_v61  ;;  %v5926_v55 = vld [vmem:[#allocation3 + $0x218] sm:$0xff] }
 0x5a4   :  { %2092 = vmatprep.subr.mxu0 %v5355_v28  ;;  %2211 = vmatpush1.msra.mxu1 %v5914_v11  ;;  %v5930_v28 = vld [vmem:[#allocation3 + $0x210] sm:$0xff] }
 0x5a5   :  { %2093 = vmatpush1.msra.mxu0 %v5359_v31  ;;  %2212 = vmatprep.subr.mxu1 %v5918_v63  ;;  %v5934_v31 = vld [vmem:[#allocation3 + $0x1e8] sm:$0xff] }
 0x5a6   :  { %2094 = vmatprep.subr.mxu0 %v5363_v15  ;;  %2213 = vmatpush1.msra.mxu1 %v5922_v23  ;;  %v5938_v15 = vld [vmem:[#allocation3 + $0x1e0] sm:$0xff] }
 0x5a7   :  { %2095 = vmatpush1.msra.mxu0 %v5367_v24  ;;  %2214 = vmatprep.subr.mxu1 %v5926_v55  ;;  %v5942_v24 = vld [vmem:[#allocation3 + $0x1b8] sm:$0xff] }
 0x5a8   :  { %2096 = vmatprep.subr.mxu0 %v5371_v12  ;;  %2215 = vmatpush1.msra.mxu1 %v5930_v28  ;;  %v5946_v12 = vld [vmem:[#allocation3 + $0x1b0] sm:$0xff] }
 0x5a9   :  { %2097 = vmatpush1.msra.mxu0 %v5375_v8  ;;  %2216 = vmatprep.subr.mxu1 %v5934_v31  ;;  %v5950_v8 = vld [vmem:[#allocation3 + $0x188] sm:$0xff] }
 0x5aa   :  { %2098 = vmatprep.subr.mxu0 %v5379_v9  ;;  %2217 = vmatpush1.msra.mxu1 %v5938_v15  ;;  %v5954_v9 = vld [vmem:[#allocation3 + $0x180] sm:$0xff] }
 0x5ab   :  { %2099 = vmatpush1.msra.mxu0 %v5383_v5  ;;  %2218 = vmatprep.subr.mxu1 %v5942_v24  ;;  %v5958_v5 = vld [vmem:[#allocation3 + $0x158] sm:$0xff] }
 0x5ac   :  { %2100 = vmatprep.subr.mxu0 %v8228_v27  ;;  %2219 = vmatpush1.msra.mxu1 %v5946_v12  ;;  %v5962_v27 = vld [vmem:[#allocation3 + $0x150] sm:$0xff] }
 0x5ad   :  { %2101 = vmatpush1.msra.mxu0 %v8229_v36  ;;  %2220 = vmatprep.subr.mxu1 %v5950_v8  ;;  %v5966_v36 = vld [vmem:[#allocation3 + $0x128] sm:$0xff] }
 0x5ae   :  { %2102 = vmatprep.subr.mxu0 %v8230_v19  ;;  %2221 = vmatpush1.msra.mxu1 %v5954_v9  ;;  %v5970_v19 = vld [vmem:[#allocation3 + $0x120] sm:$0xff] }
 0x5af   :  { %2103 = vmatpush1.msra.mxu0 %v8231_v10  ;;  %2222 = vmatprep.subr.mxu1 %v5958_v5  ;;  %v5974_v10 = vld [vmem:[#allocation3 + $0xf8] sm:$0xff] }
 0x5b0   :  { %2104 = vmatprep.subr.mxu0 %v8232_v18  ;;  %2223 = vmatpush1.msra.mxu1 %v5962_v27  ;;  %v5978_v18 = vld [vmem:[#allocation3 + $0xf0] sm:$0xff] }
 0x5b1   :  { %2105 = vmatpush1.msra.mxu0 %v8233_v42  ;;  %2224 = vmatprep.subr.mxu1 %v5966_v36  ;;  %v5982_v42 = vld [vmem:[#allocation3 + $0xc8] sm:$0xff] }
 0x5b2   :  { %2106 = vmatprep.subr.mxu0 %v8234_v35  ;;  %2225 = vmatpush1.msra.mxu1 %v5970_v19  ;;  %v5986_v35 = vld [vmem:[#allocation3 + $0xc0] sm:$0xff] }
 0x5b3   :  { %2107 = vmatpush1.msra.mxu0 %v8235_v16  ;;  %2226 = vmatprep.subr.mxu1 %v5974_v10  ;;  %v5990_v16 = vld [vmem:[#allocation3 + $0x98] sm:$0xff] }
 0x5b4   :  { %2108 = vmatprep.subr.mxu0 %v8236_v56  ;;  %2227 = vmatpush1.msra.mxu1 %v5978_v18  ;;  %v5994_v56 = vld [vmem:[#allocation3 + $0x90] sm:$0xff] }
 0x5b5   :  { %2109 = vmatpush1.msra.mxu0 %v8237_v21  ;;  %2228 = vmatprep.subr.mxu1 %v5982_v42  ;;  %8389 = vst [vmem:[#allocation6_spill] sm:$0xff] %v5994_v56  ;;  %v5998_v21 = vld [vmem:[#allocation3 + $0x68] sm:$0xff] }
 0x5b6   :  { %2110 = vmatprep.subr.mxu0 %v8238_v41  ;;  %2229 = vmatpush1.msra.mxu1 %v5986_v35  ;;  %8390 = vst [vmem:[#allocation7_spill] sm:$0xff] %v5998_v21  ;;  %v6002_v41 = vld [vmem:[#allocation3 + $0x60] sm:$0xff] }
 0x5b7   :  { %2111 = vmatpush1.msra.mxu0 %v8239_v22  ;;  %2230 = vmatprep.subr.mxu1 %v5990_v16  ;;  %8391 = vst [vmem:[#allocation38_spill] sm:$0xff] %v6002_v41  ;;  %v6006_v22 = vld [vmem:[#allocation3 + $0x38] sm:$0xff] }
 0x5b8   :  { %2112 = vmatprep.subr.mxu0 %v8240_v37  ;;  %2231 = vmatpush1.msra.mxu1 %v5994_v56  ;;  %8392 = vst [vmem:[#allocation40_spill] sm:$0xff] %v6006_v22  ;;  %v6010_v37 = vld [vmem:[#allocation3 + $0x30] sm:$0xff] }
 0x5b9   :  { %2113 = vmatpush1.msra.mxu0 %v8241_v40  ;;  %2232 = vmatprep.subr.mxu1 %v5998_v21  ;;  %8393 = vst [vmem:[#allocation19_spill] sm:$0xff] %v6010_v37  ;;  %v6014_v40 = vld [vmem:[#allocation3 + $0x8] sm:$0xff] }
 0x5ba   :  { %2114 = vmatprep.subr.mxu0 %v8242_v13  ;;  %2233 = vmatpush1.msra.mxu1 %v6002_v41  ;;  %8394 = vst [vmem:[#allocation54_spill] sm:$0xff] %v6014_v40  ;;  %v6018_v13 = vld [vmem:[#allocation3] sm:$0xff] }
 0x5bb   :  { %2115 = vmatpush1.msra.mxu0 %v8244_v6  ;;  %2234 = vmatprep.subr.mxu1 %v6006_v22  ;;  %8395 = vst [vmem:[#allocation13_spill] sm:$0xff] %v6018_v13  ;;  %v6022_v6 = vld [vmem:[#allocation3 + $0x5d8] sm:$0xff] }
 0x5bc   :  { %2116 = vmatprep.subr.mxu0 %v8246_v25  ;;  %2235 = vmatpush1.msra.mxu1 %v6010_v37  ;;  %8396 = vst [vmem:[#allocation26_spill] sm:$0xff] %v6022_v6  ;;  %v6026_v25 = vld [vmem:[#allocation3 + $0x5d0] sm:$0xff] }
 0x5bd   :  { %2117 = vmatpush1.msra.mxu0 %v8248_v34  ;;  %2236 = vmatprep.subr.mxu1 %v6014_v40  ;;  %8397 = vst [vmem:[#allocation28_spill] sm:$0xff] %v6026_v25  ;;  %v6030_v34 = vld [vmem:[#allocation3 + $0x5a8] sm:$0xff] }
 0x5be   :  { %2118 = vmatprep.subr.mxu0 %v8250_v30  ;;  %2237 = vmatpush1.msra.mxu1 %v6018_v13  ;;  %8398 = vst [vmem:[#allocation32_spill] sm:$0xff] %v6030_v34  ;;  %v6034_v30 = vld [vmem:[#allocation3 + $0x5a0] sm:$0xff] }
 0x5bf   :  { %2119 = vmatpush2.msra.mxu0 %v8252_v38  ;;  %2238 = vmatprep.subr.mxu1 %v6022_v6  ;;  %8399 = vst [vmem:[#allocation34_spill] sm:$0xff] %v6034_v30  ;;  %v6038_v38 = vld [vmem:[#allocation3 + $0x578] sm:$0xff] }
 0x5c0   :  { %2120 = vmatprep.subr.mxu0 %v8254_v26  ;;  %2239 = vmatpush2.msra.mxu1 %v6026_v25  ;;  %8400 = vst [vmem:[#allocation17_spill] sm:$0xff] %v6038_v38  ;;  %v6042_v26 = vld [vmem:[#allocation3 + $0x570] sm:$0xff] }
 0x5c1   :  { %2121 = vmatpush2.msra.mxu0 %v8256_v29  ;;  %2240 = vmatprep.subr.mxu1 %v6030_v34  ;;  %8401 = vst [vmem:[#allocation50_spill] sm:$0xff] %v6042_v26  ;;  %v6046_v29 = vld [vmem:[#allocation3 + $0x548] sm:$0xff] }
 0x5c2   :  { %2122 = vmatprep.subr.mxu0 %v8258_v46  ;;  %2241 = vmatpush2.msra.mxu1 %v6034_v30  ;;  %8402 = vst [vmem:[#allocation39_spill] sm:$0xff] %v6046_v29  ;;  %v8403_v46 = vld [vmem:[#allocation172_spill] sm:$0xff] }
 0x5c3   :  { %2123 = vmatpush2.msra.mxu0 %v8260_v3  ;;  %2242 = vmatprep.subr.mxu1 %v6038_v38  ;;  %v8405_v3 = vld [vmem:[#allocation173_spill] sm:$0xff] }
 0x5c4   :  { %2124 = vmatprep.subr.mxu0 %v8262_v58  ;;  %2243 = vmatpush2.msra.mxu1 %v6042_v26  ;;  %v8407_v58 = vld [vmem:[#allocation174_spill] sm:$0xff] }
 0x5c5   :  { %2125 = vmatpush2.msra.mxu0 %v8264_v43  ;;  %2244 = vmatprep.subr.mxu1 %v6046_v29  ;;  %v8409_v43 = vld [vmem:[#allocation175_spill] sm:$0xff] }
 0x5c6   :  { %2126 = vmatprep.subr.mxu0 %v8403_v46  ;;  %2245 = vmatpush2.msra.mxu1 %v6050_v54  ;;  %v8423_v46 = vld [vmem:[#allocation182_spill] sm:$0xff] }
 0x5c7   :  { %2127 = vmatpush2.msra.mxu0 %v8405_v3  ;;  %2246 = vmatprep.subr.mxu1 %v6054_v60  ;;  %v6090_v3 = vld [vmem:[#allocation3 + $0x450] sm:$0xff] }
 0x5c8   :  { %2128 = vmatprep.subr.mxu0 %v8407_v58  ;;  %2247 = vmatpush2.msra.mxu1 %v6058_v20  ;;  %8424 = vst [vmem:[#allocation162_spill] sm:$0xff] %v6090_v3  ;;  %v8425_v58 = vld [vmem:[#allocation183_spill] sm:$0xff]  ;;  %v8523_v60 = vld [vmem:[#allocation48_spill] sm:$0xff] }
 0x5c9   :  { %2129 = vmatpush2.msra.mxu0 %v8409_v43  ;;  %2248 = vmatprep.subr.mxu1 %v6062_v1  ;;  %v6094_v43 = vld [vmem:[#allocation3 + $0x428] sm:$0xff] }
 0x5ca   :  { %2130 = vmatprep.subr.mxu0 %v8411_v44  ;;  %2249 = vmatpush2.msra.mxu1 %v6066_v51  ;;  %8426 = vst [vmem:[#allocation47_spill] sm:$0xff] %v6094_v43  ;;  %v8427_v44 = vld [vmem:[#allocation184_spill] sm:$0xff] }
 0x5cb   :  { %2131 = vmatpush2.msra.mxu0 %v8413_v49  ;;  %2250 = vmatprep.subr.mxu1 %v6070_v52  ;;  %v6098_v49 = vld [vmem:[#allocation3 + $0x420] sm:$0xff] }
 0x5cc   :  { %2132 = vmatprep.subr.mxu0 %v8415_v50  ;;  %2251 = vmatpush2.msra.mxu1 %v6074_v47  ;;  %8428 = vst [vmem:[#allocation163_spill] sm:$0xff] %v6098_v49  ;;  %v8429_v50 = vld [vmem:[#allocation185_spill] sm:$0xff] }
 0x5cd   :  { %2133 = vmatpush2.msra.mxu0 %v8417_v59  ;;  %2252 = vmatprep.subr.mxu1 %v6078_v53  ;;  %v6102_v59 = vld [vmem:[#allocation3 + $0x3f8] sm:$0xff]  ;;  %v8521_v53 = vld [vmem:[#allocation10_spill] sm:$0xff] }
 0x5ce   :  { %2134 = vmatprep.subr.mxu0 %v8419_v57  ;;  %2253 = vmatpush2.msra.mxu1 %v6082_v32  ;;  %8430 = vst [vmem:[#allocation49_spill] sm:$0xff] %v6102_v59  ;;  %v8431_v57 = vld [vmem:[#allocation186_spill] sm:$0xff] }
 0x5cf   :  { %2135 = vmatpush2.msra.mxu0 %v8421_v2  ;;  %2254 = vmatprep.subr.mxu1 %v6086_v17  ;;  %v6106_v2 = vld [vmem:[#allocation3 + $0x3f0] sm:$0xff]  ;;  %v8520_v17 = vld [vmem:[#allocation9_spill] sm:$0xff] }
 0x5d0   :  { %2136 = vmatprep.subr.mxu0 %v8423_v46  ;;  %2255 = vmatpush2.msra.mxu1 %v6090_v3  ;;  %8432 = vst [vmem:[#allocation164_spill] sm:$0xff] %v6106_v2  ;;  %v8433_v46 = vld [vmem:[#allocation187_spill] sm:$0xff]  ;;  %v8519_v3 = vld [vmem:[#allocation37_spill] sm:$0xff] }
 0x5d1   :  { %2137 = vmatpush2.msra.mxu0 %v8425_v58  ;;  %2256 = vmatprep.subr.mxu1 %v6094_v43  ;;  %v6110_v58 = vld [vmem:[#allocation3 + $0x3c8] sm:$0xff] }
 0x5d2   :  { %2138 = vmatprep.subr.mxu0 %v8427_v44  ;;  %2257 = vmatpush2.msra.mxu1 %v6098_v49  ;;  %8434 = vst [vmem:[#allocation51_spill] sm:$0xff] %v6110_v58  ;;  %v8435_v44 = vld [vmem:[#allocation188_spill] sm:$0xff]  ;;  %v6114_v49 = vld [vmem:[#allocation3 + $0x3c0] sm:$0xff] }
 0x5d3   :  { %2139 = vmatpush2.msra.mxu0 %v8429_v50  ;;  %2258 = vmatprep.subr.mxu1 %v6102_v59  ;;  %8436 = vst [vmem:[#allocation165_spill] sm:$0xff] %v6114_v49  ;;  %v8437_v50 = vld [vmem:[#allocation189_spill] sm:$0xff] }
 0x5d4   :  { %2140 = vmatprep.subr.mxu0 %v8431_v57  ;;  %2259 = vmatpush2.msra.mxu1 %v6106_v2  ;;  %v6118_v59 = vld [vmem:[#allocation3 + $0x398] sm:$0xff]  ;;  %v8439_v57 = vld [vmem:[#allocation190_spill] sm:$0xff]  ;;  %v6122_v2 = vld [vmem:[#allocation3 + $0x390] sm:$0xff] }
 0x5d5   :  { %2141 = vmatpush2.msra.mxu0 %v8433_v46  ;;  %2260 = vmatprep.subr.mxu1 %v6110_v58  ;;  %8438 = vst [vmem:[#allocation53_spill] sm:$0xff] %v6118_v59  ;;  %8440 = vst [vmem:[#allocation166_spill] sm:$0xff] %v6122_v2  ;;  %v8441_v46 = vld [vmem:[#allocation191_spill] sm:$0xff] }
 0x5d6   :  { %2142 = vmatprep.subr.mxu0 %v8435_v44  ;;  %2261 = vmatpush2.msra.mxu1 %v6114_v49  ;;  %v6126_v58 = vld [vmem:[#allocation3 + $0x368] sm:$0xff]  ;;  %v8443_v44 = vld [vmem:[#allocation192_spill] sm:$0xff]  ;;  %v6130_v49 = vld [vmem:[#allocation3 + $0x360] sm:$0xff] }
 0x5d7   :  { %2143 = vmatpush2.msra.mxu0 %v8437_v50  ;;  %2262 = vmatprep.subr.mxu1 %v6118_v59  ;;  %8442 = vst [vmem:[#allocation55_spill] sm:$0xff] %v6126_v58  ;;  %8444 = vst [vmem:[#allocation167_spill] sm:$0xff] %v6130_v49  ;;  %v8445_v50 = vld [vmem:[#allocation193_spill] sm:$0xff] }
 0x5d8   :  { %2144 = vmatprep.subr.mxu0 %v8439_v57  ;;  %2263 = vmatpush2.msra.mxu1 %v6122_v2  ;;  %v6134_v59 = vld [vmem:[#allocation3 + $0x338] sm:$0xff]  ;;  %v8447_v57 = vld [vmem:[#allocation194_spill] sm:$0xff]  ;;  %v6138_v2 = vld [vmem:[#allocation3 + $0x330] sm:$0xff] }
 0x5d9   :  { %2145 = vmatpush2.msra.mxu0 %v8441_v46  ;;  %2264 = vmatprep.subr.mxu1 %v6126_v58  ;;  %8446 = vst [vmem:[#allocation57_spill] sm:$0xff] %v6134_v59  ;;  %8448 = vst [vmem:[#allocation168_spill] sm:$0xff] %v6138_v2  ;;  %v8449_v46 = vld [vmem:[#allocation195_spill] sm:$0xff] }
 0x5da   :  { %2146 = vmatprep.subr.mxu0 %v8443_v44  ;;  %2265 = vmatpush2.msra.mxu1 %v6130_v49  ;;  %v6142_v58 = vld [vmem:[#allocation3 + $0x308] sm:$0xff] }
 0x5db   :  { %2147 = vmatpush2.msra.mxu0 %v8445_v50  ;;  %2266 = vmatprep.subr.mxu1 %v6134_v59  ;;  %8450 = vst [vmem:[#allocation59_spill] sm:$0xff] %v6142_v58  ;;  %v6146_v44 = vld [vmem:[#allocation3 + $0x2e8] sm:$0xff]  ;;  %v6149_v50 = vld [vmem:[#allocation3 + $0x2e0] sm:$0xff] }
 0x5dc   :  { %2148 = vmatprep.subr.mxu0 %v8447_v57  ;;  %2267 = vmatpush2.msra.mxu1 %v6138_v2  ;;  %8451 = vst [vmem:[#allocation169_spill] sm:$0xff] %v6146_v44  ;;  %8452 = vst [vmem:[#allocation61_spill] sm:$0xff] %v6149_v50  ;;  %v6152_v57 = vld [vmem:[#allocation3 + $0x300] sm:$0xff]  ;;  %v6155_v2 = vld [vmem:[#allocation3 + $0x2b8] sm:$0xff] }
 0x5dd   :  { %2149 = vmatpush2.msra.mxu0 %v8449_v46  ;;  %2268 = vmatprep.subr.mxu1 %v6142_v58  ;;  %8453 = vst [vmem:[#allocation170_spill] sm:$0xff] %v6152_v57  ;;  %8454 = vst [vmem:[#allocation62_spill] sm:$0xff] %v6155_v2  ;;  %v6158_v46 = vld [vmem:[#allocation3 + $0x2f8] sm:$0xff]  ;;  %v6161_v58 = vld [vmem:[#allocation3 + $0x2b0] sm:$0xff] }
 0x5de   :  { %2151 = vmatmul.mubr.f32.vlgmr.msra.gmra.mxu0 %v5887_v39  ;;  %2277 = vmatprep.subr.mxu0 %v6146_v44  ;;  %8455 = vst [vmem:[#allocation171_spill] sm:$0xff] %v6158_v46  ;;  %8456 = vst [vmem:[#allocation64_spill] sm:$0xff] %v6161_v58  ;;  %v6164_v44 = vld [vmem:[#allocation3 + $0x288] sm:$0xff] }
 0x5df   :  { %2278 = vmatpush1.msra.mxu0 %v6149_v50  ;;  %2269 = vmatpush2.msra.mxu1 %v6152_v57  ;;  %8457 = vst [vmem:[#allocation66_spill] sm:$0xff] %v6164_v44  ;;  %v6167_v50 = vld [vmem:[#allocation3 + $0x280] sm:$0xff]  ;;  %v6170_v57 = vld [vmem:[#allocation3 + $0x258] sm:$0xff]  ;;  %v8518_v49 = vld [vmem:[#allocation35_spill] sm:$0xff] }
 0x5e0   :  { %2279 = vmatprep.subr.mxu0 %v6155_v2  ;;  %2348 = vmatprep.subr.mxu1 %v6158_v46  ;;  %8458 = vst [vmem:[#allocation68_spill] sm:$0xff] %v6167_v50  ;;  %8459 = vst [vmem:[#allocation70_spill] sm:$0xff] %v6170_v57  ;;  %v6173_v2 = vld [vmem:[#allocation3 + $0x250] sm:$0xff]  ;;  %v6176_v46 = vld [vmem:[#allocation3 + $0x228] sm:$0xff] }
 0x5e1   :  { %2280 = vmatpush1.msra.mxu0 %v6161_v58  ;;  %8460 = vst [vmem:[#allocation72_spill] sm:$0xff] %v6173_v2  ;;  %8461 = vst [vmem:[#allocation74_spill] sm:$0xff] %v6176_v46  ;;  %v6179_v58 = vld [vmem:[#allocation3 + $0x220] sm:$0xff] }
 0x5e2   :  { %2281 = vmatprep.subr.mxu0 %v6164_v44  ;;  %8462 = vst [vmem:[#allocation76_spill] sm:$0xff] %v6179_v58  ;;  %v6182_v44 = vld [vmem:[#allocation3 + $0x1f8] sm:$0xff] }
 0x5e3   :  { %2282 = vmatpush1.msra.mxu0 %v6167_v50  ;;  %8463 = vst [vmem:[#allocation78_spill] sm:$0xff] %v6182_v44  ;;  %v6185_v50 = vld [vmem:[#allocation3 + $0x1f0] sm:$0xff] }
 0x5e4   :  { %2283 = vmatprep.subr.mxu0 %v6170_v57  ;;  %8464 = vst [vmem:[#allocation80_spill] sm:$0xff] %v6185_v50  ;;  %v6188_v57 = vld [vmem:[#allocation3 + $0x1c8] sm:$0xff] }
 0x5e5   :  { %2284 = vmatpush1.msra.mxu0 %v6173_v2  ;;  %8465 = vst [vmem:[#allocation82_spill] sm:$0xff] %v6188_v57  ;;  %v6191_v2 = vld [vmem:[#allocation3 + $0x1c0] sm:$0xff] }
 0x5e6   :  { %2285 = vmatprep.subr.mxu0 %v6176_v46  ;;  %8466 = vst [vmem:[#allocation84_spill] sm:$0xff] %v6191_v2  ;;  %v6194_v46 = vld [vmem:[#allocation3 + $0x198] sm:$0xff] }
 0x5e7   :  { %2286 = vmatpush1.msra.mxu0 %v6179_v58  ;;  %8467 = vst [vmem:[#allocation86_spill] sm:$0xff] %v6194_v46  ;;  %v6197_v58 = vld [vmem:[#allocation3 + $0x190] sm:$0xff] }
 0x5e8   :  { %2287 = vmatprep.subr.mxu0 %v6182_v44  ;;  %8468 = vst [vmem:[#allocation88_spill] sm:$0xff] %v6197_v58  ;;  %v6200_v44 = vld [vmem:[#allocation3 + $0x168] sm:$0xff] }
 0x5e9   :  { %2288 = vmatpush1.msra.mxu0 %v6185_v50  ;;  %8469 = vst [vmem:[#allocation90_spill] sm:$0xff] %v6200_v44  ;;  %v6203_v50 = vld [vmem:[#allocation3 + $0x160] sm:$0xff] }
 0x5ea   :  { %2289 = vmatprep.subr.mxu0 %v6188_v57  ;;  %8470 = vst [vmem:[#allocation95_spill] sm:$0xff] %v6203_v50  ;;  %v6206_v57 = vld [vmem:[#allocation3 + $0x138] sm:$0xff] }
 0x5eb   :  { %2290 = vmatpush1.msra.mxu0 %v6191_v2  ;;  %8471 = vst [vmem:[#allocation65_spill] sm:$0xff] %v6206_v57  ;;  %v6209_v2 = vld [vmem:[#allocation3 + $0x130] sm:$0xff] }
 0x5ec   :  { %2291 = vmatprep.subr.mxu0 %v6194_v46  ;;  %8472 = vst [vmem:[#allocation67_spill] sm:$0xff] %v6209_v2  ;;  %v6212_v46 = vld [vmem:[#allocation3 + $0x108] sm:$0xff] }
 0x5ed   :  { %2292 = vmatpush1.msra.mxu0 %v6197_v58  ;;  %8473 = vst [vmem:[#allocation69_spill] sm:$0xff] %v6212_v46  ;;  %v6215_v58 = vld [vmem:[#allocation3 + $0x100] sm:$0xff] }
 0x5ee   :  { %2293 = vmatprep.subr.mxu0 %v6200_v44  ;;  %8474 = vst [vmem:[#allocation71_spill] sm:$0xff] %v6215_v58  ;;  %v6218_v44 = vld [vmem:[#allocation3 + $0xd8] sm:$0xff] }
 0x5ef   :  { %2294 = vmatpush1.msra.mxu0 %v6203_v50  ;;  %8475 = vst [vmem:[#allocation73_spill] sm:$0xff] %v6218_v44  ;;  %v6221_v50 = vld [vmem:[#allocation3 + $0xd0] sm:$0xff] }
 0x5f0   :  { %2295 = vmatprep.subr.mxu0 %v6206_v57  ;;  %8476 = vst [vmem:[#allocation75_spill] sm:$0xff] %v6221_v50  ;;  %v6224_v57 = vld [vmem:[#allocation3 + $0xa8] sm:$0xff] }
 0x5f1   :  { %2296 = vmatpush1.msra.mxu0 %v6209_v2  ;;  %8477 = vst [vmem:[#allocation77_spill] sm:$0xff] %v6224_v57  ;;  %v6227_v2 = vld [vmem:[#allocation3 + $0xa0] sm:$0xff] }
 0x5f2   :  { %2297 = vmatprep.subr.mxu0 %v6212_v46  ;;  %8478 = vst [vmem:[#allocation79_spill] sm:$0xff] %v6227_v2  ;;  %v6230_v46 = vld [vmem:[#allocation3 + $0x78] sm:$0xff] }
 0x5f3   :  { %2298 = vmatpush1.msra.mxu0 %v6215_v58  ;;  %8479 = vst [vmem:[#allocation81_spill] sm:$0xff] %v6230_v46  ;;  %v6233_v58 = vld [vmem:[#allocation3 + $0x70] sm:$0xff] }
 0x5f4   :  { %2299 = vmatprep.subr.mxu0 %v6218_v44  ;;  %8480 = vst [vmem:[#allocation83_spill] sm:$0xff] %v6233_v58  ;;  %v6236_v44 = vld [vmem:[#allocation3 + $0x48] sm:$0xff] }
 0x5f5   :  { %2300 = vmatpush1.msra.mxu0 %v6221_v50  ;;  %8481 = vst [vmem:[#allocation85_spill] sm:$0xff] %v6236_v44  ;;  %v6239_v50 = vld [vmem:[#allocation3 + $0x40] sm:$0xff] }
 0x5f6   :  { %2301 = vmatprep.subr.mxu0 %v6224_v57  ;;  %8482 = vst [vmem:[#allocation87_spill] sm:$0xff] %v6239_v50  ;;  %v6242_v57 = vld [vmem:[#allocation3 + $0x18] sm:$0xff] }
 0x5f7   :  { %2302 = vmatpush1.msra.mxu0 %v6227_v2  ;;  %8483 = vst [vmem:[#allocation89_spill] sm:$0xff] %v6242_v57  ;;  %v6245_v2 = vld [vmem:[#allocation3 + $0x10] sm:$0xff] }
 0x5f8   :  { %2303 = vmatprep.subr.mxu0 %v6230_v46  ;;  %8484 = vst [vmem:[#allocation91_spill] sm:$0xff] %v6245_v2  ;;  %v6248_v46 = vld [vmem:[#allocation3 + $0x5e8] sm:$0xff] }
 0x5f9   :  { %2304 = vmatpush1.msra.mxu0 %v6233_v58  ;;  %8485 = vst [vmem:[#allocation92_spill] sm:$0xff] %v6248_v46  ;;  %v6251_v58 = vld [vmem:[#allocation3 + $0x5e0] sm:$0xff] }
 0x5fa   :  { %2305 = vmatprep.subr.mxu0 %v6236_v44  ;;  %8486 = vst [vmem:[#allocation93_spill] sm:$0xff] %v6251_v58  ;;  %v6254_v44 = vld [vmem:[#allocation3 + $0x5b8] sm:$0xff] }
 0x5fb   :  { %2306 = vmatpush1.msra.mxu0 %v6239_v50  ;;  %8487 = vst [vmem:[#allocation94_spill] sm:$0xff] %v6254_v44  ;;  %v6257_v50 = vld [vmem:[#allocation3 + $0x5b0] sm:$0xff] }
 0x5fc   :  { %2307 = vmatprep.subr.mxu0 %v6242_v57  ;;  %8488 = vst [vmem:[#allocation96_spill] sm:$0xff] %v6257_v50  ;;  %v6260_v57 = vld [vmem:[#allocation3 + $0x588] sm:$0xff] }
 0x5fd   :  { %2308 = vmatpush1.msra.mxu0 %v6245_v2  ;;  %8489 = vst [vmem:[#allocation97_spill] sm:$0xff] %v6260_v57  ;;  %v6263_v2 = vld [vmem:[#allocation3 + $0x580] sm:$0xff] }
 0x5fe   :  { %2309 = vmatprep.subr.mxu0 %v6248_v46  ;;  %8490 = vst [vmem:[#allocation98_spill] sm:$0xff] %v6263_v2  ;;  %v6266_v46 = vld [vmem:[#allocation3 + $0x558] sm:$0xff] }
 0x5ff   :  { %2310 = vmatpush2.msra.mxu0 %v6251_v58  ;;  %8491 = vst [vmem:[#allocation99_spill] sm:$0xff] %v6266_v46  ;;  %v6269_v58 = vld [vmem:[#allocation3 + $0x550] sm:$0xff] }
 0x600   :  { %2311 = vmatprep.subr.mxu0 %v6254_v44  ;;  %8492 = vst [vmem:[#allocation100_spill] sm:$0xff] %v6269_v58  ;;  %v6272_v44 = vld [vmem:[#allocation3 + $0x528] sm:$0xff] }
 0x601   :  { %2312 = vmatpush2.msra.mxu0 %v6257_v50  ;;  %8493 = vst [vmem:[#allocation101_spill] sm:$0xff] %v6272_v44  ;;  %v6275_v50 = vld [vmem:[#allocation3 + $0x520] sm:$0xff] }
 0x602   :  { %2313 = vmatprep.subr.mxu0 %v6260_v57  ;;  %8494 = vst [vmem:[#allocation102_spill] sm:$0xff] %v6275_v50  ;;  %v6278_v57 = vld [vmem:[#allocation3 + $0x4f8] sm:$0xff] }
 0x603   :  { %2314 = vmatpush2.msra.mxu0 %v6263_v2  ;;  %8495 = vst [vmem:[#allocation103_spill] sm:$0xff] %v6278_v57  ;;  %v6281_v2 = vld [vmem:[#allocation3 + $0x4f0] sm:$0xff] }
 0x604   :  { %2315 = vmatprep.subr.mxu0 %v6266_v46  ;;  %8496 = vst [vmem:[#allocation104_spill] sm:$0xff] %v6281_v2  ;;  %v6284_v46 = vld [vmem:[#allocation3 + $0x4c8] sm:$0xff] }
 0x605   :  { %2316 = vmatpush2.msra.mxu0 %v6269_v58  ;;  %8497 = vst [vmem:[#allocation105_spill] sm:$0xff] %v6284_v46  ;;  %v6287_v58 = vld [vmem:[#allocation3 + $0x4c0] sm:$0xff] }
 0x606   :  { %2317 = vmatprep.subr.mxu0 %v6272_v44  ;;  %8498 = vst [vmem:[#allocation106_spill] sm:$0xff] %v6287_v58  ;;  %v6290_v44 = vld [vmem:[#allocation3 + $0x498] sm:$0xff] }
 0x607   :  { %2318 = vmatpush2.msra.mxu0 %v6275_v50  ;;  %8499 = vst [vmem:[#allocation107_spill] sm:$0xff] %v6290_v44  ;;  %v6293_v50 = vld [vmem:[#allocation3 + $0x490] sm:$0xff] }
 0x608   :  { %2319 = vmatprep.subr.mxu0 %v6278_v57  ;;  %8500 = vst [vmem:[#allocation108_spill] sm:$0xff] %v6293_v50  ;;  %v6296_v57 = vld [vmem:[#allocation3 + $0x468] sm:$0xff] }
 0x609   :  { %2320 = vmatpush2.msra.mxu0 %v6281_v2  ;;  %8501 = vst [vmem:[#allocation109_spill] sm:$0xff] %v6296_v57  ;;  %v6299_v2 = vld [vmem:[#allocation3 + $0x460] sm:$0xff] }
 0x60a   :  { %2321 = vmatprep.subr.mxu0 %v6284_v46  ;;  %8502 = vst [vmem:[#allocation110_spill] sm:$0xff] %v6299_v2  ;;  %v6302_v46 = vld [vmem:[#allocation3 + $0x438] sm:$0xff] }
 0x60b   :  { %2322 = vmatpush2.msra.mxu0 %v6287_v58  ;;  %8503 = vst [vmem:[#allocation111_spill] sm:$0xff] %v6302_v46  ;;  %v6305_v58 = vld [vmem:[#allocation3 + $0x430] sm:$0xff] }
 0x60c   :  { %2323 = vmatprep.subr.mxu0 %v6290_v44  ;;  %8504 = vst [vmem:[#allocation112_spill] sm:$0xff] %v6305_v58  ;;  %v6308_v44 = vld [vmem:[#allocation3 + $0x408] sm:$0xff] }
 0x60d   :  { %2324 = vmatpush2.msra.mxu0 %v6293_v50  ;;  %8505 = vst [vmem:[#allocation113_spill] sm:$0xff] %v6308_v44  ;;  %v6311_v50 = vld [vmem:[#allocation3 + $0x400] sm:$0xff] }
 0x60e   :  { %2325 = vmatprep.subr.mxu0 %v6296_v57  ;;  %8506 = vst [vmem:[#allocation114_spill] sm:$0xff] %v6311_v50  ;;  %v6314_v57 = vld [vmem:[#allocation3 + $0x3d8] sm:$0xff] }
 0x60f   :  { %2326 = vmatpush2.msra.mxu0 %v6299_v2  ;;  %8507 = vst [vmem:[#allocation115_spill] sm:$0xff] %v6314_v57  ;;  %v6317_v2 = vld [vmem:[#allocation3 + $0x3d0] sm:$0xff] }
 0x610   :  { %2327 = vmatprep.subr.mxu0 %v6302_v46  ;;  %8508 = vst [vmem:[#allocation116_spill] sm:$0xff] %v6317_v2  ;;  %v6320_v46 = vld [vmem:[#allocation3 + $0x3a8] sm:$0xff] }
 0x611   :  { %2328 = vmatpush2.msra.mxu0 %v6305_v58  ;;  %8509 = vst [vmem:[#allocation117_spill] sm:$0xff] %v6320_v46  ;;  %v6323_v58 = vld [vmem:[#allocation3 + $0x3a0] sm:$0xff] }
 0x612   :  { %2329 = vmatprep.subr.mxu0 %v6308_v44  ;;  %8510 = vst [vmem:[#allocation118_spill] sm:$0xff] %v6323_v58  ;;  %v6326_v44 = vld [vmem:[#allocation3 + $0x378] sm:$0xff] }
 0x613   :  { %2330 = vmatpush2.msra.mxu0 %v6311_v50  ;;  %8511 = vst [vmem:[#allocation119_spill] sm:$0xff] %v6326_v44  ;;  %v6329_v50 = vld [vmem:[#allocation3 + $0x370] sm:$0xff] }
 0x614   :  { %2331 = vmatprep.subr.mxu0 %v6314_v57  ;;  %8512 = vst [vmem:[#allocation120_spill] sm:$0xff] %v6329_v50  ;;  %v6332_v57 = vld [vmem:[#allocation3 + $0x348] sm:$0xff] }
 0x615   :  { %2332 = vmatpush2.msra.mxu0 %v6317_v2  ;;  %8513 = vst [vmem:[#allocation121_spill] sm:$0xff] %v6332_v57  ;;  %v6335_v2 = vld [vmem:[#allocation3 + $0x340] sm:$0xff] }
 0x616   :  { %2333 = vmatprep.subr.mxu0 %v6320_v46  ;;  %8514 = vst [vmem:[#allocation122_spill] sm:$0xff] %v6335_v2  ;;  %v6338_v46 = vld [vmem:[#allocation3 + $0x318] sm:$0xff] }
 0x617   :  { %2334 = vmatpush2.msra.mxu0 %v6323_v58  ;;  %8515 = vst [vmem:[#allocation123_spill] sm:$0xff] %v6338_v46  ;;  %v6341_v58 = vld [vmem:[#allocation3 + $0x310] sm:$0xff] }
 0x618   :  { %2335 = vmatprep.subr.mxu0 %v6326_v44  ;;  %8516 = vst [vmem:[#allocation124_spill] sm:$0xff] %v6341_v58  ;;  %v8517_v44 = vld [vmem:[#allocation196_spill] sm:$0xff] }
 0x619   :  { %2336 = vmatpush2.msra.mxu0 %v6329_v50 }
 0x61a   :  { %2337 = vmatprep.subr.mxu0 %v6332_v57 }
 0x61b   :  { %2338 = vmatpush2.msra.mxu0 %v6335_v2 }
 0x61c   :  { %2339 = vmatprep.subr.mxu0 %v6338_v46 }
 0x61d   :  { %2340 = vmatpush2.msra.mxu0 %v6341_v58  ;;  %v8522_v58 = vld [vmem:[#allocation16_spill] sm:$0xff] }
 0x61e   :  { %2468 = vmatprep.subr.mxu0 %v8517_v44 }
 0x65e   :  { %v2010_v59 = vpop.f32.mrf.mxu0  ;;  %v2081_v52 = vpop.f32.mrf.mxu1 }
 0x65f   :  { %v2011_v43 = vadd.f32 %v2010_v59, %v8518_v49  ;;  %v2082_v1 = vadd.f32 %v2081_v52, %v4829_v4 }
 0x660   :  { %v2012_v50 = vpop.f32.mrf.mxu0  ;;  %v2083_v46 = vpop.f32.mrf.mxu1 }
 0x661   :  { %v2013_v57 = vadd.f32 %v2012_v50, %v8519_v3  ;;  %v2157_v32 = vadd.f32 %v2011_v43, %v8520_v17  ;;  %v2084_v44 = vadd.f32 %v2083_v46, %v4833_v45  ;;  %v2171_v20 = vadd.f32 %v2082_v1, %v8522_v58 }
 0x663   :  { %v2158_v2 = vadd.f32 %v2013_v57, %v8521_v53  ;;  %v3042_v47 = vmul.f32 -1.442695, %v2157_v32  ;;  %v2172_v59 = vadd.f32 %v2084_v44, %v8523_v60  ;;  %v3044_v49 = vmul.f32 -1.442695, %v2171_v20 }
 0x665   :  { %v3043_v51 = vmul.f32 -1.442695, %v2158_v2  ;;  %3173 = vpow2.f32 %v3042_v47  ;;  %v3045_v50 = vmul.f32 -1.442695, %v2172_v59  ;;  %v8525_v59 = vld [vmem:[#allocation63_spill] sm:$0xff] }
 0x667   :  { %3175 = vpow2.f32 %v3043_v51 }
 0x668   :  { %3177 = vpow2.f32 %v3044_v49 }
 0x669   :  { %3179 = vpow2.f32 %v3045_v50 }
 0x672   :  { %v3174_v3 = vpop.eup %3173 }
 0x673   :  { %v2165_v53 = vadd.f32 1.0, %v3174_v3  ;;  %v8524_v3 = vld [vmem:[#allocation23_spill] sm:$0xff] }
 0x674   :  { %v3176_v17 = vpop.eup %3175 }
 0x675   :  { %v2166_v32 = vadd.f32 1.0, %v3176_v17  ;;  %3181 = vrcp.f32 %v2165_v53  ;;  %v3178_v47 = vpop.eup %3177 }
 0x676   :  { %v3180_v43 = vpop.eup %3179  ;;  %v2179_v52 = vadd.f32 1.0, %v3178_v47 }
 0x677   :  { %3183 = vrcp.f32 %v2166_v32  ;;  %v2180_v2 = vadd.f32 1.0, %v3180_v43 }
 0x678   :  { %3185 = vrcp.f32 %v2179_v52 }
 0x679   :  { %3187 = vrcp.f32 %v2180_v2 }
 0x682   :  { %v3182_v1 = vpop.eup %3181 }
 0x684   :  { %v3184_v49 = vpop.eup %3183 }
 0x685   :  { %v3186_v17 = vpop.eup %3185 }
 0x686   :  { %v3188_v53 = vpop.eup %3187  ;;  %v2191_v32 = vsub.f32 1.0, %v3186_v17  ;;  %v2195_v52 = vmul.f32 %v3186_v17, %v5887_v39  ;;  %v6371_v39 = vld [vmem:[#allocation3 + $0x2c8] sm:$0xff] }
 0x687   :  { %v2192_v43 = vsub.f32 1.0, %v3188_v53  ;;  %v6403_v17 = vld [vmem:[#allocation3 + $0x208] sm:$0xff] }
 0x69e   :  { %v2152_v51 = vpop.f32.mrf.mxu0 }
 0x69f   :  { %v2153_v57 = vadd.f32 %v2152_v51, %v4843_v33 }
 0x6a0   :  { %v2154_v58 = vpop.f32.mrf.mxu0 }
 0x6a1   :  { %v2185_v60 = vmul.f32 %v3182_v1, %v2153_v57  ;;  %v2155_v20 = vadd.f32 %v2154_v58, %v4847_v62  ;;  %v2196_v58 = vmul.f32 %v3188_v53, %v5889_v7  ;;  %v6375_v7 = vld [vmem:[#allocation3 + $0x2c0] sm:$0xff] }
 0x6a2   :  { %v6407_v53 = vld [vmem:[#allocation3 + $0x200] sm:$0xff] }
 0x6a3   :  { %v2187_v46 = vadd.f32 %v2185_v60, %v8524_v3  ;;  %v2186_v44 = vmul.f32 %v3184_v49, %v2155_v20  ;;  %v6367_v20 = vld [vmem:[#allocation3 + $0x2f0] sm:$0xff]  ;;  %v6379_v49 = vld [vmem:[#allocation3 + $0x298] sm:$0xff] }
 0x6a4   :  { %v6383_v3 = vld [vmem:[#allocation3 + $0x290] sm:$0xff] }
 0x6a5   :  { %3189 = vtanh.f32 %v2187_v46  ;;  %v2188_v50 = vadd.f32 %v2186_v44, %v8525_v59  ;;  %v6387_v46 = vld [vmem:[#allocation3 + $0x268] sm:$0xff]  ;;  %v6391_v44 = vld [vmem:[#allocation3 + $0x260] sm:$0xff]  ;;  %v6395_v59 = vld [vmem:[#allocation3 + $0x238] sm:$0xff] }
 0x6a7   :  { %3191 = vtanh.f32 %v2188_v50  ;;  %v6399_v50 = vld [vmem:[#allocation3 + $0x230] sm:$0xff] }
 0x6b2   :  { %v3190_v47 = vpop.eup %3189 }
 0x6b3   :  { %v2193_v51 = vmul.f32 %v3190_v47, %v2191_v32  ;;  %v6411_v32 = vld [vmem:[#allocation3 + $0x1d8] sm:$0xff]  ;;  %v6415_v47 = vld [vmem:[#allocation3 + $0x1d0] sm:$0xff] }
 0x6b4   :  { %v3192_v57 = vpop.eup %3191 }
 0x6b5   :  { %v2194_v1 = vmul.f32 %v3192_v57, %v2192_v43  ;;  %v6359_v2 = vadd.f32 %v2195_v52, %v2193_v51  ;;  %v6419_v43 = vld [vmem:[#allocation3 + $0x1a8] sm:$0xff]  ;;  %v6423_v51 = vld [vmem:[#allocation3 + $0x1a0] sm:$0xff]  ;;  %v6427_v52 = vld [vmem:[#allocation3 + $0x178] sm:$0xff] }
 0x6b6   :  { %8526 = vst [vmem:[#allocation125_spill] sm:$0xff] %v6427_v52  ;;  %v6431_v57 = vld [vmem:[#allocation3 + $0x170] sm:$0xff] }
 0x6b7   :  { %v6361_v60 = vadd.f32 %v2196_v58, %v2194_v1  ;;  %8527 = vst [vmem:[#allocation126_spill] sm:$0xff] %v6431_v57  ;;  %v6435_v1 = vld [vmem:[#allocation3 + $0x148] sm:$0xff]  ;;  %v6439_v58 = vld [vmem:[#allocation3 + $0x140] sm:$0xff] }
 0x6b8   :  { %8528 = vst [vmem:[#allocation127_spill] sm:$0xff] %v6435_v1  ;;  %8529 = vst [vmem:[#allocation128_spill] sm:$0xff] %v6439_v58 }
 0x6b9   :  { %2270 = vmatprep.mubr.f32.mxu1 %v6361_v60  ;;  %2341 = vmatprep.mubr.f32.mxu0 %v6361_v60 }
 0x6ba   :  { %2271 = vmatmul.mubr.f32.vlgmr.msra.gmra.mxu1 %v6359_v2  ;;  %2342 = vmatmul.mubr.f32.vlgmr.msra.gmra.mxu0 %v6359_v2 }
 0x6bb   :  { %2349 = vmatpush1.msra.mxu1 %v6367_v20  ;;  %2412 = vmatprep.mubr.f32.mxu1 %v6361_v60 }
 0x6bc   :  { %2350 = vmatprep.subr.mxu1 %v6371_v39  ;;  %2469 = vmatpush1.msra.mxu0 %v5898_v14 }
 0x6bd   :  { %2351 = vmatpush1.msra.mxu1 %v6375_v7  ;;  %2470 = vmatprep.subr.mxu0 %v5902_v0 }
 0x6be   :  { %2352 = vmatprep.subr.mxu1 %v6379_v49  ;;  %2471 = vmatpush1.msra.mxu0 %v5906_v48 }
 0x6bf   :  { %2353 = vmatpush1.msra.mxu1 %v6383_v3  ;;  %2472 = vmatprep.subr.mxu0 %v5910_v61 }
 0x6c0   :  { %2354 = vmatprep.subr.mxu1 %v6387_v46  ;;  %2473 = vmatpush1.msra.mxu0 %v5914_v11 }
 0x6c1   :  { %2355 = vmatpush1.msra.mxu1 %v6391_v44  ;;  %2474 = vmatprep.subr.mxu0 %v5918_v63 }
 0x6c2   :  { %2356 = vmatprep.subr.mxu1 %v6395_v59  ;;  %2475 = vmatpush1.msra.mxu0 %v5922_v23 }
 0x6c3   :  { %2357 = vmatpush1.msra.mxu1 %v6399_v50  ;;  %2476 = vmatprep.subr.mxu0 %v5926_v55 }
 0x6c4   :  { %2358 = vmatprep.subr.mxu1 %v6403_v17  ;;  %2477 = vmatpush1.msra.mxu0 %v5930_v28 }
 0x6c5   :  { %2359 = vmatpush1.msra.mxu1 %v6407_v53  ;;  %2478 = vmatprep.subr.mxu0 %v5934_v31 }
 0x6c6   :  { %2360 = vmatprep.subr.mxu1 %v6411_v32  ;;  %2479 = vmatpush1.msra.mxu0 %v5938_v15 }
 0x6c7   :  { %2361 = vmatpush1.msra.mxu1 %v6415_v47  ;;  %2480 = vmatprep.subr.mxu0 %v5942_v24 }
 0x6c8   :  { %2362 = vmatprep.subr.mxu1 %v6419_v43  ;;  %2481 = vmatpush1.msra.mxu0 %v5946_v12 }
 0x6c9   :  { %2363 = vmatpush1.msra.mxu1 %v6423_v51  ;;  %2482 = vmatprep.subr.mxu0 %v5950_v8 }
 0x6ca   :  { %2364 = vmatprep.subr.mxu1 %v6427_v52  ;;  %2483 = vmatpush1.msra.mxu0 %v5954_v9  ;;  %v6443_v52 = vld [vmem:[#allocation3 + $0x118] sm:$0xff] }
 0x6cb   :  { %2365 = vmatpush1.msra.mxu1 %v6431_v57  ;;  %2484 = vmatprep.subr.mxu0 %v5958_v5  ;;  %8530 = vst [vmem:[#allocation129_spill] sm:$0xff] %v6443_v52  ;;  %v6447_v57 = vld [vmem:[#allocation3 + $0x110] sm:$0xff] }
 0x6cc   :  { %2366 = vmatprep.subr.mxu1 %v6435_v1  ;;  %2485 = vmatpush1.msra.mxu0 %v5962_v27  ;;  %8531 = vst [vmem:[#allocation130_spill] sm:$0xff] %v6447_v57  ;;  %v6451_v1 = vld [vmem:[#allocation3 + $0xe8] sm:$0xff] }
 0x6cd   :  { %2367 = vmatpush1.msra.mxu1 %v6439_v58  ;;  %2486 = vmatprep.subr.mxu0 %v5966_v36  ;;  %8532 = vst [vmem:[#allocation131_spill] sm:$0xff] %v6451_v1  ;;  %v6455_v58 = vld [vmem:[#allocation3 + $0xe0] sm:$0xff] }
 0x6ce   :  { %2368 = vmatprep.subr.mxu1 %v6443_v52  ;;  %2487 = vmatpush1.msra.mxu0 %v5970_v19  ;;  %8533 = vst [vmem:[#allocation132_spill] sm:$0xff] %v6455_v58  ;;  %v6459_v52 = vld [vmem:[#allocation3 + $0xb8] sm:$0xff] }
 0x6cf   :  { %2369 = vmatpush1.msra.mxu1 %v6447_v57  ;;  %2488 = vmatprep.subr.mxu0 %v5974_v10  ;;  %8534 = vst [vmem:[#allocation133_spill] sm:$0xff] %v6459_v52  ;;  %v6463_v57 = vld [vmem:[#allocation3 + $0xb0] sm:$0xff] }
 0x6d0   :  { %2370 = vmatprep.subr.mxu1 %v6451_v1  ;;  %2489 = vmatpush1.msra.mxu0 %v5978_v18  ;;  %8535 = vst [vmem:[#allocation134_spill] sm:$0xff] %v6463_v57  ;;  %v6467_v1 = vld [vmem:[#allocation3 + $0x88] sm:$0xff] }
 0x6d1   :  { %2371 = vmatpush1.msra.mxu1 %v6455_v58  ;;  %2490 = vmatprep.subr.mxu0 %v5982_v42  ;;  %8536 = vst [vmem:[#allocation135_spill] sm:$0xff] %v6467_v1  ;;  %v6471_v58 = vld [vmem:[#allocation3 + $0x80] sm:$0xff] }
 0x6d2   :  { %2372 = vmatprep.subr.mxu1 %v6459_v52  ;;  %2491 = vmatpush1.msra.mxu0 %v5986_v35  ;;  %8537 = vst [vmem:[#allocation136_spill] sm:$0xff] %v6471_v58  ;;  %v6475_v52 = vld [vmem:[#allocation3 + $0x58] sm:$0xff] }
 0x6d3   :  { %2373 = vmatpush1.msra.mxu1 %v6463_v57  ;;  %2492 = vmatprep.subr.mxu0 %v5990_v16  ;;  %8538 = vst [vmem:[#allocation137_spill] sm:$0xff] %v6475_v52  ;;  %v6479_v57 = vld [vmem:[#allocation3 + $0x50] sm:$0xff] }
 0x6d4   :  { %2374 = vmatprep.subr.mxu1 %v6467_v1  ;;  %2493 = vmatpush1.msra.mxu0 %v5994_v56  ;;  %8539 = vst [vmem:[#allocation138_spill] sm:$0xff] %v6479_v57  ;;  %v6483_v1 = vld [vmem:[#allocation3 + $0x28] sm:$0xff]  ;;  %v8668_v56 = vld [vmem:[#allocation52_spill] sm:$0xff] }
 0x6d5   :  { %2375 = vmatpush1.msra.mxu1 %v6471_v58  ;;  %2494 = vmatprep.subr.mxu0 %v5998_v21  ;;  %8540 = vst [vmem:[#allocation139_spill] sm:$0xff] %v6483_v1  ;;  %v6487_v58 = vld [vmem:[#allocation3 + $0x20] sm:$0xff] }
 0x6d6   :  { %2376 = vmatprep.subr.mxu1 %v6475_v52  ;;  %2495 = vmatpush1.msra.mxu0 %v6002_v41  ;;  %8541 = vst [vmem:[#allocation140_spill] sm:$0xff] %v6487_v58  ;;  %v6491_v52 = vld [vmem:[#allocation3 + $0x5f8] sm:$0xff] }
 0x6d7   :  { %2377 = vmatpush1.msra.mxu1 %v6479_v57  ;;  %2496 = vmatprep.subr.mxu0 %v6006_v22  ;;  %8542 = vst [vmem:[#allocation141_spill] sm:$0xff] %v6491_v52  ;;  %v6495_v57 = vld [vmem:[#allocation3 + $0x5f0] sm:$0xff] }
 0x6d8   :  { %2378 = vmatprep.subr.mxu1 %v6483_v1  ;;  %2497 = vmatpush1.msra.mxu0 %v6010_v37  ;;  %8543 = vst [vmem:[#allocation142_spill] sm:$0xff] %v6495_v57  ;;  %v6499_v1 = vld [vmem:[#allocation3 + $0x5c8] sm:$0xff] }
 0x6d9   :  { %2379 = vmatpush1.msra.mxu1 %v6487_v58  ;;  %2498 = vmatprep.subr.mxu0 %v6014_v40  ;;  %8544 = vst [vmem:[#allocation143_spill] sm:$0xff] %v6499_v1  ;;  %v6503_v58 = vld [vmem:[#allocation3 + $0x5c0] sm:$0xff]  ;;  %v8665_v40 = vld [vmem:[#allocation36_spill] sm:$0xff]  ;;  %v8666_v37 = vld [vmem:[#allocation11_spill] sm:$0xff] }
 0x6da   :  { %2380 = vmatprep.subr.mxu1 %v6491_v52  ;;  %2499 = vmatpush1.msra.mxu0 %v6018_v13  ;;  %8545 = vst [vmem:[#allocation144_spill] sm:$0xff] %v6503_v58  ;;  %v6507_v52 = vld [vmem:[#allocation3 + $0x598] sm:$0xff] }
 0x6db   :  { %2381 = vmatpush2.msra.mxu1 %v6495_v57  ;;  %2500 = vmatprep.subr.mxu0 %v6022_v6  ;;  %8546 = vst [vmem:[#allocation145_spill] sm:$0xff] %v6507_v52  ;;  %v6511_v57 = vld [vmem:[#allocation3 + $0x590] sm:$0xff]  ;;  %v8663_v6 = vld [vmem:[#allocation35_spill] sm:$0xff]  ;;  %v8664_v13 = vld [vmem:[#allocation37_spill] sm:$0xff] }
 0x6dc   :  { %2382 = vmatprep.subr.mxu1 %v6499_v1  ;;  %2501 = vmatpush2.msra.mxu0 %v6026_v25  ;;  %8547 = vst [vmem:[#allocation146_spill] sm:$0xff] %v6511_v57  ;;  %v6515_v1 = vld [vmem:[#allocation3 + $0x568] sm:$0xff]  ;;  %v8607_v25 = vld [vmem:[#allocation74_spill] sm:$0xff] }
 0x6dd   :  { %2383 = vmatpush2.msra.mxu1 %v6503_v58  ;;  %2502 = vmatprep.subr.mxu0 %v6030_v34  ;;  %8548 = vst [vmem:[#allocation147_spill] sm:$0xff] %v6515_v1  ;;  %v6519_v58 = vld [vmem:[#allocation3 + $0x560] sm:$0xff]  ;;  %v8604_v34 = vld [vmem:[#allocation68_spill] sm:$0xff] }
 0x6de   :  { %2384 = vmatprep.subr.mxu1 %v6507_v52  ;;  %2503 = vmatpush2.msra.mxu0 %v6034_v30  ;;  %8549 = vst [vmem:[#allocation148_spill] sm:$0xff] %v6519_v58  ;;  %v6523_v52 = vld [vmem:[#allocation3 + $0x538] sm:$0xff]  ;;  %v8601_v30 = vld [vmem:[#allocation171_spill] sm:$0xff] }
 0x6df   :  { %2385 = vmatpush2.msra.mxu1 %v6511_v57  ;;  %2504 = vmatprep.subr.mxu0 %v6038_v38  ;;  %8550 = vst [vmem:[#allocation149_spill] sm:$0xff] %v6523_v52  ;;  %v6527_v57 = vld [vmem:[#allocation3 + $0x530] sm:$0xff]  ;;  %v8552_v38 = vld [vmem:[#allocation155_spill] sm:$0xff] }
 0x6e0   :  { %2386 = vmatprep.subr.mxu1 %v6515_v1  ;;  %2505 = vmatpush2.msra.mxu0 %v6042_v26  ;;  %8551 = vst [vmem:[#allocation150_spill] sm:$0xff] %v6527_v57  ;;  %v6531_v1 = vld [vmem:[#allocation3 + $0x508] sm:$0xff]  ;;  %v8554_v26 = vld [vmem:[#allocation156_spill] sm:$0xff] }
 0x6e1   :  { %2387 = vmatpush2.msra.mxu1 %v6519_v58  ;;  %2506 = vmatprep.subr.mxu0 %v6046_v29  ;;  %8553 = vst [vmem:[#allocation151_spill] sm:$0xff] %v6531_v1  ;;  %v6535_v58 = vld [vmem:[#allocation3 + $0x500] sm:$0xff]  ;;  %v8556_v29 = vld [vmem:[#allocation157_spill] sm:$0xff] }
 0x6e2   :  { %2388 = vmatprep.subr.mxu1 %v6523_v52  ;;  %2507 = vmatpush2.msra.mxu0 %v6050_v54  ;;  %8555 = vst [vmem:[#allocation152_spill] sm:$0xff] %v6535_v58  ;;  %v6539_v52 = vld [vmem:[#allocation3 + $0x4d8] sm:$0xff]  ;;  %v8558_v54 = vld [vmem:[#allocation158_spill] sm:$0xff] }
 0x6e3   :  { %2389 = vmatpush2.msra.mxu1 %v6527_v57  ;;  %2508 = vmatprep.subr.mxu0 %v8552_v38  ;;  %8557 = vst [vmem:[#allocation153_spill] sm:$0xff] %v6539_v52  ;;  %v6543_v57 = vld [vmem:[#allocation3 + $0x4d0] sm:$0xff]  ;;  %v8560_v38 = vld [vmem:[#allocation159_spill] sm:$0xff] }
 0x6e4   :  { %2390 = vmatprep.subr.mxu1 %v6531_v1  ;;  %2509 = vmatpush2.msra.mxu0 %v8554_v26  ;;  %8559 = vst [vmem:[#allocation154_spill] sm:$0xff] %v6543_v57  ;;  %v6547_v1 = vld [vmem:[#allocation3 + $0x4a8] sm:$0xff]  ;;  %v8562_v26 = vld [vmem:[#allocation160_spill] sm:$0xff] }
 0x6e5   :  { %2391 = vmatpush2.msra.mxu1 %v6535_v58  ;;  %2510 = vmatprep.subr.mxu0 %v8556_v29  ;;  %8561 = vst [vmem:[#allocation30_spill] sm:$0xff] %v6547_v1  ;;  %v6551_v58 = vld [vmem:[#allocation3 + $0x4a0] sm:$0xff]  ;;  %v8564_v29 = vld [vmem:[#allocation43_spill] sm:$0xff] }
 0x6e6   :  { %2392 = vmatprep.subr.mxu1 %v6539_v52  ;;  %2511 = vmatpush2.msra.mxu0 %v8558_v54  ;;  %8563 = vst [vmem:[#allocation8_spill] sm:$0xff] %v6551_v58  ;;  %v6555_v52 = vld [vmem:[#allocation3 + $0x478] sm:$0xff] }
 0x6e7   :  { %2393 = vmatpush2.msra.mxu1 %v6543_v57  ;;  %2512 = vmatprep.subr.mxu0 %v8560_v38  ;;  %8565 = vst [vmem:[#allocation15_spill] sm:$0xff] %v6555_v52  ;;  %v8566_v54 = vld [vmem:[#allocation161_spill] sm:$0xff]  ;;  %v6559_v57 = vld [vmem:[#allocation3 + $0x470] sm:$0xff] }
 0x6e8   :  { %2394 = vmatprep.subr.mxu1 %v6547_v1  ;;  %2513 = vmatpush2.msra.mxu0 %v8562_v26  ;;  %8567 = vst [vmem:[#allocation46_spill] sm:$0xff] %v6559_v57  ;;  %v8568_v38 = vld [vmem:[#allocation45_spill] sm:$0xff]  ;;  %v6563_v1 = vld [vmem:[#allocation3 + $0x448] sm:$0xff]  ;;  %v8570_v26 = vld [vmem:[#allocation162_spill] sm:$0xff] }
 0x6e9   :  { %2395 = vmatpush2.msra.mxu1 %v6551_v58  ;;  %2514 = vmatprep.subr.mxu0 %v8564_v29  ;;  %8569 = vst [vmem:[#allocation21_spill] sm:$0xff] %v6563_v1  ;;  %v6567_v58 = vld [vmem:[#allocation3 + $0x440] sm:$0xff]  ;;  %v8572_v29 = vld [vmem:[#allocation47_spill] sm:$0xff] }
 0x6ea   :  { %2396 = vmatprep.subr.mxu1 %v6555_v52  ;;  %2515 = vmatpush2.msra.mxu0 %v8566_v54  ;;  %8571 = vst [vmem:[#allocation58_spill] sm:$0xff] %v6567_v58  ;;  %v6571_v52 = vld [vmem:[#allocation3 + $0x418] sm:$0xff]  ;;  %v8574_v54 = vld [vmem:[#allocation163_spill] sm:$0xff] }
 0x6eb   :  { %2397 = vmatpush2.msra.mxu1 %v6559_v57  ;;  %2516 = vmatprep.subr.mxu0 %v8568_v38  ;;  %8573 = vst [vmem:[#allocation172_spill] sm:$0xff] %v6571_v52  ;;  %v6575_v57 = vld [vmem:[#allocation3 + $0x410] sm:$0xff]  ;;  %v8576_v38 = vld [vmem:[#allocation49_spill] sm:$0xff] }
 0x6ec   :  { %2398 = vmatprep.subr.mxu1 %v6563_v1  ;;  %2517 = vmatpush2.msra.mxu0 %v8570_v26  ;;  %8575 = vst [vmem:[#allocation173_spill] sm:$0xff] %v6575_v57  ;;  %v6579_v1 = vld [vmem:[#allocation3 + $0x3e8] sm:$0xff]  ;;  %v8578_v26 = vld [vmem:[#allocation164_spill] sm:$0xff] }
 0x6ed   :  { %2399 = vmatpush2.msra.mxu1 %v6567_v58  ;;  %2518 = vmatprep.subr.mxu0 %v8572_v29  ;;  %8577 = vst [vmem:[#allocation174_spill] sm:$0xff] %v6579_v1  ;;  %v6583_v58 = vld [vmem:[#allocation3 + $0x3e0] sm:$0xff]  ;;  %v8580_v29 = vld [vmem:[#allocation51_spill] sm:$0xff] }
 0x6ee   :  { %2400 = vmatprep.subr.mxu1 %v6571_v52  ;;  %2519 = vmatpush2.msra.mxu0 %v8574_v54  ;;  %8579 = vst [vmem:[#allocation175_spill] sm:$0xff] %v6583_v58  ;;  %v6587_v52 = vld [vmem:[#allocation3 + $0x3b8] sm:$0xff] }
 0x6ef   :  { %2401 = vmatpush2.msra.mxu1 %v6575_v57  ;;  %2520 = vmatprep.subr.mxu0 %v8576_v38  ;;  %8581 = vst [vmem:[#allocation176_spill] sm:$0xff] %v6587_v52  ;;  %v8582_v54 = vld [vmem:[#allocation165_spill] sm:$0xff]  ;;  %v6591_v57 = vld [vmem:[#allocation3 + $0x3b0] sm:$0xff] }
 0x6f0   :  { %2402 = vmatprep.subr.mxu1 %v6579_v1  ;;  %2521 = vmatpush2.msra.mxu0 %v8578_v26  ;;  %8583 = vst [vmem:[#allocation177_spill] sm:$0xff] %v6591_v57  ;;  %v8584_v38 = vld [vmem:[#allocation53_spill] sm:$0xff]  ;;  %v6595_v1 = vld [vmem:[#allocation3 + $0x388] sm:$0xff]  ;;  %v8586_v26 = vld [vmem:[#allocation166_spill] sm:$0xff] }
 0x6f1   :  { %2403 = vmatpush2.msra.mxu1 %v6583_v58  ;;  %2522 = vmatprep.subr.mxu0 %v8580_v29  ;;  %8585 = vst [vmem:[#allocation178_spill] sm:$0xff] %v6595_v1  ;;  %v6599_v58 = vld [vmem:[#allocation3 + $0x380] sm:$0xff]  ;;  %v8588_v29 = vld [vmem:[#allocation55_spill] sm:$0xff] }
 0x6f2   :  { %2404 = vmatprep.subr.mxu1 %v6587_v52  ;;  %2523 = vmatpush2.msra.mxu0 %v8582_v54  ;;  %8587 = vst [vmem:[#allocation179_spill] sm:$0xff] %v6599_v58  ;;  %v6603_v52 = vld [vmem:[#allocation3 + $0x358] sm:$0xff]  ;;  %v8590_v54 = vld [vmem:[#allocation167_spill] sm:$0xff] }
 0x6f3   :  { %2405 = vmatpush2.msra.mxu1 %v6591_v57  ;;  %2524 = vmatprep.subr.mxu0 %v8584_v38  ;;  %8589 = vst [vmem:[#allocation180_spill] sm:$0xff] %v6603_v52  ;;  %v6607_v57 = vld [vmem:[#allocation3 + $0x350] sm:$0xff]  ;;  %v8592_v38 = vld [vmem:[#allocation57_spill] sm:$0xff] }
 0x6f4   :  { %2406 = vmatprep.subr.mxu1 %v6595_v1  ;;  %2525 = vmatpush2.msra.mxu0 %v8586_v26  ;;  %8591 = vst [vmem:[#allocation181_spill] sm:$0xff] %v6607_v57  ;;  %v6611_v1 = vld [vmem:[#allocation3 + $0x328] sm:$0xff]  ;;  %v8594_v26 = vld [vmem:[#allocation168_spill] sm:$0xff] }
 0x6f5   :  { %2407 = vmatpush2.msra.mxu1 %v6599_v58  ;;  %2526 = vmatprep.subr.mxu0 %v8588_v29  ;;  %8593 = vst [vmem:[#allocation182_spill] sm:$0xff] %v6611_v1  ;;  %v6615_v58 = vld [vmem:[#allocation3 + $0x320] sm:$0xff]  ;;  %v8596_v29 = vld [vmem:[#allocation59_spill] sm:$0xff] }
 0x6f6   :  { %2408 = vmatprep.subr.mxu1 %v6603_v52  ;;  %2527 = vmatpush2.msra.mxu0 %v8590_v54  ;;  %8595 = vst [vmem:[#allocation183_spill] sm:$0xff] %v6615_v58  ;;  %v8597_v54 = vld [vmem:[#allocation169_spill] sm:$0xff] }
 0x6f7   :  { %2409 = vmatpush2.msra.mxu1 %v6607_v57  ;;  %2528 = vmatprep.subr.mxu0 %v8592_v38  ;;  %v8598_v52 = vld [vmem:[#allocation61_spill] sm:$0xff]  ;;  %v8599_v57 = vld [vmem:[#allocation170_spill] sm:$0xff] }
 0x6f8   :  { %2410 = vmatprep.subr.mxu1 %v6611_v1  ;;  %2529 = vmatpush2.msra.mxu0 %v8594_v26  ;;  %v8600_v38 = vld [vmem:[#allocation62_spill] sm:$0xff]  ;;  %v8602_v1 = vld [vmem:[#allocation64_spill] sm:$0xff] }
 0x6f9   :  { %2411 = vmatpush2.msra.mxu1 %v6615_v58  ;;  %2530 = vmatprep.subr.mxu0 %v8596_v29  ;;  %v8603_v26 = vld [vmem:[#allocation66_spill] sm:$0xff]  ;;  %v8606_v29 = vld [vmem:[#allocation72_spill] sm:$0xff] }
 0x6fa   :  { %2413 = vmatmul.mubr.f32.vlgmr.msra.gmra.mxu1 %v6359_v2  ;;  %2539 = vmatprep.subr.mxu1 %v8597_v54  ;;  %v8605_v58 = vld [vmem:[#allocation70_spill] sm:$0xff]  ;;  %v8608_v54 = vld [vmem:[#allocation76_spill] sm:$0xff] }
 0x6fb   :  { %2540 = vmatpush1.msra.mxu1 %v8598_v52  ;;  %2531 = vmatpush2.msra.mxu0 %v8599_v57  ;;  %v8609_v52 = vld [vmem:[#allocation78_spill] sm:$0xff]  ;;  %v8610_v57 = vld [vmem:[#allocation80_spill] sm:$0xff] }
 0x6fc   :  { %2541 = vmatprep.subr.mxu1 %v8600_v38  ;;  %2610 = vmatprep.subr.mxu0 %v8601_v30  ;;  %v8611_v38 = vld [vmem:[#allocation82_spill] sm:$0xff]  ;;  %v8612_v30 = vld [vmem:[#allocation84_spill] sm:$0xff] }
 0x6fd   :  { %2542 = vmatpush1.msra.mxu1 %v8602_v1  ;;  %v8613_v1 = vld [vmem:[#allocation86_spill] sm:$0xff] }
 0x6fe   :  { %2543 = vmatprep.subr.mxu1 %v8603_v26  ;;  %v8614_v26 = vld [vmem:[#allocation88_spill] sm:$0xff] }
 0x6ff   :  { %2544 = vmatpush1.msra.mxu1 %v8604_v34  ;;  %v8615_v34 = vld [vmem:[#allocation90_spill] sm:$0xff] }
 0x700   :  { %2545 = vmatprep.subr.mxu1 %v8605_v58  ;;  %v8616_v58 = vld [vmem:[#allocation95_spill] sm:$0xff] }
 0x701   :  { %2546 = vmatpush1.msra.mxu1 %v8606_v29  ;;  %v8617_v29 = vld [vmem:[#allocation65_spill] sm:$0xff] }
 0x702   :  { %2547 = vmatprep.subr.mxu1 %v8607_v25  ;;  %v8618_v25 = vld [vmem:[#allocation67_spill] sm:$0xff] }
 0x703   :  { %2548 = vmatpush1.msra.mxu1 %v8608_v54  ;;  %v8619_v54 = vld [vmem:[#allocation69_spill] sm:$0xff] }
 0x704   :  { %2549 = vmatprep.subr.mxu1 %v8609_v52  ;;  %v8620_v52 = vld [vmem:[#allocation71_spill] sm:$0xff] }
 0x705   :  { %2550 = vmatpush1.msra.mxu1 %v8610_v57  ;;  %v8621_v57 = vld [vmem:[#allocation73_spill] sm:$0xff] }
 0x706   :  { %2551 = vmatprep.subr.mxu1 %v8611_v38  ;;  %v8622_v38 = vld [vmem:[#allocation75_spill] sm:$0xff] }
 0x707   :  { %2552 = vmatpush1.msra.mxu1 %v8612_v30  ;;  %v8623_v30 = vld [vmem:[#allocation77_spill] sm:$0xff] }
 0x708   :  { %2553 = vmatprep.subr.mxu1 %v8613_v1  ;;  %v8624_v1 = vld [vmem:[#allocation79_spill] sm:$0xff] }
 0x709   :  { %2554 = vmatpush1.msra.mxu1 %v8614_v26  ;;  %v8625_v26 = vld [vmem:[#allocation81_spill] sm:$0xff] }
 0x70a   :  { %2555 = vmatprep.subr.mxu1 %v8615_v34  ;;  %v8626_v34 = vld [vmem:[#allocation83_spill] sm:$0xff] }
 0x70b   :  { %2556 = vmatpush1.msra.mxu1 %v8616_v58  ;;  %v8627_v58 = vld [vmem:[#allocation85_spill] sm:$0xff] }
 0x70c   :  { %2557 = vmatprep.subr.mxu1 %v8617_v29  ;;  %v8628_v29 = vld [vmem:[#allocation87_spill] sm:$0xff] }
 0x70d   :  { %2558 = vmatpush1.msra.mxu1 %v8618_v25  ;;  %v8629_v25 = vld [vmem:[#allocation89_spill] sm:$0xff] }
 0x70e   :  { %2559 = vmatprep.subr.mxu1 %v8619_v54  ;;  %v8630_v54 = vld [vmem:[#allocation91_spill] sm:$0xff] }
 0x70f   :  { %2560 = vmatpush1.msra.mxu1 %v8620_v52  ;;  %v8631_v52 = vld [vmem:[#allocation92_spill] sm:$0xff] }
 0x710   :  { %2561 = vmatprep.subr.mxu1 %v8621_v57  ;;  %v8632_v57 = vld [vmem:[#allocation93_spill] sm:$0xff] }
 0x711   :  { %2562 = vmatpush1.msra.mxu1 %v8622_v38  ;;  %v8633_v38 = vld [vmem:[#allocation94_spill] sm:$0xff] }
 0x712   :  { %2563 = vmatprep.subr.mxu1 %v8623_v30  ;;  %v8634_v30 = vld [vmem:[#allocation96_spill] sm:$0xff] }
 0x713   :  { %2564 = vmatpush1.msra.mxu1 %v8624_v1  ;;  %v8635_v1 = vld [vmem:[#allocation97_spill] sm:$0xff] }
 0x714   :  { %2565 = vmatprep.subr.mxu1 %v8625_v26  ;;  %v8636_v26 = vld [vmem:[#allocation98_spill] sm:$0xff] }
 0x715   :  { %2566 = vmatpush1.msra.mxu1 %v8626_v34  ;;  %v8637_v34 = vld [vmem:[#allocation99_spill] sm:$0xff] }
 0x716   :  { %2567 = vmatprep.subr.mxu1 %v8627_v58  ;;  %v8638_v58 = vld [vmem:[#allocation100_spill] sm:$0xff] }
 0x717   :  { %2568 = vmatpush1.msra.mxu1 %v8628_v29  ;;  %v8639_v29 = vld [vmem:[#allocation101_spill] sm:$0xff] }
 0x718   :  { %2569 = vmatprep.subr.mxu1 %v8629_v25  ;;  %v8640_v25 = vld [vmem:[#allocation102_spill] sm:$0xff] }
 0x719   :  { %2570 = vmatpush1.msra.mxu1 %v8630_v54  ;;  %v8641_v54 = vld [vmem:[#allocation103_spill] sm:$0xff] }
 0x71a   :  { %2571 = vmatprep.subr.mxu1 %v8631_v52  ;;  %v8642_v52 = vld [vmem:[#allocation104_spill] sm:$0xff] }
 0x71b   :  { %2572 = vmatpush2.msra.mxu1 %v8632_v57  ;;  %v8643_v57 = vld [vmem:[#allocation105_spill] sm:$0xff] }
 0x71c   :  { %2573 = vmatprep.subr.mxu1 %v8633_v38  ;;  %v8644_v38 = vld [vmem:[#allocation106_spill] sm:$0xff] }
 0x71d   :  { %2574 = vmatpush2.msra.mxu1 %v8634_v30  ;;  %v8645_v30 = vld [vmem:[#allocation107_spill] sm:$0xff] }
 0x71e   :  { %2575 = vmatprep.subr.mxu1 %v8635_v1  ;;  %v8646_v1 = vld [vmem:[#allocation108_spill] sm:$0xff] }
 0x71f   :  { %2576 = vmatpush2.msra.mxu1 %v8636_v26  ;;  %v8647_v26 = vld [vmem:[#allocation109_spill] sm:$0xff] }
 0x720   :  { %2577 = vmatprep.subr.mxu1 %v8637_v34  ;;  %v8648_v34 = vld [vmem:[#allocation110_spill] sm:$0xff] }
 0x721   :  { %2578 = vmatpush2.msra.mxu1 %v8638_v58  ;;  %v8649_v58 = vld [vmem:[#allocation111_spill] sm:$0xff] }
 0x722   :  { %2579 = vmatprep.subr.mxu1 %v8639_v29  ;;  %v8650_v29 = vld [vmem:[#allocation112_spill] sm:$0xff] }
 0x723   :  { %2580 = vmatpush2.msra.mxu1 %v8640_v25  ;;  %v8651_v25 = vld [vmem:[#allocation113_spill] sm:$0xff] }
 0x724   :  { %2581 = vmatprep.subr.mxu1 %v8641_v54  ;;  %v8652_v54 = vld [vmem:[#allocation114_spill] sm:$0xff] }
 0x725   :  { %2582 = vmatpush2.msra.mxu1 %v8642_v52  ;;  %v8653_v52 = vld [vmem:[#allocation115_spill] sm:$0xff] }
 0x726   :  { %2583 = vmatprep.subr.mxu1 %v8643_v57  ;;  %v8654_v57 = vld [vmem:[#allocation116_spill] sm:$0xff] }
 0x727   :  { %2584 = vmatpush2.msra.mxu1 %v8644_v38  ;;  %v8655_v38 = vld [vmem:[#allocation117_spill] sm:$0xff] }
 0x728   :  { %2585 = vmatprep.subr.mxu1 %v8645_v30  ;;  %v8656_v30 = vld [vmem:[#allocation118_spill] sm:$0xff] }
 0x729   :  { %2586 = vmatpush2.msra.mxu1 %v8646_v1  ;;  %v8657_v1 = vld [vmem:[#allocation119_spill] sm:$0xff] }
 0x72a   :  { %2587 = vmatprep.subr.mxu1 %v8647_v26  ;;  %v8658_v26 = vld [vmem:[#allocation120_spill] sm:$0xff] }
 0x72b   :  { %2588 = vmatpush2.msra.mxu1 %v8648_v34  ;;  %v8659_v34 = vld [vmem:[#allocation121_spill] sm:$0xff] }
 0x72c   :  { %2589 = vmatprep.subr.mxu1 %v8649_v58  ;;  %v8660_v58 = vld [vmem:[#allocation122_spill] sm:$0xff] }
 0x72d   :  { %2590 = vmatpush2.msra.mxu1 %v8650_v29  ;;  %v8661_v29 = vld [vmem:[#allocation123_spill] sm:$0xff] }
 0x72e   :  { %2591 = vmatprep.subr.mxu1 %v8651_v25  ;;  %v8662_v25 = vld [vmem:[#allocation124_spill] sm:$0xff] }
 0x72f   :  { %2592 = vmatpush2.msra.mxu1 %v8652_v54  ;;  %v3637_v54 = vld [vmem:[#allocation3 + $0x2d8] sm:$0xff] }
 0x730   :  { %2593 = vmatprep.subr.mxu1 %v8653_v52 }
 0x731   :  { %2594 = vmatpush2.msra.mxu1 %v8654_v57 }
 0x732   :  { %2595 = vmatprep.subr.mxu1 %v8655_v38 }
 0x733   :  { %2596 = vmatpush2.msra.mxu1 %v8656_v30 }
 0x734   :  { %2597 = vmatprep.subr.mxu1 %v8657_v1 }
 0x735   :  { %2598 = vmatpush2.msra.mxu1 %v8658_v26 }
 0x736   :  { %2599 = vmatprep.subr.mxu1 %v8659_v34 }
 0x737   :  { %2600 = vmatpush2.msra.mxu1 %v8660_v58 }
 0x738   :  { %2601 = vmatprep.subr.mxu1 %v8661_v29 }
 0x739   :  { %2602 = vmatpush2.msra.mxu1 %v8662_v25  ;;  %v8667_v25 = vld [vmem:[#allocation18_spill] sm:$0xff] }
 0x73a   :  { %2730 = vmatprep.subr.mxu1 %v3637_v54 }
 0x77a   :  { %v2272_v52 = vpop.f32.mrf.mxu1  ;;  %v2343_v34 = vpop.f32.mrf.mxu0 }
 0x77b   :  { %v2273_v38 = vadd.f32 %v2272_v52, %v8663_v6  ;;  %v2344_v29 = vadd.f32 %v2343_v34, %v4829_v4 }
 0x77c   :  { %v2274_v57 = vpop.f32.mrf.mxu1  ;;  %v2345_v58 = vpop.f32.mrf.mxu0 }
 0x77d   :  { %v2275_v30 = vadd.f32 %v2274_v57, %v8664_v13  ;;  %v2419_v1 = vadd.f32 %v2273_v38, %v8665_v40  ;;  %v2346_v54 = vadd.f32 %v2345_v58, %v4833_v45  ;;  %v2433_v21 = vadd.f32 %v2344_v29, %v8667_v25 }
 0x77f   :  { %v2420_v26 = vadd.f32 %v2275_v30, %v8666_v37  ;;  %v3046_v22 = vmul.f32 -1.442695, %v2419_v1  ;;  %v2434_v52 = vadd.f32 %v2346_v54, %v8668_v56  ;;  %v3048_v6 = vmul.f32 -1.442695, %v2433_v21 }
 0x781   :  { %v3047_v41 = vmul.f32 -1.442695, %v2420_v26  ;;  %3193 = vpow2.f32 %v3046_v22  ;;  %v3049_v57 = vmul.f32 -1.442695, %v2434_v52  ;;  %v8670_v52 = vld [vmem:[#allocation25_spill] sm:$0xff] }
 0x783   :  { %3195 = vpow2.f32 %v3047_v41 }
 0x784   :  { %3197 = vpow2.f32 %v3048_v6 }
 0x785   :  { %3199 = vpow2.f32 %v3049_v57 }
 0x78e   :  { %v3194_v13 = vpop.eup %3193 }
 0x78f   :  { %v2427_v37 = vadd.f32 1.0, %v3194_v13  ;;  %v8669_v13 = vld [vmem:[#allocation24_spill] sm:$0xff] }
 0x790   :  { %v3196_v40 = vpop.eup %3195 }
 0x791   :  { %v2428_v30 = vadd.f32 1.0, %v3196_v40  ;;  %3201 = vrcp.f32 %v2427_v37  ;;  %v3198_v22 = vpop.eup %3197 }
 0x792   :  { %v3200_v38 = vpop.eup %3199  ;;  %v2441_v34 = vadd.f32 1.0, %v3198_v22 }
 0x793   :  { %3203 = vrcp.f32 %v2428_v30  ;;  %v2442_v26 = vadd.f32 1.0, %v3200_v38 }
 0x794   :  { %3205 = vrcp.f32 %v2441_v34 }
 0x795   :  { %3207 = vrcp.f32 %v2442_v26 }
 0x79e   :  { %v3202_v25 = vpop.eup %3201 }
 0x7a0   :  { %v3204_v6 = vpop.eup %3203 }
 0x7a1   :  { %v3206_v40 = vpop.eup %3205 }
 0x7a2   :  { %v3208_v37 = vpop.eup %3207  ;;  %v2453_v30 = vsub.f32 1.0, %v3206_v40  ;;  %v2457_v34 = vmul.f32 %v3206_v40, %v6359_v2  ;;  %v8695_v2 = vld [vmem:[#allocation142_spill] sm:$0xff]  ;;  %v8704_v40 = vld [vmem:[#allocation17_spill] sm:$0xff] }
 0x7a3   :  { %v2454_v38 = vsub.f32 1.0, %v3208_v37 }
 0x7ba   :  { %v2414_v41 = vpop.f32.mrf.mxu1 }
 0x7bb   :  { %v2415_v1 = vadd.f32 %v2414_v41, %v4843_v33 }
 0x7bc   :  { %v2416_v29 = vpop.f32.mrf.mxu1 }
 0x7bd   :  { %v2447_v56 = vmul.f32 %v3202_v25, %v2415_v1  ;;  %v2417_v21 = vadd.f32 %v2416_v29, %v4847_v62  ;;  %v2458_v29 = vmul.f32 %v3208_v37, %v6361_v60  ;;  %v8696_v60 = vld [vmem:[#allocation26_spill] sm:$0xff]  ;;  %v8705_v37 = vld [vmem:[#allocation147_spill] sm:$0xff] }
 0x7bf   :  { %v2449_v58 = vadd.f32 %v2447_v56, %v8669_v13  ;;  %v2448_v54 = vmul.f32 %v3204_v6, %v2417_v21  ;;  %v8697_v21 = vld [vmem:[#allocation143_spill] sm:$0xff]  ;;  %v8698_v6 = vld [vmem:[#allocation28_spill] sm:$0xff] }
 0x7c0   :  { %v8699_v13 = vld [vmem:[#allocation144_spill] sm:$0xff] }
 0x7c1   :  { %3209 = vtanh.f32 %v2449_v58  ;;  %v2450_v57 = vadd.f32 %v2448_v54, %v8670_v52  ;;  %v8700_v58 = vld [vmem:[#allocation32_spill] sm:$0xff]  ;;  %v8701_v54 = vld [vmem:[#allocation145_spill] sm:$0xff]  ;;  %v8702_v52 = vld [vmem:[#allocation34_spill] sm:$0xff] }
 0x7c3   :  { %3211 = vtanh.f32 %v2450_v57  ;;  %v8703_v57 = vld [vmem:[#allocation146_spill] sm:$0xff] }
 0x7ce   :  { %v3210_v22 = vpop.eup %3209 }
 0x7cf   :  { %v2455_v41 = vmul.f32 %v3210_v22, %v2453_v30  ;;  %v8706_v30 = vld [vmem:[#allocation50_spill] sm:$0xff]  ;;  %v8707_v22 = vld [vmem:[#allocation148_spill] sm:$0xff] }
 0x7d0   :  { %v3212_v1 = vpop.eup %3211 }
 0x7d1   :  { %v2456_v25 = vmul.f32 %v3212_v1, %v2454_v38  ;;  %v6700_v26 = vadd.f32 %v2457_v34, %v2455_v41  ;;  %v8708_v38 = vld [vmem:[#allocation39_spill] sm:$0xff]  ;;  %v8709_v41 = vld [vmem:[#allocation149_spill] sm:$0xff]  ;;  %v8711_v1 = vld [vmem:[#allocation150_spill] sm:$0xff] }
 0x7d2   :  { %v8710_v34 = vld [vmem:[#allocation41_spill] sm:$0xff] }
 0x7d3   :  { %v6702_v56 = vadd.f32 %v2458_v29, %v2456_v25  ;;  %v8712_v25 = vld [vmem:[#allocation155_spill] sm:$0xff] }
 0x7d4   :  { %v8713_v29 = vld [vmem:[#allocation151_spill] sm:$0xff] }
 0x7d5   :  { %2532 = vmatprep.mubr.f32.mxu0 %v6702_v56  ;;  %2603 = vmatprep.mubr.f32.mxu1 %v6702_v56 }
 0x7d6   :  { %2533 = vmatmul.mubr.f32.vlgmr.msra.gmra.mxu0 %v6700_v26  ;;  %2604 = vmatmul.mubr.f32.vlgmr.msra.gmra.mxu1 %v6700_v26 }
 0x7d7   :  { %2611 = vmatpush1.msra.mxu0 %v6367_v20  ;;  %2674 = vmatprep.mubr.f32.mxu0 %v6702_v56 }
 0x7d8   :  { %2612 = vmatprep.subr.mxu0 %v6371_v39  ;;  %2731 = vmatpush1.msra.mxu1 %v5898_v14  ;;  %v8671_v14 = vld [vmem:[#allocation125_spill] sm:$0xff] }
 0x7d9   :  { %2613 = vmatpush1.msra.mxu0 %v6375_v7  ;;  %2732 = vmatprep.subr.mxu1 %v5902_v0  ;;  %v8672_v0 = vld [vmem:[#allocation126_spill] sm:$0xff] }
 0x7da   :  { %2614 = vmatprep.subr.mxu0 %v6379_v49  ;;  %2733 = vmatpush1.msra.mxu1 %v5906_v48  ;;  %v8673_v48 = vld [vmem:[#allocation127_spill] sm:$0xff] }
 0x7db   :  { %2615 = vmatpush1.msra.mxu0 %v6383_v3  ;;  %2734 = vmatprep.subr.mxu1 %v5910_v61  ;;  %v8674_v61 = vld [vmem:[#allocation128_spill] sm:$0xff] }
 0x7dc   :  { %2616 = vmatprep.subr.mxu0 %v6387_v46  ;;  %2735 = vmatpush1.msra.mxu1 %v5914_v11  ;;  %v8675_v11 = vld [vmem:[#allocation129_spill] sm:$0xff] }
 0x7dd   :  { %2617 = vmatpush1.msra.mxu0 %v6391_v44  ;;  %2736 = vmatprep.subr.mxu1 %v5918_v63  ;;  %v8676_v63 = vld [vmem:[#allocation130_spill] sm:$0xff] }
 0x7de   :  { %2618 = vmatprep.subr.mxu0 %v6395_v59  ;;  %2737 = vmatpush1.msra.mxu1 %v5922_v23  ;;  %v8677_v23 = vld [vmem:[#allocation131_spill] sm:$0xff] }
 0x7df   :  { %2619 = vmatpush1.msra.mxu0 %v6399_v50  ;;  %2738 = vmatprep.subr.mxu1 %v5926_v55  ;;  %v8678_v55 = vld [vmem:[#allocation132_spill] sm:$0xff] }
 0x7e0   :  { %2620 = vmatprep.subr.mxu0 %v6403_v17  ;;  %2739 = vmatpush1.msra.mxu1 %v5930_v28  ;;  %v8679_v28 = vld [vmem:[#allocation133_spill] sm:$0xff] }
 0x7e1   :  { %2621 = vmatpush1.msra.mxu0 %v6407_v53  ;;  %2740 = vmatprep.subr.mxu1 %v5934_v31  ;;  %v8680_v31 = vld [vmem:[#allocation134_spill] sm:$0xff] }
 0x7e2   :  { %2622 = vmatprep.subr.mxu0 %v6411_v32  ;;  %2741 = vmatpush1.msra.mxu1 %v5938_v15  ;;  %v8681_v15 = vld [vmem:[#allocation135_spill] sm:$0xff] }
 0x7e3   :  { %2623 = vmatpush1.msra.mxu0 %v6415_v47  ;;  %2742 = vmatprep.subr.mxu1 %v5942_v24  ;;  %v8682_v24 = vld [vmem:[#allocation6_spill] sm:$0xff] }
 0x7e4   :  { %2624 = vmatprep.subr.mxu0 %v6419_v43  ;;  %2743 = vmatpush1.msra.mxu1 %v5946_v12  ;;  %v8683_v12 = vld [vmem:[#allocation136_spill] sm:$0xff] }
 0x7e5   :  { %2625 = vmatpush1.msra.mxu0 %v6423_v51  ;;  %2744 = vmatprep.subr.mxu1 %v5950_v8  ;;  %v8684_v8 = vld [vmem:[#allocation7_spill] sm:$0xff] }
 0x7e6   :  { %2626 = vmatprep.subr.mxu0 %v8671_v14  ;;  %2745 = vmatpush1.msra.mxu1 %v5954_v9  ;;  %v8685_v9 = vld [vmem:[#allocation137_spill] sm:$0xff] }
 0x7e7   :  { %2627 = vmatpush1.msra.mxu0 %v8672_v0  ;;  %2746 = vmatprep.subr.mxu1 %v5958_v5  ;;  %v8686_v5 = vld [vmem:[#allocation38_spill] sm:$0xff] }
 0x7e8   :  { %2628 = vmatprep.subr.mxu0 %v8673_v48  ;;  %2747 = vmatpush1.msra.mxu1 %v5962_v27  ;;  %v8687_v27 = vld [vmem:[#allocation138_spill] sm:$0xff] }
 0x7e9   :  { %2629 = vmatpush1.msra.mxu0 %v8674_v61  ;;  %2748 = vmatprep.subr.mxu1 %v5966_v36  ;;  %v8688_v36 = vld [vmem:[#allocation40_spill] sm:$0xff] }
 0x7ea   :  { %2630 = vmatprep.subr.mxu0 %v8675_v11  ;;  %2749 = vmatpush1.msra.mxu1 %v5970_v19  ;;  %v8689_v19 = vld [vmem:[#allocation139_spill] sm:$0xff] }
 0x7eb   :  { %2631 = vmatpush1.msra.mxu0 %v8676_v63  ;;  %2750 = vmatprep.subr.mxu1 %v5974_v10  ;;  %v8690_v10 = vld [vmem:[#allocation19_spill] sm:$0xff] }
 0x7ec   :  { %2632 = vmatprep.subr.mxu0 %v8677_v23  ;;  %2751 = vmatpush1.msra.mxu1 %v5978_v18  ;;  %v8691_v18 = vld [vmem:[#allocation140_spill] sm:$0xff] }
 0x7ed   :  { %2633 = vmatpush1.msra.mxu0 %v8678_v55  ;;  %2752 = vmatprep.subr.mxu1 %v5982_v42  ;;  %v8692_v42 = vld [vmem:[#allocation54_spill] sm:$0xff] }
 0x7ee   :  { %2634 = vmatprep.subr.mxu0 %v8679_v28  ;;  %2753 = vmatpush1.msra.mxu1 %v5986_v35  ;;  %v8693_v35 = vld [vmem:[#allocation141_spill] sm:$0xff] }
 0x7ef   :  { %2635 = vmatpush1.msra.mxu0 %v8680_v31  ;;  %2754 = vmatprep.subr.mxu1 %v5990_v16  ;;  %v8694_v16 = vld [vmem:[#allocation13_spill] sm:$0xff] }
 0x7f0   :  { %2636 = vmatprep.subr.mxu0 %v8681_v15  ;;  %2755 = vmatpush1.msra.mxu1 %v8682_v24  ;;  %v8714_v24 = vld [vmem:[#allocation156_spill] sm:$0xff] }
 0x7f1   :  { %2637 = vmatpush1.msra.mxu0 %v8683_v12  ;;  %2756 = vmatprep.subr.mxu1 %v8684_v8  ;;  %v8715_v8 = vld [vmem:[#allocation152_spill] sm:$0xff] }
 0x7f2   :  { %2638 = vmatprep.subr.mxu0 %v8685_v9  ;;  %2757 = vmatpush1.msra.mxu1 %v8686_v5  ;;  %v8716_v5 = vld [vmem:[#allocation157_spill] sm:$0xff] }
 0x7f3   :  { %2639 = vmatpush1.msra.mxu0 %v8687_v27  ;;  %2758 = vmatprep.subr.mxu1 %v8688_v36  ;;  %v8717_v36 = vld [vmem:[#allocation153_spill] sm:$0xff] }
 0x7f4   :  { %2640 = vmatprep.subr.mxu0 %v8689_v19  ;;  %2759 = vmatpush1.msra.mxu1 %v8690_v10  ;;  %v8718_v10 = vld [vmem:[#allocation158_spill] sm:$0xff] }
 0x7f5   :  { %2641 = vmatpush1.msra.mxu0 %v8691_v18  ;;  %2760 = vmatprep.subr.mxu1 %v8692_v42  ;;  %v8719_v42 = vld [vmem:[#allocation154_spill] sm:$0xff] }
 0x7f6   :  { %2642 = vmatprep.subr.mxu0 %v8693_v35  ;;  %2761 = vmatpush1.msra.mxu1 %v8694_v16  ;;  %v8720_v16 = vld [vmem:[#allocation159_spill] sm:$0xff] }
 0x7f7   :  { %2643 = vmatpush2.msra.mxu0 %v8695_v2  ;;  %2762 = vmatprep.subr.mxu1 %v8696_v60  ;;  %v8721_v60 = vld [vmem:[#allocation30_spill] sm:$0xff] }
 0x7f8   :  { %2644 = vmatprep.subr.mxu0 %v8697_v21  ;;  %2763 = vmatpush2.msra.mxu1 %v8698_v6  ;;  %v8722_v6 = vld [vmem:[#allocation160_spill] sm:$0xff] }
 0x7f9   :  { %2645 = vmatpush2.msra.mxu0 %v8699_v13  ;;  %2764 = vmatprep.subr.mxu1 %v8700_v58  ;;  %v8723_v58 = vld [vmem:[#allocation8_spill] sm:$0xff] }
 0x7fa   :  { %2646 = vmatprep.subr.mxu0 %v8701_v54  ;;  %2765 = vmatpush2.msra.mxu1 %v8702_v52  ;;  %v8724_v52 = vld [vmem:[#allocation43_spill] sm:$0xff] }
 0x7fb   :  { %2647 = vmatpush2.msra.mxu0 %v8703_v57  ;;  %2766 = vmatprep.subr.mxu1 %v8704_v40  ;;  %v8725_v40 = vld [vmem:[#allocation15_spill] sm:$0xff] }
 0x7fc   :  { %2648 = vmatprep.subr.mxu0 %v8705_v37  ;;  %2767 = vmatpush2.msra.mxu1 %v8706_v30  ;;  %v8726_v30 = vld [vmem:[#allocation161_spill] sm:$0xff] }
 0x7fd   :  { %2649 = vmatpush2.msra.mxu0 %v8707_v22  ;;  %2768 = vmatprep.subr.mxu1 %v8708_v38  ;;  %v8727_v38 = vld [vmem:[#allocation46_spill] sm:$0xff] }
 0x7fe   :  { %2650 = vmatprep.subr.mxu0 %v8709_v41  ;;  %2769 = vmatpush2.msra.mxu1 %v8710_v34  ;;  %v8728_v34 = vld [vmem:[#allocation45_spill] sm:$0xff]  ;;  %v8828_v41 = vld [vmem:[#allocation56_spill] sm:$0xff] }
 0x7ff   :  { %2651 = vmatpush2.msra.mxu0 %v8711_v1  ;;  %2770 = vmatprep.subr.mxu1 %v8712_v25  ;;  %v8729_v25 = vld [vmem:[#allocation21_spill] sm:$0xff] }
 0x800   :  { %2652 = vmatprep.subr.mxu0 %v8713_v29  ;;  %2771 = vmatpush2.msra.mxu1 %v8714_v24  ;;  %v8730_v24 = vld [vmem:[#allocation162_spill] sm:$0xff] }
 0x801   :  { %2653 = vmatpush2.msra.mxu0 %v8715_v8  ;;  %2772 = vmatprep.subr.mxu1 %v8716_v5  ;;  %v8731_v5 = vld [vmem:[#allocation58_spill] sm:$0xff] }
 0x802   :  { %2654 = vmatprep.subr.mxu0 %v8717_v36  ;;  %2773 = vmatpush2.msra.mxu1 %v8718_v10  ;;  %v8732_v10 = vld [vmem:[#allocation47_spill] sm:$0xff]  ;;  %v8826_v36 = vld [vmem:[#allocation42_spill] sm:$0xff] }
 0x803   :  { %2655 = vmatpush2.msra.mxu0 %v8719_v42  ;;  %2774 = vmatprep.subr.mxu1 %v8720_v16  ;;  %v8733_v16 = vld [vmem:[#allocation172_spill] sm:$0xff] }
 0x804   :  { %2656 = vmatprep.subr.mxu0 %v8721_v60  ;;  %2775 = vmatpush2.msra.mxu1 %v8722_v6  ;;  %v8734_v6 = vld [vmem:[#allocation163_spill] sm:$0xff]  ;;  %v8824_v60 = vld [vmem:[#allocation37_spill] sm:$0xff]  ;;  %v8825_v42 = vld [vmem:[#allocation12_spill] sm:$0xff] }
 0x805   :  { %2657 = vmatpush2.msra.mxu0 %v8723_v58  ;;  %2776 = vmatprep.subr.mxu1 %v8724_v52  ;;  %v8735_v52 = vld [vmem:[#allocation173_spill] sm:$0xff]  ;;  %v8823_v58 = vld [vmem:[#allocation35_spill] sm:$0xff] }
 0x806   :  { %2658 = vmatprep.subr.mxu0 %v8725_v40  ;;  %2777 = vmatpush2.msra.mxu1 %v8726_v30  ;;  %v8736_v40 = vld [vmem:[#allocation49_spill] sm:$0xff]  ;;  %v8737_v30 = vld [vmem:[#allocation174_spill] sm:$0xff] }
 0x807   :  { %2659 = vmatpush2.msra.mxu0 %v8727_v38  ;;  %2778 = vmatprep.subr.mxu1 %v8728_v34  ;;  %v8738_v38 = vld [vmem:[#allocation164_spill] sm:$0xff]  ;;  %v8739_v34 = vld [vmem:[#allocation175_spill] sm:$0xff] }
 0x808   :  { %2660 = vmatprep.subr.mxu0 %v8729_v25  ;;  %2779 = vmatpush2.msra.mxu1 %v8730_v24  ;;  %v8740_v25 = vld [vmem:[#allocation51_spill] sm:$0xff]  ;;  %v8741_v24 = vld [vmem:[#allocation176_spill] sm:$0xff] }
 0x809   :  { %2661 = vmatpush2.msra.mxu0 %v8731_v5  ;;  %2780 = vmatprep.subr.mxu1 %v8732_v10  ;;  %v8742_v5 = vld [vmem:[#allocation165_spill] sm:$0xff] }
 0x80a   :  { %2662 = vmatprep.subr.mxu0 %v8733_v16  ;;  %2781 = vmatpush2.msra.mxu1 %v8734_v6  ;;  %v8743_v10 = vld [vmem:[#allocation177_spill] sm:$0xff]  ;;  %v8745_v6 = vld [vmem:[#allocation178_spill] sm:$0xff] }
 0x80b   :  { %2663 = vmatpush2.msra.mxu0 %v8735_v52  ;;  %2782 = vmatprep.subr.mxu1 %v8736_v40  ;;  %v8744_v16 = vld [vmem:[#allocation53_spill] sm:$0xff]  ;;  %v8746_v52 = vld [vmem:[#allocation166_spill] sm:$0xff]  ;;  %v8747_v40 = vld [vmem:[#allocation179_spill] sm:$0xff] }
 0x80c   :  { %2664 = vmatprep.subr.mxu0 %v8737_v30  ;;  %2783 = vmatpush2.msra.mxu1 %v8738_v38  ;;  %v8748_v30 = vld [vmem:[#allocation55_spill] sm:$0xff]  ;;  %v8749_v38 = vld [vmem:[#allocation180_spill] sm:$0xff] }
 0x80d   :  { %2665 = vmatpush2.msra.mxu0 %v8739_v34  ;;  %2784 = vmatprep.subr.mxu1 %v8740_v25  ;;  %v8750_v34 = vld [vmem:[#allocation167_spill] sm:$0xff]  ;;  %v8751_v25 = vld [vmem:[#allocation181_spill] sm:$0xff] }
 0x80e   :  { %2666 = vmatprep.subr.mxu0 %v8741_v24  ;;  %2785 = vmatpush2.msra.mxu1 %v8742_v5  ;;  %v8752_v24 = vld [vmem:[#allocation57_spill] sm:$0xff]  ;;  %v8753_v5 = vld [vmem:[#allocation182_spill] sm:$0xff] }
 0x80f   :  { %2667 = vmatpush2.msra.mxu0 %v8743_v10  ;;  %2786 = vmatprep.subr.mxu1 %v8744_v16  ;;  %v8754_v10 = vld [vmem:[#allocation168_spill] sm:$0xff]  ;;  %v8755_v16 = vld [vmem:[#allocation183_spill] sm:$0xff] }
 0x810   :  { %2668 = vmatprep.subr.mxu0 %v8745_v6  ;;  %2787 = vmatpush2.msra.mxu1 %v8746_v52  ;;  %v8756_v6 = vld [vmem:[#allocation59_spill] sm:$0xff]  ;;  %v8757_v52 = vld [vmem:[#allocation169_spill] sm:$0xff] }
 0x811   :  { %2669 = vmatpush2.msra.mxu0 %v8747_v40  ;;  %2788 = vmatprep.subr.mxu1 %v8748_v30  ;;  %v8758_v30 = vld [vmem:[#allocation61_spill] sm:$0xff]  ;;  %v8767_v40 = vld [vmem:[#allocation74_spill] sm:$0xff] }
 0x812   :  { %2670 = vmatprep.subr.mxu0 %v8749_v38  ;;  %2789 = vmatpush2.msra.mxu1 %v8750_v34  ;;  %v8759_v38 = vld [vmem:[#allocation170_spill] sm:$0xff] }
 0x813   :  { %2671 = vmatpush2.msra.mxu0 %v8751_v25  ;;  %2790 = vmatprep.subr.mxu1 %v8752_v24  ;;  %v8760_v34 = vld [vmem:[#allocation62_spill] sm:$0xff]  ;;  %v8761_v25 = vld [vmem:[#allocation171_spill] sm:$0xff]  ;;  %v8762_v24 = vld [vmem:[#allocation64_spill] sm:$0xff] }
 0x814   :  { %2672 = vmatprep.subr.mxu0 %v8753_v5  ;;  %2791 = vmatpush2.msra.mxu1 %v8754_v10  ;;  %v8763_v5 = vld [vmem:[#allocation66_spill] sm:$0xff]  ;;  %v8764_v10 = vld [vmem:[#allocation68_spill] sm:$0xff] }
 0x815   :  { %2673 = vmatpush2.msra.mxu0 %v8755_v16  ;;  %2792 = vmatprep.subr.mxu1 %v8756_v6  ;;  %v8765_v16 = vld [vmem:[#allocation70_spill] sm:$0xff]  ;;  %v8766_v6 = vld [vmem:[#allocation72_spill] sm:$0xff] }
 0x816   :  { %2675 = vmatmul.mubr.f32.vlgmr.msra.gmra.mxu0 %v6700_v26  ;;  %2801 = vmatprep.subr.mxu0 %v8757_v52  ;;  %v8768_v52 = vld [vmem:[#allocation76_spill] sm:$0xff] }
 0x817   :  { %2802 = vmatpush1.msra.mxu0 %v8758_v30  ;;  %2793 = vmatpush2.msra.mxu1 %v8759_v38  ;;  %v8769_v30 = vld [vmem:[#allocation78_spill] sm:$0xff]  ;;  %v8770_v38 = vld [vmem:[#allocation80_spill] sm:$0xff] }
 0x818   :  { %2803 = vmatprep.subr.mxu0 %v8760_v34  ;;  %2872 = vmatprep.subr.mxu1 %v8761_v25  ;;  %v8771_v34 = vld [vmem:[#allocation82_spill] sm:$0xff]  ;;  %v8772_v25 = vld [vmem:[#allocation84_spill] sm:$0xff] }
 0x819   :  { %2804 = vmatpush1.msra.mxu0 %v8762_v24  ;;  %v8773_v24 = vld [vmem:[#allocation86_spill] sm:$0xff] }
 0x81a   :  { %2805 = vmatprep.subr.mxu0 %v8763_v5  ;;  %v8774_v5 = vld [vmem:[#allocation88_spill] sm:$0xff] }
 0x81b   :  { %2806 = vmatpush1.msra.mxu0 %v8764_v10  ;;  %v8775_v10 = vld [vmem:[#allocation90_spill] sm:$0xff] }
 0x81c   :  { %2807 = vmatprep.subr.mxu0 %v8765_v16  ;;  %v8776_v16 = vld [vmem:[#allocation95_spill] sm:$0xff] }
 0x81d   :  { %2808 = vmatpush1.msra.mxu0 %v8766_v6  ;;  %v8777_v6 = vld [vmem:[#allocation65_spill] sm:$0xff] }
 0x81e   :  { %2809 = vmatprep.subr.mxu0 %v8767_v40  ;;  %v8778_v40 = vld [vmem:[#allocation67_spill] sm:$0xff] }
 0x81f   :  { %2810 = vmatpush1.msra.mxu0 %v8768_v52  ;;  %v8779_v52 = vld [vmem:[#allocation69_spill] sm:$0xff] }
 0x820   :  { %2811 = vmatprep.subr.mxu0 %v8769_v30  ;;  %v8780_v30 = vld [vmem:[#allocation71_spill] sm:$0xff] }
 0x821   :  { %2812 = vmatpush1.msra.mxu0 %v8770_v38  ;;  %v8781_v38 = vld [vmem:[#allocation73_spill] sm:$0xff] }
 0x822   :  { %2813 = vmatprep.subr.mxu0 %v8771_v34  ;;  %v8782_v34 = vld [vmem:[#allocation75_spill] sm:$0xff] }
 0x823   :  { %2814 = vmatpush1.msra.mxu0 %v8772_v25  ;;  %v8783_v25 = vld [vmem:[#allocation77_spill] sm:$0xff] }
 0x824   :  { %2815 = vmatprep.subr.mxu0 %v8773_v24  ;;  %v8784_v24 = vld [vmem:[#allocation79_spill] sm:$0xff] }
 0x825   :  { %2816 = vmatpush1.msra.mxu0 %v8774_v5  ;;  %v8785_v5 = vld [vmem:[#allocation81_spill] sm:$0xff] }
 0x826   :  { %2817 = vmatprep.subr.mxu0 %v8775_v10  ;;  %v8786_v10 = vld [vmem:[#allocation83_spill] sm:$0xff] }
 0x827   :  { %2818 = vmatpush1.msra.mxu0 %v8776_v16  ;;  %v8787_v16 = vld [vmem:[#allocation85_spill] sm:$0xff] }
 0x828   :  { %2819 = vmatprep.subr.mxu0 %v8777_v6  ;;  %v8788_v6 = vld [vmem:[#allocation87_spill] sm:$0xff] }
 0x829   :  { %2820 = vmatpush1.msra.mxu0 %v8778_v40  ;;  %v8789_v40 = vld [vmem:[#allocation89_spill] sm:$0xff] }
 0x82a   :  { %2821 = vmatprep.subr.mxu0 %v8779_v52  ;;  %v8790_v52 = vld [vmem:[#allocation91_spill] sm:$0xff] }
 0x82b   :  { %2822 = vmatpush1.msra.mxu0 %v8780_v30  ;;  %v8791_v30 = vld [vmem:[#allocation92_spill] sm:$0xff] }
 0x82c   :  { %2823 = vmatprep.subr.mxu0 %v8781_v38  ;;  %v8792_v38 = vld [vmem:[#allocation93_spill] sm:$0xff] }
 0x82d   :  { %2824 = vmatpush1.msra.mxu0 %v8782_v34  ;;  %v8793_v34 = vld [vmem:[#allocation94_spill] sm:$0xff] }
 0x82e   :  { %2825 = vmatprep.subr.mxu0 %v8783_v25  ;;  %v8794_v25 = vld [vmem:[#allocation96_spill] sm:$0xff] }
 0x82f   :  { %2826 = vmatpush1.msra.mxu0 %v8784_v24  ;;  %v8795_v24 = vld [vmem:[#allocation97_spill] sm:$0xff] }
 0x830   :  { %2827 = vmatprep.subr.mxu0 %v8785_v5  ;;  %v8796_v5 = vld [vmem:[#allocation98_spill] sm:$0xff] }
 0x831   :  { %2828 = vmatpush1.msra.mxu0 %v8786_v10  ;;  %v8797_v10 = vld [vmem:[#allocation99_spill] sm:$0xff] }
 0x832   :  { %2829 = vmatprep.subr.mxu0 %v8787_v16  ;;  %v8798_v16 = vld [vmem:[#allocation100_spill] sm:$0xff] }
 0x833   :  { %2830 = vmatpush1.msra.mxu0 %v8788_v6  ;;  %v8799_v6 = vld [vmem:[#allocation101_spill] sm:$0xff] }
 0x834   :  { %2831 = vmatprep.subr.mxu0 %v8789_v40  ;;  %v8800_v40 = vld [vmem:[#allocation102_spill] sm:$0xff] }
 0x835   :  { %2832 = vmatpush1.msra.mxu0 %v8790_v52  ;;  %v8801_v52 = vld [vmem:[#allocation103_spill] sm:$0xff] }
 0x836   :  { %2833 = vmatprep.subr.mxu0 %v8791_v30  ;;  %v8802_v30 = vld [vmem:[#allocation104_spill] sm:$0xff] }
 0x837   :  { %2834 = vmatpush2.msra.mxu0 %v8792_v38  ;;  %v8803_v38 = vld [vmem:[#allocation105_spill] sm:$0xff] }
 0x838   :  { %2835 = vmatprep.subr.mxu0 %v8793_v34  ;;  %v8804_v34 = vld [vmem:[#allocation106_spill] sm:$0xff] }
 0x839   :  { %2836 = vmatpush2.msra.mxu0 %v8794_v25  ;;  %v8805_v25 = vld [vmem:[#allocation107_spill] sm:$0xff] }
 0x83a   :  { %2837 = vmatprep.subr.mxu0 %v8795_v24  ;;  %v8806_v24 = vld [vmem:[#allocation108_spill] sm:$0xff] }
 0x83b   :  { %2838 = vmatpush2.msra.mxu0 %v8796_v5  ;;  %v8807_v5 = vld [vmem:[#allocation109_spill] sm:$0xff] }
 0x83c   :  { %2839 = vmatprep.subr.mxu0 %v8797_v10  ;;  %v8808_v10 = vld [vmem:[#allocation110_spill] sm:$0xff] }
 0x83d   :  { %2840 = vmatpush2.msra.mxu0 %v8798_v16  ;;  %v8809_v16 = vld [vmem:[#allocation111_spill] sm:$0xff] }
 0x83e   :  { %2841 = vmatprep.subr.mxu0 %v8799_v6  ;;  %v8810_v6 = vld [vmem:[#allocation112_spill] sm:$0xff] }
 0x83f   :  { %2842 = vmatpush2.msra.mxu0 %v8800_v40  ;;  %v8811_v40 = vld [vmem:[#allocation113_spill] sm:$0xff] }
 0x840   :  { %2843 = vmatprep.subr.mxu0 %v8801_v52  ;;  %v8812_v52 = vld [vmem:[#allocation114_spill] sm:$0xff] }
 0x841   :  { %2844 = vmatpush2.msra.mxu0 %v8802_v30  ;;  %v8813_v30 = vld [vmem:[#allocation115_spill] sm:$0xff] }
 0x842   :  { %2845 = vmatprep.subr.mxu0 %v8803_v38  ;;  %v8814_v38 = vld [vmem:[#allocation116_spill] sm:$0xff] }
 0x843   :  { %2846 = vmatpush2.msra.mxu0 %v8804_v34  ;;  %v8815_v34 = vld [vmem:[#allocation117_spill] sm:$0xff] }
 0x844   :  { %2847 = vmatprep.subr.mxu0 %v8805_v25  ;;  %v8816_v25 = vld [vmem:[#allocation118_spill] sm:$0xff] }
 0x845   :  { %2848 = vmatpush2.msra.mxu0 %v8806_v24  ;;  %v8817_v24 = vld [vmem:[#allocation119_spill] sm:$0xff] }
 0x846   :  { %2849 = vmatprep.subr.mxu0 %v8807_v5  ;;  %v8818_v5 = vld [vmem:[#allocation120_spill] sm:$0xff] }
 0x847   :  { %2850 = vmatpush2.msra.mxu0 %v8808_v10  ;;  %v8819_v10 = vld [vmem:[#allocation121_spill] sm:$0xff] }
 0x848   :  { %2851 = vmatprep.subr.mxu0 %v8809_v16  ;;  %v8820_v16 = vld [vmem:[#allocation122_spill] sm:$0xff] }
 0x849   :  { %2852 = vmatpush2.msra.mxu0 %v8810_v6  ;;  %v8821_v6 = vld [vmem:[#allocation123_spill] sm:$0xff] }
 0x84a   :  { %2853 = vmatprep.subr.mxu0 %v8811_v40  ;;  %v8822_v40 = vld [vmem:[#allocation124_spill] sm:$0xff] }
 0x84b   :  { %2854 = vmatpush2.msra.mxu0 %v8812_v52 }
 0x84c   :  { %2855 = vmatprep.subr.mxu0 %v8813_v30 }
 0x84d   :  { %2856 = vmatpush2.msra.mxu0 %v8814_v38 }
 0x84e   :  { %2857 = vmatprep.subr.mxu0 %v8815_v34 }
 0x84f   :  { %2858 = vmatpush2.msra.mxu0 %v8816_v25 }
 0x850   :  { %2859 = vmatprep.subr.mxu0 %v8817_v24 }
 0x851   :  { %2860 = vmatpush2.msra.mxu0 %v8818_v5 }
 0x852   :  { %2861 = vmatprep.subr.mxu0 %v8819_v10 }
 0x853   :  { %2862 = vmatpush2.msra.mxu0 %v8820_v16 }
 0x854   :  { %2863 = vmatprep.subr.mxu0 %v8821_v6 }
 0x855   :  { %2864 = vmatpush2.msra.mxu0 %v8822_v40  ;;  %v8827_v40 = vld [vmem:[#allocation20_spill] sm:$0xff] }
 0x896   :  { %v2534_v52 = vpop.f32.mrf.mxu0  ;;  %v2605_v5 = vpop.f32.mrf.mxu1 }
 0x897   :  { %v2535_v38 = vadd.f32 %v2534_v52, %v8823_v58  ;;  %v2606_v16 = vadd.f32 %v2605_v5, %v4829_v4 }
 0x898   :  { %v2536_v30 = vpop.f32.mrf.mxu0  ;;  %v2607_v10 = vpop.f32.mrf.mxu1 }
 0x899   :  { %v2537_v34 = vadd.f32 %v2536_v30, %v8824_v60  ;;  %v2681_v25 = vadd.f32 %v2535_v38, %v8825_v42  ;;  %v2608_v6 = vadd.f32 %v2607_v10, %v4833_v45  ;;  %v2695_v1 = vadd.f32 %v2606_v16, %v8827_v40 }
 0x89b   :  { %v2682_v24 = vadd.f32 %v2537_v34, %v8826_v36  ;;  %v3050_v8 = vmul.f32 -1.442695, %v2681_v25  ;;  %v2696_v52 = vadd.f32 %v2608_v6, %v8828_v41  ;;  %v3052_v58 = vmul.f32 -1.442695, %v2695_v1 }
 0x89d   :  { %v3051_v29 = vmul.f32 -1.442695, %v2682_v24  ;;  %3213 = vpow2.f32 %v3050_v8  ;;  %v3053_v30 = vmul.f32 -1.442695, %v2696_v52  ;;  %v8830_v52 = vld [vmem:[#allocation29_spill] sm:$0xff] }
 0x89f   :  { %3215 = vpow2.f32 %v3051_v29 }
 0x8a0   :  { %3217 = vpow2.f32 %v3052_v58 }
 0x8a1   :  { %3219 = vpow2.f32 %v3053_v30 }
 0x8aa   :  { %v3214_v60 = vpop.eup %3213 }
 0x8ab   :  { %v2689_v36 = vadd.f32 1.0, %v3214_v60  ;;  %v8829_v60 = vld [vmem:[#allocation27_spill] sm:$0xff] }
 0x8ac   :  { %v3216_v42 = vpop.eup %3215 }
 0x8ad   :  { %v2690_v38 = vadd.f32 1.0, %v3216_v42  ;;  %3221 = vrcp.f32 %v2689_v36  ;;  %v3218_v8 = vpop.eup %3217 }
 0x8ae   :  { %v3220_v34 = vpop.eup %3219  ;;  %v2703_v25 = vadd.f32 1.0, %v3218_v8 }
 0x8af   :  { %3223 = vrcp.f32 %v2690_v38  ;;  %v2704_v24 = vadd.f32 1.0, %v3220_v34 }
 0x8b0   :  { %3225 = vrcp.f32 %v2703_v25 }
 0x8b1   :  { %3227 = vrcp.f32 %v2704_v24 }
 0x8ba   :  { %v3222_v10 = vpop.eup %3221 }
 0x8bc   :  { %v3224_v58 = vpop.eup %3223 }
 0x8bd   :  { %v3226_v42 = vpop.eup %3225 }
 0x8be   :  { %v3228_v36 = vpop.eup %3227  ;;  %v2715_v38 = vsub.f32 1.0, %v3226_v42  ;;  %v2719_v25 = vmul.f32 %v3226_v42, %v6700_v26  ;;  %v8846_v26 = vld [vmem:[#allocation175_spill] sm:$0xff] }
 0x8bf   :  { %v2716_v34 = vsub.f32 1.0, %v3228_v36 }
 0x8d6   :  { %v2676_v29 = vpop.f32.mrf.mxu0 }
 0x8d7   :  { %v2677_v5 = vadd.f32 %v2676_v29, %v4843_v33 }
 0x8d8   :  { %v2678_v16 = vpop.f32.mrf.mxu0 }
 0x8d9   :  { %v2709_v41 = vmul.f32 %v3222_v10, %v2677_v5  ;;  %v2679_v1 = vadd.f32 %v2678_v16, %v4847_v62  ;;  %v2720_v16 = vmul.f32 %v3228_v36, %v6702_v56  ;;  %v8847_v56 = vld [vmem:[#allocation176_spill] sm:$0xff] }
 0x8db   :  { %v2711_v6 = vadd.f32 %v2709_v41, %v8829_v60  ;;  %v2710_v40 = vmul.f32 %v3224_v58, %v2679_v1  ;;  %v8860_v58 = vld [vmem:[#allocation60_spill] sm:$0xff] }
 0x8dd   :  { %3229 = vtanh.f32 %v2711_v6  ;;  %v2712_v30 = vadd.f32 %v2710_v40, %v8830_v52 }
 0x8df   :  { %3231 = vtanh.f32 %v2712_v30 }
 0x8ea   :  { %v3230_v8 = vpop.eup %3229 }
 0x8eb   :  { %v2717_v29 = vmul.f32 %v3230_v8, %v2715_v38 }
 0x8ec   :  { %v3232_v5 = vpop.eup %3231 }
 0x8ed   :  { %v2718_v10 = vmul.f32 %v3232_v5, %v2716_v34  ;;  %v6915_v24 = vadd.f32 %v2719_v25, %v2717_v29 }
 0x8ef   :  { %v6917_v41 = vadd.f32 %v2720_v16, %v2718_v10 }
 0x8f1   :  { %2794 = vmatprep.mubr.f32.mxu1 %v6917_v41  ;;  %2865 = vmatprep.mubr.f32.mxu0 %v6917_v41 }
 0x8f2   :  { %2795 = vmatmul.mubr.f32.vlgmr.msra.gmra.mxu1 %v6915_v24  ;;  %2866 = vmatmul.mubr.f32.vlgmr.msra.gmra.mxu0 %v6915_v24 }
 0x8f3   :  { %2873 = vmatpush1.msra.mxu1 %v6367_v20  ;;  %2936 = vmatprep.mubr.f32.mxu1 %v6917_v41  ;;  %v8831_v20 = vld [vmem:[#allocation149_spill] sm:$0xff] }
 0x8f4   :  { %2874 = vmatprep.subr.mxu1 %v6371_v39  ;;  %v8832_v39 = vld [vmem:[#allocation150_spill] sm:$0xff] }
 0x8f5   :  { %2875 = vmatpush1.msra.mxu1 %v6375_v7  ;;  %v8833_v7 = vld [vmem:[#allocation151_spill] sm:$0xff] }
 0x8f6   :  { %2876 = vmatprep.subr.mxu1 %v6379_v49  ;;  %v8834_v49 = vld [vmem:[#allocation152_spill] sm:$0xff] }
 0x8f7   :  { %2877 = vmatpush1.msra.mxu1 %v6383_v3  ;;  %v8835_v3 = vld [vmem:[#allocation153_spill] sm:$0xff] }
 0x8f8   :  { %2878 = vmatprep.subr.mxu1 %v6387_v46  ;;  %v8836_v46 = vld [vmem:[#allocation154_spill] sm:$0xff] }
 0x8f9   :  { %2879 = vmatpush1.msra.mxu1 %v6391_v44  ;;  %v8837_v44 = vld [vmem:[#allocation30_spill] sm:$0xff] }
 0x8fa   :  { %2880 = vmatprep.subr.mxu1 %v6395_v59  ;;  %v8838_v59 = vld [vmem:[#allocation8_spill] sm:$0xff] }
 0x8fb   :  { %2881 = vmatpush1.msra.mxu1 %v6399_v50  ;;  %v8839_v50 = vld [vmem:[#allocation15_spill] sm:$0xff] }
 0x8fc   :  { %2882 = vmatprep.subr.mxu1 %v6403_v17  ;;  %v8840_v17 = vld [vmem:[#allocation46_spill] sm:$0xff] }
 0x8fd   :  { %2883 = vmatpush1.msra.mxu1 %v6407_v53  ;;  %v8841_v53 = vld [vmem:[#allocation21_spill] sm:$0xff] }
 0x8fe   :  { %2884 = vmatprep.subr.mxu1 %v6411_v32  ;;  %v8842_v32 = vld [vmem:[#allocation58_spill] sm:$0xff] }
 0x8ff   :  { %2885 = vmatpush1.msra.mxu1 %v6415_v47  ;;  %v8843_v47 = vld [vmem:[#allocation172_spill] sm:$0xff] }
 0x900   :  { %2886 = vmatprep.subr.mxu1 %v6419_v43  ;;  %v8844_v43 = vld [vmem:[#allocation173_spill] sm:$0xff] }
 0x901   :  { %2887 = vmatpush1.msra.mxu1 %v6423_v51  ;;  %v8845_v51 = vld [vmem:[#allocation174_spill] sm:$0xff] }
 0x902   :  { %2888 = vmatprep.subr.mxu1 %v8671_v14  ;;  %v8848_v14 = vld [vmem:[#allocation177_spill] sm:$0xff] }
 0x903   :  { %2889 = vmatpush1.msra.mxu1 %v8672_v0  ;;  %v8849_v0 = vld [vmem:[#allocation178_spill] sm:$0xff] }
 0x904   :  { %2890 = vmatprep.subr.mxu1 %v8673_v48  ;;  %v8850_v48 = vld [vmem:[#allocation179_spill] sm:$0xff] }
 0x905   :  { %2891 = vmatpush1.msra.mxu1 %v8674_v61  ;;  %v8851_v61 = vld [vmem:[#allocation180_spill] sm:$0xff] }
 0x906   :  { %2892 = vmatprep.subr.mxu1 %v8675_v11  ;;  %v8852_v11 = vld [vmem:[#allocation181_spill] sm:$0xff] }
 0x907   :  { %2893 = vmatpush1.msra.mxu1 %v8676_v63  ;;  %v8853_v63 = vld [vmem:[#allocation182_spill] sm:$0xff] }
 0x908   :  { %2894 = vmatprep.subr.mxu1 %v8677_v23  ;;  %v8854_v23 = vld [vmem:[#allocation183_spill] sm:$0xff] }
 0x909   :  { %2895 = vmatpush1.msra.mxu1 %v8678_v55 }
 0x90a   :  { %2896 = vmatprep.subr.mxu1 %v8679_v28 }
 0x90b   :  { %2897 = vmatpush1.msra.mxu1 %v8680_v31  ;;  %v8855_v31 = vld [vmem:[#allocation35_spill] sm:$0xff] }
 0x90c   :  { %2898 = vmatprep.subr.mxu1 %v8681_v15 }
 0x90d   :  { %2899 = vmatpush1.msra.mxu1 %v8683_v12  ;;  %v8856_v12 = vld [vmem:[#allocation37_spill] sm:$0xff] }
 0x90e   :  { %2900 = vmatprep.subr.mxu1 %v8685_v9 }
 0x90f   :  { %2901 = vmatpush1.msra.mxu1 %v8687_v27  ;;  %v8857_v27 = vld [vmem:[#allocation14_spill] sm:$0xff] }
 0x910   :  { %2902 = vmatprep.subr.mxu1 %v8689_v19 }
 0x911   :  { %2903 = vmatpush1.msra.mxu1 %v8691_v18  ;;  %v8858_v18 = vld [vmem:[#allocation44_spill] sm:$0xff] }
 0x912   :  { %2904 = vmatprep.subr.mxu1 %v8693_v35 }
 0x913   :  { %2905 = vmatpush2.msra.mxu1 %v8695_v2 }
 0x914   :  { %2906 = vmatprep.subr.mxu1 %v8697_v21 }
 0x915   :  { %2907 = vmatpush2.msra.mxu1 %v8699_v13 }
 0x916   :  { %2908 = vmatprep.subr.mxu1 %v8701_v54 }
 0x917   :  { %2909 = vmatpush2.msra.mxu1 %v8703_v57 }
 0x918   :  { %2910 = vmatprep.subr.mxu1 %v8705_v37 }
 0x919   :  { %2911 = vmatpush2.msra.mxu1 %v8707_v22  ;;  %v8859_v22 = vld [vmem:[#allocation22_spill] sm:$0xff] }
 0x91a   :  { %2912 = vmatprep.subr.mxu1 %v8831_v20 }
 0x91b   :  { %2913 = vmatpush2.msra.mxu1 %v8832_v39  ;;  %v8861_v39 = vld [vmem:[#allocation31_spill] sm:$0xff] }
 0x91c   :  { %2914 = vmatprep.subr.mxu1 %v8833_v7 }
 0x91d   :  { %2915 = vmatpush2.msra.mxu1 %v8834_v49 }
 0x91e   :  { %2916 = vmatprep.subr.mxu1 %v8835_v3  ;;  %v8862_v3 = vld [vmem:[#allocation33_spill] sm:$0xff] }
 0x91f   :  { %2917 = vmatpush2.msra.mxu1 %v8836_v46 }
 0x920   :  { %2918 = vmatprep.subr.mxu1 %v8837_v44 }
 0x921   :  { %2919 = vmatpush2.msra.mxu1 %v8838_v59 }
 0x922   :  { %2920 = vmatprep.subr.mxu1 %v8839_v50 }
 0x923   :  { %2921 = vmatpush2.msra.mxu1 %v8840_v17 }
 0x924   :  { %2922 = vmatprep.subr.mxu1 %v8841_v53 }
 0x925   :  { %2923 = vmatpush2.msra.mxu1 %v8842_v32 }
 0x926   :  { %2924 = vmatprep.subr.mxu1 %v8843_v47 }
 0x927   :  { %2925 = vmatpush2.msra.mxu1 %v8844_v43 }
 0x928   :  { %2926 = vmatprep.subr.mxu1 %v8845_v51 }
 0x929   :  { %2927 = vmatpush2.msra.mxu1 %v8846_v26 }
 0x92a   :  { %2928 = vmatprep.subr.mxu1 %v8847_v56 }
 0x92b   :  { %2929 = vmatpush2.msra.mxu1 %v8848_v14 }
 0x92c   :  { %2930 = vmatprep.subr.mxu1 %v8849_v0 }
 0x92d   :  { %2931 = vmatpush2.msra.mxu1 %v8850_v48 }
 0x92e   :  { %2932 = vmatprep.subr.mxu1 %v8851_v61 }
 0x92f   :  { %2933 = vmatpush2.msra.mxu1 %v8852_v11 }
 0x930   :  { %2934 = vmatprep.subr.mxu1 %v8853_v63 }
 0x931   :  { %2935 = vmatpush2.msra.mxu1 %v8854_v23 }
 0x932   :  { %2937 = vmatmul.mubr.f32.vlgmr.msra.gmra.mxu1 %v6915_v24 }
 0x9b2   :  { %v2796_v55 = vpop.f32.mrf.mxu1  ;;  %v2867_v21 = vpop.f32.mrf.mxu0 }
 0x9b3   :  { %v2797_v15 = vadd.f32 %v2796_v55, %v8855_v31  ;;  %v2868_v57 = vadd.f32 %v2867_v21, %v4829_v4 }
 0x9b4   :  { %v2798_v28 = vpop.f32.mrf.mxu1  ;;  %v2869_v54 = vpop.f32.mrf.mxu0 }
 0x9b5   :  { %v2799_v9 = vadd.f32 %v2798_v28, %v8856_v12  ;;  %v2943_v19 = vadd.f32 %v2797_v15, %v8857_v27  ;;  %v2870_v37 = vadd.f32 %v2869_v54, %v4833_v45  ;;  %v2957_v1 = vadd.f32 %v2868_v57, %v8859_v22 }
 0x9b7   :  { %v2944_v35 = vadd.f32 %v2799_v9, %v8858_v18  ;;  %v3054_v2 = vmul.f32 -1.442695, %v2943_v19  ;;  %v2958_v60 = vadd.f32 %v2870_v37, %v8860_v58  ;;  %v3056_v6 = vmul.f32 -1.442695, %v2957_v1 }
 0x9b9   :  { %v3055_v13 = vmul.f32 -1.442695, %v2944_v35  ;;  %3233 = vpow2.f32 %v3054_v2  ;;  %v3057_v40 = vmul.f32 -1.442695, %v2958_v60 }
 0x9bb   :  { %3235 = vpow2.f32 %v3055_v13 }
 0x9bc   :  { %3237 = vpow2.f32 %v3056_v6 }
 0x9bd   :  { %3239 = vpow2.f32 %v3057_v40 }
 0x9c6   :  { %v3234_v52 = vpop.eup %3233 }
 0x9c7   :  { %v2951_v42 = vadd.f32 1.0, %v3234_v52 }
 0x9c8   :  { %v3236_v30 = vpop.eup %3235 }
 0x9c9   :  { %v2952_v36 = vadd.f32 1.0, %v3236_v30  ;;  %3241 = vrcp.f32 %v2951_v42  ;;  %v3238_v38 = vpop.eup %3237 }
 0x9ca   :  { %v3240_v8 = vpop.eup %3239  ;;  %v2965_v4 = vadd.f32 1.0, %v3238_v38 }
 0x9cb   :  { %3243 = vrcp.f32 %v2952_v36  ;;  %v2966_v29 = vadd.f32 1.0, %v3240_v8 }
 0x9cc   :  { %3245 = vrcp.f32 %v2965_v4 }
 0x9cd   :  { %3247 = vrcp.f32 %v2966_v29 }
 0x9d6   :  { %v3242_v25 = vpop.eup %3241 }
 0x9d8   :  { %v3244_v20 = vpop.eup %3243 }
 0x9d9   :  { %v3246_v44 = vpop.eup %3245 }
 0x9da   :  { %v3248_v59 = vpop.eup %3247  ;;  %v2977_v50 = vsub.f32 1.0, %v3246_v44 }
 0x9db   :  { %v2978_v32 = vsub.f32 1.0, %v3248_v59 }
 0x9f2   :  { %v2938_v34 = vpop.f32.mrf.mxu1 }
 0x9f3   :  { %v2939_v45 = vadd.f32 %v2938_v34, %v4843_v33  ;;  %v2981_v33 = vmul.f32 %v3246_v44, %v6915_v24 }
 0x9f4   :  { %v2940_v5 = vpop.f32.mrf.mxu1 }
 0x9f5   :  { %v2971_v10 = vmul.f32 %v3242_v25, %v2939_v45  ;;  %v2941_v16 = vadd.f32 %v2940_v5, %v4847_v62  ;;  %v2982_v62 = vmul.f32 %v3248_v59, %v6917_v41 }
 0x9f7   :  { %v2973_v7 = vadd.f32 %v2971_v10, %v8861_v39  ;;  %v2972_v49 = vmul.f32 %v3244_v20, %v2941_v16 }
 0x9f9   :  { %3249 = vtanh.f32 %v2973_v7  ;;  %v2974_v46 = vadd.f32 %v2972_v49, %v8862_v3 }
 0x9fb   :  { %3251 = vtanh.f32 %v2974_v46 }
 0xa06   :  { %v3250_v17 = vpop.eup %3249 }
 0xa07   :  { %v2979_v53 = vmul.f32 %v3250_v17, %v2977_v50 }
 0xa08   :  { %v3252_v47 = vpop.eup %3251 }
 0xa09   :  { %v2983_v43 = vadd.f32 %v2981_v33, %v2979_v53  ;;  %v2980_v51 = vmul.f32 %v3252_v47, %v2978_v32 }
 0xa0b   :  { %2985 = vst [vmem:[%s7015_s7] sm:$0xff] %v2983_v43  ;;  %v2984_v26 = vadd.f32 %v2982_v62, %v2980_v51 }
 0xa0d   :  { %2986 = vst [vmem:[%s7015_s7 + $0x8] sm:$0xff] %v2984_v26 }
 0xa0e   :  { %2991 = vsyncpa [#allocation4], 1 }

</bundles_post_ra>
